<compile_context>
chip_gen: v6e
topology: v6e:2x2x1
jax: 0.10.0
libtpu: 0.0.40
codegen_flags: <defaults>
</compile_context>

<pallas_src>
import jax
import jax.numpy as jnp
import numpy as np
from jax import lax
from jax.experimental import pallas as pl
from jax.experimental.pallas import tpu as pltpu

_VMEM_LIMIT = 24 * 1024 * 1024   # < v7x physical VMEM (64 MiB), >> actual working set


# ----------------------------- Pallas kernels -------------------------------

def _matmul_bias_relu_kernel(x_ref, w_ref, b_ref, o_ref):
    # x: (M, K), w: (K, N), b: (1, N) -> o: (M, N) = relu(x @ w + b)
    y = jnp.dot(x_ref[...], w_ref[...], preferred_element_type=jnp.float32)
    o_ref[...] = jnp.maximum(y + b_ref[...], 0.0).astype(o_ref.dtype)


def _conv2_pool_kernel(cols_ref, w_ref, b_ref, o_ref):
    # cols: (4*M, K) bf16 -- rows ordered (pool-offset d, b, ph, pw); the 4 row
    # groups are the 4 conv-output positions inside each 2x2 pool window,
    # im2col'ed with output stride 2.  ONE dot (single MXU weight stage), then an
    # elementwise max over the 4 (M, N) row groups, then bias+relu:
    #   relu(max_d(cols[d] @ w) + b)  ==  maxpool2x2(relu(conv2(x) + b))
    # (bias is per-channel constant; relu/max are monotonic), so the un-pooled
    # (B,24,24,64) tensor never leaves VMEM.
    M = o_ref.shape[0]
    y = jnp.dot(cols_ref[...], w_ref[...], preferred_element_type=jnp.float32)
    m = jnp.maximum(jnp.maximum(y[0:M], y[M:2 * M]),
                    jnp.maximum(y[2 * M:3 * M], y[3 * M:4 * M]))
    o_ref[...] = jnp.maximum(m + b_ref[...], 0.0).astype(o_ref.dtype)


def _fc_head_kernel(x_ref, w1_ref, b1_ref, w2_ref, b2_ref, o_ref):
    # Fused fc1 (matmul+bias+relu) + fc2 (matmul+bias) + log_softmax.
    # The (B, 128) hidden activation never round-trips through HBM.
    h = jnp.dot(x_ref[...], w1_ref[...], preferred_element_type=jnp.float32)
    h = jnp.maximum(h + b1_ref[...], 0.0)
    logits = jnp.dot(h, w2_ref[...],
                     preferred_element_type=jnp.float32) + b2_ref[...]
    m = jnp.max(logits, axis=-1, keepdims=True)
    s = logits - m
    lse = jnp.log(jnp.sum(jnp.exp(s), axis=-1, keepdims=True))
    o_ref[...] = (s - lse).astype(o_ref.dtype)


# ------------------------------ Pallas wrappers ------------------------------

def matmul_bias_relu(x, w, b, out_dtype=jnp.float32):
    """x: (M, K), w: (K, N), b: (1, N) -> relu(x @ w + b), single grid step."""
    M, K = x.shape
    _, N = w.shape
    return pl.pallas_call(
        _matmul_bias_relu_kernel,
        out_shape=jax.ShapeDtypeStruct((M, N), out_dtype),
        grid=(1,),
        in_specs=[
            pl.BlockSpec((M, K), lambda i: (0, 0)),
            pl.BlockSpec((K, N), lambda i: (0, 0)),
            pl.BlockSpec((1, N), lambda i: (0, 0)),
        ],
        out_specs=pl.BlockSpec((M, N), lambda i: (0, 0)),
        compiler_params=pltpu.CompilerParams(
            dimension_semantics=("arbitrary",),
            vmem_limit_bytes=_VMEM_LIMIT),
    )(x, w, b)


def conv2_relu_pool(cols, w, b):
    """cols: (4*M, K) bf16, w: (K, N) bf16, b: (1, N) f32 -> (M, N) bf16 pooled act."""
    M4, K = cols.shape
    M = M4 // 4
    N = w.shape[1]
    return pl.pallas_call(
        _conv2_pool_kernel,
        out_shape=jax.ShapeDtypeStruct((M, N), jnp.bfloat16),
        grid=(1,),
        in_specs=[
            pl.BlockSpec((M4, K), lambda i: (0, 0)),
            pl.BlockSpec((K, N), lambda i: (0, 0)),
            pl.BlockSpec((1, N), lambda i: (0, 0)),
        ],
        out_specs=pl.BlockSpec((M, N), lambda i: (0, 0)),
        compiler_params=pltpu.CompilerParams(
            dimension_semantics=("arbitrary",),
            vmem_limit_bytes=_VMEM_LIMIT),
    )(cols, w, b)


def fc_head(x, w1, b1, w2, b2):
    """Fused fc1+relu+fc2+log_softmax. x: (B, K) bf16 -> (B, 10) f32 log-probs."""
    B, K = x.shape
    H = w1.shape[1]
    N = w2.shape[1]
    return pl.pallas_call(
        _fc_head_kernel,
        out_shape=jax.ShapeDtypeStruct((B, N), jnp.float32),
        grid=(1,),
        in_specs=[
            pl.BlockSpec((B, K), lambda i: (0, 0)),
            pl.BlockSpec((K, H), lambda i: (0, 0)),
            pl.BlockSpec((1, H), lambda i: (0, 0)),
            pl.BlockSpec((H, N), lambda i: (0, 0)),
            pl.BlockSpec((1, N), lambda i: (0, 0)),
        ],
        out_specs=pl.BlockSpec((B, N), lambda i: (0, 0)),
        compiler_params=pltpu.CompilerParams(
            dimension_semantics=("arbitrary",),
            vmem_limit_bytes=_VMEM_LIMIT),
    )(x, w1, b1, w2, b2)


# ------------------------------- im2col glue ---------------------------------

def _im2col(x, k):
    """x: (B,H,W,C) NHWC -> (B, OH*OW, k*k*C); feature order (kh, kw, c)."""
    B, H, W, C = x.shape
    OH, OW = H - k + 1, W - k + 1
    patches = [x[:, i:i + OH, j:j + OW, :] for i in range(k) for j in range(k)]
    return jnp.stack(patches, axis=3).reshape(B, OH * OW, k * k * C)


def _pool_grouped_cols(x1, k=3):
    """x1: (B,26,26,C) bf16 -> (4*B*144, k*k*C) bf16.

    Row order is (pool-offset d = dy*2+dx, b, ph, pw); feature order (kh, kw, c).
    Built with stride-2 slices straight from the bf16 activation (no 6-D transpose,
    no f32 intermediates), so the XLA glue moves ~half the bytes of the old path.
    """
    B, _, _, C = x1.shape
    groups = []
    for dy in range(2):
        for dx in range(2):
            taps = [x1[:, dy + kh: dy + kh + 23: 2, dx + kw: dx + kw + 23: 2, :]
                    for kh in range(k) for kw in range(k)]
            groups.append(jnp.stack(taps, axis=3).reshape(B * 144, k * k * C))
    return jnp.concatenate(groups, axis=0)


# --------------------------- parameters & forward ----------------------------

def init_params(key):
    """Deterministic synthetic parameters with PyTorch-module shapes."""
    ks = jax.random.split(key, 8)

    def u(k, shape, fan_in):
        bound = 1.0 / np.sqrt(fan_in)
        return jax.random.uniform(k, shape, jnp.float32, -bound, bound)

    return {
        "conv1_w": u(ks[0], (32, 1, 3, 3), 1 * 9),    # (Cout, Cin, KH, KW)
        "conv1_b": u(ks[1], (32,), 1 * 9),
        "conv2_w": u(ks[2], (64, 32, 3, 3), 32 * 9),
        "conv2_b": u(ks[3], (64,), 32 * 9),
        "fc1_w":   u(ks[4], (128, 9216), 9216),       # (out, in)
        "fc1_b":   u(ks[5], (128,), 9216),
        "fc2_w":   u(ks[6], (10, 128), 128),
        "fc2_b":   u(ks[7], (10,), 128),
    }


def to_kernel_params(p):
    """Rearrange PyTorch-layout params for the NHWC / im2col kernels."""
    # conv: (Cout, Cin, KH, KW) -> (KH, KW, Cin, Cout) -> (KH*KW*Cin, Cout)
    c1w = jnp.transpose(p["conv1_w"], (2, 3, 1, 0)).reshape(9 * 1, 32)
    c2w = jnp.transpose(p["conv2_w"], (2, 3, 1, 0)).reshape(9 * 32, 64)
    # fc1: PyTorch flatten order is (C,H,W); our NHWC flatten order is (H,W,C)
    f1w = (p["fc1_w"].reshape(128, 64, 12, 12)
           .transpose(0, 2, 3, 1).reshape(128, 9216).T)   # (9216, 128)
    f2w = p["fc2_w"].T                                    # (128, 10)
    return {
        # Weights that feed matmuls are bf16 (MXU-native); biases stay f32 and are
        # applied to the f32 accumulator in the kernels' epilogues.
        "c1w": c1w.astype(jnp.bfloat16), "c1b": p["conv1_b"][None, :],
        "c2w": c2w.astype(jnp.bfloat16), "c2b": p["conv2_b"][None, :],
        "f1w": f1w.astype(jnp.bfloat16), "f1b": p["fc1_b"][None, :],
        "f2w": f2w, "f2b": p["fc2_b"][None, :],
    }


@jax.jit
def simple_cnn_forward(x_nchw, kp):
    B = x_nchw.shape[0]
    # Cin == 1, so NCHW -> NHWC is a pure reshape (no transpose op needed).
    x = x_nchw.reshape(B, 28, 28, 1)

    # conv1 + relu: batch folded into M -> one (B*676, 9) x (9, 32) bf16 matmul.
    cols1 = _im2col(x, 3).reshape(B * 26 * 26, 9).astype(jnp.bfloat16)
    x1 = matmul_bias_relu(cols1, kp["c1w"], kp["c1b"],
                          out_dtype=jnp.bfloat16).reshape(B, 26, 26, 32)

    # conv2 + relu + maxpool(2): im2col rows grouped by their position inside each
    # 2x2 pool window, built from bf16 x1 with stride-2 slices; one fused kernel
    # emits the pooled activation directly.
    cols2 = _pool_grouped_cols(x1, 3)                       # (4*B*144, 288) bf16
    pooled = conv2_relu_pool(cols2, kp["c2w"], kp["c2b"])   # (B*144, 64) bf16

    # dropout1 / dropout2: identity in eval mode.
    # Rows of `pooled` are ordered (b, ph, pw), so this reshape is a free
    # row-major view: feature order (ph, pw, c) matches the permuted fc1 weight.
    feats = pooled.reshape(B, 144 * 64)                     # (B, 9216) bf16
    # fused fc1 + relu + fc2 + log_softmax
    return fc_head(feats, kp["f1w"], kp["f1b"], kp["f2w"], kp["f2b"])


# ------------------------------- pure-JAX ref --------------------------------

def reference_forward(x_nchw, p):
    def conv(x, w, b):
        y = lax.conv_general_dilated(
            x, w, (1, 1), "VALID", dimension_numbers=("NCHW", "OIHW", "NCHW"))
        return y + b[None, :, None, None]

    x = jnp.maximum(conv(x_nchw, p["conv1_w"], p["conv1_b"]), 0.0)
    x = jnp.maximum(conv(x, p["conv2_w"], p["conv2_b"]), 0.0)
    x = lax.reduce_window(x, -jnp.inf, lax.max, (1, 1, 2, 2), (1, 1, 2, 2), "VALID")
    x = x.reshape(x.shape[0], -1)                       # NCHW flatten (== torch)
    x = jnp.maximum(x @ p["fc1_w"].T + p["fc1_b"], 0.0)
    x = x @ p["fc2_w"].T + p["fc2_b"]
    return jax.nn.log_softmax(x, axis=1)


# ------------------------------------ main -----------------------------------

if __name__ == "__main__":
    key = jax.random.PRNGKey(0)
    pkey, xkey = jax.random.split(key)

    params = init_params(pkey)
    kparams = to_kernel_params(params)

    # Input matches the PyTorch module's implied shape (1 channel, 28x28).
    x = jax.random.normal(xkey, (2, 1, 28, 28), dtype=jnp.float32)   # NCHW

    out = jax.block_until_ready(simple_cnn_forward(x, kparams))
    assert out.shape == (2, 10) and out.dtype == jnp.float32

    # Tolerance is loosened vs the all-f32 reference because conv/fc weights and
    # intermediate activations are stored/fed as bf16 (expected error ~1e-3..1e-2).
    ref = reference_forward(x, params)
    np.testing.assert_allclose(np.asarray(out), np.asarray(ref),
                               rtol=2e-2, atol=2e-2)
    print("KERNEL_OK")
</pallas_src>

<mosaic_0001>
module attributes {stable_mosaic.version = 11 : i64} {
  func.func @_matmul_bias_relu_kernel(%arg0: i32, %arg1: memref<1352x9xbf16, #tpu.memory_space<vmem>>, %arg2: memref<9x32xbf16, #tpu.memory_space<vmem>>, %arg3: memref<1x32xf32, #tpu.memory_space<vmem>>, %arg4: memref<1352x32xbf16, #tpu.memory_space<vmem>>) attributes {dimension_semantics = [#tpu.dimension_semantics<arbitrary>], iteration_bounds = array<i64: 1>, scalar_prefetch = 0 : i64, scratch_operands = 0 : i64, tpu.core_type = #tpu.core_type<tc>, window_params = [{pipeline_mode = #tpu.pipeline_mode<synchronous>, transform_indices = @transform_0, window_bounds = array<i64: 1352, 9>}, {pipeline_mode = #tpu.pipeline_mode<synchronous>, transform_indices = @transform_1, window_bounds = array<i64: 9, 32>}, {pipeline_mode = #tpu.pipeline_mode<synchronous>, transform_indices = @transform_2, window_bounds = array<i64: 1, 32>}, {pipeline_mode = #tpu.pipeline_mode<synchronous>, transform_indices = @transform_3, window_bounds = array<i64: 1352, 32>}]} {
    %c0 = arith.constant 0 : index
    %c0_0 = arith.constant 0 : index
    %0 = vector.load %arg1[%c0, %c0_0] : memref<1352x9xbf16, #tpu.memory_space<vmem>>, vector<1352x9xbf16>
    %c0_1 = arith.constant 0 : index
    %c0_2 = arith.constant 0 : index
    %1 = vector.load %arg2[%c0_1, %c0_2] : memref<9x32xbf16, #tpu.memory_space<vmem>>, vector<9x32xbf16>
    %cst = arith.constant dense<0.000000e+00> : vector<1352x32xf32>
    %2 = tpu.matmul %0, %1, %cst {dimension_numbers = #tpu.dot_dimension_numbers<[1], [0], [0], [1], [0, 0, 1, 1], [], []>} : vector<1352x9xbf16>, vector<9x32xbf16>, vector<1352x32xf32> -> vector<1352x32xf32>
    %c0_3 = arith.constant 0 : index
    %c0_4 = arith.constant 0 : index
    %3 = vector.load %arg3[%c0_3, %c0_4] : memref<1x32xf32, #tpu.memory_space<vmem>>, vector<1x32xf32>
    %4 = vector.broadcast %3 : vector<1x32xf32> to vector<1352x32xf32>
    %5 = arith.addf %2, %4 : vector<1352x32xf32>
    %cst_5 = arith.constant 0.000000e+00 : f32
    %6 = vector.broadcast %cst_5 : f32 to vector<1352x32xf32>
    %7 = arith.maximumf %5, %6 : vector<1352x32xf32>
    %8 = arith.truncf %7 : vector<1352x32xf32> to vector<1352x32xbf16>
    %c0_6 = arith.constant 0 : index
    %c0_7 = arith.constant 0 : index
    %9 = vector.load %arg4[%c0_6, %c0_7] : memref<1352x32xbf16, #tpu.memory_space<vmem>>, vector<1352x32xbf16>
    tpu.vector_store %arg4[%c0_6, %c0_7], %8 {strides = array<i32>} : memref<1352x32xbf16, #tpu.memory_space<vmem>>, vector<1352x32xbf16>,
    return
  }
  func.func @transform_0(%arg0: i32) -> (i32, i32) {
    %c0_i32 = arith.constant 0 : i32
    %c0_i32_0 = arith.constant 0 : i32
    %c0_i32_1 = arith.constant 0 : i32
    return %c0_i32, %c0_i32_0 : i32, i32
  }
  func.func @transform_1(%arg0: i32) -> (i32, i32) {
    %c0_i32 = arith.constant 0 : i32
    %c0_i32_0 = arith.constant 0 : i32
    %c0_i32_1 = arith.constant 0 : i32
    return %c0_i32, %c0_i32_0 : i32, i32
  }
  func.func @transform_2(%arg0: i32) -> (i32, i32) {
    %c0_i32 = arith.constant 0 : i32
    %c0_i32_0 = arith.constant 0 : i32
    %c0_i32_1 = arith.constant 0 : i32
    return %c0_i32, %c0_i32_0 : i32, i32
  }
  func.func @transform_3(%arg0: i32) -> (i32, i32) {
    %c0_i32 = arith.constant 0 : i32
    %c0_i32_0 = arith.constant 0 : i32
    %c0_i32_1 = arith.constant 0 : i32
    return %c0_i32, %c0_i32_0 : i32, i32
  }
}

module attributes {stable_mosaic.version = 11 : i64} {
  func.func @_conv2_pool_kernel(%arg0: i32, %arg1: memref<1152x288xbf16, #tpu.memory_space<vmem>>, %arg2: memref<288x64xbf16, #tpu.memory_space<vmem>>, %arg3: memref<1x64xf32, #tpu.memory_space<vmem>>, %arg4: memref<288x64xbf16, #tpu.memory_space<vmem>>) attributes {dimension_semantics = [#tpu.dimension_semantics<arbitrary>], iteration_bounds = array<i64: 1>, scalar_prefetch = 0 : i64, scratch_operands = 0 : i64, tpu.core_type = #tpu.core_type<tc>, window_params = [{pipeline_mode = #tpu.pipeline_mode<synchronous>, transform_indices = @transform_0, window_bounds = array<i64: 1152, 288>}, {pipeline_mode = #tpu.pipeline_mode<synchronous>, transform_indices = @transform_1, window_bounds = array<i64: 288, 64>}, {pipeline_mode = #tpu.pipeline_mode<synchronous>, transform_indices = @transform_2, window_bounds = array<i64: 1, 64>}, {pipeline_mode = #tpu.pipeline_mode<synchronous>, transform_indices = @transform_3, window_bounds = array<i64: 288, 64>}]} {
    %c0 = arith.constant 0 : index
    %c0_0 = arith.constant 0 : index
    %0 = vector.load %arg1[%c0, %c0_0] : memref<1152x288xbf16, #tpu.memory_space<vmem>>, vector<1152x288xbf16>
    %c0_1 = arith.constant 0 : index
    %c0_2 = arith.constant 0 : index
    %1 = vector.load %arg2[%c0_1, %c0_2] : memref<288x64xbf16, #tpu.memory_space<vmem>>, vector<288x64xbf16>
    %cst = arith.constant dense<0.000000e+00> : vector<1152x64xf32>
    %2 = tpu.matmul %0, %1, %cst {dimension_numbers = #tpu.dot_dimension_numbers<[1], [0], [0], [1], [0, 0, 1, 1], [], []>} : vector<1152x288xbf16>, vector<288x64xbf16>, vector<1152x64xf32> -> vector<1152x64xf32>
    %3 = vector.extract_strided_slice %2 {offsets = [0, 0], sizes = [288, 64], strides = [1, 1]} : vector<1152x64xf32> to vector<288x64xf32>
    %4 = vector.extract_strided_slice %2 {offsets = [288, 0], sizes = [288, 64], strides = [1, 1]} : vector<1152x64xf32> to vector<288x64xf32>
    %5 = arith.maximumf %3, %4 : vector<288x64xf32>
    %6 = vector.extract_strided_slice %2 {offsets = [576, 0], sizes = [288, 64], strides = [1, 1]} : vector<1152x64xf32> to vector<288x64xf32>
    %7 = vector.extract_strided_slice %2 {offsets = [864, 0], sizes = [288, 64], strides = [1, 1]} : vector<1152x64xf32> to vector<288x64xf32>
    %8 = arith.maximumf %6, %7 : vector<288x64xf32>
    %9 = arith.maximumf %5, %8 : vector<288x64xf32>
    %c0_3 = arith.constant 0 : index
    %c0_4 = arith.constant 0 : index
    %10 = vector.load %arg3[%c0_3, %c0_4] : memref<1x64xf32, #tpu.memory_space<vmem>>, vector<1x64xf32>
    %11 = vector.broadcast %10 : vector<1x64xf32> to vector<288x64xf32>
    %12 = arith.addf %9, %11 : vector<288x64xf32>
    %cst_5 = arith.constant 0.000000e+00 : f32
    %13 = vector.broadcast %cst_5 : f32 to vector<288x64xf32>
    %14 = arith.maximumf %12, %13 : vector<288x64xf32>
    %15 = arith.truncf %14 : vector<288x64xf32> to vector<288x64xbf16>
    %c0_6 = arith.constant 0 : index
    %c0_7 = arith.constant 0 : index
    %16 = vector.load %arg4[%c0_6, %c0_7] : memref<288x64xbf16, #tpu.memory_space<vmem>>, vector<288x64xbf16>
    tpu.vector_store %arg4[%c0_6, %c0_7], %15 {strides = array<i32>} : memref<288x64xbf16, #tpu.memory_space<vmem>>, vector<288x64xbf16>,
    return
  }
  func.func @transform_0(%arg0: i32) -> (i32, i32) {
    %c0_i32 = arith.constant 0 : i32
    %c0_i32_0 = arith.constant 0 : i32
    %c0_i32_1 = arith.constant 0 : i32
    return %c0_i32, %c0_i32_0 : i32, i32
  }
  func.func @transform_1(%arg0: i32) -> (i32, i32) {
    %c0_i32 = arith.constant 0 : i32
    %c0_i32_0 = arith.constant 0 : i32
    %c0_i32_1 = arith.constant 0 : i32
    return %c0_i32, %c0_i32_0 : i32, i32
  }
  func.func @transform_2(%arg0: i32) -> (i32, i32) {
    %c0_i32 = arith.constant 0 : i32
    %c0_i32_0 = arith.constant 0 : i32
    %c0_i32_1 = arith.constant 0 : i32
    return %c0_i32, %c0_i32_0 : i32, i32
  }
  func.func @transform_3(%arg0: i32) -> (i32, i32) {
    %c0_i32 = arith.constant 0 : i32
    %c0_i32_0 = arith.constant 0 : i32
    %c0_i32_1 = arith.constant 0 : i32
    return %c0_i32, %c0_i32_0 : i32, i32
  }
}

module attributes {stable_mosaic.version = 11 : i64} {
  func.func @_fc_head_kernel(%arg0: i32, %arg1: memref<2x9216xbf16, #tpu.memory_space<vmem>>, %arg2: memref<9216x128xbf16, #tpu.memory_space<vmem>>, %arg3: memref<1x128xf32, #tpu.memory_space<vmem>>, %arg4: memref<128x10xf32, #tpu.memory_space<vmem>>, %arg5: memref<1x10xf32, #tpu.memory_space<vmem>>, %arg6: memref<2x10xf32, #tpu.memory_space<vmem>>) attributes {dimension_semantics = [#tpu.dimension_semantics<arbitrary>], iteration_bounds = array<i64: 1>, scalar_prefetch = 0 : i64, scratch_operands = 0 : i64, tpu.core_type = #tpu.core_type<tc>, window_params = [{pipeline_mode = #tpu.pipeline_mode<synchronous>, transform_indices = @transform_0, window_bounds = array<i64: 2, 9216>}, {pipeline_mode = #tpu.pipeline_mode<synchronous>, transform_indices = @transform_1, window_bounds = array<i64: 9216, 128>}, {pipeline_mode = #tpu.pipeline_mode<synchronous>, transform_indices = @transform_2, window_bounds = array<i64: 1, 128>}, {pipeline_mode = #tpu.pipeline_mode<synchronous>, transform_indices = @transform_3, window_bounds = array<i64: 128, 10>}, {pipeline_mode = #tpu.pipeline_mode<synchronous>, transform_indices = @transform_4, window_bounds = array<i64: 1, 10>}, {pipeline_mode = #tpu.pipeline_mode<synchronous>, transform_indices = @transform_5, window_bounds = array<i64: 2, 10>}]} {
    %c0 = arith.constant 0 : index
    %c0_0 = arith.constant 0 : index
    %0 = vector.load %arg1[%c0, %c0_0] : memref<2x9216xbf16, #tpu.memory_space<vmem>>, vector<2x9216xbf16>
    %c0_1 = arith.constant 0 : index
    %c0_2 = arith.constant 0 : index
    %1 = vector.load %arg2[%c0_1, %c0_2] : memref<9216x128xbf16, #tpu.memory_space<vmem>>, vector<9216x128xbf16>
    %cst = arith.constant dense<0.000000e+00> : vector<2x128xf32>
    %2 = tpu.matmul %0, %1, %cst {dimension_numbers = #tpu.dot_dimension_numbers<[1], [0], [0], [1], [0, 0, 1, 1], [], []>} : vector<2x9216xbf16>, vector<9216x128xbf16>, vector<2x128xf32> -> vector<2x128xf32>
    %c0_3 = arith.constant 0 : index
    %c0_4 = arith.constant 0 : index
    %3 = vector.load %arg3[%c0_3, %c0_4] : memref<1x128xf32, #tpu.memory_space<vmem>>, vector<1x128xf32>
    %4 = vector.broadcast %3 : vector<1x128xf32> to vector<2x128xf32>
    %5 = arith.addf %2, %4 : vector<2x128xf32>
    %cst_5 = arith.constant 0.000000e+00 : f32
    %6 = vector.broadcast %cst_5 : f32 to vector<2x128xf32>
    %7 = arith.maximumf %5, %6 : vector<2x128xf32>
    %c0_6 = arith.constant 0 : index
    %c0_7 = arith.constant 0 : index
    %8 = vector.load %arg4[%c0_6, %c0_7] : memref<128x10xf32, #tpu.memory_space<vmem>>, vector<128x10xf32>
    %cst_8 = arith.constant dense<0.000000e+00> : vector<2x10xf32>
    %9 = tpu.matmul %7, %8, %cst_8 {dimension_numbers = #tpu.dot_dimension_numbers<[1], [0], [0], [1], [0, 0, 1, 1], [], []>} : vector<2x128xf32>, vector<128x10xf32>, vector<2x10xf32> -> vector<2x10xf32>
    %c0_9 = arith.constant 0 : index
    %c0_10 = arith.constant 0 : index
    %10 = vector.load %arg5[%c0_9, %c0_10] : memref<1x10xf32, #tpu.memory_space<vmem>>, vector<1x10xf32>
    %11 = vector.broadcast %10 : vector<1x10xf32> to vector<2x10xf32>
    %12 = arith.addf %9, %11 : vector<2x10xf32>
    %cst_11 = arith.constant dense<0xFF800000> : vector<2xf32>
    %13 = vector.multi_reduction <maximumf>, %12, %cst_11 [1] : vector<2x10xf32> to vector<2xf32>
    %14 = vector.shape_cast %13 : vector<2xf32> to vector<2x1xf32>
    %15 = vector.broadcast %14 : vector<2x1xf32> to vector<2x10xf32>
    %16 = arith.subf %12, %15 : vector<2x10xf32>
    %17 = math.exp %16 : vector<2x10xf32>
    %cst_12 = arith.constant dense<0.000000e+00> : vector<2xf32>
    %18 = vector.multi_reduction <add>, %17, %cst_12 [1] : vector<2x10xf32> to vector<2xf32>
    %19 = vector.shape_cast %18 : vector<2xf32> to vector<2x1xf32>
    %20 = math.log %19 : vector<2x1xf32>
    %21 = vector.broadcast %20 : vector<2x1xf32> to vector<2x10xf32>
    %22 = arith.subf %16, %21 : vector<2x10xf32>
    %c0_13 = arith.constant 0 : index
    %c0_14 = arith.constant 0 : index
    %23 = vector.load %arg6[%c0_13, %c0_14] : memref<2x10xf32, #tpu.memory_space<vmem>>, vector<2x10xf32>
    tpu.vector_store %arg6[%c0_13, %c0_14], %22 {strides = array<i32>} : memref<2x10xf32, #tpu.memory_space<vmem>>, vector<2x10xf32>,
    return
  }
  func.func @transform_0(%arg0: i32) -> (i32, i32) {
    %c0_i32 = arith.constant 0 : i32
    %c0_i32_0 = arith.constant 0 : i32
    %c0_i32_1 = arith.constant 0 : i32
    return %c0_i32, %c0_i32_0 : i32, i32
  }
  func.func @transform_1(%arg0: i32) -> (i32, i32) {
    %c0_i32 = arith.constant 0 : i32
    %c0_i32_0 = arith.constant 0 : i32
    %c0_i32_1 = arith.constant 0 : i32
    return %c0_i32, %c0_i32_0 : i32, i32
  }
  func.func @transform_2(%arg0: i32) -> (i32, i32) {
    %c0_i32 = arith.constant 0 : i32
    %c0_i32_0 = arith.constant 0 : i32
    %c0_i32_1 = arith.constant 0 : i32
    return %c0_i32, %c0_i32_0 : i32, i32
  }
  func.func @transform_3(%arg0: i32) -> (i32, i32) {
    %c0_i32 = arith.constant 0 : i32
    %c0_i32_0 = arith.constant 0 : i32
    %c0_i32_1 = arith.constant 0 : i32
    return %c0_i32, %c0_i32_0 : i32, i32
  }
  func.func @transform_4(%arg0: i32) -> (i32, i32) {
    %c0_i32 = arith.constant 0 : i32
    %c0_i32_0 = arith.constant 0 : i32
    %c0_i32_1 = arith.constant 0 : i32
    return %c0_i32, %c0_i32_0 : i32, i32
  }
  func.func @transform_5(%arg0: i32) -> (i32, i32) {
    %c0_i32 = arith.constant 0 : i32
    %c0_i32_0 = arith.constant 0 : i32
    %c0_i32_1 = arith.constant 0 : i32
    return %c0_i32, %c0_i32_0 : i32, i32
  }
}

</mosaic_0001>

<bundles_post_ra>
// kernel: simple_cnn_forward.3
= control target key start
LH: loop header
LB: loop body
LE: loop exit
PB: predicated region body
PF: predicated region fallthrough
CT: control target
= control target key end

     0   :  { %8 = vsyncpa [#allocation3], 0  ;;  %s5119_s0 = inlined_call_operand.vmem [shape: bf16[1352,9], index: 0, kind: input, shape index: {}]   ;;  %s5120_s1 = inlined_call_operand.hbm [shape: bf16[9,32], index: 1, kind: input, shape index: {}]   ;;  %s5121_s2 = inlined_call_operand.hbm [shape: f32[1,32], index: 2, kind: input, shape index: {}]   ;;  %s5122_s3 = inlined_call_operand.vmem [shape: bf16[1352,32], index: 3, kind: output, shape index: {}]  }
   0x1   :  { %9 = vsyncpa [#allocation5], 0  ;;  %s3723_s12 = smov [#allocation2]  }
   0x2   :  { %s17_s13 = sshll.u32 %s3723_s12, 4  ;;  %s18_s13 = int_to_ptr.vmem [resolvable:$true] %s17_s13 }
   0x3   :  { %s3687_s14 = scalar_lea.vmem %s18_s13, 128  ;;  %p3692_p1 = scmp.lt.s32.totalorder %s18_s13, %s18_s13 }
   0x4   :  { %p3688_p0 = scmp.ne.s32.totalorder %s18_s13, %s3687_s14  ;;  %p3693_p2 = scmp.lt.s32.totalorder %s3687_s14, %s3687_s14 }
   0x6   :  { %p3694_p3 = por %p3693_p2, %p3692_p1 }
   0x8   :  { %p3695_p4 = pnand %p3694_p3, %p3688_p0 }
   0xa   :  { %3698 = shalt.err (!%p3695_p4)
}
   0xb   :  { %s3724_s15 = smov 64   ;;  %s3725_s16 = smov 4  }
   0xc   :  { %23 = dma.hbm_to_vmem [thread:$0]  %s5120_s1, 128, %s18_s13, [#allocation3], %s3724_s15, %s3724_s15, %s3725_s16  }
   0xd   :  { %s3726_s19 = smov [#allocation4]  }
   0xe   :  { %s30_s20 = sshll.u32 %s3726_s19, 4  ;;  %s31_s20 = int_to_ptr.vmem [resolvable:$true] %s30_s20 }
   0xf   :  { %s3707_s21 = scalar_lea.vmem %s31_s20, 16  ;;  %s3711_s22 = scalar_lea.vmem %s31_s20, 32 }
  0x10   :  { %p3708_p5 = scmp.ne.s32.totalorder %s31_s20, %s3707_s21  ;;  %p3712_p6 = scmp.lt.s32.totalorder %s31_s20, %s31_s20 }
  0x11   :  { %p3713_p7 = scmp.lt.s32.totalorder %s3711_s22, %s3707_s21 }
  0x13   :  { %p3714_p8 = por %p3713_p7, %p3712_p6 }
  0x15   :  { %p3715_p9 = pnand %p3714_p8, %p3708_p5 }
  0x17   :  { %3718 = shalt.err (!%p3715_p9)
}
  0x18   :  { %33 = dma.hbm_to_vmem [thread:$0]  %s5121_s2, 16, %s31_s20, [#allocation5]  }
  0x19   :  { %3719 = dma.done.wait [#allocation3], 128  }
  0x1a   :  { %3720 = vsyncadd [#allocation3], 4294967168 }
  0x1b   :  { %3721 = dma.done.wait [#allocation5], 16  }
  0x1c   :  { %3722 = vsyncadd [#allocation5], 4294967280  ;;  %vm903_vm0 = vcmask 1043456   ;;  %v3727_v0 = vmov 0.0   ;;  %vm3728_vm1 = vmmov 0   ;;  %vm904_vm2 = vcmask 1044480  }
  0x1d   :  { %3240 = vmatprep.subr.bf16.mxu0 %v3727_v0  ;;  %3582 = vmatprep.subr.bf16.mxu1 %v3727_v0  ;;  %v3729_v1 = vmov 65535   ;;  %v3591_v4 = vld [vmem:[#allocation2] sm:$0x1f]   ;;  %v3593_v7 = vld [vmem:[%s5119_s0 + $0x158] sm:$0xff]   ;;  %vm647_vm3 = vcmask 72704   ;;  %v3594_v8 = vld [vmem:[%s5119_s0 + $0x8] sm:$0xff]  }
  0x1e   :  { %3242 = vmatprep.mubr.msk.bf16.mxu0 %vm3728_vm1, %v3727_v0  ;;  %3414 = vmatprep.mubr.msk.bf16.mxu1 %vm3728_vm1, %v3727_v0  ;;  %v905_v2 = vsel %vm903_vm0, 4294967295, %v3729_v1  ;;  %v3592_v6 = vld [vmem:[%s5119_s0] sm:$0xff]   ;;  %v3596_v10 = vld [vmem:[%s5119_s0 + $0x10] sm:$0xff]   ;;  %v3597_v11 = vld [vmem:[%s5119_s0 + $0x168] sm:$0xff]   ;;  %vm2468_vm4 = vcmask 257024  }
  0x1f   :  { %v906_v3 = vsel %vm904_vm2, %v905_v2, 0  ;;  %v3595_v9 = vld [vmem:[%s5119_s0 + $0x160] sm:$0xff]   ;;  %v3598_v12 = vld [vmem:[%s5119_s0 + $0x18] sm:$0xff]   ;;  %v3599_v13 = vld [vmem:[%s5119_s0 + $0x170] sm:$0xff]  }
  0x20   :  { %v908_v5 = vand.u32 %v3591_v4, %v906_v3  ;;  %v3600_v14 = vld [vmem:[%s5119_s0 + $0x20] sm:$0xff]   ;;  %v3601_v15 = vld [vmem:[%s5119_s0 + $0x178] sm:$0xff]   ;;  %v3602_v16 = vld [vmem:[%s5119_s0 + $0x28] sm:$0xff]  }
  0x21   :  { %v3603_v17 = vld [vmem:[%s5119_s0 + $0x180] sm:$0xff]   ;;  %v3604_v18 = vld [vmem:[%s5119_s0 + $0x30] sm:$0xff]   ;;  %v3605_v19 = vld [vmem:[%s5119_s0 + $0x188] sm:$0xff]  }
  0x22   :  { %3241 = vmatpush3.bf16.msra.mxu0 %v908_v5  ;;  %3583 = vmatpush3.bf16.msra.mxu1 %v908_v5  ;;  %v3606_v20 = vld [vmem:[%s5119_s0 + $0x38] sm:$0xff]   ;;  %v3607_v21 = vld [vmem:[%s5119_s0 + $0x190] sm:$0xff]   ;;  %v3608_v22 = vld [vmem:[%s5119_s0 + $0x40] sm:$0xff]  }
  0x23   :  { %v3609_v23 = vld [vmem:[%s5119_s0 + $0x198] sm:$0xff]   ;;  %v3610_v24 = vld [vmem:[%s5119_s0 + $0x48] sm:$0xff]   ;;  %v3611_v25 = vld [vmem:[%s5119_s0 + $0x1a0] sm:$0xff]  }
  0x24   :  { %v3612_v26 = vld [vmem:[%s5119_s0 + $0x50] sm:$0xff]   ;;  %v3613_v27 = vld [vmem:[%s5119_s0 + $0x1a8] sm:$0xff]   ;;  %v3614_v28 = vld [vmem:[%s5119_s0 + $0x58] sm:$0xff]  }
  0x25   :  { %3243 = vmatmul.mubr.msk.bf16.vlgmr.msra.gmra.mxu0 %vm647_vm3, %v3592_v6  ;;  %3415 = vmatmul.mubr.msk.bf16.vlgmr.msra.gmra.mxu1 %vm647_vm3, %v3593_v7  ;;  %v3615_v29 = vld [vmem:[%s5119_s0 + $0x1b0] sm:$0xff]   ;;  %v3616_v30 = vld [vmem:[%s5119_s0 + $0x60] sm:$0xff]   ;;  %v3617_v31 = vld [vmem:[%s5119_s0 + $0x1b8] sm:$0xff]  }
  0x26   :  { %3246 = vmatprep.mubr.msk.bf16.mxu0 %vm3728_vm1, %v3727_v0  ;;  %3418 = vmatprep.mubr.msk.bf16.mxu1 %vm3728_vm1, %v3727_v0  ;;  %v3618_v32 = vld [vmem:[%s5119_s0 + $0x68] sm:$0xff]   ;;  %v3619_v33 = vld [vmem:[%s5119_s0 + $0x1c0] sm:$0xff]   ;;  %v3620_v34 = vld [vmem:[%s5119_s0 + $0x70] sm:$0xff]  }
  0x27   :  { %v3621_v35 = vld [vmem:[%s5119_s0 + $0x1c8] sm:$0xff]   ;;  %v3622_v36 = vld [vmem:[%s5119_s0 + $0x78] sm:$0xff]   ;;  %v3623_v37 = vld [vmem:[%s5119_s0 + $0x1d0] sm:$0xff]  }
  0x28   :  { %v3624_v38 = vld [vmem:[%s5119_s0 + $0x80] sm:$0xff]   ;;  %v3625_v39 = vld [vmem:[%s5119_s0 + $0x1d8] sm:$0xff]   ;;  %v3626_v40 = vld [vmem:[%s5119_s0 + $0x88] sm:$0xff]  }
  0x29   :  { %v3627_v41 = vld [vmem:[%s5119_s0 + $0x1e0] sm:$0xff]   ;;  %v3628_v42 = vld [vmem:[%s5119_s0 + $0x90] sm:$0xff]   ;;  %v3629_v43 = vld [vmem:[%s5119_s0 + $0x1e8] sm:$0xff]  }
  0x2a   :  { %v3630_v44 = vld [vmem:[%s5119_s0 + $0x98] sm:$0xff]   ;;  %v3631_v45 = vld [vmem:[%s5119_s0 + $0x1f0] sm:$0xff]   ;;  %v3632_v46 = vld [vmem:[%s5119_s0 + $0xa0] sm:$0xff]  }
  0x2b   :  { %v3633_v47 = vld [vmem:[%s5119_s0 + $0x1f8] sm:$0xff]   ;;  %v3634_v48 = vld [vmem:[%s5119_s0 + $0xa8] sm:$0xff]   ;;  %v3635_v49 = vld [vmem:[%s5119_s0 + $0x200] sm:$0xff]  }
  0x2c   :  { %v3636_v50 = vld [vmem:[%s5119_s0 + $0xb0] sm:$0xff]   ;;  %v3637_v51 = vld [vmem:[%s5119_s0 + $0x208] sm:$0xff]   ;;  %v3638_v52 = vld [vmem:[%s5119_s0 + $0xb8] sm:$0xff]  }
  0x2d   :  { %3247 = vmatmul.mubr.msk.bf16.gmra.mxu0 %vm647_vm3, %v3594_v8  ;;  %3419 = vmatmul.mubr.msk.bf16.gmra.mxu1 %vm647_vm3, %v3595_v9  ;;  %v3639_v53 = vld [vmem:[%s5119_s0 + $0x210] sm:$0xff]   ;;  %v3640_v54 = vld [vmem:[%s5119_s0 + $0xc0] sm:$0xff]   ;;  %v3641_v55 = vld [vmem:[%s5119_s0 + $0x218] sm:$0xff]  }
  0x2e   :  { %3250 = vmatprep.mubr.msk.bf16.mxu0 %vm3728_vm1, %v3727_v0  ;;  %3422 = vmatprep.mubr.msk.bf16.mxu1 %vm3728_vm1, %v3727_v0  ;;  %v4056_v56 = vld [vmem:[#allocation4] ss:$0 sm:$0xff]  ;;  %v3643_v5 = vld [vmem:[%s5119_s0 + $0x220] sm:$0xff]  }
  0x2f   :  { %v3642_v3 = vld [vmem:[%s5119_s0 + $0xc8] sm:$0xff]  }
  0x35   :  { %3251 = vmatmul.mubr.msk.bf16.gmra.mxu0 %vm647_vm3, %v3596_v10  ;;  %3423 = vmatmul.mubr.msk.bf16.gmra.mxu1 %vm647_vm3, %v3597_v11 }
  0x36   :  { %3254 = vmatprep.mubr.msk.bf16.mxu0 %vm3728_vm1, %v3727_v0  ;;  %3426 = vmatprep.mubr.msk.bf16.mxu1 %vm3728_vm1, %v3727_v0 }
  0x3d   :  { %3255 = vmatmul.mubr.msk.bf16.gmra.mxu0 %vm647_vm3, %v3598_v12  ;;  %3427 = vmatmul.mubr.msk.bf16.gmra.mxu1 %vm647_vm3, %v3599_v13 }
  0x3e   :  { %3258 = vmatprep.mubr.msk.bf16.mxu0 %vm3728_vm1, %v3727_v0  ;;  %3430 = vmatprep.mubr.msk.bf16.mxu1 %vm3728_vm1, %v3727_v0 }
  0x45   :  { %3259 = vmatmul.mubr.msk.bf16.gmra.mxu0 %vm647_vm3, %v3600_v14  ;;  %3431 = vmatmul.mubr.msk.bf16.gmra.mxu1 %vm647_vm3, %v3601_v15 }
  0x46   :  { %3262 = vmatprep.mubr.msk.bf16.mxu0 %vm3728_vm1, %v3727_v0  ;;  %3434 = vmatprep.mubr.msk.bf16.mxu1 %vm3728_vm1, %v3727_v0 }
  0x4d   :  { %3263 = vmatmul.mubr.msk.bf16.gmra.mxu0 %vm647_vm3, %v3602_v16  ;;  %3435 = vmatmul.mubr.msk.bf16.gmra.mxu1 %vm647_vm3, %v3603_v17 }
  0x4e   :  { %3266 = vmatprep.mubr.msk.bf16.mxu0 %vm3728_vm1, %v3727_v0  ;;  %3438 = vmatprep.mubr.msk.bf16.mxu1 %vm3728_vm1, %v3727_v0 }
  0x55   :  { %3267 = vmatmul.mubr.msk.bf16.gmra.mxu0 %vm647_vm3, %v3604_v18  ;;  %3439 = vmatmul.mubr.msk.bf16.gmra.mxu1 %vm647_vm3, %v3605_v19 }
  0x56   :  { %3270 = vmatprep.mubr.msk.bf16.mxu0 %vm3728_vm1, %v3727_v0  ;;  %3442 = vmatprep.mubr.msk.bf16.mxu1 %vm3728_vm1, %v3727_v0 }
  0x5d   :  { %3271 = vmatmul.mubr.msk.bf16.gmra.mxu0 %vm647_vm3, %v3606_v20  ;;  %3443 = vmatmul.mubr.msk.bf16.gmra.mxu1 %vm647_vm3, %v3607_v21 }
  0x5e   :  { %3274 = vmatprep.mubr.msk.bf16.mxu0 %vm3728_vm1, %v3727_v0  ;;  %3446 = vmatprep.mubr.msk.bf16.mxu1 %vm3728_vm1, %v3727_v0 }
  0x65   :  { %3275 = vmatmul.mubr.msk.bf16.gmra.mxu0 %vm647_vm3, %v3608_v22  ;;  %3447 = vmatmul.mubr.msk.bf16.gmra.mxu1 %vm647_vm3, %v3609_v23 }
  0x66   :  { %3278 = vmatprep.mubr.msk.bf16.mxu0 %vm3728_vm1, %v3727_v0  ;;  %3450 = vmatprep.mubr.msk.bf16.mxu1 %vm3728_vm1, %v3727_v0 }
  0x6d   :  { %3279 = vmatmul.mubr.msk.bf16.gmra.mxu0 %vm647_vm3, %v3610_v24  ;;  %3451 = vmatmul.mubr.msk.bf16.gmra.mxu1 %vm647_vm3, %v3611_v25  ;;  %v3644_v25 = vld [vmem:[%s5119_s0 + $0xd0] sm:$0xff]  }
  0x6e   :  { %3282 = vmatprep.mubr.msk.bf16.mxu0 %vm3728_vm1, %v3727_v0  ;;  %3454 = vmatprep.mubr.msk.bf16.mxu1 %vm3728_vm1, %v3727_v0 }
  0x75   :  { %3283 = vmatmul.mubr.msk.bf16.gmra.mxu0 %vm647_vm3, %v3612_v26  ;;  %3455 = vmatmul.mubr.msk.bf16.gmra.mxu1 %vm647_vm3, %v3613_v27  ;;  %v3645_v27 = vld [vmem:[%s5119_s0 + $0x228] sm:$0xff]  }
  0x76   :  { %3286 = vmatprep.mubr.msk.bf16.mxu0 %vm3728_vm1, %v3727_v0  ;;  %3458 = vmatprep.mubr.msk.bf16.mxu1 %vm3728_vm1, %v3727_v0 }
  0x7d   :  { %3287 = vmatmul.mubr.msk.bf16.gmra.mxu0 %vm647_vm3, %v3614_v28  ;;  %3459 = vmatmul.mubr.msk.bf16.gmra.mxu1 %vm647_vm3, %v3615_v29 }
  0x7e   :  { %3290 = vmatprep.mubr.msk.bf16.mxu0 %vm3728_vm1, %v3727_v0  ;;  %3462 = vmatprep.mubr.msk.bf16.mxu1 %vm3728_vm1, %v3727_v0 }
  0x85   :  { %3291 = vmatmul.mubr.msk.bf16.gmra.mxu0 %vm647_vm3, %v3616_v30  ;;  %3463 = vmatmul.mubr.msk.bf16.gmra.mxu1 %vm647_vm3, %v3617_v31 }
  0x86   :  { %3294 = vmatprep.mubr.msk.bf16.mxu0 %vm3728_vm1, %v3727_v0  ;;  %3466 = vmatprep.mubr.msk.bf16.mxu1 %vm3728_vm1, %v3727_v0 }
  0x8d   :  { %3295 = vmatmul.mubr.msk.bf16.gmra.mxu0 %vm647_vm3, %v3618_v32  ;;  %3467 = vmatmul.mubr.msk.bf16.gmra.mxu1 %vm647_vm3, %v3619_v33 }
  0x8e   :  { %3298 = vmatprep.mubr.msk.bf16.mxu0 %vm3728_vm1, %v3727_v0  ;;  %3470 = vmatprep.mubr.msk.bf16.mxu1 %vm3728_vm1, %v3727_v0 }
  0x95   :  { %3299 = vmatmul.mubr.msk.bf16.gmra.mxu0 %vm647_vm3, %v3620_v34  ;;  %3471 = vmatmul.mubr.msk.bf16.gmra.mxu1 %vm647_vm3, %v3621_v35 }
  0x96   :  { %3302 = vmatprep.mubr.msk.bf16.mxu0 %vm3728_vm1, %v3727_v0  ;;  %3474 = vmatprep.mubr.msk.bf16.mxu1 %vm3728_vm1, %v3727_v0 }
  0x9d   :  { %3303 = vmatmul.mubr.msk.bf16.gmra.mxu0 %vm647_vm3, %v3622_v36  ;;  %3475 = vmatmul.mubr.msk.bf16.gmra.mxu1 %vm647_vm3, %v3623_v37 }
  0x9e   :  { %3306 = vmatprep.mubr.msk.bf16.mxu0 %vm3728_vm1, %v3727_v0  ;;  %3478 = vmatprep.mubr.msk.bf16.mxu1 %vm3728_vm1, %v3727_v0 }
  0xa5   :  { %3307 = vmatmul.mubr.msk.bf16.gmra.mxu0 %vm647_vm3, %v3624_v38  ;;  %3479 = vmatmul.mubr.msk.bf16.gmra.mxu1 %vm647_vm3, %v3625_v39 }
  0xa6   :  { %3310 = vmatprep.mubr.msk.bf16.mxu0 %vm3728_vm1, %v3727_v0  ;;  %3482 = vmatprep.mubr.msk.bf16.mxu1 %vm3728_vm1, %v3727_v0 }
  0xad   :  { %3311 = vmatmul.mubr.msk.bf16.gmra.mxu0 %vm647_vm3, %v3626_v40  ;;  %3483 = vmatmul.mubr.msk.bf16.gmra.mxu1 %vm647_vm3, %v3627_v41 }
  0xae   :  { %3314 = vmatprep.mubr.msk.bf16.mxu0 %vm3728_vm1, %v3727_v0  ;;  %3486 = vmatprep.mubr.msk.bf16.mxu1 %vm3728_vm1, %v3727_v0 }
  0xb5   :  { %3315 = vmatmul.mubr.msk.bf16.gmra.mxu0 %vm647_vm3, %v3628_v42  ;;  %3487 = vmatmul.mubr.msk.bf16.gmra.mxu1 %vm647_vm3, %v3629_v43 }
  0xb6   :  { %3318 = vmatprep.mubr.msk.bf16.mxu0 %vm3728_vm1, %v3727_v0  ;;  %3490 = vmatprep.mubr.msk.bf16.mxu1 %vm3728_vm1, %v3727_v0 }
  0xbd   :  { %3319 = vmatmul.mubr.msk.bf16.gmra.mxu0 %vm647_vm3, %v3630_v44  ;;  %3491 = vmatmul.mubr.msk.bf16.gmra.mxu1 %vm647_vm3, %v3631_v45 }
  0xbe   :  { %3322 = vmatprep.mubr.msk.bf16.mxu0 %vm3728_vm1, %v3727_v0  ;;  %3494 = vmatprep.mubr.msk.bf16.mxu1 %vm3728_vm1, %v3727_v0 }
  0xc5   :  { %3323 = vmatmul.mubr.msk.bf16.gmra.mxu0 %vm647_vm3, %v3632_v46  ;;  %3495 = vmatmul.mubr.msk.bf16.gmra.mxu1 %vm647_vm3, %v3633_v47  ;;  %v3646_v47 = vld [vmem:[%s5119_s0 + $0xd8] sm:$0xff]  }
  0xc6   :  { %3326 = vmatprep.mubr.msk.bf16.mxu0 %vm3728_vm1, %v3727_v0  ;;  %3498 = vmatprep.mubr.msk.bf16.mxu1 %vm3728_vm1, %v3727_v0 }
  0xcd   :  { %3327 = vmatmul.mubr.msk.bf16.gmra.mxu0 %vm647_vm3, %v3634_v48  ;;  %3499 = vmatmul.mubr.msk.bf16.gmra.mxu1 %vm647_vm3, %v3635_v49  ;;  %v3647_v49 = vld [vmem:[%s5119_s0 + $0x230] sm:$0xff]  }
  0xce   :  { %3330 = vmatprep.mubr.msk.bf16.mxu0 %vm3728_vm1, %v3727_v0  ;;  %3502 = vmatprep.mubr.msk.bf16.mxu1 %vm3728_vm1, %v3727_v0 }
  0xd5   :  { %3331 = vmatmul.mubr.msk.bf16.gmra.mxu0 %vm647_vm3, %v3636_v50  ;;  %3503 = vmatmul.mubr.msk.bf16.gmra.mxu1 %vm647_vm3, %v3637_v51 }
  0xd6   :  { %3334 = vmatprep.mubr.msk.bf16.mxu0 %vm3728_vm1, %v3727_v0  ;;  %3506 = vmatprep.mubr.msk.bf16.mxu1 %vm3728_vm1, %v3727_v0 }
  0xdd   :  { %3335 = vmatmul.mubr.msk.bf16.gmra.mxu0 %vm647_vm3, %v3638_v52  ;;  %3507 = vmatmul.mubr.msk.bf16.gmra.mxu1 %vm647_vm3, %v3639_v53 }
  0xde   :  { %3338 = vmatprep.mubr.msk.bf16.mxu0 %vm3728_vm1, %v3727_v0  ;;  %3510 = vmatprep.mubr.msk.bf16.mxu1 %vm3728_vm1, %v3727_v0 }
  0xe5   :  { %v944_v57 = vpop.f32.mrf.mxu0  ;;  %3339 = vmatmul.mubr.msk.bf16.gmra.mxu0 %vm647_vm3, %v3640_v54  ;;  %v1288_v58 = vpop.f32.mrf.mxu1  ;;  %3511 = vmatmul.mubr.msk.bf16.gmra.mxu1 %vm647_vm3, %v3641_v55 }
  0xe6   :  { %v945_v59 = vadd.f32 %v4056_v56, %v944_v57  ;;  %v1289_v60 = vadd.f32 %v4056_v56, %v1288_v58  ;;  %3342 = vmatprep.mubr.msk.bf16.mxu0 %vm3728_vm1, %v3727_v0  ;;  %3514 = vmatprep.mubr.msk.bf16.mxu1 %vm3728_vm1, %v3727_v0 }
  0xe7   :  { %v3244_v61 = vpop.f32.mrf.mxu0  ;;  %v3416_v62 = vpop.f32.mrf.mxu1 }
  0xe8   :  { %v1622_v63 = vmax.f32 %v945_v59, 0.0  ;;  %v1708_v1 = vmax.f32 %v1289_v60, 0.0 }
  0xe9   :  { %v947_v2 = vpop.f32.mrf.mxu0  ;;  %v1291_v4 = vpop.f32.mrf.mxu1 }
  0xea   :  { %v2985_v6 = vpack.c.bf16 %v1622_v63, %v1622_v63  ;;  %v948_v7 = vadd.f32 %v4056_v56, %v947_v2  ;;  %v3071_v8 = vpack.c.bf16 %v1708_v1, %v1708_v1  ;;  %v1292_v9 = vadd.f32 %v4056_v56, %v1291_v4 }
  0xeb   :  { %v3245_v10 = vpop.f32.mrf.mxu0  ;;  %v3417_v11 = vpop.f32.mrf.mxu1 }
  0xec   :  { %2469 = vst.msk [vmem:[%s5122_s3] sm:$0xf] %vm2468_vm4, %v2985_v6  ;;  %v1623_v12 = vmax.f32 %v948_v7, 0.0  ;;  %2555 = vst.msk [vmem:[%s5122_s3 + $0x158] sm:$0xf] %vm2468_vm4, %v3071_v8  ;;  %v1709_v13 = vmax.f32 %v1292_v9, 0.0 }
  0xed   :  { %v952_v14 = vpop.f32.mrf.mxu0  ;;  %3343 = vmatmul.mubr.msk.bf16.gmra.mxu0 %vm647_vm3, %v3642_v3  ;;  %v1296_v15 = vpop.f32.mrf.mxu1  ;;  %3515 = vmatmul.mubr.msk.bf16.gmra.mxu1 %vm647_vm3, %v3643_v5  ;;  %v3648_v7 = vld [vmem:[%s5119_s0 + $0xe0] sm:$0xff]   ;;  %v3649_v9 = vld [vmem:[%s5119_s0 + $0x238] sm:$0xff]  }
  0xee   :  { %v2986_v16 = vpack.c.bf16 %v1623_v12, %v1623_v12  ;;  %v953_v17 = vadd.f32 %v4056_v56, %v952_v14  ;;  %v3072_v18 = vpack.c.bf16 %v1709_v13, %v1709_v13  ;;  %v1297_v19 = vadd.f32 %v4056_v56, %v1296_v15  ;;  %3346 = vmatprep.mubr.msk.bf16.mxu0 %vm3728_vm1, %v3727_v0 }
  0xef   :  { %v3248_v20 = vpop.f32.mrf.mxu0  ;;  %v3420_v21 = vpop.f32.mrf.mxu1  ;;  %3518 = vmatprep.mubr.msk.bf16.mxu1 %vm3728_vm1, %v3727_v0 }
  0xf0   :  { %2470 = vst.msk [vmem:[%s5122_s3 + $0x4] sm:$0xf] %vm2468_vm4, %v2986_v16  ;;  %v1624_v22 = vmax.f32 %v953_v17, 0.0  ;;  %2556 = vst.msk [vmem:[%s5122_s3 + $0x15c] sm:$0xf] %vm2468_vm4, %v3072_v18  ;;  %v1710_v23 = vmax.f32 %v1297_v19, 0.0 }
  0xf1   :  { %v955_v24 = vpop.f32.mrf.mxu0  ;;  %v1299_v26 = vpop.f32.mrf.mxu1 }
  0xf2   :  { %v2987_v28 = vpack.c.bf16 %v1624_v22, %v1624_v22  ;;  %v956_v29 = vadd.f32 %v4056_v56, %v955_v24  ;;  %v3073_v30 = vpack.c.bf16 %v1710_v23, %v1710_v23  ;;  %v1300_v31 = vadd.f32 %v4056_v56, %v1299_v26 }
  0xf3   :  { %v3249_v32 = vpop.f32.mrf.mxu0  ;;  %v3421_v33 = vpop.f32.mrf.mxu1 }
  0xf4   :  { %2471 = vst.msk [vmem:[%s5122_s3 + $0x8] sm:$0xf] %vm2468_vm4, %v2987_v28  ;;  %v1625_v34 = vmax.f32 %v956_v29, 0.0  ;;  %2557 = vst.msk [vmem:[%s5122_s3 + $0x160] sm:$0xf] %vm2468_vm4, %v3073_v30  ;;  %v1711_v35 = vmax.f32 %v1300_v31, 0.0 }
  0xf5   :  { %v960_v36 = vpop.f32.mrf.mxu0  ;;  %3347 = vmatmul.mubr.msk.bf16.gmra.mxu0 %vm647_vm3, %v3644_v25  ;;  %v1304_v37 = vpop.f32.mrf.mxu1  ;;  %3519 = vmatmul.mubr.msk.bf16.gmra.mxu1 %vm647_vm3, %v3645_v27  ;;  %v3650_v29 = vld [vmem:[%s5119_s0 + $0xe8] sm:$0xff]   ;;  %v3651_v31 = vld [vmem:[%s5119_s0 + $0x240] sm:$0xff]  }
  0xf6   :  { %v2988_v38 = vpack.c.bf16 %v1625_v34, %v1625_v34  ;;  %v961_v39 = vadd.f32 %v4056_v56, %v960_v36  ;;  %v3074_v40 = vpack.c.bf16 %v1711_v35, %v1711_v35  ;;  %v1305_v41 = vadd.f32 %v4056_v56, %v1304_v37  ;;  %3350 = vmatprep.mubr.msk.bf16.mxu0 %vm3728_vm1, %v3727_v0 }
  0xf7   :  { %v3252_v42 = vpop.f32.mrf.mxu0  ;;  %v3424_v43 = vpop.f32.mrf.mxu1  ;;  %3522 = vmatprep.mubr.msk.bf16.mxu1 %vm3728_vm1, %v3727_v0 }
  0xf8   :  { %2472 = vst.msk [vmem:[%s5122_s3 + $0xc] sm:$0xf] %vm2468_vm4, %v2988_v38  ;;  %v1626_v44 = vmax.f32 %v961_v39, 0.0  ;;  %2558 = vst.msk [vmem:[%s5122_s3 + $0x164] sm:$0xf] %vm2468_vm4, %v3074_v40  ;;  %v1712_v45 = vmax.f32 %v1305_v41, 0.0 }
  0xf9   :  { %v963_v46 = vpop.f32.mrf.mxu0  ;;  %v1307_v48 = vpop.f32.mrf.mxu1 }
  0xfa   :  { %v2989_v50 = vpack.c.bf16 %v1626_v44, %v1626_v44  ;;  %v964_v51 = vadd.f32 %v4056_v56, %v963_v46  ;;  %v3075_v52 = vpack.c.bf16 %v1712_v45, %v1712_v45  ;;  %v1308_v53 = vadd.f32 %v4056_v56, %v1307_v48 }
  0xfb   :  { %v3253_v54 = vpop.f32.mrf.mxu0  ;;  %v3425_v55 = vpop.f32.mrf.mxu1 }
  0xfc   :  { %2473 = vst.msk [vmem:[%s5122_s3 + $0x10] sm:$0xf] %vm2468_vm4, %v2989_v50  ;;  %v1627_v57 = vmax.f32 %v964_v51, 0.0  ;;  %2559 = vst.msk [vmem:[%s5122_s3 + $0x168] sm:$0xf] %vm2468_vm4, %v3075_v52  ;;  %v1713_v58 = vmax.f32 %v1308_v53, 0.0 }
  0xfd   :  { %v968_v59 = vpop.f32.mrf.mxu0  ;;  %3351 = vmatmul.mubr.msk.bf16.gmra.mxu0 %vm647_vm3, %v3646_v47  ;;  %v1312_v60 = vpop.f32.mrf.mxu1  ;;  %3523 = vmatmul.mubr.msk.bf16.gmra.mxu1 %vm647_vm3, %v3647_v49  ;;  %v3652_v51 = vld [vmem:[%s5119_s0 + $0xf0] sm:$0xff]   ;;  %v3653_v53 = vld [vmem:[%s5119_s0 + $0x248] sm:$0xff]  }
  0xfe   :  { %v2990_v61 = vpack.c.bf16 %v1627_v57, %v1627_v57  ;;  %v969_v62 = vadd.f32 %v4056_v56, %v968_v59  ;;  %v3076_v63 = vpack.c.bf16 %v1713_v58, %v1713_v58  ;;  %v1313_v1 = vadd.f32 %v4056_v56, %v1312_v60  ;;  %3354 = vmatprep.mubr.msk.bf16.mxu0 %vm3728_vm1, %v3727_v0 }
  0xff   :  { %v3256_v2 = vpop.f32.mrf.mxu0  ;;  %v3428_v3 = vpop.f32.mrf.mxu1  ;;  %3526 = vmatprep.mubr.msk.bf16.mxu1 %vm3728_vm1, %v3727_v0 }
 0x100   :  { %2474 = vst.msk [vmem:[%s5122_s3 + $0x14] sm:$0xf] %vm2468_vm4, %v2990_v61  ;;  %v1628_v4 = vmax.f32 %v969_v62, 0.0  ;;  %2560 = vst.msk [vmem:[%s5122_s3 + $0x16c] sm:$0xf] %vm2468_vm4, %v3076_v63  ;;  %v1714_v5 = vmax.f32 %v1313_v1, 0.0 }
 0x101   :  { %v971_v6 = vpop.f32.mrf.mxu0  ;;  %v1315_v8 = vpop.f32.mrf.mxu1 }
 0x102   :  { %v2991_v10 = vpack.c.bf16 %v1628_v4, %v1628_v4  ;;  %v972_v11 = vadd.f32 %v4056_v56, %v971_v6  ;;  %v3077_v12 = vpack.c.bf16 %v1714_v5, %v1714_v5  ;;  %v1316_v13 = vadd.f32 %v4056_v56, %v1315_v8 }
 0x103   :  { %v3257_v14 = vpop.f32.mrf.mxu0  ;;  %v3429_v15 = vpop.f32.mrf.mxu1 }
 0x104   :  { %2475 = vst.msk [vmem:[%s5122_s3 + $0x18] sm:$0xf] %vm2468_vm4, %v2991_v10  ;;  %v1629_v16 = vmax.f32 %v972_v11, 0.0  ;;  %2561 = vst.msk [vmem:[%s5122_s3 + $0x170] sm:$0xf] %vm2468_vm4, %v3077_v12  ;;  %v1715_v17 = vmax.f32 %v1316_v13, 0.0 }
 0x105   :  { %v976_v18 = vpop.f32.mrf.mxu0  ;;  %3355 = vmatmul.mubr.msk.bf16.gmra.mxu0 %vm647_vm3, %v3648_v7  ;;  %v1320_v19 = vpop.f32.mrf.mxu1  ;;  %3527 = vmatmul.mubr.msk.bf16.gmra.mxu1 %vm647_vm3, %v3649_v9  ;;  %v3654_v11 = vld [vmem:[%s5119_s0 + $0xf8] sm:$0xff]   ;;  %v3655_v13 = vld [vmem:[%s5119_s0 + $0x250] sm:$0xff]  }
 0x106   :  { %v2992_v20 = vpack.c.bf16 %v1629_v16, %v1629_v16  ;;  %v977_v21 = vadd.f32 %v4056_v56, %v976_v18  ;;  %v3078_v22 = vpack.c.bf16 %v1715_v17, %v1715_v17  ;;  %v1321_v23 = vadd.f32 %v4056_v56, %v1320_v19  ;;  %3358 = vmatprep.mubr.msk.bf16.mxu0 %vm3728_vm1, %v3727_v0 }
 0x107   :  { %v3260_v24 = vpop.f32.mrf.mxu0  ;;  %v3432_v25 = vpop.f32.mrf.mxu1  ;;  %3530 = vmatprep.mubr.msk.bf16.mxu1 %vm3728_vm1, %v3727_v0 }
 0x108   :  { %2476 = vst.msk [vmem:[%s5122_s3 + $0x1c] sm:$0xf] %vm2468_vm4, %v2992_v20  ;;  %v1630_v26 = vmax.f32 %v977_v21, 0.0  ;;  %2562 = vst.msk [vmem:[%s5122_s3 + $0x174] sm:$0xf] %vm2468_vm4, %v3078_v22  ;;  %v1716_v27 = vmax.f32 %v1321_v23, 0.0 }
 0x109   :  { %v979_v28 = vpop.f32.mrf.mxu0  ;;  %v1323_v30 = vpop.f32.mrf.mxu1 }
 0x10a   :  { %v2993_v32 = vpack.c.bf16 %v1630_v26, %v1630_v26  ;;  %v980_v33 = vadd.f32 %v4056_v56, %v979_v28  ;;  %v3079_v34 = vpack.c.bf16 %v1716_v27, %v1716_v27  ;;  %v1324_v35 = vadd.f32 %v4056_v56, %v1323_v30 }
 0x10b   :  { %v3261_v36 = vpop.f32.mrf.mxu0  ;;  %v3433_v37 = vpop.f32.mrf.mxu1 }
 0x10c   :  { %2477 = vst.msk [vmem:[%s5122_s3 + $0x20] sm:$0xf] %vm2468_vm4, %v2993_v32  ;;  %v1631_v38 = vmax.f32 %v980_v33, 0.0  ;;  %2563 = vst.msk [vmem:[%s5122_s3 + $0x178] sm:$0xf] %vm2468_vm4, %v3079_v34  ;;  %v1717_v39 = vmax.f32 %v1324_v35, 0.0 }
 0x10d   :  { %v984_v40 = vpop.f32.mrf.mxu0  ;;  %3359 = vmatmul.mubr.msk.bf16.gmra.mxu0 %vm647_vm3, %v3650_v29  ;;  %v1328_v41 = vpop.f32.mrf.mxu1  ;;  %3531 = vmatmul.mubr.msk.bf16.gmra.mxu1 %vm647_vm3, %v3651_v31  ;;  %v3656_v33 = vld [vmem:[%s5119_s0 + $0x100] sm:$0xff]   ;;  %v3657_v35 = vld [vmem:[%s5119_s0 + $0x258] sm:$0xff]  }
 0x10e   :  { %v2994_v42 = vpack.c.bf16 %v1631_v38, %v1631_v38  ;;  %v985_v43 = vadd.f32 %v4056_v56, %v984_v40  ;;  %v3080_v44 = vpack.c.bf16 %v1717_v39, %v1717_v39  ;;  %v1329_v45 = vadd.f32 %v4056_v56, %v1328_v41  ;;  %3362 = vmatprep.mubr.msk.bf16.mxu0 %vm3728_vm1, %v3727_v0 }
 0x10f   :  { %v3264_v46 = vpop.f32.mrf.mxu0  ;;  %v3436_v47 = vpop.f32.mrf.mxu1  ;;  %3534 = vmatprep.mubr.msk.bf16.mxu1 %vm3728_vm1, %v3727_v0 }
 0x110   :  { %2478 = vst.msk [vmem:[%s5122_s3 + $0x24] sm:$0xf] %vm2468_vm4, %v2994_v42  ;;  %v1632_v48 = vmax.f32 %v985_v43, 0.0  ;;  %2564 = vst.msk [vmem:[%s5122_s3 + $0x17c] sm:$0xf] %vm2468_vm4, %v3080_v44  ;;  %v1718_v49 = vmax.f32 %v1329_v45, 0.0 }
 0x111   :  { %v987_v50 = vpop.f32.mrf.mxu0  ;;  %v1331_v52 = vpop.f32.mrf.mxu1 }
 0x112   :  { %v2995_v54 = vpack.c.bf16 %v1632_v48, %v1632_v48  ;;  %v988_v55 = vadd.f32 %v4056_v56, %v987_v50  ;;  %v3081_v57 = vpack.c.bf16 %v1718_v49, %v1718_v49  ;;  %v1332_v58 = vadd.f32 %v4056_v56, %v1331_v52 }
 0x113   :  { %v3265_v59 = vpop.f32.mrf.mxu0  ;;  %v3437_v60 = vpop.f32.mrf.mxu1 }
 0x114   :  { %2479 = vst.msk [vmem:[%s5122_s3 + $0x28] sm:$0xf] %vm2468_vm4, %v2995_v54  ;;  %v1633_v61 = vmax.f32 %v988_v55, 0.0  ;;  %2565 = vst.msk [vmem:[%s5122_s3 + $0x180] sm:$0xf] %vm2468_vm4, %v3081_v57  ;;  %v1719_v62 = vmax.f32 %v1332_v58, 0.0 }
 0x115   :  { %v992_v63 = vpop.f32.mrf.mxu0  ;;  %3363 = vmatmul.mubr.msk.bf16.gmra.mxu0 %vm647_vm3, %v3652_v51  ;;  %v1336_v1 = vpop.f32.mrf.mxu1  ;;  %3535 = vmatmul.mubr.msk.bf16.gmra.mxu1 %vm647_vm3, %v3653_v53  ;;  %v3658_v55 = vld [vmem:[%s5119_s0 + $0x108] sm:$0xff]   ;;  %v3659_v58 = vld [vmem:[%s5119_s0 + $0x260] sm:$0xff]  }
 0x116   :  { %v2996_v2 = vpack.c.bf16 %v1633_v61, %v1633_v61  ;;  %v993_v3 = vadd.f32 %v4056_v56, %v992_v63  ;;  %v3082_v4 = vpack.c.bf16 %v1719_v62, %v1719_v62  ;;  %v1337_v5 = vadd.f32 %v4056_v56, %v1336_v1  ;;  %3366 = vmatprep.mubr.msk.bf16.mxu0 %vm3728_vm1, %v3727_v0 }
 0x117   :  { %v3268_v6 = vpop.f32.mrf.mxu0  ;;  %v3440_v7 = vpop.f32.mrf.mxu1  ;;  %3538 = vmatprep.mubr.msk.bf16.mxu1 %vm3728_vm1, %v3727_v0 }
 0x118   :  { %2480 = vst.msk [vmem:[%s5122_s3 + $0x2c] sm:$0xf] %vm2468_vm4, %v2996_v2  ;;  %v1634_v8 = vmax.f32 %v993_v3, 0.0  ;;  %2566 = vst.msk [vmem:[%s5122_s3 + $0x184] sm:$0xf] %vm2468_vm4, %v3082_v4  ;;  %v1720_v9 = vmax.f32 %v1337_v5, 0.0 }
 0x119   :  { %v995_v10 = vpop.f32.mrf.mxu0  ;;  %v1339_v12 = vpop.f32.mrf.mxu1 }
 0x11a   :  { %v2997_v14 = vpack.c.bf16 %v1634_v8, %v1634_v8  ;;  %v996_v15 = vadd.f32 %v4056_v56, %v995_v10  ;;  %v3083_v16 = vpack.c.bf16 %v1720_v9, %v1720_v9  ;;  %v1340_v17 = vadd.f32 %v4056_v56, %v1339_v12 }
 0x11b   :  { %v3269_v18 = vpop.f32.mrf.mxu0  ;;  %v3441_v19 = vpop.f32.mrf.mxu1 }
 0x11c   :  { %2481 = vst.msk [vmem:[%s5122_s3 + $0x30] sm:$0xf] %vm2468_vm4, %v2997_v14  ;;  %v1635_v20 = vmax.f32 %v996_v15, 0.0  ;;  %2567 = vst.msk [vmem:[%s5122_s3 + $0x188] sm:$0xf] %vm2468_vm4, %v3083_v16  ;;  %v1721_v21 = vmax.f32 %v1340_v17, 0.0 }
 0x11d   :  { %v1000_v22 = vpop.f32.mrf.mxu0  ;;  %3367 = vmatmul.mubr.msk.bf16.gmra.mxu0 %vm647_vm3, %v3654_v11  ;;  %v1344_v23 = vpop.f32.mrf.mxu1  ;;  %3539 = vmatmul.mubr.msk.bf16.gmra.mxu1 %vm647_vm3, %v3655_v13  ;;  %v3660_v15 = vld [vmem:[%s5119_s0 + $0x110] sm:$0xff]   ;;  %v3661_v17 = vld [vmem:[%s5119_s0 + $0x268] sm:$0xff]  }
 0x11e   :  { %v2998_v24 = vpack.c.bf16 %v1635_v20, %v1635_v20  ;;  %v1001_v25 = vadd.f32 %v4056_v56, %v1000_v22  ;;  %v3084_v26 = vpack.c.bf16 %v1721_v21, %v1721_v21  ;;  %v1345_v27 = vadd.f32 %v4056_v56, %v1344_v23  ;;  %3370 = vmatprep.mubr.msk.bf16.mxu0 %vm3728_vm1, %v3727_v0 }
 0x11f   :  { %v3272_v28 = vpop.f32.mrf.mxu0  ;;  %v3444_v29 = vpop.f32.mrf.mxu1  ;;  %3542 = vmatprep.mubr.msk.bf16.mxu1 %vm3728_vm1, %v3727_v0 }
 0x120   :  { %2482 = vst.msk [vmem:[%s5122_s3 + $0x34] sm:$0xf] %vm2468_vm4, %v2998_v24  ;;  %v1636_v30 = vmax.f32 %v1001_v25, 0.0  ;;  %2568 = vst.msk [vmem:[%s5122_s3 + $0x18c] sm:$0xf] %vm2468_vm4, %v3084_v26  ;;  %v1722_v31 = vmax.f32 %v1345_v27, 0.0 }
 0x121   :  { %v1003_v32 = vpop.f32.mrf.mxu0  ;;  %v1347_v34 = vpop.f32.mrf.mxu1 }
 0x122   :  { %v2999_v36 = vpack.c.bf16 %v1636_v30, %v1636_v30  ;;  %v1004_v37 = vadd.f32 %v4056_v56, %v1003_v32  ;;  %v3085_v38 = vpack.c.bf16 %v1722_v31, %v1722_v31  ;;  %v1348_v39 = vadd.f32 %v4056_v56, %v1347_v34 }
 0x123   :  { %v3273_v40 = vpop.f32.mrf.mxu0  ;;  %v3445_v41 = vpop.f32.mrf.mxu1 }
 0x124   :  { %2483 = vst.msk [vmem:[%s5122_s3 + $0x38] sm:$0xf] %vm2468_vm4, %v2999_v36  ;;  %v1637_v42 = vmax.f32 %v1004_v37, 0.0  ;;  %2569 = vst.msk [vmem:[%s5122_s3 + $0x190] sm:$0xf] %vm2468_vm4, %v3085_v38  ;;  %v1723_v43 = vmax.f32 %v1348_v39, 0.0 }
 0x125   :  { %v1008_v44 = vpop.f32.mrf.mxu0  ;;  %3371 = vmatmul.mubr.msk.bf16.gmra.mxu0 %vm647_vm3, %v3656_v33  ;;  %v1352_v45 = vpop.f32.mrf.mxu1  ;;  %3543 = vmatmul.mubr.msk.bf16.gmra.mxu1 %vm647_vm3, %v3657_v35  ;;  %v3662_v37 = vld [vmem:[%s5119_s0 + $0x118] sm:$0xff]   ;;  %v3663_v39 = vld [vmem:[%s5119_s0 + $0x270] sm:$0xff]  }
 0x126   :  { %v3000_v46 = vpack.c.bf16 %v1637_v42, %v1637_v42  ;;  %v1009_v47 = vadd.f32 %v4056_v56, %v1008_v44  ;;  %v3086_v48 = vpack.c.bf16 %v1723_v43, %v1723_v43  ;;  %v1353_v49 = vadd.f32 %v4056_v56, %v1352_v45  ;;  %3374 = vmatprep.mubr.msk.bf16.mxu0 %vm3728_vm1, %v3727_v0 }
 0x127   :  { %v3276_v50 = vpop.f32.mrf.mxu0  ;;  %v3448_v51 = vpop.f32.mrf.mxu1  ;;  %3546 = vmatprep.mubr.msk.bf16.mxu1 %vm3728_vm1, %v3727_v0 }
 0x128   :  { %2484 = vst.msk [vmem:[%s5122_s3 + $0x3c] sm:$0xf] %vm2468_vm4, %v3000_v46  ;;  %v1638_v52 = vmax.f32 %v1009_v47, 0.0  ;;  %2570 = vst.msk [vmem:[%s5122_s3 + $0x194] sm:$0xf] %vm2468_vm4, %v3086_v48  ;;  %v1724_v53 = vmax.f32 %v1353_v49, 0.0 }
 0x129   :  { %v1011_v54 = vpop.f32.mrf.mxu0  ;;  %v1355_v57 = vpop.f32.mrf.mxu1 }
 0x12a   :  { %v3001_v59 = vpack.c.bf16 %v1638_v52, %v1638_v52  ;;  %v1012_v60 = vadd.f32 %v4056_v56, %v1011_v54  ;;  %v3087_v61 = vpack.c.bf16 %v1724_v53, %v1724_v53  ;;  %v1356_v62 = vadd.f32 %v4056_v56, %v1355_v57 }
 0x12b   :  { %v3277_v63 = vpop.f32.mrf.mxu0  ;;  %v3449_v1 = vpop.f32.mrf.mxu1 }
 0x12c   :  { %2485 = vst.msk [vmem:[%s5122_s3 + $0x40] sm:$0xf] %vm2468_vm4, %v3001_v59  ;;  %v1639_v2 = vmax.f32 %v1012_v60, 0.0  ;;  %2571 = vst.msk [vmem:[%s5122_s3 + $0x198] sm:$0xf] %vm2468_vm4, %v3087_v61  ;;  %v1725_v3 = vmax.f32 %v1356_v62, 0.0 }
 0x12d   :  { %v1016_v4 = vpop.f32.mrf.mxu0  ;;  %3375 = vmatmul.mubr.msk.bf16.gmra.mxu0 %vm647_vm3, %v3658_v55  ;;  %v1360_v5 = vpop.f32.mrf.mxu1  ;;  %3547 = vmatmul.mubr.msk.bf16.gmra.mxu1 %vm647_vm3, %v3659_v58  ;;  %v3664_v60 = vld [vmem:[%s5119_s0 + $0x120] sm:$0xff]   ;;  %v3665_v62 = vld [vmem:[%s5119_s0 + $0x278] sm:$0xff]  }
 0x12e   :  { %v3002_v6 = vpack.c.bf16 %v1639_v2, %v1639_v2  ;;  %v1017_v7 = vadd.f32 %v4056_v56, %v1016_v4  ;;  %v3088_v8 = vpack.c.bf16 %v1725_v3, %v1725_v3  ;;  %v1361_v9 = vadd.f32 %v4056_v56, %v1360_v5  ;;  %3378 = vmatprep.mubr.msk.bf16.mxu0 %vm3728_vm1, %v3727_v0 }
 0x12f   :  { %v3280_v10 = vpop.f32.mrf.mxu0  ;;  %v3452_v11 = vpop.f32.mrf.mxu1  ;;  %3550 = vmatprep.mubr.msk.bf16.mxu1 %vm3728_vm1, %v3727_v0 }
 0x130   :  { %2486 = vst.msk [vmem:[%s5122_s3 + $0x44] sm:$0xf] %vm2468_vm4, %v3002_v6  ;;  %v1640_v12 = vmax.f32 %v1017_v7, 0.0  ;;  %2572 = vst.msk [vmem:[%s5122_s3 + $0x19c] sm:$0xf] %vm2468_vm4, %v3088_v8  ;;  %v1726_v13 = vmax.f32 %v1361_v9, 0.0 }
 0x131   :  { %v1019_v14 = vpop.f32.mrf.mxu0  ;;  %v1363_v16 = vpop.f32.mrf.mxu1 }
 0x132   :  { %v3003_v18 = vpack.c.bf16 %v1640_v12, %v1640_v12  ;;  %v1020_v19 = vadd.f32 %v4056_v56, %v1019_v14  ;;  %v3089_v20 = vpack.c.bf16 %v1726_v13, %v1726_v13  ;;  %v1364_v21 = vadd.f32 %v4056_v56, %v1363_v16 }
 0x133   :  { %v3281_v22 = vpop.f32.mrf.mxu0  ;;  %v3453_v23 = vpop.f32.mrf.mxu1 }
 0x134   :  { %2487 = vst.msk [vmem:[%s5122_s3 + $0x48] sm:$0xf] %vm2468_vm4, %v3003_v18  ;;  %v1641_v24 = vmax.f32 %v1020_v19, 0.0  ;;  %2573 = vst.msk [vmem:[%s5122_s3 + $0x1a0] sm:$0xf] %vm2468_vm4, %v3089_v20  ;;  %v1727_v25 = vmax.f32 %v1364_v21, 0.0 }
 0x135   :  { %v1024_v26 = vpop.f32.mrf.mxu0  ;;  %3379 = vmatmul.mubr.msk.bf16.gmra.mxu0 %vm647_vm3, %v3660_v15  ;;  %v1368_v27 = vpop.f32.mrf.mxu1  ;;  %3551 = vmatmul.mubr.msk.bf16.gmra.mxu1 %vm647_vm3, %v3661_v17  ;;  %v3666_v19 = vld [vmem:[%s5119_s0 + $0x128] sm:$0xff]   ;;  %v3667_v21 = vld [vmem:[%s5119_s0 + $0x280] sm:$0xff]  }
 0x136   :  { %v3004_v28 = vpack.c.bf16 %v1641_v24, %v1641_v24  ;;  %v1025_v29 = vadd.f32 %v4056_v56, %v1024_v26  ;;  %v3090_v30 = vpack.c.bf16 %v1727_v25, %v1727_v25  ;;  %v1369_v31 = vadd.f32 %v4056_v56, %v1368_v27  ;;  %3382 = vmatprep.mubr.msk.bf16.mxu0 %vm3728_vm1, %v3727_v0 }
 0x137   :  { %v3284_v32 = vpop.f32.mrf.mxu0  ;;  %v3456_v33 = vpop.f32.mrf.mxu1  ;;  %3554 = vmatprep.mubr.msk.bf16.mxu1 %vm3728_vm1, %v3727_v0 }
 0x138   :  { %2488 = vst.msk [vmem:[%s5122_s3 + $0x4c] sm:$0xf] %vm2468_vm4, %v3004_v28  ;;  %v1642_v34 = vmax.f32 %v1025_v29, 0.0  ;;  %2574 = vst.msk [vmem:[%s5122_s3 + $0x1a4] sm:$0xf] %vm2468_vm4, %v3090_v30  ;;  %v1728_v35 = vmax.f32 %v1369_v31, 0.0 }
 0x139   :  { %v1027_v36 = vpop.f32.mrf.mxu0  ;;  %v1371_v38 = vpop.f32.mrf.mxu1 }
 0x13a   :  { %v3005_v40 = vpack.c.bf16 %v1642_v34, %v1642_v34  ;;  %v1028_v41 = vadd.f32 %v4056_v56, %v1027_v36  ;;  %v3091_v42 = vpack.c.bf16 %v1728_v35, %v1728_v35  ;;  %v1372_v43 = vadd.f32 %v4056_v56, %v1371_v38 }
 0x13b   :  { %v3285_v44 = vpop.f32.mrf.mxu0  ;;  %v3457_v45 = vpop.f32.mrf.mxu1 }
 0x13c   :  { %2489 = vst.msk [vmem:[%s5122_s3 + $0x50] sm:$0xf] %vm2468_vm4, %v3005_v40  ;;  %v1643_v46 = vmax.f32 %v1028_v41, 0.0  ;;  %2575 = vst.msk [vmem:[%s5122_s3 + $0x1a8] sm:$0xf] %vm2468_vm4, %v3091_v42  ;;  %v1729_v47 = vmax.f32 %v1372_v43, 0.0 }
 0x13d   :  { %v1032_v48 = vpop.f32.mrf.mxu0  ;;  %3383 = vmatmul.mubr.msk.bf16.gmra.mxu0 %vm647_vm3, %v3662_v37  ;;  %v1376_v49 = vpop.f32.mrf.mxu1  ;;  %3555 = vmatmul.mubr.msk.bf16.gmra.mxu1 %vm647_vm3, %v3663_v39  ;;  %v3668_v41 = vld [vmem:[%s5119_s0 + $0x130] sm:$0xff]   ;;  %v3669_v43 = vld [vmem:[%s5119_s0 + $0x288] sm:$0xff]  }
 0x13e   :  { %v3006_v50 = vpack.c.bf16 %v1643_v46, %v1643_v46  ;;  %v1033_v51 = vadd.f32 %v4056_v56, %v1032_v48  ;;  %v3092_v52 = vpack.c.bf16 %v1729_v47, %v1729_v47  ;;  %v1377_v53 = vadd.f32 %v4056_v56, %v1376_v49  ;;  %3386 = vmatprep.mubr.msk.bf16.mxu0 %vm3728_vm1, %v3727_v0 }
 0x13f   :  { %v3288_v54 = vpop.f32.mrf.mxu0  ;;  %v3460_v55 = vpop.f32.mrf.mxu1  ;;  %3558 = vmatprep.mubr.msk.bf16.mxu1 %vm3728_vm1, %v3727_v0 }
 0x140   :  { %2490 = vst.msk [vmem:[%s5122_s3 + $0x54] sm:$0xf] %vm2468_vm4, %v3006_v50  ;;  %v1644_v57 = vmax.f32 %v1033_v51, 0.0  ;;  %2576 = vst.msk [vmem:[%s5122_s3 + $0x1ac] sm:$0xf] %vm2468_vm4, %v3092_v52  ;;  %v1730_v58 = vmax.f32 %v1377_v53, 0.0 }
 0x141   :  { %v1035_v59 = vpop.f32.mrf.mxu0  ;;  %v1379_v61 = vpop.f32.mrf.mxu1 }
 0x142   :  { %v3007_v63 = vpack.c.bf16 %v1644_v57, %v1644_v57  ;;  %v1036_v1 = vadd.f32 %v4056_v56, %v1035_v59  ;;  %v3093_v2 = vpack.c.bf16 %v1730_v58, %v1730_v58  ;;  %v1380_v3 = vadd.f32 %v4056_v56, %v1379_v61 }
 0x143   :  { %v3289_v4 = vpop.f32.mrf.mxu0  ;;  %v3461_v5 = vpop.f32.mrf.mxu1 }
 0x144   :  { %2491 = vst.msk [vmem:[%s5122_s3 + $0x58] sm:$0xf] %vm2468_vm4, %v3007_v63  ;;  %v1645_v6 = vmax.f32 %v1036_v1, 0.0  ;;  %2577 = vst.msk [vmem:[%s5122_s3 + $0x1b0] sm:$0xf] %vm2468_vm4, %v3093_v2  ;;  %v1731_v7 = vmax.f32 %v1380_v3, 0.0 }
 0x145   :  { %v1040_v8 = vpop.f32.mrf.mxu0  ;;  %3387 = vmatmul.mubr.msk.bf16.gmra.mxu0 %vm647_vm3, %v3664_v60  ;;  %v1384_v9 = vpop.f32.mrf.mxu1  ;;  %3559 = vmatmul.mubr.msk.bf16.gmra.mxu1 %vm647_vm3, %v3665_v62  ;;  %v3670_v1 = vld [vmem:[%s5119_s0 + $0x138] sm:$0xff]   ;;  %v3671_v3 = vld [vmem:[%s5119_s0 + $0x290] sm:$0xff]  }
 0x146   :  { %v3008_v10 = vpack.c.bf16 %v1645_v6, %v1645_v6  ;;  %v1041_v11 = vadd.f32 %v4056_v56, %v1040_v8  ;;  %v3094_v12 = vpack.c.bf16 %v1731_v7, %v1731_v7  ;;  %v1385_v13 = vadd.f32 %v4056_v56, %v1384_v9  ;;  %3390 = vmatprep.mubr.msk.bf16.mxu0 %vm3728_vm1, %v3727_v0 }
 0x147   :  { %v3292_v14 = vpop.f32.mrf.mxu0  ;;  %v3464_v15 = vpop.f32.mrf.mxu1  ;;  %3562 = vmatprep.mubr.msk.bf16.mxu1 %vm3728_vm1, %v3727_v0 }
 0x148   :  { %2492 = vst.msk [vmem:[%s5122_s3 + $0x5c] sm:$0xf] %vm2468_vm4, %v3008_v10  ;;  %v1646_v16 = vmax.f32 %v1041_v11, 0.0  ;;  %2578 = vst.msk [vmem:[%s5122_s3 + $0x1b4] sm:$0xf] %vm2468_vm4, %v3094_v12  ;;  %v1732_v17 = vmax.f32 %v1385_v13, 0.0 }
 0x149   :  { %v1043_v18 = vpop.f32.mrf.mxu0  ;;  %v1387_v20 = vpop.f32.mrf.mxu1 }
 0x14a   :  { %v3009_v22 = vpack.c.bf16 %v1646_v16, %v1646_v16  ;;  %v1044_v23 = vadd.f32 %v4056_v56, %v1043_v18  ;;  %v3095_v24 = vpack.c.bf16 %v1732_v17, %v1732_v17  ;;  %v1388_v25 = vadd.f32 %v4056_v56, %v1387_v20 }
 0x14b   :  { %v3293_v26 = vpop.f32.mrf.mxu0  ;;  %v3465_v27 = vpop.f32.mrf.mxu1 }
 0x14c   :  { %2493 = vst.msk [vmem:[%s5122_s3 + $0x60] sm:$0xf] %vm2468_vm4, %v3009_v22  ;;  %v1647_v28 = vmax.f32 %v1044_v23, 0.0  ;;  %2579 = vst.msk [vmem:[%s5122_s3 + $0x1b8] sm:$0xf] %vm2468_vm4, %v3095_v24  ;;  %v1733_v29 = vmax.f32 %v1388_v25, 0.0 }
 0x14d   :  { %v1048_v30 = vpop.f32.mrf.mxu0  ;;  %3391 = vmatmul.mubr.msk.bf16.gmra.mxu0 %vm647_vm3, %v3666_v19  ;;  %v1392_v31 = vpop.f32.mrf.mxu1  ;;  %3563 = vmatmul.mubr.msk.bf16.gmra.mxu1 %vm647_vm3, %v3667_v21  ;;  %v3672_v23 = vld [vmem:[%s5119_s0 + $0x140] sm:$0xff]   ;;  %v3673_v25 = vld [vmem:[%s5119_s0 + $0x298] sm:$0xff]  }
 0x14e   :  { %v3010_v32 = vpack.c.bf16 %v1647_v28, %v1647_v28  ;;  %v1049_v33 = vadd.f32 %v4056_v56, %v1048_v30  ;;  %v3096_v34 = vpack.c.bf16 %v1733_v29, %v1733_v29  ;;  %v1393_v35 = vadd.f32 %v4056_v56, %v1392_v31  ;;  %3394 = vmatprep.mubr.msk.bf16.mxu0 %vm3728_vm1, %v3727_v0 }
 0x14f   :  { %v3296_v36 = vpop.f32.mrf.mxu0  ;;  %v3468_v37 = vpop.f32.mrf.mxu1  ;;  %3566 = vmatprep.mubr.msk.bf16.mxu1 %vm3728_vm1, %v3727_v0 }
 0x150   :  { %2494 = vst.msk [vmem:[%s5122_s3 + $0x64] sm:$0xf] %vm2468_vm4, %v3010_v32  ;;  %v1648_v38 = vmax.f32 %v1049_v33, 0.0  ;;  %2580 = vst.msk [vmem:[%s5122_s3 + $0x1bc] sm:$0xf] %vm2468_vm4, %v3096_v34  ;;  %v1734_v39 = vmax.f32 %v1393_v35, 0.0 }
 0x151   :  { %v1051_v40 = vpop.f32.mrf.mxu0  ;;  %v1395_v42 = vpop.f32.mrf.mxu1 }
 0x152   :  { %v3011_v44 = vpack.c.bf16 %v1648_v38, %v1648_v38  ;;  %v1052_v45 = vadd.f32 %v4056_v56, %v1051_v40  ;;  %v3097_v46 = vpack.c.bf16 %v1734_v39, %v1734_v39  ;;  %v1396_v47 = vadd.f32 %v4056_v56, %v1395_v42 }
 0x153   :  { %v3297_v48 = vpop.f32.mrf.mxu0  ;;  %v3469_v49 = vpop.f32.mrf.mxu1 }
 0x154   :  { %2495 = vst.msk [vmem:[%s5122_s3 + $0x68] sm:$0xf] %vm2468_vm4, %v3011_v44  ;;  %v1649_v50 = vmax.f32 %v1052_v45, 0.0  ;;  %2581 = vst.msk [vmem:[%s5122_s3 + $0x1c0] sm:$0xf] %vm2468_vm4, %v3097_v46  ;;  %v1735_v51 = vmax.f32 %v1396_v47, 0.0 }
 0x155   :  { %v1056_v52 = vpop.f32.mrf.mxu0  ;;  %3395 = vmatmul.mubr.msk.bf16.gmra.mxu0 %vm647_vm3, %v3668_v41  ;;  %v1400_v53 = vpop.f32.mrf.mxu1  ;;  %3567 = vmatmul.mubr.msk.bf16.gmra.mxu1 %vm647_vm3, %v3669_v43  ;;  %v3674_v45 = vld [vmem:[%s5119_s0 + $0x148] sm:$0xff]   ;;  %v3675_v47 = vld [vmem:[%s5119_s0 + $0x2a0] ss:$0 sps:$4 sm:$0xff]  }
 0x156   :  { %v3012_v54 = vpack.c.bf16 %v1649_v50, %v1649_v50  ;;  %v1057_v55 = vadd.f32 %v4056_v56, %v1056_v52  ;;  %v3098_v57 = vpack.c.bf16 %v1735_v51, %v1735_v51  ;;  %v1401_v58 = vadd.f32 %v4056_v56, %v1400_v53  ;;  %3398 = vmatprep.mubr.msk.bf16.mxu0 %vm3728_vm1, %v3727_v0 }
 0x157   :  { %v3300_v59 = vpop.f32.mrf.mxu0  ;;  %v3472_v60 = vpop.f32.mrf.mxu1  ;;  %3570 = vmatprep.mubr.msk.bf16.mxu1 %vm3728_vm1, %v3727_v0 }
 0x158   :  { %2496 = vst.msk [vmem:[%s5122_s3 + $0x6c] sm:$0xf] %vm2468_vm4, %v3012_v54  ;;  %v1650_v61 = vmax.f32 %v1057_v55, 0.0  ;;  %2582 = vst.msk [vmem:[%s5122_s3 + $0x1c4] sm:$0xf] %vm2468_vm4, %v3098_v57  ;;  %v1736_v62 = vmax.f32 %v1401_v58, 0.0 }
 0x159   :  { %v1059_v63 = vpop.f32.mrf.mxu0  ;;  %v1403_v2 = vpop.f32.mrf.mxu1  ;;  %v4596_v59 = vld [vmem:[#allocation4] ss:$0 sm:$0xff] }
 0x15a   :  { %v3013_v4 = vpack.c.bf16 %v1650_v61, %v1650_v61  ;;  %v1060_v5 = vadd.f32 %v4056_v56, %v1059_v63  ;;  %v3099_v6 = vpack.c.bf16 %v1736_v62, %v1736_v62  ;;  %v1404_v7 = vadd.f32 %v4056_v56, %v1403_v2 }
 0x15b   :  { %v3301_v8 = vpop.f32.mrf.mxu0  ;;  %v3473_v9 = vpop.f32.mrf.mxu1 }
 0x15c   :  { %2497 = vst.msk [vmem:[%s5122_s3 + $0x70] sm:$0xf] %vm2468_vm4, %v3013_v4  ;;  %v1651_v10 = vmax.f32 %v1060_v5, 0.0  ;;  %2583 = vst.msk [vmem:[%s5122_s3 + $0x1c8] sm:$0xf] %vm2468_vm4, %v3099_v6  ;;  %v1737_v11 = vmax.f32 %v1404_v7, 0.0 }
 0x15d   :  { %v1064_v12 = vpop.f32.mrf.mxu0  ;;  %3399 = vmatmul.mubr.msk.bf16.gmra.mxu0 %vm647_vm3, %v3670_v1  ;;  %v1408_v13 = vpop.f32.mrf.mxu1  ;;  %3571 = vmatmul.mubr.msk.bf16.gmra.mxu1 %vm647_vm3, %v3671_v3  ;;  %v3676_v5 = vld [vmem:[%s5119_s0 + $0x150] sm:$0xff]  }
 0x15e   :  { %v3014_v14 = vpack.c.bf16 %v1651_v10, %v1651_v10  ;;  %v1065_v15 = vadd.f32 %v4056_v56, %v1064_v12  ;;  %v3100_v16 = vpack.c.bf16 %v1737_v11, %v1737_v11  ;;  %v1409_v17 = vadd.f32 %v4056_v56, %v1408_v13  ;;  %3402 = vmatprep.mubr.msk.bf16.mxu0 %vm3728_vm1, %v3727_v0 }
 0x15f   :  { %v3304_v18 = vpop.f32.mrf.mxu0  ;;  %v3476_v19 = vpop.f32.mrf.mxu1  ;;  %3574 = vmatprep.mubr.msk.bf16.mxu1 %vm3728_vm1, %v3727_v0 }
 0x160   :  { %2498 = vst.msk [vmem:[%s5122_s3 + $0x74] sm:$0xf] %vm2468_vm4, %v3014_v14  ;;  %v1652_v20 = vmax.f32 %v1065_v15, 0.0  ;;  %2584 = vst.msk [vmem:[%s5122_s3 + $0x1cc] sm:$0xf] %vm2468_vm4, %v3100_v16  ;;  %v1738_v21 = vmax.f32 %v1409_v17, 0.0 }
 0x161   :  { %v1067_v22 = vpop.f32.mrf.mxu0  ;;  %v1411_v24 = vpop.f32.mrf.mxu1 }
 0x162   :  { %v3015_v26 = vpack.c.bf16 %v1652_v20, %v1652_v20  ;;  %v1068_v27 = vadd.f32 %v4056_v56, %v1067_v22  ;;  %v3101_v28 = vpack.c.bf16 %v1738_v21, %v1738_v21  ;;  %v1412_v29 = vadd.f32 %v4056_v56, %v1411_v24 }
 0x163   :  { %v3305_v30 = vpop.f32.mrf.mxu0  ;;  %v3477_v31 = vpop.f32.mrf.mxu1 }
 0x164   :  { %2499 = vst.msk [vmem:[%s5122_s3 + $0x78] sm:$0xf] %vm2468_vm4, %v3015_v26  ;;  %v1653_v32 = vmax.f32 %v1068_v27, 0.0  ;;  %2585 = vst.msk [vmem:[%s5122_s3 + $0x1d0] sm:$0xf] %vm2468_vm4, %v3101_v28  ;;  %v1739_v33 = vmax.f32 %v1412_v29, 0.0 }
 0x165   :  { %v1072_v34 = vpop.f32.mrf.mxu0  ;;  %3403 = vmatmul.mubr.msk.bf16.gmra.mxu0 %vm647_vm3, %v3672_v23  ;;  %v1416_v35 = vpop.f32.mrf.mxu1  ;;  %3575 = vmatmul.mubr.msk.bf16.gmra.mxu1 %vm647_vm3, %v3673_v25 }
 0x166   :  { %v3016_v36 = vpack.c.bf16 %v1653_v32, %v1653_v32  ;;  %v1073_v37 = vadd.f32 %v4056_v56, %v1072_v34  ;;  %v3102_v38 = vpack.c.bf16 %v1739_v33, %v1739_v33  ;;  %v1417_v39 = vadd.f32 %v4056_v56, %v1416_v35  ;;  %3406 = vmatprep.mubr.msk.bf16.mxu0 %vm3728_vm1, %v3727_v0 }
 0x167   :  { %v3308_v40 = vpop.f32.mrf.mxu0  ;;  %v3480_v41 = vpop.f32.mrf.mxu1  ;;  %3578 = vmatprep.mubr.msk.bf16.mxu1 %vm3728_vm1, %v3727_v0 }
 0x168   :  { %2500 = vst.msk [vmem:[%s5122_s3 + $0x7c] sm:$0xf] %vm2468_vm4, %v3016_v36  ;;  %v1654_v42 = vmax.f32 %v1073_v37, 0.0  ;;  %2586 = vst.msk [vmem:[%s5122_s3 + $0x1d4] sm:$0xf] %vm2468_vm4, %v3102_v38  ;;  %v1740_v43 = vmax.f32 %v1417_v39, 0.0 }
 0x169   :  { %v1075_v44 = vpop.f32.mrf.mxu0  ;;  %v1419_v46 = vpop.f32.mrf.mxu1 }
 0x16a   :  { %v3017_v48 = vpack.c.bf16 %v1654_v42, %v1654_v42  ;;  %v1076_v49 = vadd.f32 %v4056_v56, %v1075_v44  ;;  %v3103_v50 = vpack.c.bf16 %v1740_v43, %v1740_v43  ;;  %v1420_v51 = vadd.f32 %v4056_v56, %v1419_v46 }
 0x16b   :  { %v3309_v52 = vpop.f32.mrf.mxu0  ;;  %v3481_v53 = vpop.f32.mrf.mxu1 }
 0x16c   :  { %2501 = vst.msk [vmem:[%s5122_s3 + $0x80] sm:$0xf] %vm2468_vm4, %v3017_v48  ;;  %v1655_v54 = vmax.f32 %v1076_v49, 0.0  ;;  %2587 = vst.msk [vmem:[%s5122_s3 + $0x1d8] sm:$0xf] %vm2468_vm4, %v3103_v50  ;;  %v1741_v55 = vmax.f32 %v1420_v51, 0.0 }
 0x16d   :  { %v1080_v57 = vpop.f32.mrf.mxu0  ;;  %3407 = vmatmul.mubr.msk.bf16.gmra.mxu0 %vm647_vm3, %v3674_v45  ;;  %v1424_v58 = vpop.f32.mrf.mxu1  ;;  %3579 = vmatmul.mubr.msk.bf16.gmra.mxu1 %vm647_vm3, %v3675_v47 }
 0x16e   :  { %v3018_v56 = vpack.c.bf16 %v1655_v54, %v1655_v54  ;;  %v1081_v60 = vadd.f32 %v4596_v59, %v1080_v57  ;;  %v3104_v61 = vpack.c.bf16 %v1741_v55, %v1741_v55  ;;  %v1425_v62 = vadd.f32 %v4596_v59, %v1424_v58  ;;  %3410 = vmatprep.mubr.msk.bf16.mxu0 %vm3728_vm1, %v3727_v0 }
 0x16f   :  { %v3312_v63 = vpop.f32.mrf.mxu0  ;;  %v3484_v1 = vpop.f32.mrf.mxu1 }
 0x170   :  { %2502 = vst.msk [vmem:[%s5122_s3 + $0x84] sm:$0xf] %vm2468_vm4, %v3018_v56  ;;  %v1656_v2 = vmax.f32 %v1081_v60, 0.0  ;;  %2588 = vst.msk [vmem:[%s5122_s3 + $0x1dc] sm:$0xf] %vm2468_vm4, %v3104_v61  ;;  %v1742_v3 = vmax.f32 %v1425_v62, 0.0 }
 0x171   :  { %v1083_v4 = vpop.f32.mrf.mxu0  ;;  %v1427_v0 = vpop.f32.mrf.mxu1 }
 0x172   :  { %v3019_v6 = vpack.c.bf16 %v1656_v2, %v1656_v2  ;;  %v1084_v7 = vadd.f32 %v4596_v59, %v1083_v4  ;;  %v3105_v8 = vpack.c.bf16 %v1742_v3, %v1742_v3  ;;  %v1428_v9 = vadd.f32 %v4596_v59, %v1427_v0 }
 0x173   :  { %v3313_v10 = vpop.f32.mrf.mxu0  ;;  %v3485_v11 = vpop.f32.mrf.mxu1 }
 0x174   :  { %2503 = vst.msk [vmem:[%s5122_s3 + $0x88] sm:$0xf] %vm2468_vm4, %v3019_v6  ;;  %v1657_v12 = vmax.f32 %v1084_v7, 0.0  ;;  %2589 = vst.msk [vmem:[%s5122_s3 + $0x1e0] sm:$0xf] %vm2468_vm4, %v3105_v8  ;;  %v1743_v13 = vmax.f32 %v1428_v9, 0.0 }
 0x175   :  { %v1088_v14 = vpop.f32.mrf.mxu0  ;;  %3411 = vmatmul.mubr.msk.bf16.gmra.mxu0 %vm647_vm3, %v3676_v5  ;;  %v1432_v15 = vpop.f32.mrf.mxu1 }
 0x176   :  { %v3020_v16 = vpack.c.bf16 %v1657_v12, %v1657_v12  ;;  %v1089_v17 = vadd.f32 %v4596_v59, %v1088_v14  ;;  %v3106_v18 = vpack.c.bf16 %v1743_v13, %v1743_v13  ;;  %v1433_v19 = vadd.f32 %v4596_v59, %v1432_v15 }
 0x177   :  { %v3316_v20 = vpop.f32.mrf.mxu0  ;;  %v3488_v21 = vpop.f32.mrf.mxu1 }
 0x178   :  { %2504 = vst.msk [vmem:[%s5122_s3 + $0x8c] sm:$0xf] %vm2468_vm4, %v3020_v16  ;;  %v1658_v22 = vmax.f32 %v1089_v17, 0.0  ;;  %2590 = vst.msk [vmem:[%s5122_s3 + $0x1e4] sm:$0xf] %vm2468_vm4, %v3106_v18  ;;  %v1744_v23 = vmax.f32 %v1433_v19, 0.0 }
 0x179   :  { %v1091_v24 = vpop.f32.mrf.mxu0  ;;  %v1435_v25 = vpop.f32.mrf.mxu1 }
 0x17a   :  { %v3021_v26 = vpack.c.bf16 %v1658_v22, %v1658_v22  ;;  %v1092_v27 = vadd.f32 %v4596_v59, %v1091_v24  ;;  %v3107_v28 = vpack.c.bf16 %v1744_v23, %v1744_v23  ;;  %v1436_v29 = vadd.f32 %v4596_v59, %v1435_v25 }
 0x17b   :  { %v3317_v30 = vpop.f32.mrf.mxu0  ;;  %v3489_v31 = vpop.f32.mrf.mxu1 }
 0x17c   :  { %2505 = vst.msk [vmem:[%s5122_s3 + $0x90] sm:$0xf] %vm2468_vm4, %v3021_v26  ;;  %v1659_v32 = vmax.f32 %v1092_v27, 0.0  ;;  %2591 = vst.msk [vmem:[%s5122_s3 + $0x1e8] sm:$0xf] %vm2468_vm4, %v3107_v28  ;;  %v1745_v33 = vmax.f32 %v1436_v29, 0.0 }
 0x17d   :  { %v1096_v34 = vpop.f32.mrf.mxu0  ;;  %v1440_v35 = vpop.f32.mrf.mxu1 }
 0x17e   :  { %v3022_v36 = vpack.c.bf16 %v1659_v32, %v1659_v32  ;;  %v1097_v37 = vadd.f32 %v4596_v59, %v1096_v34  ;;  %v3108_v38 = vpack.c.bf16 %v1745_v33, %v1745_v33  ;;  %v1441_v39 = vadd.f32 %v4596_v59, %v1440_v35 }
 0x17f   :  { %v3320_v40 = vpop.f32.mrf.mxu0  ;;  %v3492_v41 = vpop.f32.mrf.mxu1 }
 0x180   :  { %2506 = vst.msk [vmem:[%s5122_s3 + $0x94] sm:$0xf] %vm2468_vm4, %v3022_v36  ;;  %v1660_v42 = vmax.f32 %v1097_v37, 0.0  ;;  %2592 = vst.msk [vmem:[%s5122_s3 + $0x1ec] sm:$0xf] %vm2468_vm4, %v3108_v38  ;;  %v1746_v43 = vmax.f32 %v1441_v39, 0.0 }
 0x181   :  { %v1099_v44 = vpop.f32.mrf.mxu0  ;;  %v1443_v45 = vpop.f32.mrf.mxu1 }
 0x182   :  { %v3023_v46 = vpack.c.bf16 %v1660_v42, %v1660_v42  ;;  %v1100_v47 = vadd.f32 %v4596_v59, %v1099_v44  ;;  %v3109_v48 = vpack.c.bf16 %v1746_v43, %v1746_v43  ;;  %v1444_v49 = vadd.f32 %v4596_v59, %v1443_v45 }
 0x183   :  { %v3321_v50 = vpop.f32.mrf.mxu0  ;;  %v3493_v51 = vpop.f32.mrf.mxu1 }
 0x184   :  { %2507 = vst.msk [vmem:[%s5122_s3 + $0x98] sm:$0xf] %vm2468_vm4, %v3023_v46  ;;  %v1661_v52 = vmax.f32 %v1100_v47, 0.0  ;;  %2593 = vst.msk [vmem:[%s5122_s3 + $0x1f0] sm:$0xf] %vm2468_vm4, %v3109_v48  ;;  %v1747_v53 = vmax.f32 %v1444_v49, 0.0 }
 0x185   :  { %v1104_v54 = vpop.f32.mrf.mxu0  ;;  %v1448_v55 = vpop.f32.mrf.mxu1 }
 0x186   :  { %v3024_v57 = vpack.c.bf16 %v1661_v52, %v1661_v52  ;;  %v1105_v58 = vadd.f32 %v4596_v59, %v1104_v54  ;;  %v3110_v56 = vpack.c.bf16 %v1747_v53, %v1747_v53  ;;  %v1449_v60 = vadd.f32 %v4596_v59, %v1448_v55 }
 0x187   :  { %v3324_v61 = vpop.f32.mrf.mxu0  ;;  %v3496_v62 = vpop.f32.mrf.mxu1 }
 0x188   :  { %2508 = vst.msk [vmem:[%s5122_s3 + $0x9c] sm:$0xf] %vm2468_vm4, %v3024_v57  ;;  %v1662_v63 = vmax.f32 %v1105_v58, 0.0  ;;  %2594 = vst.msk [vmem:[%s5122_s3 + $0x1f4] sm:$0xf] %vm2468_vm4, %v3110_v56  ;;  %v1748_v1 = vmax.f32 %v1449_v60, 0.0 }
 0x189   :  { %v1107_v2 = vpop.f32.mrf.mxu0  ;;  %v1451_v3 = vpop.f32.mrf.mxu1 }
 0x18a   :  { %v3025_v4 = vpack.c.bf16 %v1662_v63, %v1662_v63  ;;  %v1108_v5 = vadd.f32 %v4596_v59, %v1107_v2  ;;  %v3111_v0 = vpack.c.bf16 %v1748_v1, %v1748_v1  ;;  %v1452_v6 = vadd.f32 %v4596_v59, %v1451_v3 }
 0x18b   :  { %v3325_v7 = vpop.f32.mrf.mxu0  ;;  %v3497_v8 = vpop.f32.mrf.mxu1 }
 0x18c   :  { %2509 = vst.msk [vmem:[%s5122_s3 + $0xa0] sm:$0xf] %vm2468_vm4, %v3025_v4  ;;  %v1663_v9 = vmax.f32 %v1108_v5, 0.0  ;;  %2595 = vst.msk [vmem:[%s5122_s3 + $0x1f8] sm:$0xf] %vm2468_vm4, %v3111_v0  ;;  %v1749_v10 = vmax.f32 %v1452_v6, 0.0 }
 0x18d   :  { %v1112_v11 = vpop.f32.mrf.mxu0  ;;  %v1456_v12 = vpop.f32.mrf.mxu1 }
 0x18e   :  { %v3026_v13 = vpack.c.bf16 %v1663_v9, %v1663_v9  ;;  %v1113_v14 = vadd.f32 %v4596_v59, %v1112_v11  ;;  %v3112_v15 = vpack.c.bf16 %v1749_v10, %v1749_v10  ;;  %v1457_v16 = vadd.f32 %v4596_v59, %v1456_v12 }
 0x18f   :  { %v3328_v17 = vpop.f32.mrf.mxu0  ;;  %v3500_v18 = vpop.f32.mrf.mxu1 }
 0x190   :  { %2510 = vst.msk [vmem:[%s5122_s3 + $0xa4] sm:$0xf] %vm2468_vm4, %v3026_v13  ;;  %v1664_v19 = vmax.f32 %v1113_v14, 0.0  ;;  %2596 = vst.msk [vmem:[%s5122_s3 + $0x1fc] sm:$0xf] %vm2468_vm4, %v3112_v15  ;;  %v1750_v20 = vmax.f32 %v1457_v16, 0.0 }
 0x191   :  { %v1115_v21 = vpop.f32.mrf.mxu0  ;;  %v1459_v22 = vpop.f32.mrf.mxu1 }
 0x192   :  { %v3027_v23 = vpack.c.bf16 %v1664_v19, %v1664_v19  ;;  %v1116_v24 = vadd.f32 %v4596_v59, %v1115_v21  ;;  %v3113_v25 = vpack.c.bf16 %v1750_v20, %v1750_v20  ;;  %v1460_v26 = vadd.f32 %v4596_v59, %v1459_v22 }
 0x193   :  { %v3329_v27 = vpop.f32.mrf.mxu0  ;;  %v3501_v28 = vpop.f32.mrf.mxu1 }
 0x194   :  { %2511 = vst.msk [vmem:[%s5122_s3 + $0xa8] sm:$0xf] %vm2468_vm4, %v3027_v23  ;;  %v1665_v29 = vmax.f32 %v1116_v24, 0.0  ;;  %2597 = vst.msk [vmem:[%s5122_s3 + $0x200] sm:$0xf] %vm2468_vm4, %v3113_v25  ;;  %v1751_v30 = vmax.f32 %v1460_v26, 0.0 }
 0x195   :  { %v1120_v31 = vpop.f32.mrf.mxu0  ;;  %v1464_v32 = vpop.f32.mrf.mxu1 }
 0x196   :  { %v3028_v33 = vpack.c.bf16 %v1665_v29, %v1665_v29  ;;  %v1121_v34 = vadd.f32 %v4596_v59, %v1120_v31  ;;  %v3114_v35 = vpack.c.bf16 %v1751_v30, %v1751_v30  ;;  %v1465_v36 = vadd.f32 %v4596_v59, %v1464_v32 }
 0x197   :  { %v3332_v37 = vpop.f32.mrf.mxu0  ;;  %v3504_v38 = vpop.f32.mrf.mxu1 }
 0x198   :  { %2512 = vst.msk [vmem:[%s5122_s3 + $0xac] sm:$0xf] %vm2468_vm4, %v3028_v33  ;;  %v1666_v39 = vmax.f32 %v1121_v34, 0.0  ;;  %2598 = vst.msk [vmem:[%s5122_s3 + $0x204] sm:$0xf] %vm2468_vm4, %v3114_v35  ;;  %v1752_v40 = vmax.f32 %v1465_v36, 0.0 }
 0x199   :  { %v1123_v41 = vpop.f32.mrf.mxu0  ;;  %v1467_v42 = vpop.f32.mrf.mxu1 }
 0x19a   :  { %v3029_v43 = vpack.c.bf16 %v1666_v39, %v1666_v39  ;;  %v1124_v44 = vadd.f32 %v4596_v59, %v1123_v41  ;;  %v3115_v45 = vpack.c.bf16 %v1752_v40, %v1752_v40  ;;  %v1468_v46 = vadd.f32 %v4596_v59, %v1467_v42 }
 0x19b   :  { %v3333_v47 = vpop.f32.mrf.mxu0  ;;  %v3505_v48 = vpop.f32.mrf.mxu1 }
 0x19c   :  { %2513 = vst.msk [vmem:[%s5122_s3 + $0xb0] sm:$0xf] %vm2468_vm4, %v3029_v43  ;;  %v1667_v49 = vmax.f32 %v1124_v44, 0.0  ;;  %2599 = vst.msk [vmem:[%s5122_s3 + $0x208] sm:$0xf] %vm2468_vm4, %v3115_v45  ;;  %v1753_v50 = vmax.f32 %v1468_v46, 0.0 }
 0x19d   :  { %v1128_v51 = vpop.f32.mrf.mxu0  ;;  %v1472_v52 = vpop.f32.mrf.mxu1 }
 0x19e   :  { %v3030_v53 = vpack.c.bf16 %v1667_v49, %v1667_v49  ;;  %v1129_v54 = vadd.f32 %v4596_v59, %v1128_v51  ;;  %v3116_v55 = vpack.c.bf16 %v1753_v50, %v1753_v50  ;;  %v1473_v57 = vadd.f32 %v4596_v59, %v1472_v52 }
 0x19f   :  { %v3336_v58 = vpop.f32.mrf.mxu0  ;;  %v3508_v56 = vpop.f32.mrf.mxu1 }
 0x1a0   :  { %2514 = vst.msk [vmem:[%s5122_s3 + $0xb4] sm:$0xf] %vm2468_vm4, %v3030_v53  ;;  %v1668_v60 = vmax.f32 %v1129_v54, 0.0  ;;  %2600 = vst.msk [vmem:[%s5122_s3 + $0x20c] sm:$0xf] %vm2468_vm4, %v3116_v55  ;;  %v1754_v61 = vmax.f32 %v1473_v57, 0.0 }
 0x1a1   :  { %v1131_v62 = vpop.f32.mrf.mxu0  ;;  %v1475_v63 = vpop.f32.mrf.mxu1 }
 0x1a2   :  { %v3031_v1 = vpack.c.bf16 %v1668_v60, %v1668_v60  ;;  %v1132_v2 = vadd.f32 %v4596_v59, %v1131_v62  ;;  %v3117_v3 = vpack.c.bf16 %v1754_v61, %v1754_v61  ;;  %v1476_v4 = vadd.f32 %v4596_v59, %v1475_v63 }
 0x1a3   :  { %v3337_v5 = vpop.f32.mrf.mxu0  ;;  %v3509_v0 = vpop.f32.mrf.mxu1 }
 0x1a4   :  { %2515 = vst.msk [vmem:[%s5122_s3 + $0xb8] sm:$0xf] %vm2468_vm4, %v3031_v1  ;;  %v1669_v6 = vmax.f32 %v1132_v2, 0.0  ;;  %2601 = vst.msk [vmem:[%s5122_s3 + $0x210] sm:$0xf] %vm2468_vm4, %v3117_v3  ;;  %v1755_v7 = vmax.f32 %v1476_v4, 0.0 }
 0x1a5   :  { %v1136_v8 = vpop.f32.mrf.mxu0  ;;  %v1480_v9 = vpop.f32.mrf.mxu1 }
 0x1a6   :  { %v3032_v10 = vpack.c.bf16 %v1669_v6, %v1669_v6  ;;  %v1137_v11 = vadd.f32 %v4596_v59, %v1136_v8  ;;  %v3118_v12 = vpack.c.bf16 %v1755_v7, %v1755_v7  ;;  %v1481_v13 = vadd.f32 %v4596_v59, %v1480_v9 }
 0x1a7   :  { %v3340_v14 = vpop.f32.mrf.mxu0  ;;  %v3512_v15 = vpop.f32.mrf.mxu1 }
 0x1a8   :  { %2516 = vst.msk [vmem:[%s5122_s3 + $0xbc] sm:$0xf] %vm2468_vm4, %v3032_v10  ;;  %v1670_v16 = vmax.f32 %v1137_v11, 0.0  ;;  %2602 = vst.msk [vmem:[%s5122_s3 + $0x214] sm:$0xf] %vm2468_vm4, %v3118_v12  ;;  %v1756_v17 = vmax.f32 %v1481_v13, 0.0 }
 0x1a9   :  { %v1139_v18 = vpop.f32.mrf.mxu0  ;;  %v1483_v19 = vpop.f32.mrf.mxu1 }
 0x1aa   :  { %v3033_v20 = vpack.c.bf16 %v1670_v16, %v1670_v16  ;;  %v1140_v21 = vadd.f32 %v4596_v59, %v1139_v18  ;;  %v3119_v22 = vpack.c.bf16 %v1756_v17, %v1756_v17  ;;  %v1484_v23 = vadd.f32 %v4596_v59, %v1483_v19 }
 0x1ab   :  { %v3341_v24 = vpop.f32.mrf.mxu0  ;;  %v3513_v25 = vpop.f32.mrf.mxu1 }
 0x1ac   :  { %2517 = vst.msk [vmem:[%s5122_s3 + $0xc0] sm:$0xf] %vm2468_vm4, %v3033_v20  ;;  %v1671_v26 = vmax.f32 %v1140_v21, 0.0  ;;  %2603 = vst.msk [vmem:[%s5122_s3 + $0x218] sm:$0xf] %vm2468_vm4, %v3119_v22  ;;  %v1757_v27 = vmax.f32 %v1484_v23, 0.0 }
 0x1ad   :  { %v1144_v28 = vpop.f32.mrf.mxu0  ;;  %v1488_v29 = vpop.f32.mrf.mxu1 }
 0x1ae   :  { %v3034_v30 = vpack.c.bf16 %v1671_v26, %v1671_v26  ;;  %v1145_v31 = vadd.f32 %v4596_v59, %v1144_v28  ;;  %v3120_v32 = vpack.c.bf16 %v1757_v27, %v1757_v27  ;;  %v1489_v33 = vadd.f32 %v4596_v59, %v1488_v29 }
 0x1af   :  { %v3344_v34 = vpop.f32.mrf.mxu0  ;;  %v3516_v35 = vpop.f32.mrf.mxu1 }
 0x1b0   :  { %2518 = vst.msk [vmem:[%s5122_s3 + $0xc4] sm:$0xf] %vm2468_vm4, %v3034_v30  ;;  %v1672_v36 = vmax.f32 %v1145_v31, 0.0  ;;  %2604 = vst.msk [vmem:[%s5122_s3 + $0x21c] sm:$0xf] %vm2468_vm4, %v3120_v32  ;;  %v1758_v37 = vmax.f32 %v1489_v33, 0.0 }
 0x1b1   :  { %v1147_v38 = vpop.f32.mrf.mxu0  ;;  %v1491_v39 = vpop.f32.mrf.mxu1 }
 0x1b2   :  { %v3035_v40 = vpack.c.bf16 %v1672_v36, %v1672_v36  ;;  %v1148_v41 = vadd.f32 %v4596_v59, %v1147_v38  ;;  %v3121_v42 = vpack.c.bf16 %v1758_v37, %v1758_v37  ;;  %v1492_v43 = vadd.f32 %v4596_v59, %v1491_v39 }
 0x1b3   :  { %v3345_v44 = vpop.f32.mrf.mxu0  ;;  %v3517_v45 = vpop.f32.mrf.mxu1 }
 0x1b4   :  { %2519 = vst.msk [vmem:[%s5122_s3 + $0xc8] sm:$0xf] %vm2468_vm4, %v3035_v40  ;;  %v1673_v46 = vmax.f32 %v1148_v41, 0.0  ;;  %2605 = vst.msk [vmem:[%s5122_s3 + $0x220] sm:$0xf] %vm2468_vm4, %v3121_v42  ;;  %v1759_v47 = vmax.f32 %v1492_v43, 0.0 }
 0x1b5   :  { %v1152_v48 = vpop.f32.mrf.mxu0  ;;  %v1496_v49 = vpop.f32.mrf.mxu1 }
 0x1b6   :  { %v3036_v50 = vpack.c.bf16 %v1673_v46, %v1673_v46  ;;  %v1153_v51 = vadd.f32 %v4596_v59, %v1152_v48  ;;  %v3122_v52 = vpack.c.bf16 %v1759_v47, %v1759_v47  ;;  %v1497_v53 = vadd.f32 %v4596_v59, %v1496_v49 }
 0x1b7   :  { %v3348_v54 = vpop.f32.mrf.mxu0  ;;  %v3520_v55 = vpop.f32.mrf.mxu1 }
 0x1b8   :  { %2520 = vst.msk [vmem:[%s5122_s3 + $0xcc] sm:$0xf] %vm2468_vm4, %v3036_v50  ;;  %v1674_v57 = vmax.f32 %v1153_v51, 0.0  ;;  %2606 = vst.msk [vmem:[%s5122_s3 + $0x224] sm:$0xf] %vm2468_vm4, %v3122_v52  ;;  %v1760_v58 = vmax.f32 %v1497_v53, 0.0 }
 0x1b9   :  { %v1155_v56 = vpop.f32.mrf.mxu0  ;;  %v1499_v60 = vpop.f32.mrf.mxu1 }
 0x1ba   :  { %v3037_v61 = vpack.c.bf16 %v1674_v57, %v1674_v57  ;;  %v1156_v62 = vadd.f32 %v4596_v59, %v1155_v56  ;;  %v3123_v63 = vpack.c.bf16 %v1760_v58, %v1760_v58  ;;  %v1500_v1 = vadd.f32 %v4596_v59, %v1499_v60 }
 0x1bb   :  { %v3349_v2 = vpop.f32.mrf.mxu0  ;;  %v3521_v3 = vpop.f32.mrf.mxu1 }
 0x1bc   :  { %2521 = vst.msk [vmem:[%s5122_s3 + $0xd0] sm:$0xf] %vm2468_vm4, %v3037_v61  ;;  %v1675_v4 = vmax.f32 %v1156_v62, 0.0  ;;  %2607 = vst.msk [vmem:[%s5122_s3 + $0x228] sm:$0xf] %vm2468_vm4, %v3123_v63  ;;  %v1761_v5 = vmax.f32 %v1500_v1, 0.0 }
 0x1bd   :  { %v1160_v0 = vpop.f32.mrf.mxu0  ;;  %v1504_v6 = vpop.f32.mrf.mxu1 }
 0x1be   :  { %v3038_v7 = vpack.c.bf16 %v1675_v4, %v1675_v4  ;;  %v1161_v8 = vadd.f32 %v4596_v59, %v1160_v0  ;;  %v3124_v9 = vpack.c.bf16 %v1761_v5, %v1761_v5  ;;  %v1505_v10 = vadd.f32 %v4596_v59, %v1504_v6 }
 0x1bf   :  { %v3352_v11 = vpop.f32.mrf.mxu0  ;;  %v3524_v12 = vpop.f32.mrf.mxu1 }
 0x1c0   :  { %2522 = vst.msk [vmem:[%s5122_s3 + $0xd4] sm:$0xf] %vm2468_vm4, %v3038_v7  ;;  %v1676_v13 = vmax.f32 %v1161_v8, 0.0  ;;  %2608 = vst.msk [vmem:[%s5122_s3 + $0x22c] sm:$0xf] %vm2468_vm4, %v3124_v9  ;;  %v1762_v14 = vmax.f32 %v1505_v10, 0.0 }
 0x1c1   :  { %v1163_v15 = vpop.f32.mrf.mxu0  ;;  %v1507_v16 = vpop.f32.mrf.mxu1 }
 0x1c2   :  { %v3039_v17 = vpack.c.bf16 %v1676_v13, %v1676_v13  ;;  %v1164_v18 = vadd.f32 %v4596_v59, %v1163_v15  ;;  %v3125_v19 = vpack.c.bf16 %v1762_v14, %v1762_v14  ;;  %v1508_v20 = vadd.f32 %v4596_v59, %v1507_v16 }
 0x1c3   :  { %v3353_v21 = vpop.f32.mrf.mxu0  ;;  %v3525_v22 = vpop.f32.mrf.mxu1 }
 0x1c4   :  { %2523 = vst.msk [vmem:[%s5122_s3 + $0xd8] sm:$0xf] %vm2468_vm4, %v3039_v17  ;;  %v1677_v23 = vmax.f32 %v1164_v18, 0.0  ;;  %2609 = vst.msk [vmem:[%s5122_s3 + $0x230] sm:$0xf] %vm2468_vm4, %v3125_v19  ;;  %v1763_v24 = vmax.f32 %v1508_v20, 0.0 }
 0x1c5   :  { %v1168_v25 = vpop.f32.mrf.mxu0  ;;  %v1512_v26 = vpop.f32.mrf.mxu1 }
 0x1c6   :  { %v3040_v27 = vpack.c.bf16 %v1677_v23, %v1677_v23  ;;  %v1169_v28 = vadd.f32 %v4596_v59, %v1168_v25  ;;  %v3126_v29 = vpack.c.bf16 %v1763_v24, %v1763_v24  ;;  %v1513_v30 = vadd.f32 %v4596_v59, %v1512_v26 }
 0x1c7   :  { %v3356_v31 = vpop.f32.mrf.mxu0  ;;  %v3528_v32 = vpop.f32.mrf.mxu1 }
 0x1c8   :  { %2524 = vst.msk [vmem:[%s5122_s3 + $0xdc] sm:$0xf] %vm2468_vm4, %v3040_v27  ;;  %v1678_v33 = vmax.f32 %v1169_v28, 0.0  ;;  %2610 = vst.msk [vmem:[%s5122_s3 + $0x234] sm:$0xf] %vm2468_vm4, %v3126_v29  ;;  %v1764_v34 = vmax.f32 %v1513_v30, 0.0 }
 0x1c9   :  { %v1171_v35 = vpop.f32.mrf.mxu0  ;;  %v1515_v36 = vpop.f32.mrf.mxu1 }
 0x1ca   :  { %v3041_v37 = vpack.c.bf16 %v1678_v33, %v1678_v33  ;;  %v1172_v38 = vadd.f32 %v4596_v59, %v1171_v35  ;;  %v3127_v39 = vpack.c.bf16 %v1764_v34, %v1764_v34  ;;  %v1516_v40 = vadd.f32 %v4596_v59, %v1515_v36 }
 0x1cb   :  { %v3357_v41 = vpop.f32.mrf.mxu0  ;;  %v3529_v42 = vpop.f32.mrf.mxu1 }
 0x1cc   :  { %2525 = vst.msk [vmem:[%s5122_s3 + $0xe0] sm:$0xf] %vm2468_vm4, %v3041_v37  ;;  %v1679_v43 = vmax.f32 %v1172_v38, 0.0  ;;  %2611 = vst.msk [vmem:[%s5122_s3 + $0x238] sm:$0xf] %vm2468_vm4, %v3127_v39  ;;  %v1765_v44 = vmax.f32 %v1516_v40, 0.0 }
 0x1cd   :  { %v1176_v45 = vpop.f32.mrf.mxu0  ;;  %v1520_v46 = vpop.f32.mrf.mxu1 }
 0x1ce   :  { %v3042_v47 = vpack.c.bf16 %v1679_v43, %v1679_v43  ;;  %v1177_v48 = vadd.f32 %v4596_v59, %v1176_v45  ;;  %v3128_v49 = vpack.c.bf16 %v1765_v44, %v1765_v44  ;;  %v1521_v50 = vadd.f32 %v4596_v59, %v1520_v46 }
 0x1cf   :  { %v3360_v51 = vpop.f32.mrf.mxu0  ;;  %v3532_v52 = vpop.f32.mrf.mxu1 }
 0x1d0   :  { %2526 = vst.msk [vmem:[%s5122_s3 + $0xe4] sm:$0xf] %vm2468_vm4, %v3042_v47  ;;  %v1680_v53 = vmax.f32 %v1177_v48, 0.0  ;;  %2612 = vst.msk [vmem:[%s5122_s3 + $0x23c] sm:$0xf] %vm2468_vm4, %v3128_v49  ;;  %v1766_v54 = vmax.f32 %v1521_v50, 0.0 }
 0x1d1   :  { %v1179_v55 = vpop.f32.mrf.mxu0  ;;  %v1523_v57 = vpop.f32.mrf.mxu1 }
 0x1d2   :  { %v3043_v58 = vpack.c.bf16 %v1680_v53, %v1680_v53  ;;  %v1180_v56 = vadd.f32 %v4596_v59, %v1179_v55  ;;  %v3129_v60 = vpack.c.bf16 %v1766_v54, %v1766_v54  ;;  %v1524_v61 = vadd.f32 %v4596_v59, %v1523_v57 }
 0x1d3   :  { %v3361_v62 = vpop.f32.mrf.mxu0  ;;  %v3533_v63 = vpop.f32.mrf.mxu1 }
 0x1d4   :  { %2527 = vst.msk [vmem:[%s5122_s3 + $0xe8] sm:$0xf] %vm2468_vm4, %v3043_v58  ;;  %v1681_v1 = vmax.f32 %v1180_v56, 0.0  ;;  %2613 = vst.msk [vmem:[%s5122_s3 + $0x240] sm:$0xf] %vm2468_vm4, %v3129_v60  ;;  %v1767_v2 = vmax.f32 %v1524_v61, 0.0 }
 0x1d5   :  { %v1184_v3 = vpop.f32.mrf.mxu0  ;;  %v1528_v4 = vpop.f32.mrf.mxu1 }
 0x1d6   :  { %v3044_v5 = vpack.c.bf16 %v1681_v1, %v1681_v1  ;;  %v1185_v0 = vadd.f32 %v4596_v59, %v1184_v3  ;;  %v3130_v6 = vpack.c.bf16 %v1767_v2, %v1767_v2  ;;  %v1529_v7 = vadd.f32 %v4596_v59, %v1528_v4 }
 0x1d7   :  { %v3364_v8 = vpop.f32.mrf.mxu0  ;;  %v3536_v9 = vpop.f32.mrf.mxu1 }
 0x1d8   :  { %2528 = vst.msk [vmem:[%s5122_s3 + $0xec] sm:$0xf] %vm2468_vm4, %v3044_v5  ;;  %v1682_v10 = vmax.f32 %v1185_v0, 0.0  ;;  %2614 = vst.msk [vmem:[%s5122_s3 + $0x244] sm:$0xf] %vm2468_vm4, %v3130_v6  ;;  %v1768_v11 = vmax.f32 %v1529_v7, 0.0 }
 0x1d9   :  { %v1187_v12 = vpop.f32.mrf.mxu0  ;;  %v1531_v13 = vpop.f32.mrf.mxu1 }
 0x1da   :  { %v3045_v14 = vpack.c.bf16 %v1682_v10, %v1682_v10  ;;  %v1188_v15 = vadd.f32 %v4596_v59, %v1187_v12  ;;  %v3131_v16 = vpack.c.bf16 %v1768_v11, %v1768_v11  ;;  %v1532_v17 = vadd.f32 %v4596_v59, %v1531_v13 }
 0x1db   :  { %v3365_v18 = vpop.f32.mrf.mxu0  ;;  %v3537_v19 = vpop.f32.mrf.mxu1 }
 0x1dc   :  { %2529 = vst.msk [vmem:[%s5122_s3 + $0xf0] sm:$0xf] %vm2468_vm4, %v3045_v14  ;;  %v1683_v20 = vmax.f32 %v1188_v15, 0.0  ;;  %2615 = vst.msk [vmem:[%s5122_s3 + $0x248] sm:$0xf] %vm2468_vm4, %v3131_v16  ;;  %v1769_v21 = vmax.f32 %v1532_v17, 0.0 }
 0x1dd   :  { %v1192_v22 = vpop.f32.mrf.mxu0  ;;  %v1536_v23 = vpop.f32.mrf.mxu1 }
 0x1de   :  { %v3046_v24 = vpack.c.bf16 %v1683_v20, %v1683_v20  ;;  %v1193_v25 = vadd.f32 %v4596_v59, %v1192_v22  ;;  %v3132_v26 = vpack.c.bf16 %v1769_v21, %v1769_v21  ;;  %v1537_v27 = vadd.f32 %v4596_v59, %v1536_v23 }
 0x1df   :  { %v3368_v28 = vpop.f32.mrf.mxu0  ;;  %v3540_v29 = vpop.f32.mrf.mxu1 }
 0x1e0   :  { %2530 = vst.msk [vmem:[%s5122_s3 + $0xf4] sm:$0xf] %vm2468_vm4, %v3046_v24  ;;  %v1684_v30 = vmax.f32 %v1193_v25, 0.0  ;;  %2616 = vst.msk [vmem:[%s5122_s3 + $0x24c] sm:$0xf] %vm2468_vm4, %v3132_v26  ;;  %v1770_v31 = vmax.f32 %v1537_v27, 0.0 }
 0x1e1   :  { %v1195_v32 = vpop.f32.mrf.mxu0  ;;  %v1539_v33 = vpop.f32.mrf.mxu1 }
 0x1e2   :  { %v3047_v34 = vpack.c.bf16 %v1684_v30, %v1684_v30  ;;  %v1196_v35 = vadd.f32 %v4596_v59, %v1195_v32  ;;  %v3133_v36 = vpack.c.bf16 %v1770_v31, %v1770_v31  ;;  %v1540_v37 = vadd.f32 %v4596_v59, %v1539_v33 }
 0x1e3   :  { %v3369_v38 = vpop.f32.mrf.mxu0  ;;  %v3541_v39 = vpop.f32.mrf.mxu1 }
 0x1e4   :  { %2531 = vst.msk [vmem:[%s5122_s3 + $0xf8] sm:$0xf] %vm2468_vm4, %v3047_v34  ;;  %v1685_v40 = vmax.f32 %v1196_v35, 0.0  ;;  %2617 = vst.msk [vmem:[%s5122_s3 + $0x250] sm:$0xf] %vm2468_vm4, %v3133_v36  ;;  %v1771_v41 = vmax.f32 %v1540_v37, 0.0 }
 0x1e5   :  { %v1200_v42 = vpop.f32.mrf.mxu0  ;;  %v1544_v43 = vpop.f32.mrf.mxu1 }
 0x1e6   :  { %v3048_v44 = vpack.c.bf16 %v1685_v40, %v1685_v40  ;;  %v1201_v45 = vadd.f32 %v4596_v59, %v1200_v42  ;;  %v3134_v46 = vpack.c.bf16 %v1771_v41, %v1771_v41  ;;  %v1545_v47 = vadd.f32 %v4596_v59, %v1544_v43 }
 0x1e7   :  { %v3372_v48 = vpop.f32.mrf.mxu0  ;;  %v3544_v49 = vpop.f32.mrf.mxu1 }
 0x1e8   :  { %2532 = vst.msk [vmem:[%s5122_s3 + $0xfc] sm:$0xf] %vm2468_vm4, %v3048_v44  ;;  %v1686_v50 = vmax.f32 %v1201_v45, 0.0  ;;  %2618 = vst.msk [vmem:[%s5122_s3 + $0x254] sm:$0xf] %vm2468_vm4, %v3134_v46  ;;  %v1772_v51 = vmax.f32 %v1545_v47, 0.0 }
 0x1e9   :  { %v1203_v52 = vpop.f32.mrf.mxu0  ;;  %v1547_v53 = vpop.f32.mrf.mxu1 }
 0x1ea   :  { %v3049_v54 = vpack.c.bf16 %v1686_v50, %v1686_v50  ;;  %v1204_v55 = vadd.f32 %v4596_v59, %v1203_v52  ;;  %v3135_v57 = vpack.c.bf16 %v1772_v51, %v1772_v51  ;;  %v1548_v58 = vadd.f32 %v4596_v59, %v1547_v53 }
 0x1eb   :  { %v3373_v56 = vpop.f32.mrf.mxu0  ;;  %v3545_v60 = vpop.f32.mrf.mxu1 }
 0x1ec   :  { %2533 = vst.msk [vmem:[%s5122_s3 + $0x100] sm:$0xf] %vm2468_vm4, %v3049_v54  ;;  %v1687_v61 = vmax.f32 %v1204_v55, 0.0  ;;  %2619 = vst.msk [vmem:[%s5122_s3 + $0x258] sm:$0xf] %vm2468_vm4, %v3135_v57  ;;  %v1773_v62 = vmax.f32 %v1548_v58, 0.0 }
 0x1ed   :  { %v1208_v63 = vpop.f32.mrf.mxu0  ;;  %v1552_v1 = vpop.f32.mrf.mxu1 }
 0x1ee   :  { %v3050_v2 = vpack.c.bf16 %v1687_v61, %v1687_v61  ;;  %v1209_v3 = vadd.f32 %v4596_v59, %v1208_v63  ;;  %v3136_v4 = vpack.c.bf16 %v1773_v62, %v1773_v62  ;;  %v1553_v5 = vadd.f32 %v4596_v59, %v1552_v1 }
 0x1ef   :  { %v3376_v0 = vpop.f32.mrf.mxu0  ;;  %v3548_v6 = vpop.f32.mrf.mxu1 }
 0x1f0   :  { %2534 = vst.msk [vmem:[%s5122_s3 + $0x104] sm:$0xf] %vm2468_vm4, %v3050_v2  ;;  %v1688_v7 = vmax.f32 %v1209_v3, 0.0  ;;  %2620 = vst.msk [vmem:[%s5122_s3 + $0x25c] sm:$0xf] %vm2468_vm4, %v3136_v4  ;;  %v1774_v8 = vmax.f32 %v1553_v5, 0.0 }
 0x1f1   :  { %v1211_v9 = vpop.f32.mrf.mxu0  ;;  %v1555_v10 = vpop.f32.mrf.mxu1 }
 0x1f2   :  { %v3051_v11 = vpack.c.bf16 %v1688_v7, %v1688_v7  ;;  %v1212_v12 = vadd.f32 %v4596_v59, %v1211_v9  ;;  %v3137_v13 = vpack.c.bf16 %v1774_v8, %v1774_v8  ;;  %v1556_v14 = vadd.f32 %v4596_v59, %v1555_v10 }
 0x1f3   :  { %v3377_v15 = vpop.f32.mrf.mxu0  ;;  %v3549_v16 = vpop.f32.mrf.mxu1 }
 0x1f4   :  { %2535 = vst.msk [vmem:[%s5122_s3 + $0x108] sm:$0xf] %vm2468_vm4, %v3051_v11  ;;  %v1689_v17 = vmax.f32 %v1212_v12, 0.0  ;;  %2621 = vst.msk [vmem:[%s5122_s3 + $0x260] sm:$0xf] %vm2468_vm4, %v3137_v13  ;;  %v1775_v18 = vmax.f32 %v1556_v14, 0.0 }
 0x1f5   :  { %v1216_v19 = vpop.f32.mrf.mxu0  ;;  %v1560_v20 = vpop.f32.mrf.mxu1 }
 0x1f6   :  { %v3052_v21 = vpack.c.bf16 %v1689_v17, %v1689_v17  ;;  %v1217_v22 = vadd.f32 %v4596_v59, %v1216_v19  ;;  %v3138_v23 = vpack.c.bf16 %v1775_v18, %v1775_v18  ;;  %v1561_v24 = vadd.f32 %v4596_v59, %v1560_v20 }
 0x1f7   :  { %v3380_v25 = vpop.f32.mrf.mxu0  ;;  %v3552_v26 = vpop.f32.mrf.mxu1 }
 0x1f8   :  { %2536 = vst.msk [vmem:[%s5122_s3 + $0x10c] sm:$0xf] %vm2468_vm4, %v3052_v21  ;;  %v1690_v27 = vmax.f32 %v1217_v22, 0.0  ;;  %2622 = vst.msk [vmem:[%s5122_s3 + $0x264] sm:$0xf] %vm2468_vm4, %v3138_v23  ;;  %v1776_v28 = vmax.f32 %v1561_v24, 0.0 }
 0x1f9   :  { %v1219_v29 = vpop.f32.mrf.mxu0  ;;  %v1563_v30 = vpop.f32.mrf.mxu1 }
 0x1fa   :  { %v3053_v31 = vpack.c.bf16 %v1690_v27, %v1690_v27  ;;  %v1220_v32 = vadd.f32 %v4596_v59, %v1219_v29  ;;  %v3139_v33 = vpack.c.bf16 %v1776_v28, %v1776_v28  ;;  %v1564_v34 = vadd.f32 %v4596_v59, %v1563_v30 }
 0x1fb   :  { %v3381_v35 = vpop.f32.mrf.mxu0  ;;  %v3553_v36 = vpop.f32.mrf.mxu1 }
 0x1fc   :  { %2537 = vst.msk [vmem:[%s5122_s3 + $0x110] sm:$0xf] %vm2468_vm4, %v3053_v31  ;;  %v1691_v37 = vmax.f32 %v1220_v32, 0.0  ;;  %2623 = vst.msk [vmem:[%s5122_s3 + $0x268] sm:$0xf] %vm2468_vm4, %v3139_v33  ;;  %v1777_v38 = vmax.f32 %v1564_v34, 0.0 }
 0x1fd   :  { %v1224_v39 = vpop.f32.mrf.mxu0  ;;  %v1568_v40 = vpop.f32.mrf.mxu1 }
 0x1fe   :  { %v3054_v41 = vpack.c.bf16 %v1691_v37, %v1691_v37  ;;  %v1225_v42 = vadd.f32 %v4596_v59, %v1224_v39  ;;  %v3140_v43 = vpack.c.bf16 %v1777_v38, %v1777_v38  ;;  %v1569_v44 = vadd.f32 %v4596_v59, %v1568_v40 }
 0x1ff   :  { %v3384_v45 = vpop.f32.mrf.mxu0  ;;  %v3556_v46 = vpop.f32.mrf.mxu1 }
 0x200   :  { %2538 = vst.msk [vmem:[%s5122_s3 + $0x114] sm:$0xf] %vm2468_vm4, %v3054_v41  ;;  %v1692_v47 = vmax.f32 %v1225_v42, 0.0  ;;  %2624 = vst.msk [vmem:[%s5122_s3 + $0x26c] sm:$0xf] %vm2468_vm4, %v3140_v43  ;;  %v1778_v48 = vmax.f32 %v1569_v44, 0.0 }
 0x201   :  { %v1227_v49 = vpop.f32.mrf.mxu0  ;;  %v1571_v50 = vpop.f32.mrf.mxu1 }
 0x202   :  { %v3055_v51 = vpack.c.bf16 %v1692_v47, %v1692_v47  ;;  %v1228_v52 = vadd.f32 %v4596_v59, %v1227_v49  ;;  %v3141_v53 = vpack.c.bf16 %v1778_v48, %v1778_v48  ;;  %v1572_v54 = vadd.f32 %v4596_v59, %v1571_v50  ;;  %v5034_v49 = vld [vmem:[#allocation4] ss:$0 sm:$0xff] }
 0x203   :  { %v3385_v55 = vpop.f32.mrf.mxu0  ;;  %v3557_v57 = vpop.f32.mrf.mxu1 }
 0x204   :  { %2539 = vst.msk [vmem:[%s5122_s3 + $0x118] sm:$0xf] %vm2468_vm4, %v3055_v51  ;;  %v1693_v58 = vmax.f32 %v1228_v52, 0.0  ;;  %2625 = vst.msk [vmem:[%s5122_s3 + $0x270] sm:$0xf] %vm2468_vm4, %v3141_v53  ;;  %v1779_v56 = vmax.f32 %v1572_v54, 0.0 }
 0x205   :  { %v1232_v60 = vpop.f32.mrf.mxu0  ;;  %v1576_v61 = vpop.f32.mrf.mxu1 }
 0x206   :  { %v3056_v62 = vpack.c.bf16 %v1693_v58, %v1693_v58  ;;  %v1233_v63 = vadd.f32 %v4596_v59, %v1232_v60  ;;  %v3142_v1 = vpack.c.bf16 %v1779_v56, %v1779_v56  ;;  %v1577_v2 = vadd.f32 %v4596_v59, %v1576_v61 }
 0x207   :  { %v3388_v3 = vpop.f32.mrf.mxu0  ;;  %v3560_v4 = vpop.f32.mrf.mxu1 }
 0x208   :  { %2540 = vst.msk [vmem:[%s5122_s3 + $0x11c] sm:$0xf] %vm2468_vm4, %v3056_v62  ;;  %v1694_v5 = vmax.f32 %v1233_v63, 0.0  ;;  %2626 = vst.msk [vmem:[%s5122_s3 + $0x274] sm:$0xf] %vm2468_vm4, %v3142_v1  ;;  %v1780_v0 = vmax.f32 %v1577_v2, 0.0 }
 0x209   :  { %v1235_v6 = vpop.f32.mrf.mxu0  ;;  %v1579_v7 = vpop.f32.mrf.mxu1 }
 0x20a   :  { %v3057_v8 = vpack.c.bf16 %v1694_v5, %v1694_v5  ;;  %v1236_v9 = vadd.f32 %v4596_v59, %v1235_v6  ;;  %v3143_v10 = vpack.c.bf16 %v1780_v0, %v1780_v0  ;;  %v1580_v11 = vadd.f32 %v4596_v59, %v1579_v7 }
 0x20b   :  { %v3389_v12 = vpop.f32.mrf.mxu0  ;;  %v3561_v13 = vpop.f32.mrf.mxu1 }
 0x20c   :  { %2541 = vst.msk [vmem:[%s5122_s3 + $0x120] sm:$0xf] %vm2468_vm4, %v3057_v8  ;;  %v1695_v14 = vmax.f32 %v1236_v9, 0.0  ;;  %2627 = vst.msk [vmem:[%s5122_s3 + $0x278] sm:$0xf] %vm2468_vm4, %v3143_v10  ;;  %v1781_v15 = vmax.f32 %v1580_v11, 0.0 }
 0x20d   :  { %v1240_v16 = vpop.f32.mrf.mxu0  ;;  %v1584_v17 = vpop.f32.mrf.mxu1 }
 0x20e   :  { %v3058_v18 = vpack.c.bf16 %v1695_v14, %v1695_v14  ;;  %v1241_v19 = vadd.f32 %v4596_v59, %v1240_v16  ;;  %v3144_v20 = vpack.c.bf16 %v1781_v15, %v1781_v15  ;;  %v1585_v21 = vadd.f32 %v4596_v59, %v1584_v17 }
 0x20f   :  { %v3392_v22 = vpop.f32.mrf.mxu0  ;;  %v3564_v23 = vpop.f32.mrf.mxu1 }
 0x210   :  { %2542 = vst.msk [vmem:[%s5122_s3 + $0x124] sm:$0xf] %vm2468_vm4, %v3058_v18  ;;  %v1696_v24 = vmax.f32 %v1241_v19, 0.0  ;;  %2628 = vst.msk [vmem:[%s5122_s3 + $0x27c] sm:$0xf] %vm2468_vm4, %v3144_v20  ;;  %v1782_v25 = vmax.f32 %v1585_v21, 0.0 }
 0x211   :  { %v1243_v26 = vpop.f32.mrf.mxu0  ;;  %v1587_v27 = vpop.f32.mrf.mxu1 }
 0x212   :  { %v3059_v28 = vpack.c.bf16 %v1696_v24, %v1696_v24  ;;  %v1244_v29 = vadd.f32 %v4596_v59, %v1243_v26  ;;  %v3145_v30 = vpack.c.bf16 %v1782_v25, %v1782_v25  ;;  %v1588_v31 = vadd.f32 %v4596_v59, %v1587_v27 }
 0x213   :  { %v3393_v32 = vpop.f32.mrf.mxu0  ;;  %v3565_v33 = vpop.f32.mrf.mxu1 }
 0x214   :  { %2543 = vst.msk [vmem:[%s5122_s3 + $0x128] sm:$0xf] %vm2468_vm4, %v3059_v28  ;;  %v1697_v34 = vmax.f32 %v1244_v29, 0.0  ;;  %2629 = vst.msk [vmem:[%s5122_s3 + $0x280] sm:$0xf] %vm2468_vm4, %v3145_v30  ;;  %v1783_v35 = vmax.f32 %v1588_v31, 0.0 }
 0x215   :  { %v1248_v36 = vpop.f32.mrf.mxu0  ;;  %v1592_v37 = vpop.f32.mrf.mxu1 }
 0x216   :  { %v3060_v38 = vpack.c.bf16 %v1697_v34, %v1697_v34  ;;  %v1249_v39 = vadd.f32 %v4596_v59, %v1248_v36  ;;  %v3146_v40 = vpack.c.bf16 %v1783_v35, %v1783_v35  ;;  %v1593_v41 = vadd.f32 %v4596_v59, %v1592_v37 }
 0x217   :  { %v3396_v42 = vpop.f32.mrf.mxu0  ;;  %v3568_v43 = vpop.f32.mrf.mxu1 }
 0x218   :  { %2544 = vst.msk [vmem:[%s5122_s3 + $0x12c] sm:$0xf] %vm2468_vm4, %v3060_v38  ;;  %v1698_v44 = vmax.f32 %v1249_v39, 0.0  ;;  %2630 = vst.msk [vmem:[%s5122_s3 + $0x284] sm:$0xf] %vm2468_vm4, %v3146_v40  ;;  %v1784_v45 = vmax.f32 %v1593_v41, 0.0 }
 0x219   :  { %v1251_v46 = vpop.f32.mrf.mxu0  ;;  %v1595_v47 = vpop.f32.mrf.mxu1 }
 0x21a   :  { %v3061_v48 = vpack.c.bf16 %v1698_v44, %v1698_v44  ;;  %v1252_v59 = vadd.f32 %v5034_v49, %v1251_v46  ;;  %v3147_v50 = vpack.c.bf16 %v1784_v45, %v1784_v45  ;;  %v1596_v51 = vadd.f32 %v5034_v49, %v1595_v47 }
 0x21b   :  { %v3397_v52 = vpop.f32.mrf.mxu0  ;;  %v3569_v53 = vpop.f32.mrf.mxu1 }
 0x21c   :  { %2545 = vst.msk [vmem:[%s5122_s3 + $0x130] sm:$0xf] %vm2468_vm4, %v3061_v48  ;;  %v1699_v54 = vmax.f32 %v1252_v59, 0.0  ;;  %2631 = vst.msk [vmem:[%s5122_s3 + $0x288] sm:$0xf] %vm2468_vm4, %v3147_v50  ;;  %v1785_v55 = vmax.f32 %v1596_v51, 0.0 }
 0x21d   :  { %v1256_v57 = vpop.f32.mrf.mxu0  ;;  %v1600_v58 = vpop.f32.mrf.mxu1 }
 0x21e   :  { %v3062_v56 = vpack.c.bf16 %v1699_v54, %v1699_v54  ;;  %v1257_v60 = vadd.f32 %v5034_v49, %v1256_v57  ;;  %v3148_v61 = vpack.c.bf16 %v1785_v55, %v1785_v55  ;;  %v1601_v62 = vadd.f32 %v5034_v49, %v1600_v58 }
 0x21f   :  { %v3400_v63 = vpop.f32.mrf.mxu0  ;;  %v3572_v1 = vpop.f32.mrf.mxu1 }
 0x220   :  { %2546 = vst.msk [vmem:[%s5122_s3 + $0x134] sm:$0xf] %vm2468_vm4, %v3062_v56  ;;  %v1700_v2 = vmax.f32 %v1257_v60, 0.0  ;;  %2632 = vst.msk [vmem:[%s5122_s3 + $0x28c] sm:$0xf] %vm2468_vm4, %v3148_v61  ;;  %v1786_v3 = vmax.f32 %v1601_v62, 0.0 }
 0x221   :  { %v1259_v4 = vpop.f32.mrf.mxu0  ;;  %v1603_v5 = vpop.f32.mrf.mxu1 }
 0x222   :  { %v3063_v0 = vpack.c.bf16 %v1700_v2, %v1700_v2  ;;  %v1260_v6 = vadd.f32 %v5034_v49, %v1259_v4  ;;  %v3149_v7 = vpack.c.bf16 %v1786_v3, %v1786_v3  ;;  %v1604_v8 = vadd.f32 %v5034_v49, %v1603_v5 }
 0x223   :  { %v3401_v9 = vpop.f32.mrf.mxu0  ;;  %v3573_v10 = vpop.f32.mrf.mxu1 }
 0x224   :  { %2547 = vst.msk [vmem:[%s5122_s3 + $0x138] sm:$0xf] %vm2468_vm4, %v3063_v0  ;;  %v1701_v11 = vmax.f32 %v1260_v6, 0.0  ;;  %2633 = vst.msk [vmem:[%s5122_s3 + $0x290] sm:$0xf] %vm2468_vm4, %v3149_v7  ;;  %v1787_v12 = vmax.f32 %v1604_v8, 0.0 }
 0x225   :  { %v1264_v13 = vpop.f32.mrf.mxu0  ;;  %v1608_v14 = vpop.f32.mrf.mxu1 }
 0x226   :  { %v3064_v15 = vpack.c.bf16 %v1701_v11, %v1701_v11  ;;  %v1265_v16 = vadd.f32 %v5034_v49, %v1264_v13  ;;  %v3150_v17 = vpack.c.bf16 %v1787_v12, %v1787_v12  ;;  %v1609_v18 = vadd.f32 %v5034_v49, %v1608_v14 }
 0x227   :  { %v3404_v19 = vpop.f32.mrf.mxu0  ;;  %v3576_v20 = vpop.f32.mrf.mxu1 }
 0x228   :  { %2548 = vst.msk [vmem:[%s5122_s3 + $0x13c] sm:$0xf] %vm2468_vm4, %v3064_v15  ;;  %v1702_v21 = vmax.f32 %v1265_v16, 0.0  ;;  %2634 = vst.msk [vmem:[%s5122_s3 + $0x294] sm:$0xf] %vm2468_vm4, %v3150_v17  ;;  %v1788_v22 = vmax.f32 %v1609_v18, 0.0 }
 0x229   :  { %v1267_v23 = vpop.f32.mrf.mxu0  ;;  %v1611_v24 = vpop.f32.mrf.mxu1 }
 0x22a   :  { %v3065_v25 = vpack.c.bf16 %v1702_v21, %v1702_v21  ;;  %v1268_v26 = vadd.f32 %v5034_v49, %v1267_v23  ;;  %v3151_v27 = vpack.c.bf16 %v1788_v22, %v1788_v22  ;;  %v1612_v28 = vadd.f32 %v5034_v49, %v1611_v24 }
 0x22b   :  { %v3405_v29 = vpop.f32.mrf.mxu0  ;;  %v3577_v30 = vpop.f32.mrf.mxu1 }
 0x22c   :  { %2549 = vst.msk [vmem:[%s5122_s3 + $0x140] sm:$0xf] %vm2468_vm4, %v3065_v25  ;;  %v1703_v31 = vmax.f32 %v1268_v26, 0.0  ;;  %2635 = vst.msk [vmem:[%s5122_s3 + $0x298] sm:$0xf] %vm2468_vm4, %v3151_v27  ;;  %v1789_v32 = vmax.f32 %v1612_v28, 0.0 }
 0x22d   :  { %v1272_v33 = vpop.f32.mrf.mxu0  ;;  %v1616_v34 = vpop.f32.mrf.mxu1 }
 0x22e   :  { %v3066_v35 = vpack.c.bf16 %v1703_v31, %v1703_v31  ;;  %v1273_v36 = vadd.f32 %v5034_v49, %v1272_v33  ;;  %v3152_v37 = vpack.c.bf16 %v1789_v32, %v1789_v32  ;;  %v1617_v38 = vadd.f32 %v5034_v49, %v1616_v34 }
 0x22f   :  { %v3408_v39 = vpop.f32.mrf.mxu0  ;;  %v3580_v40 = vpop.f32.mrf.mxu1 }
 0x230   :  { %2550 = vst.msk [vmem:[%s5122_s3 + $0x144] sm:$0xf] %vm2468_vm4, %v3066_v35  ;;  %v1704_v41 = vmax.f32 %v1273_v36, 0.0  ;;  %2636 = vst.msk [vmem:[%s5122_s3 + $0x29c] sm:$0xf] %vm2468_vm4, %v3152_v37  ;;  %v1790_v42 = vmax.f32 %v1617_v38, 0.0 }
 0x231   :  { %v1275_v43 = vpop.f32.mrf.mxu0  ;;  %v1619_v44 = vpop.f32.mrf.mxu1 }
 0x232   :  { %v3067_v45 = vpack.c.bf16 %v1704_v41, %v1704_v41  ;;  %v1276_v46 = vadd.f32 %v5034_v49, %v1275_v43  ;;  %v3153_v47 = vpack.c.bf16 %v1790_v42, %v1790_v42 }
 0x233   :  { %v3409_v48 = vpop.f32.mrf.mxu0  ;;  %v3581_v59 = vpop.f32.mrf.mxu1 }
 0x234   :  { %2551 = vst.msk [vmem:[%s5122_s3 + $0x148] sm:$0xf] %vm2468_vm4, %v3067_v45  ;;  %v1705_v50 = vmax.f32 %v1276_v46, 0.0  ;;  %2637 = vst.msk [vmem:[%s5122_s3 + $0x2a0] sm:$0xf] %vm2468_vm4, %v3153_v47 }
 0x235   :  { %v1280_v51 = vpop.f32.mrf.mxu0 }
 0x236   :  { %v3068_v52 = vpack.c.bf16 %v1705_v50, %v1705_v50  ;;  %v1281_v53 = vadd.f32 %v5034_v49, %v1280_v51 }
 0x237   :  { %v3412_v54 = vpop.f32.mrf.mxu0 }
 0x238   :  { %2552 = vst.msk [vmem:[%s5122_s3 + $0x14c] sm:$0xf] %vm2468_vm4, %v3068_v52  ;;  %v1706_v55 = vmax.f32 %v1281_v53, 0.0 }
 0x239   :  { %v1283_v57 = vpop.f32.mrf.mxu0 }
 0x23a   :  { %v3069_v58 = vpack.c.bf16 %v1706_v55, %v1706_v55  ;;  %v1284_v56 = vadd.f32 %v5034_v49, %v1283_v57 }
 0x23b   :  { %v3413_v60 = vpop.f32.mrf.mxu0 }
 0x23c   :  { %2553 = vst.msk [vmem:[%s5122_s3 + $0x150] sm:$0xf] %vm2468_vm4, %v3069_v58  ;;  %v1707_v61 = vmax.f32 %v1284_v56, 0.0 }
 0x23e   :  { %v3070_v62 = vpack.c.bf16 %v1707_v61, %v1707_v61 }
 0x240   :  { %2554 = vst.msk [vmem:[%s5122_s3 + $0x154] sm:$0xf] %vm2468_vm4, %v3070_v62 }
 0x241   :  { %2642 = vsyncpa [#allocation3], 1 }
 0x242   :  { %2643 = vsyncpa [#allocation5], 1 }

// kernel: simple_cnn_forward.4
= control target key start
LH: loop header
LB: loop body
LE: loop exit
PB: predicated region body
PF: predicated region fallthrough
CT: control target
= control target key end

     0   :  { %v4274_v0 = vmov 0   ;;  %vm1527_vm0 = vcmask 261120   ;;  %vm3293_vm1 = vcmask 519168   ;;  %s6192_s1 = inlined_call_operand.vmem [shape: bf16[288,64], index: 1, kind: input, shape index: {}]   ;;  %s6193_s0 = inlined_call_operand.vmem [shape: bf16[1152,288], index: 0, kind: input, shape index: {}]   ;;  %s6194_s2 = inlined_call_operand.vmem [shape: f32[1,64], index: 2, kind: input, shape index: {}]   ;;  %s6195_s3 = inlined_call_operand.vmem [shape: bf16[288,64], index: 3, kind: output, shape index: {}]  }
   0x1   :  { %1744 = vmatprep.subr.bf16.mxu0 %v4274_v0  ;;  %3935 = vmatprep.subr.bf16.mxu1 %v4274_v0  ;;  %v3968_v1 = vld [vmem:[%s6192_s1 + $0x38] sm:$0xff]   ;;  %v3969_v2 = vld [vmem:[%s6192_s1 + $0x30] sm:$0xff]   ;;  %v3970_v3 = vld [vmem:[%s6192_s1 + $0x28] sm:$0xff]  }
   0x2   :  { %1745 = vmatpush1.bf16.msra.mxu0 %v3968_v1  ;;  %3951 = vmatpush1.bf16.msra.mxu1 %v3968_v1  ;;  %v3971_v4 = vld [vmem:[%s6192_s1 + $0x20] sm:$0xff]   ;;  %v3972_v5 = vld [vmem:[%s6192_s1 + $0x18] sm:$0xff]   ;;  %v3973_v7 = vld [vmem:[%s6192_s1 + $0x10] sm:$0xff]  }
   0x3   :  { %1746 = vmatprep.subr.bf16.mxu0 %v4274_v0  ;;  %3936 = vmatprep.subr.bf16.mxu1 %v4274_v0  ;;  %v3986_v6 = vld [vmem:[%s6193_s0 + $0x4] ss:$12 sps:$4 sm:$0xff]   ;;  %v3989_v8 = vld [vmem:[%s6193_s0 + $0x514] ss:$12 sps:$4 sm:$0xff]   ;;  %v3974_v9 = vld [vmem:[%s6192_s1 + $0x8] sm:$0xff]  }
   0x4   :  { %1776 = vmatprep.mubr.bf16.mxu0 %v3986_v6  ;;  %2208 = vmatprep.mubr.bf16.mxu1 %v3989_v8  ;;  %v3975_v10 = vld [vmem:[%s6192_s1] sm:$0xff]   ;;  %v3976_v11 = vld [vmem:[%s6192_s1 + $0x78] sm:$0xff]   ;;  %v3977_v12 = vld [vmem:[%s6192_s1 + $0x70] sm:$0xff]  }
   0x5   :  { %v3978_v13 = vld [vmem:[%s6192_s1 + $0x68] sm:$0xff]   ;;  %v3979_v14 = vld [vmem:[%s6192_s1 + $0x60] sm:$0xff]   ;;  %v3980_v15 = vld [vmem:[%s6192_s1 + $0x58] sm:$0xff]  }
   0x6   :  { %1747 = vmatpush1.bf16.msra.mxu0 %v3969_v2  ;;  %3952 = vmatpush1.bf16.msra.mxu1 %v3969_v2  ;;  %v3981_v16 = vld [vmem:[%s6192_s1 + $0x50] sm:$0xff]   ;;  %v3982_v17 = vld [vmem:[%s6192_s1 + $0x48] sm:$0xff]   ;;  %v3983_v18 = vld [vmem:[%s6192_s1 + $0x40] sm:$0xff]  }
   0x7   :  { %1748 = vmatprep.subr.bf16.mxu0 %v4274_v0  ;;  %3937 = vmatprep.subr.bf16.mxu1 %v4274_v0  ;;  %v3990_v19 = vld [vmem:[%s6192_s1 + $0x88] sm:$0xff]   ;;  %v3987_v21 = vld [vmem:[%s6193_s0 + $0x510] ss:$12 sps:$4 sm:$0xff]   ;;  %v4045_v24 = vld [vmem:[%s6192_s1 + $0x80] sm:$0xff]  }
   0x8   :  { %v3984_v20 = vld [vmem:[%s6193_s0] ss:$12 sps:$4 sm:$0xff]   ;;  %v3991_v22 = vld [vmem:[%s6193_s0 + $0x1c] ss:$12 sps:$4 sm:$0xff]   ;;  %v3995_v25 = vld [vmem:[%s6193_s0 + $0x18] ss:$12 sps:$4 sm:$0xff]  }
   0x9   :  { %v3993_v23 = vld [vmem:[%s6193_s0 + $0x52c] ss:$12 sps:$4 sm:$0xff]   ;;  %v3996_v26 = vld [vmem:[%s6193_s0 + $0x528] ss:$12 sps:$4 sm:$0xff]   ;;  %v3999_v28 = vld [vmem:[%s6193_s0 + $0x544] ss:$12 sps:$4 sm:$0xff]  }
   0xa   :  { %1749 = vmatpush1.bf16.msra.mxu0 %v3970_v3  ;;  %3953 = vmatpush1.bf16.msra.mxu1 %v3970_v3  ;;  %v3997_v27 = vld [vmem:[%s6193_s0 + $0x34] ss:$12 sps:$4 sm:$0xff]   ;;  %v4001_v29 = vld [vmem:[%s6193_s0 + $0x30] ss:$12 sps:$4 sm:$0xff]   ;;  %v4003_v31 = vld [vmem:[%s6193_s0 + $0x4c] ss:$12 sps:$4 sm:$0xff]  }
   0xb   :  { %1750 = vmatprep.subr.bf16.mxu0 %v4274_v0  ;;  %3938 = vmatprep.subr.bf16.mxu1 %v4274_v0  ;;  %v4002_v30 = vld [vmem:[%s6193_s0 + $0x540] ss:$12 sps:$4 sm:$0xff]   ;;  %v4005_v32 = vld [vmem:[%s6193_s0 + $0x55c] ss:$12 sps:$4 sm:$0xff]   ;;  %v4008_v34 = vld [vmem:[%s6193_s0 + $0x558] ss:$12 sps:$4 sm:$0xff]  }
   0xc   :  { %v4007_v33 = vld [vmem:[%s6193_s0 + $0x48] ss:$12 sps:$4 sm:$0xff]   ;;  %v4009_v35 = vld [vmem:[%s6193_s0 + $0x64] ss:$12 sps:$4 sm:$0xff]   ;;  %v4013_v37 = vld [vmem:[%s6193_s0 + $0x60] ss:$12 sps:$4 sm:$0xff]  }
   0xd   :  { %v4011_v36 = vld [vmem:[%s6193_s0 + $0x574] ss:$12 sps:$4 sm:$0xff]   ;;  %v4014_v38 = vld [vmem:[%s6193_s0 + $0x570] ss:$12 sps:$4 sm:$0xff]   ;;  %v4017_v40 = vld [vmem:[%s6193_s0 + $0x58c] ss:$12 sps:$4 sm:$0xff]  }
   0xe   :  { %1751 = vmatpush1.bf16.msra.mxu0 %v3971_v4  ;;  %3954 = vmatpush1.bf16.msra.mxu1 %v3971_v4  ;;  %v4015_v39 = vld [vmem:[%s6193_s0 + $0x7c] ss:$12 sps:$4 sm:$0xff]   ;;  %v4019_v41 = vld [vmem:[%s6193_s0 + $0x78] ss:$12 sps:$4 sm:$0xff]   ;;  %v4021_v43 = vld [vmem:[%s6193_s0 + $0x94] ss:$12 sps:$4 sm:$0xff]  }
   0xf   :  { %1752 = vmatprep.subr.bf16.mxu0 %v4274_v0  ;;  %3939 = vmatprep.subr.bf16.mxu1 %v4274_v0  ;;  %v4020_v42 = vld [vmem:[%s6193_s0 + $0x588] ss:$12 sps:$4 sm:$0xff]   ;;  %v4023_v44 = vld [vmem:[%s6193_s0 + $0x5a4] ss:$12 sps:$4 sm:$0xff]   ;;  %v4026_v46 = vld [vmem:[%s6193_s0 + $0x5a0] ss:$12 sps:$4 sm:$0xff]  }
  0x10   :  { %v4025_v45 = vld [vmem:[%s6193_s0 + $0x90] ss:$12 sps:$4 sm:$0xff]   ;;  %v4027_v47 = vld [vmem:[%s6193_s0 + $0xac] ss:$12 sps:$4 sm:$0xff]   ;;  %v4031_v49 = vld [vmem:[%s6193_s0 + $0xa8] ss:$12 sps:$4 sm:$0xff]  }
  0x11   :  { %v4029_v48 = vld [vmem:[%s6193_s0 + $0x5bc] ss:$12 sps:$4 sm:$0xff]   ;;  %v4032_v50 = vld [vmem:[%s6193_s0 + $0x5b8] ss:$12 sps:$4 sm:$0xff]   ;;  %v4035_v52 = vld [vmem:[%s6193_s0 + $0x5d4] ss:$12 sps:$4 sm:$0xff]  }
  0x12   :  { %1753 = vmatpush1.bf16.msra.mxu0 %v3972_v5  ;;  %3955 = vmatpush1.bf16.msra.mxu1 %v3972_v5  ;;  %v4033_v51 = vld [vmem:[%s6193_s0 + $0xc4] ss:$12 sps:$4 sm:$0xff]   ;;  %v4037_v53 = vld [vmem:[%s6193_s0 + $0xc0] ss:$12 sps:$4 sm:$0xff]   ;;  %v4039_v55 = vld [vmem:[%s6193_s0 + $0xdc] ss:$12 sps:$4 sm:$0xff]  }
  0x13   :  { %1754 = vmatprep.subr.bf16.mxu0 %v4274_v0  ;;  %3940 = vmatprep.subr.bf16.mxu1 %v4274_v0  ;;  %v4038_v54 = vld [vmem:[%s6193_s0 + $0x5d0] ss:$12 sps:$4 sm:$0xff]   ;;  %v4041_v56 = vld [vmem:[%s6193_s0 + $0x5ec] ss:$12 sps:$4 sm:$0xff]   ;;  %v4044_v58 = vld [vmem:[%s6193_s0 + $0x5e8] ss:$12 sps:$4 sm:$0xff]  }
  0x14   :  { %v4043_v57 = vld [vmem:[%s6193_s0 + $0xd8] ss:$12 sps:$4 sm:$0xff]   ;;  %v4046_v59 = vld [vmem:[%s6193_s0 + $0xf4] ss:$12 sps:$4 sm:$0xff]   ;;  %v4050_v61 = vld [vmem:[%s6193_s0 + $0xf0] ss:$12 sps:$4 sm:$0xff]  }
  0x15   :  { %v4048_v60 = vld [vmem:[%s6193_s0 + $0x604] ss:$12 sps:$4 sm:$0xff]   ;;  %v4051_v62 = vld [vmem:[%s6193_s0 + $0x600] ss:$12 sps:$4 sm:$0xff]   ;;  %v4056_v1 = vld [vmem:[%s6193_s0 + $0x108] ss:$12 sps:$4 sm:$0xff]  }
  0x16   :  { %1755 = vmatpush1.bf16.msra.mxu0 %v3973_v7  ;;  %3956 = vmatpush1.bf16.msra.mxu1 %v3973_v7  ;;  %v4052_v63 = vld [vmem:[%s6193_s0 + $0x10c] ss:$12 sps:$4 sm:$0xff]   ;;  %v4058_v3 = vld [vmem:[%s6193_s0 + $0x124] ss:$12 sps:$4 sm:$0xff]   ;;  %v4060_v4 = vld [vmem:[%s6193_s0 + $0x634] ss:$12 sps:$4 sm:$0xff]  }
  0x17   :  { %1756 = vmatprep.subr.bf16.mxu0 %v4274_v0  ;;  %3941 = vmatprep.subr.bf16.mxu1 %v4274_v0  ;;  %v4057_v2 = vld [vmem:[%s6193_s0 + $0x618] ss:$12 sps:$4 sm:$0xff]   ;;  %v4062_v5 = vld [vmem:[%s6193_s0 + $0x120] ss:$12 sps:$4 sm:$0xff]   ;;  %v4063_v6 = vld [vmem:[%s6193_s0 + $0x630] ss:$12 sps:$4 sm:$0xff]  }
  0x18   :  { %v4064_v7 = vld [vmem:[%s6193_s0 + $0x13c] ss:$12 sps:$4 sm:$0xff]   ;;  %v4066_v8 = vld [vmem:[%s6193_s0 + $0x64c] ss:$12 sps:$4 sm:$0xff]  }
  0x1a   :  { %1757 = vmatpush1.bf16.msra.mxu0 %v3974_v9  ;;  %3957 = vmatpush1.bf16.msra.mxu1 %v3974_v9  ;;  %v4068_v9 = vld [vmem:[%s6193_s0 + $0x138] ss:$12 sps:$4 sm:$0xff]  }
  0x1b   :  { %1758 = vmatprep.subr.bf16.mxu0 %v4274_v0  ;;  %3942 = vmatprep.subr.bf16.mxu1 %v4274_v0 }
  0x1e   :  { %1759 = vmatpush1.bf16.msra.mxu0 %v3975_v10  ;;  %3958 = vmatpush1.bf16.msra.mxu1 %v3975_v10  ;;  %v4069_v10 = vld [vmem:[%s6193_s0 + $0x648] ss:$12 sps:$4 sm:$0xff]  }
  0x1f   :  { %1760 = vmatprep.subr.bf16.mxu0 %v4274_v0  ;;  %3943 = vmatprep.subr.bf16.mxu1 %v4274_v0 }
  0x22   :  { %1761 = vmatpush2.bf16.msra.mxu0 %v3976_v11  ;;  %3959 = vmatpush2.bf16.msra.mxu1 %v3976_v11  ;;  %v4070_v11 = vld [vmem:[%s6193_s0 + $0x154] ss:$12 sps:$4 sm:$0xff]  }
  0x23   :  { %1762 = vmatprep.subr.bf16.mxu0 %v4274_v0  ;;  %3944 = vmatprep.subr.bf16.mxu1 %v4274_v0 }
  0x26   :  { %1763 = vmatpush2.bf16.msra.mxu0 %v3977_v12  ;;  %3960 = vmatpush2.bf16.msra.mxu1 %v3977_v12  ;;  %v4072_v12 = vld [vmem:[%s6193_s0 + $0x664] ss:$12 sps:$4 sm:$0xff]  }
  0x27   :  { %1764 = vmatprep.subr.bf16.mxu0 %v4274_v0  ;;  %3945 = vmatprep.subr.bf16.mxu1 %v4274_v0 }
  0x2a   :  { %1765 = vmatpush2.bf16.msra.mxu0 %v3978_v13  ;;  %3961 = vmatpush2.bf16.msra.mxu1 %v3978_v13  ;;  %v4074_v13 = vld [vmem:[%s6193_s0 + $0x150] ss:$12 sps:$4 sm:$0xff]  }
  0x2b   :  { %1766 = vmatprep.subr.bf16.mxu0 %v4274_v0  ;;  %3946 = vmatprep.subr.bf16.mxu1 %v4274_v0 }
  0x2e   :  { %1767 = vmatpush2.bf16.msra.mxu0 %v3979_v14  ;;  %3962 = vmatpush2.bf16.msra.mxu1 %v3979_v14  ;;  %v4075_v14 = vld [vmem:[%s6193_s0 + $0x660] ss:$12 sps:$4 sm:$0xff]  }
  0x2f   :  { %1768 = vmatprep.subr.bf16.mxu0 %v4274_v0  ;;  %3947 = vmatprep.subr.bf16.mxu1 %v4274_v0 }
  0x32   :  { %1769 = vmatpush2.bf16.msra.mxu0 %v3980_v15  ;;  %3963 = vmatpush2.bf16.msra.mxu1 %v3980_v15  ;;  %v4076_v15 = vld [vmem:[%s6193_s0 + $0x16c] ss:$12 sps:$4 sm:$0xff]  }
  0x33   :  { %1770 = vmatprep.subr.bf16.mxu0 %v4274_v0  ;;  %3948 = vmatprep.subr.bf16.mxu1 %v4274_v0 }
  0x36   :  { %1771 = vmatpush2.bf16.msra.mxu0 %v3981_v16  ;;  %3964 = vmatpush2.bf16.msra.mxu1 %v3981_v16  ;;  %v4078_v16 = vld [vmem:[%s6193_s0 + $0x67c] ss:$12 sps:$4 sm:$0xff]  }
  0x37   :  { %1772 = vmatprep.subr.bf16.mxu0 %v4274_v0  ;;  %3949 = vmatprep.subr.bf16.mxu1 %v4274_v0 }
  0x3a   :  { %1773 = vmatpush2.bf16.msra.mxu0 %v3982_v17  ;;  %3965 = vmatpush2.bf16.msra.mxu1 %v3982_v17  ;;  %v4080_v17 = vld [vmem:[%s6193_s0 + $0x168] ss:$12 sps:$4 sm:$0xff]  }
  0x3b   :  { %1774 = vmatprep.subr.bf16.mxu0 %v4274_v0  ;;  %3950 = vmatprep.subr.bf16.mxu1 %v4274_v0  ;;  %v4054_v0 = vld [vmem:[%s6193_s0 + $0x61c] ss:$12 sps:$4 sm:$0xff]  }
  0x3e   :  { %1775 = vmatpush2.bf16.msra.mxu0 %v3983_v18  ;;  %3966 = vmatpush2.bf16.msra.mxu1 %v3983_v18  ;;  %v4081_v18 = vld [vmem:[%s6193_s0 + $0x678] ss:$12 sps:$4 sm:$0xff]  }
  0x3f   :  { %3787 = vmatprep.subr.bf16.mxu1 %v3990_v19 }
  0x41   :  { %1777 = vmatmul.mubr.bf16.vlgmr.msra.gmra.mxu0 %v3984_v20  ;;  %2209 = vmatmul.mubr.bf16.vlgmr.msra.gmra.mxu1 %v3987_v21  ;;  %v4084_v20 = vld [vmem:[%s6193_s0 + $0x694] ss:$12 sps:$4 sm:$0xff]  }
  0x42   :  { %3788 = vmatpush3.bf16.msra.mxu1 %v3990_v19  ;;  %1784 = vmatprep.mubr.bf16.mxu0 %v3991_v22  ;;  %v4082_v19 = vld [vmem:[%s6193_s0 + $0x184] ss:$12 sps:$4 sm:$0xff]   ;;  %v4086_v21 = vld [vmem:[%s6193_s0 + $0x180] ss:$12 sps:$4 sm:$0xff]  }
  0x43   :  { %2216 = vmatprep.mubr.bf16.mxu1 %v3993_v23  ;;  %3789 = vmatprep.subr.bf16.mxu1 %v4045_v24  ;;  %v4087_v22 = vld [vmem:[%s6193_s0 + $0x690] ss:$12 sps:$4 sm:$0xff]  }
  0x44   :  { %v4088_v23 = vld [vmem:[%s6193_s0 + $0x19c] ss:$12 sps:$4 sm:$0xff]  }
  0x46   :  { %3790 = vmatpush3.bf16.msra.mxu1 %v4045_v24  ;;  %v4090_v24 = vld [vmem:[%s6193_s0 + $0x6ac] ss:$12 sps:$4 sm:$0xff]  }
  0x49   :  { %1785 = vmatmul.mubr.bf16.gmra.mxu0 %v3995_v25  ;;  %2217 = vmatmul.mubr.bf16.gmra.mxu1 %v3996_v26  ;;  %v4092_v25 = vld [vmem:[%s6193_s0 + $0x198] ss:$12 sps:$4 sm:$0xff]   ;;  %v4093_v26 = vld [vmem:[%s6193_s0 + $0x6a8] ss:$12 sps:$4 sm:$0xff]  }
  0x4a   :  { %1792 = vmatprep.mubr.bf16.mxu0 %v3997_v27  ;;  %2224 = vmatprep.mubr.bf16.mxu1 %v3999_v28  ;;  %v4094_v27 = vld [vmem:[%s6193_s0 + $0x1b4] ss:$12 sps:$4 sm:$0xff]  }
  0x4b   :  { %v4096_v28 = vld [vmem:[%s6193_s0 + $0x8] ss:$12 sps:$4 sm:$0xff]  }
  0x51   :  { %1793 = vmatmul.mubr.bf16.gmra.mxu0 %v4001_v29  ;;  %2225 = vmatmul.mubr.bf16.gmra.mxu1 %v4002_v30  ;;  %v4097_v29 = vld [vmem:[%s6193_s0 + $0x1b0] ss:$12 sps:$4 sm:$0xff]   ;;  %v4098_v30 = vld [vmem:[%s6193_s0 + $0x20] ss:$12 sps:$4 sm:$0xff]  }
  0x52   :  { %1800 = vmatprep.mubr.bf16.mxu0 %v4003_v31  ;;  %2232 = vmatprep.mubr.bf16.mxu1 %v4005_v32  ;;  %v4099_v31 = vld [vmem:[%s6193_s0 + $0x1cc] ss:$12 sps:$4 sm:$0xff]  }
  0x53   :  { %v4101_v32 = vld [vmem:[%s6193_s0 + $0x38] ss:$12 sps:$4 sm:$0xff]  }
  0x59   :  { %1801 = vmatmul.mubr.bf16.gmra.mxu0 %v4007_v33  ;;  %2233 = vmatmul.mubr.bf16.gmra.mxu1 %v4008_v34  ;;  %v4102_v33 = vld [vmem:[%s6193_s0 + $0x1c8] ss:$12 sps:$4 sm:$0xff]   ;;  %v4103_v34 = vld [vmem:[%s6193_s0 + $0x50] ss:$12 sps:$4 sm:$0xff]  }
  0x5a   :  { %1808 = vmatprep.mubr.bf16.mxu0 %v4009_v35  ;;  %2240 = vmatprep.mubr.bf16.mxu1 %v4011_v36  ;;  %v4104_v35 = vld [vmem:[%s6193_s0 + $0x1e4] ss:$12 sps:$4 sm:$0xff]   ;;  %v4106_v36 = vld [vmem:[%s6193_s0 + $0x68] ss:$12 sps:$4 sm:$0xff]  }
  0x61   :  { %1809 = vmatmul.mubr.bf16.gmra.mxu0 %v4013_v37  ;;  %2241 = vmatmul.mubr.bf16.gmra.mxu1 %v4014_v38  ;;  %v4107_v37 = vld [vmem:[%s6193_s0 + $0x1e0] ss:$12 sps:$4 sm:$0xff]  }
  0x62   :  { %1816 = vmatprep.mubr.bf16.mxu0 %v4015_v39  ;;  %2248 = vmatprep.mubr.bf16.mxu1 %v4017_v40  ;;  %v4108_v38 = vld [vmem:[%s6193_s0 + $0x80] ss:$12 sps:$4 sm:$0xff]   ;;  %v4109_v39 = vld [vmem:[%s6193_s0 + $0x1fc] ss:$12 sps:$4 sm:$0xff]   ;;  %v4111_v40 = vld [vmem:[%s6193_s0 + $0x98] ss:$12 sps:$4 sm:$0xff]  }
  0x69   :  { %1817 = vmatmul.mubr.bf16.gmra.mxu0 %v4019_v41  ;;  %2249 = vmatmul.mubr.bf16.gmra.mxu1 %v4020_v42  ;;  %v4112_v41 = vld [vmem:[%s6193_s0 + $0x1f8] ss:$12 sps:$4 sm:$0xff]   ;;  %v4113_v42 = vld [vmem:[%s6193_s0 + $0xb0] ss:$12 sps:$4 sm:$0xff]  }
  0x6a   :  { %1824 = vmatprep.mubr.bf16.mxu0 %v4021_v43  ;;  %2256 = vmatprep.mubr.bf16.mxu1 %v4023_v44  ;;  %v4114_v43 = vld [vmem:[%s6193_s0 + $0x214] ss:$12 sps:$4 sm:$0xff]  }
  0x6b   :  { %v4116_v44 = vld [vmem:[%s6193_s0 + $0xc8] ss:$12 sps:$4 sm:$0xff]  }
  0x71   :  { %1825 = vmatmul.mubr.bf16.gmra.mxu0 %v4025_v45  ;;  %2257 = vmatmul.mubr.bf16.gmra.mxu1 %v4026_v46  ;;  %v4117_v45 = vld [vmem:[%s6193_s0 + $0x210] ss:$12 sps:$4 sm:$0xff]   ;;  %v4118_v46 = vld [vmem:[%s6193_s0 + $0xe0] ss:$12 sps:$4 sm:$0xff]  }
  0x72   :  { %1832 = vmatprep.mubr.bf16.mxu0 %v4027_v47  ;;  %2264 = vmatprep.mubr.bf16.mxu1 %v4029_v48  ;;  %v4119_v47 = vld [vmem:[%s6193_s0 + $0x22c] ss:$12 sps:$4 sm:$0xff]  }
  0x73   :  { %v4121_v48 = vld [vmem:[%s6193_s0 + $0xf8] ss:$12 sps:$4 sm:$0xff]  }
  0x79   :  { %1833 = vmatmul.mubr.bf16.gmra.mxu0 %v4031_v49  ;;  %2265 = vmatmul.mubr.bf16.gmra.mxu1 %v4032_v50  ;;  %v4122_v49 = vld [vmem:[%s6193_s0 + $0x228] ss:$12 sps:$4 sm:$0xff]   ;;  %v4123_v50 = vld [vmem:[%s6193_s0 + $0x110] ss:$12 sps:$4 sm:$0xff]  }
  0x7a   :  { %1840 = vmatprep.mubr.bf16.mxu0 %v4033_v51  ;;  %2272 = vmatprep.mubr.bf16.mxu1 %v4035_v52  ;;  %v4124_v51 = vld [vmem:[%s6193_s0 + $0x244] ss:$12 sps:$4 sm:$0xff]   ;;  %v4126_v52 = vld [vmem:[%s6193_s0 + $0x128] ss:$12 sps:$4 sm:$0xff]  }
  0x81   :  { %1841 = vmatmul.mubr.bf16.gmra.mxu0 %v4037_v53  ;;  %2273 = vmatmul.mubr.bf16.gmra.mxu1 %v4038_v54  ;;  %v4127_v53 = vld [vmem:[%s6193_s0 + $0x240] ss:$12 sps:$4 sm:$0xff]  }
  0x82   :  { %1848 = vmatprep.mubr.bf16.mxu0 %v4039_v55  ;;  %2280 = vmatprep.mubr.bf16.mxu1 %v4041_v56  ;;  %v4128_v54 = vld [vmem:[%s6193_s0 + $0x140] ss:$12 sps:$4 sm:$0xff]   ;;  %v4129_v55 = vld [vmem:[%s6193_s0 + $0x25c] ss:$12 sps:$4 sm:$0xff]   ;;  %v4131_v56 = vld [vmem:[%s6193_s0 + $0x158] ss:$12 sps:$4 sm:$0xff]  }
  0x89   :  { %1849 = vmatmul.mubr.bf16.gmra.mxu0 %v4043_v57  ;;  %2281 = vmatmul.mubr.bf16.gmra.mxu1 %v4044_v58 }
  0x8a   :  { %1856 = vmatprep.mubr.bf16.mxu0 %v4046_v59  ;;  %2288 = vmatprep.mubr.bf16.mxu1 %v4048_v60 }
  0x91   :  { %1857 = vmatmul.mubr.bf16.gmra.mxu0 %v4050_v61  ;;  %2289 = vmatmul.mubr.bf16.gmra.mxu1 %v4051_v62 }
  0x92   :  { %1864 = vmatprep.mubr.bf16.mxu0 %v4052_v63  ;;  %2296 = vmatprep.mubr.bf16.mxu1 %v4054_v0  ;;  %v4132_v63 = vld [vmem:[%s6193_s0 + $0x258] ss:$12 sps:$4 sm:$0xff]   ;;  %v4133_v0 = vld [vmem:[%s6193_s0 + $0x170] ss:$12 sps:$4 sm:$0xff]  }
  0x99   :  { %1865 = vmatmul.mubr.bf16.gmra.mxu0 %v4056_v1  ;;  %2297 = vmatmul.mubr.bf16.gmra.mxu1 %v4057_v2  ;;  %v4134_v1 = vld [vmem:[%s6193_s0 + $0x274] ss:$12 sps:$4 sm:$0xff]  }
  0x9a   :  { %1872 = vmatprep.mubr.bf16.mxu0 %v4058_v3  ;;  %2304 = vmatprep.mubr.bf16.mxu1 %v4060_v4  ;;  %v4136_v2 = vld [vmem:[%s6193_s0 + $0x188] ss:$12 sps:$4 sm:$0xff]  }
  0xa1   :  { %1873 = vmatmul.mubr.bf16.gmra.mxu0 %v4062_v5  ;;  %2305 = vmatmul.mubr.bf16.gmra.mxu1 %v4063_v6 }
  0xa2   :  { %1880 = vmatprep.mubr.bf16.mxu0 %v4064_v7  ;;  %2312 = vmatprep.mubr.bf16.mxu1 %v4066_v8 }
  0xa9   :  { %1881 = vmatmul.mubr.bf16.gmra.mxu0 %v4068_v9  ;;  %2313 = vmatmul.mubr.bf16.gmra.mxu1 %v4069_v10 }
  0xaa   :  { %1888 = vmatprep.mubr.bf16.mxu0 %v4070_v11  ;;  %2320 = vmatprep.mubr.bf16.mxu1 %v4072_v12  ;;  %v4137_v11 = vld [vmem:[%s6193_s0 + $0x270] ss:$12 sps:$4 sm:$0xff]   ;;  %v4138_v12 = vld [vmem:[%s6193_s0 + $0x1a0] ss:$12 sps:$4 sm:$0xff]  }
  0xb1   :  { %1889 = vmatmul.mubr.bf16.gmra.mxu0 %v4074_v13  ;;  %2321 = vmatmul.mubr.bf16.gmra.mxu1 %v4075_v14  ;;  %v4139_v13 = vld [vmem:[%s6193_s0 + $0x28c] ss:$12 sps:$4 sm:$0xff]  }
  0xb2   :  { %1896 = vmatprep.mubr.bf16.mxu0 %v4076_v15  ;;  %2328 = vmatprep.mubr.bf16.mxu1 %v4078_v16  ;;  %v4141_v14 = vld [vmem:[%s6193_s0 + $0x1b8] ss:$12 sps:$4 sm:$0xff]  }
  0xb9   :  { %1897 = vmatmul.mubr.bf16.gmra.mxu0 %v4080_v17  ;;  %2329 = vmatmul.mubr.bf16.gmra.mxu1 %v4081_v18 }
  0xba   :  { %1904 = vmatprep.mubr.bf16.mxu0 %v4082_v19  ;;  %2336 = vmatprep.mubr.bf16.mxu1 %v4084_v20 }
  0xc1   :  { %1905 = vmatmul.mubr.bf16.gmra.mxu0 %v4086_v21  ;;  %2337 = vmatmul.mubr.bf16.gmra.mxu1 %v4087_v22 }
  0xc2   :  { %1912 = vmatprep.mubr.bf16.mxu0 %v4088_v23  ;;  %2344 = vmatprep.mubr.bf16.mxu1 %v4090_v24  ;;  %v4142_v23 = vld [vmem:[%s6193_s0 + $0x288] ss:$12 sps:$4 sm:$0xff]   ;;  %v4143_v24 = vld [vmem:[%s6193_s0 + $0x1d0] ss:$12 sps:$4 sm:$0xff]  }
  0xc9   :  { %1913 = vmatmul.mubr.bf16.gmra.mxu0 %v4092_v25  ;;  %2345 = vmatmul.mubr.bf16.gmra.mxu1 %v4093_v26  ;;  %v4146_v25 = vld [vmem:[%s6193_s0 + $0x2a4] ss:$12 sps:$4 sm:$0xff]   ;;  %v4147_v26 = vld [vmem:[%s6193_s0 + $0x1e8] ss:$12 sps:$4 sm:$0xff]  }
  0xca   :  { %1920 = vmatprep.mubr.bf16.mxu0 %v4094_v27  ;;  %3791 = vmatprep.mubr.msk.bf16.mxu1 %vm1527_vm0, %v4096_v28 }
  0xd1   :  { %1921 = vmatmul.mubr.bf16.gmra.mxu0 %v4097_v29  ;;  %3792 = vmatmul.mubr.msk.bf16.vlgmr.msra.gmra.mxu1 %vm1527_vm0, %v4098_v30 }
  0xd2   :  { %1928 = vmatprep.mubr.bf16.mxu0 %v4099_v31  ;;  %3795 = vmatprep.mubr.msk.bf16.mxu1 %vm1527_vm0, %v4101_v32 }
  0xd9   :  { %1929 = vmatmul.mubr.bf16.gmra.mxu0 %v4102_v33  ;;  %3796 = vmatmul.mubr.msk.bf16.gmra.mxu1 %vm1527_vm0, %v4103_v34 }
  0xda   :  { %1936 = vmatprep.mubr.bf16.mxu0 %v4104_v35  ;;  %3799 = vmatprep.mubr.msk.bf16.mxu1 %vm1527_vm0, %v4106_v36  ;;  %v4144_v35 = vld [vmem:[%s6193_s0 + $0x2a0] ss:$12 sps:$4 sm:$0xff]  }
  0xdb   :  { %v4148_v36 = vld [vmem:[%s6193_s0 + $0x200] ss:$12 sps:$4 sm:$0xff]  }
  0xe1   :  { %1937 = vmatmul.mubr.bf16.gmra.mxu0 %v4107_v37  ;;  %3800 = vmatmul.mubr.msk.bf16.gmra.mxu1 %vm1527_vm0, %v4108_v38  ;;  %v4151_v37 = vld [vmem:[%s6193_s0 + $0x2bc] ss:$12 sps:$4 sm:$0xff]   ;;  %v4152_v38 = vld [vmem:[%s6193_s0 + $0x218] ss:$12 sps:$4 sm:$0xff]  }
  0xe2   :  { %1944 = vmatprep.mubr.bf16.mxu0 %v4109_v39  ;;  %3803 = vmatprep.mubr.msk.bf16.mxu1 %vm1527_vm0, %v4111_v40 }
  0xe9   :  { %1945 = vmatmul.mubr.bf16.gmra.mxu0 %v4112_v41  ;;  %3804 = vmatmul.mubr.msk.bf16.gmra.mxu1 %vm1527_vm0, %v4113_v42 }
  0xea   :  { %1952 = vmatprep.mubr.bf16.mxu0 %v4114_v43  ;;  %3807 = vmatprep.mubr.msk.bf16.mxu1 %vm1527_vm0, %v4116_v44 }
  0xf1   :  { %1953 = vmatmul.mubr.bf16.gmra.mxu0 %v4117_v45  ;;  %3808 = vmatmul.mubr.msk.bf16.gmra.mxu1 %vm1527_vm0, %v4118_v46 }
  0xf2   :  { %1960 = vmatprep.mubr.bf16.mxu0 %v4119_v47  ;;  %3811 = vmatprep.mubr.msk.bf16.mxu1 %vm1527_vm0, %v4121_v48  ;;  %v4149_v47 = vld [vmem:[%s6193_s0 + $0x2b8] ss:$12 sps:$4 sm:$0xff]   ;;  %v4153_v48 = vld [vmem:[%s6193_s0 + $0x230] ss:$12 sps:$4 sm:$0xff]  }
  0xf9   :  { %1961 = vmatmul.mubr.bf16.gmra.mxu0 %v4122_v49  ;;  %3812 = vmatmul.mubr.msk.bf16.gmra.mxu1 %vm1527_vm0, %v4123_v50  ;;  %v4156_v49 = vld [vmem:[%s6193_s0 + $0x2d4] ss:$12 sps:$4 sm:$0xff]  }
  0xfa   :  { %1968 = vmatprep.mubr.bf16.mxu0 %v4124_v51  ;;  %3815 = vmatprep.mubr.msk.bf16.mxu1 %vm1527_vm0, %v4126_v52  ;;  %v4157_v50 = vld [vmem:[%s6193_s0 + $0x248] ss:$12 sps:$4 sm:$0xff]  }
 0x101   :  { %v4700_v57 = vpop.f32.mrf.mxu0  ;;  %1969 = vmatmul.mubr.bf16.gmra.mxu0 %v4127_v53  ;;  %v4702_v58 = vpop.f32.mrf.mxu1  ;;  %3816 = vmatmul.mubr.msk.bf16.gmra.mxu1 %vm1527_vm0, %v4128_v54 }
 0x102   :  { %6244 = vst [vmem:[#allocation2_spill] sm:$0xff] %v4702_v58  ;;  %1976 = vmatprep.mubr.bf16.mxu0 %v4129_v55  ;;  %3819 = vmatprep.mubr.msk.bf16.mxu1 %vm1527_vm0, %v4131_v56 }
 0x103   :  { %v1780_v59 = vpop.f32.mrf.mxu0  ;;  %v2212_v60 = vpop.f32.mrf.mxu1 }
 0x105   :  { %v4706_v61 = vpop.f32.mrf.mxu0  ;;  %v4708_v62 = vpop.f32.mrf.mxu1 }
 0x106   :  { %6245 = vst [vmem:[#allocation3_spill] sm:$0xff] %v4708_v62 }
 0x107   :  { %v1783_v3 = vpop.f32.mrf.mxu0  ;;  %v2215_v4 = vpop.f32.mrf.mxu1 }
 0x109   :  { %v4722_v5 = vpop.f32.mrf.mxu0  ;;  %1977 = vmatmul.mubr.bf16.gmra.mxu0 %v4132_v63  ;;  %v4724_v6 = vpop.f32.mrf.mxu1  ;;  %3820 = vmatmul.mubr.msk.bf16.gmra.mxu1 %vm1527_vm0, %v4133_v0  ;;  %v4154_v63 = vld [vmem:[%s6193_s0 + $0x2d0] ss:$12 sps:$4 sm:$0xff]   ;;  %v4158_v0 = vld [vmem:[%s6193_s0 + $0x260] ss:$12 sps:$4 sm:$0xff]  }
 0x10a   :  { %6246 = vst [vmem:[#allocation4_spill] sm:$0xff] %v4724_v6  ;;  %1984 = vmatprep.mubr.bf16.mxu0 %v4134_v1  ;;  %3823 = vmatprep.mubr.msk.bf16.mxu1 %vm1527_vm0, %v4136_v2  ;;  %v4161_v1 = vld [vmem:[%s6193_s0 + $0x2ec] ss:$12 sps:$4 sm:$0xff]  }
 0x10b   :  { %v1788_v7 = vpop.f32.mrf.mxu0  ;;  %v2220_v8 = vpop.f32.mrf.mxu1  ;;  %v4162_v2 = vld [vmem:[%s6193_s0 + $0x278] ss:$12 sps:$4 sm:$0xff]  }
 0x10d   :  { %v4728_v9 = vpop.f32.mrf.mxu0  ;;  %v4730_v10 = vpop.f32.mrf.mxu1 }
 0x10e   :  { %6247 = vst [vmem:[#allocation5_spill] sm:$0xff] %v4730_v10 }
 0x10f   :  { %v1791_v15 = vpop.f32.mrf.mxu0  ;;  %v2223_v16 = vpop.f32.mrf.mxu1 }
 0x110   :  { %v4159_v15 = vld [vmem:[%s6193_s0 + $0x2e8] ss:$12 sps:$4 sm:$0xff]   ;;  %v4163_v16 = vld [vmem:[%s6193_s0 + $0x290] ss:$12 sps:$4 sm:$0xff]  }
 0x111   :  { %v4744_v17 = vpop.f32.mrf.mxu0  ;;  %1985 = vmatmul.mubr.bf16.gmra.mxu0 %v4137_v11  ;;  %v4746_v18 = vpop.f32.mrf.mxu1  ;;  %3824 = vmatmul.mubr.msk.bf16.gmra.mxu1 %vm1527_vm0, %v4138_v12 }
 0x112   :  { %6248 = vst [vmem:[#allocation6_spill] sm:$0xff] %v4746_v18  ;;  %1992 = vmatprep.mubr.bf16.mxu0 %v4139_v13  ;;  %3827 = vmatprep.mubr.msk.bf16.mxu1 %vm1527_vm0, %v4141_v14 }
 0x113   :  { %v1796_v19 = vpop.f32.mrf.mxu0  ;;  %v2228_v20 = vpop.f32.mrf.mxu1 }
 0x114   :  { %v4166_v19 = vld [vmem:[%s6193_s0 + $0x304] ss:$12 sps:$4 sm:$0xff]   ;;  %v4167_v20 = vld [vmem:[%s6193_s0 + $0x2a8] ss:$12 sps:$4 sm:$0xff]  }
 0x115   :  { %v4750_v21 = vpop.f32.mrf.mxu0  ;;  %v4752_v22 = vpop.f32.mrf.mxu1 }
 0x116   :  { %6249 = vst [vmem:[#allocation7_spill] sm:$0xff] %v4752_v22 }
 0x117   :  { %v1799_v27 = vpop.f32.mrf.mxu0  ;;  %v2231_v28 = vpop.f32.mrf.mxu1 }
 0x119   :  { %v4766_v29 = vpop.f32.mrf.mxu0  ;;  %1993 = vmatmul.mubr.bf16.gmra.mxu0 %v4142_v23  ;;  %v4768_v30 = vpop.f32.mrf.mxu1  ;;  %3828 = vmatmul.mubr.msk.bf16.gmra.mxu1 %vm1527_vm0, %v4143_v24 }
 0x11a   :  { %6250 = vst [vmem:[#allocation8_spill] sm:$0xff] %v4768_v30  ;;  %2000 = vmatprep.mubr.bf16.mxu0 %v4146_v25  ;;  %3831 = vmatprep.mubr.msk.bf16.mxu1 %vm1527_vm0, %v4147_v26 }
 0x11b   :  { %v1804_v31 = vpop.f32.mrf.mxu0  ;;  %v2236_v32 = vpop.f32.mrf.mxu1 }
 0x11d   :  { %v4772_v33 = vpop.f32.mrf.mxu0  ;;  %v4774_v34 = vpop.f32.mrf.mxu1 }
 0x11e   :  { %6251 = vst [vmem:[#allocation9_spill] sm:$0xff] %v4774_v34 }
 0x11f   :  { %v1807_v39 = vpop.f32.mrf.mxu0  ;;  %v2239_v40 = vpop.f32.mrf.mxu1 }
 0x121   :  { %v4788_v41 = vpop.f32.mrf.mxu0  ;;  %2001 = vmatmul.mubr.bf16.gmra.mxu0 %v4144_v35  ;;  %v4790_v42 = vpop.f32.mrf.mxu1  ;;  %3832 = vmatmul.mubr.msk.bf16.gmra.mxu1 %vm1527_vm0, %v4148_v36  ;;  %v4164_v35 = vld [vmem:[%s6193_s0 + $0x300] ss:$12 sps:$4 sm:$0xff]  }
 0x122   :  { %6252 = vst [vmem:[#allocation10_spill] sm:$0xff] %v4790_v42  ;;  %2008 = vmatprep.mubr.bf16.mxu0 %v4151_v37  ;;  %3835 = vmatprep.mubr.msk.bf16.mxu1 %vm1527_vm0, %v4152_v38  ;;  %v4168_v36 = vld [vmem:[%s6193_s0 + $0x2c0] ss:$12 sps:$4 sm:$0xff]   ;;  %v4171_v37 = vld [vmem:[%s6193_s0 + $0x31c] ss:$12 sps:$4 sm:$0xff]  }
 0x123   :  { %v1812_v43 = vpop.f32.mrf.mxu0  ;;  %v2244_v44 = vpop.f32.mrf.mxu1  ;;  %v4172_v38 = vld [vmem:[%s6193_s0 + $0x2d8] ss:$12 sps:$4 sm:$0xff]  }
 0x125   :  { %v4794_v45 = vpop.f32.mrf.mxu0  ;;  %v4796_v46 = vpop.f32.mrf.mxu1 }
 0x126   :  { %6253 = vst [vmem:[#allocation11_spill] sm:$0xff] %v4796_v46 }
 0x127   :  { %v1815_v51 = vpop.f32.mrf.mxu0  ;;  %v2247_v52 = vpop.f32.mrf.mxu1 }
 0x128   :  { %v4169_v51 = vld [vmem:[%s6193_s0 + $0x318] ss:$12 sps:$4 sm:$0xff]   ;;  %v4173_v52 = vld [vmem:[%s6193_s0 + $0x2f0] ss:$12 sps:$4 sm:$0xff]  }
 0x129   :  { %v4810_v53 = vpop.f32.mrf.mxu0  ;;  %2009 = vmatmul.mubr.bf16.gmra.mxu0 %v4149_v47  ;;  %v4812_v54 = vpop.f32.mrf.mxu1  ;;  %3836 = vmatmul.mubr.msk.bf16.gmra.mxu1 %vm1527_vm0, %v4153_v48 }
 0x12a   :  { %6254 = vst [vmem:[#allocation12_spill] sm:$0xff] %v4812_v54  ;;  %2016 = vmatprep.mubr.bf16.mxu0 %v4156_v49  ;;  %3839 = vmatprep.mubr.msk.bf16.mxu1 %vm1527_vm0, %v4157_v50 }
 0x12b   :  { %v1820_v55 = vpop.f32.mrf.mxu0  ;;  %v2252_v56 = vpop.f32.mrf.mxu1 }
 0x12c   :  { %v4176_v55 = vld [vmem:[%s6193_s0 + $0x334] ss:$12 sps:$4 sm:$0xff]  }
 0x12d   :  { %v4816_v59 = vpop.f32.mrf.mxu0  ;;  %v4818_v60 = vpop.f32.mrf.mxu1  ;;  %v4177_v56 = vld [vmem:[%s6193_s0 + $0x308] ss:$12 sps:$4 sm:$0xff]  }
 0x12e   :  { %6255 = vst [vmem:[#allocation13_spill] sm:$0xff] %v4818_v60 }
 0x12f   :  { %v1823_v3 = vpop.f32.mrf.mxu0  ;;  %v2255_v4 = vpop.f32.mrf.mxu1 }
 0x131   :  { %v4832_v7 = vpop.f32.mrf.mxu0  ;;  %2017 = vmatmul.mubr.bf16.gmra.mxu0 %v4154_v63  ;;  %v4834_v8 = vpop.f32.mrf.mxu1  ;;  %3840 = vmatmul.mubr.msk.bf16.gmra.mxu1 %vm1527_vm0, %v4158_v0 }
 0x132   :  { %6256 = vst [vmem:[#allocation14_spill] sm:$0xff] %v4834_v8  ;;  %2024 = vmatprep.mubr.bf16.mxu0 %v4161_v1  ;;  %3843 = vmatprep.mubr.msk.bf16.mxu1 %vm1527_vm0, %v4162_v2 }
 0x133   :  { %v1828_v11 = vpop.f32.mrf.mxu0  ;;  %v2260_v12 = vpop.f32.mrf.mxu1 }
 0x135   :  { %v4838_v13 = vpop.f32.mrf.mxu0  ;;  %v4840_v14 = vpop.f32.mrf.mxu1 }
 0x136   :  { %6257 = vst [vmem:[#allocation15_spill] sm:$0xff] %v4840_v14 }
 0x137   :  { %v1831_v23 = vpop.f32.mrf.mxu0  ;;  %v2263_v24 = vpop.f32.mrf.mxu1 }
 0x139   :  { %v4854_v25 = vpop.f32.mrf.mxu0  ;;  %2025 = vmatmul.mubr.bf16.gmra.mxu0 %v4159_v15  ;;  %v4856_v26 = vpop.f32.mrf.mxu1  ;;  %3844 = vmatmul.mubr.msk.bf16.gmra.mxu1 %vm1527_vm0, %v4163_v16  ;;  %v4174_v15 = vld [vmem:[%s6193_s0 + $0x330] ss:$12 sps:$4 sm:$0xff]   ;;  %v4178_v16 = vld [vmem:[%s6193_s0 + $0x320] ss:$12 sps:$4 sm:$0xff]  }
 0x13a   :  { %6258 = vst [vmem:[#allocation16_spill] sm:$0xff] %v4856_v26  ;;  %2032 = vmatprep.mubr.bf16.mxu0 %v4166_v19  ;;  %3847 = vmatprep.mubr.msk.bf16.mxu1 %vm1527_vm0, %v4167_v20  ;;  %v4181_v19 = vld [vmem:[%s6193_s0 + $0x34c] ss:$12 sps:$4 sm:$0xff]  }
 0x13b   :  { %v1836_v27 = vpop.f32.mrf.mxu0  ;;  %v2268_v28 = vpop.f32.mrf.mxu1  ;;  %v4182_v20 = vld [vmem:[%s6193_s0 + $0x338] ss:$12 sps:$4 sm:$0xff]  }
 0x13d   :  { %v4860_v31 = vpop.f32.mrf.mxu0  ;;  %v4862_v32 = vpop.f32.mrf.mxu1 }
 0x13e   :  { %6259 = vst [vmem:[#allocation17_spill] sm:$0xff] %v4862_v32 }
 0x13f   :  { %v1839_v39 = vpop.f32.mrf.mxu0  ;;  %v2271_v40 = vpop.f32.mrf.mxu1 }
 0x140   :  { %v4179_v39 = vld [vmem:[%s6193_s0 + $0x348] ss:$12 sps:$4 sm:$0xff]   ;;  %v4183_v40 = vld [vmem:[%s6193_s0 + $0x350] ss:$12 sps:$4 sm:$0xff]  }
 0x141   :  { %v4876_v43 = vpop.f32.mrf.mxu0  ;;  %2033 = vmatmul.mubr.bf16.gmra.mxu0 %v4164_v35  ;;  %v4878_v44 = vpop.f32.mrf.mxu1  ;;  %3848 = vmatmul.mubr.msk.bf16.gmra.mxu1 %vm1527_vm0, %v4168_v36 }
 0x142   :  { %6260 = vst [vmem:[#allocation18_spill] sm:$0xff] %v4878_v44  ;;  %2040 = vmatprep.mubr.bf16.mxu0 %v4171_v37  ;;  %3851 = vmatprep.mubr.msk.bf16.mxu1 %vm1527_vm0, %v4172_v38 }
 0x143   :  { %v1844_v47 = vpop.f32.mrf.mxu0  ;;  %v2276_v48 = vpop.f32.mrf.mxu1 }
 0x144   :  { %v4186_v47 = vld [vmem:[%s6193_s0 + $0x364] ss:$12 sps:$4 sm:$0xff]   ;;  %v4187_v48 = vld [vmem:[%s6193_s0 + $0x368] ss:$12 sps:$4 sm:$0xff]  }
 0x145   :  { %v4882_v49 = vpop.f32.mrf.mxu0  ;;  %v4884_v50 = vpop.f32.mrf.mxu1 }
 0x146   :  { %6261 = vst [vmem:[#allocation19_spill] sm:$0xff] %v4882_v49  ;;  %6262 = vst [vmem:[#allocation20_spill] sm:$0xff] %v4884_v50 }
 0x147   :  { %v1847_v63 = vpop.f32.mrf.mxu0  ;;  %v2279_v0 = vpop.f32.mrf.mxu1 }
 0x149   :  { %v4898_v1 = vpop.f32.mrf.mxu0  ;;  %2041 = vmatmul.mubr.bf16.gmra.mxu0 %v4169_v51  ;;  %v4900_v2 = vpop.f32.mrf.mxu1  ;;  %3852 = vmatmul.mubr.msk.bf16.gmra.mxu1 %vm1527_vm0, %v4173_v52 }
 0x14a   :  { %6263 = vst [vmem:[#allocation21_spill] sm:$0xff] %v4900_v2  ;;  %2048 = vmatprep.mubr.bf16.mxu0 %v4176_v55  ;;  %3855 = vmatprep.mubr.msk.bf16.mxu1 %vm1527_vm0, %v4177_v56 }
 0x14b   :  { %v1852_v3 = vpop.f32.mrf.mxu0  ;;  %v2284_v4 = vpop.f32.mrf.mxu1 }
 0x14d   :  { %v4904_v11 = vpop.f32.mrf.mxu0  ;;  %v4906_v12 = vpop.f32.mrf.mxu1 }
 0x14e   :  { %6264 = vst [vmem:[#allocation22_spill] sm:$0xff] %v4904_v11  ;;  %6265 = vst [vmem:[#allocation23_spill] sm:$0xff] %v4906_v12 }
 0x14f   :  { %v1855_v23 = vpop.f32.mrf.mxu0  ;;  %v2287_v24 = vpop.f32.mrf.mxu1 }
 0x151   :  { %v4920_v27 = vpop.f32.mrf.mxu0  ;;  %2049 = vmatmul.mubr.bf16.gmra.mxu0 %v4174_v15  ;;  %v4922_v28 = vpop.f32.mrf.mxu1  ;;  %3856 = vmatmul.mubr.msk.bf16.gmra.mxu1 %vm1527_vm0, %v4178_v16  ;;  %v4184_v15 = vld [vmem:[%s6193_s0 + $0x360] ss:$12 sps:$4 sm:$0xff]  }
 0x152   :  { %6266 = vst [vmem:[#allocation24_spill] sm:$0xff] %v4920_v27  ;;  %6267 = vst [vmem:[#allocation25_spill] sm:$0xff] %v4922_v28  ;;  %2056 = vmatprep.mubr.bf16.mxu0 %v4181_v19  ;;  %3859 = vmatprep.mubr.msk.bf16.mxu1 %vm1527_vm0, %v4182_v20  ;;  %v4188_v16 = vld [vmem:[%s6193_s0 + $0x380] ss:$12 sps:$4 sm:$0xff]   ;;  %v4191_v19 = vld [vmem:[%s6193_s0 + $0x37c] ss:$12 sps:$4 sm:$0xff]  }
 0x153   :  { %v1860_v35 = vpop.f32.mrf.mxu0  ;;  %v2292_v36 = vpop.f32.mrf.mxu1  ;;  %v4192_v20 = vld [vmem:[%s6193_s0 + $0x398] ss:$12 sps:$4 sm:$0xff]  }
 0x155   :  { %v4926_v37 = vpop.f32.mrf.mxu0  ;;  %v4928_v38 = vpop.f32.mrf.mxu1 }
 0x156   :  { %6268 = vst [vmem:[#allocation26_spill] sm:$0xff] %v4926_v37  ;;  %6269 = vst [vmem:[#allocation27_spill] sm:$0xff] %v4928_v38 }
 0x157   :  { %v1863_v51 = vpop.f32.mrf.mxu0  ;;  %v2295_v52 = vpop.f32.mrf.mxu1 }
 0x158   :  { %v4189_v51 = vld [vmem:[%s6193_s0 + $0x378] ss:$12 sps:$4 sm:$0xff]   ;;  %v4193_v52 = vld [vmem:[%s6193_s0 + $0x3b0] ss:$12 sps:$4 sm:$0xff]  }
 0x159   :  { %v4942_v55 = vpop.f32.mrf.mxu0  ;;  %2057 = vmatmul.mubr.bf16.gmra.mxu0 %v4179_v39  ;;  %v4944_v56 = vpop.f32.mrf.mxu1  ;;  %3860 = vmatmul.mubr.msk.bf16.gmra.mxu1 %vm1527_vm0, %v4183_v40 }
 0x15a   :  { %6270 = vst [vmem:[#allocation28_spill] sm:$0xff] %v4942_v55  ;;  %6271 = vst [vmem:[#allocation29_spill] sm:$0xff] %v4944_v56  ;;  %2064 = vmatprep.mubr.bf16.mxu0 %v4186_v47  ;;  %3863 = vmatprep.mubr.msk.bf16.mxu1 %vm1527_vm0, %v4187_v48 }
 0x15b   :  { %v1868_v63 = vpop.f32.mrf.mxu0  ;;  %v2300_v0 = vpop.f32.mrf.mxu1 }
 0x15c   :  { %v4196_v63 = vld [vmem:[%s6193_s0 + $0x394] ss:$12 sps:$4 sm:$0xff]  }
 0x15d   :  { %v4948_v3 = vpop.f32.mrf.mxu0  ;;  %v4950_v4 = vpop.f32.mrf.mxu1  ;;  %v4197_v0 = vld [vmem:[%s6193_s0 + $0x3c8] ss:$12 sps:$4 sm:$0xff]  }
 0x15e   :  { %6272 = vst [vmem:[#allocation30_spill] sm:$0xff] %v4948_v3  ;;  %6273 = vst [vmem:[#allocation31_spill] sm:$0xff] %v4950_v4 }
 0x15f   :  { %v1871_v23 = vpop.f32.mrf.mxu0  ;;  %v2303_v24 = vpop.f32.mrf.mxu1 }
 0x161   :  { %v4964_v35 = vpop.f32.mrf.mxu0  ;;  %2065 = vmatmul.mubr.bf16.gmra.mxu0 %v4184_v15  ;;  %v4966_v36 = vpop.f32.mrf.mxu1  ;;  %3864 = vmatmul.mubr.msk.bf16.gmra.mxu1 %vm1527_vm0, %v4188_v16 }
 0x162   :  { %6274 = vst [vmem:[#allocation32_spill] sm:$0xff] %v4964_v35  ;;  %6275 = vst [vmem:[#allocation33_spill] sm:$0xff] %v4966_v36  ;;  %2072 = vmatprep.mubr.bf16.mxu0 %v4191_v19  ;;  %3867 = vmatprep.mubr.msk.bf16.mxu1 %vm1527_vm0, %v4192_v20 }
 0x163   :  { %v1876_v39 = vpop.f32.mrf.mxu0  ;;  %v2308_v40 = vpop.f32.mrf.mxu1 }
 0x165   :  { %v4970_v47 = vpop.f32.mrf.mxu0  ;;  %v4972_v48 = vpop.f32.mrf.mxu1 }
 0x166   :  { %6276 = vst [vmem:[#allocation34_spill] sm:$0xff] %v4970_v47  ;;  %6277 = vst [vmem:[#allocation35_spill] sm:$0xff] %v4972_v48 }
 0x167   :  { %v1879_v15 = vpop.f32.mrf.mxu0  ;;  %v2311_v16 = vpop.f32.mrf.mxu1 }
 0x168   :  { %v4194_v15 = vld [vmem:[%s6193_s0 + $0x390] ss:$12 sps:$4 sm:$0xff]  }
 0x169   :  { %v4986_v19 = vpop.f32.mrf.mxu0  ;;  %2073 = vmatmul.mubr.bf16.gmra.mxu0 %v4189_v51  ;;  %v4988_v20 = vpop.f32.mrf.mxu1  ;;  %3868 = vmatmul.mubr.msk.bf16.gmra.mxu1 %vm1527_vm0, %v4193_v52  ;;  %v4198_v51 = vld [vmem:[%s6193_s0 + $0x3e0] ss:$12 sps:$4 sm:$0xff]  }
 0x16a   :  { %6278 = vst [vmem:[#allocation36_spill] sm:$0xff] %v4986_v19  ;;  %6279 = vst [vmem:[#allocation37_spill] sm:$0xff] %v4988_v20  ;;  %2080 = vmatprep.mubr.bf16.mxu0 %v4196_v63  ;;  %3871 = vmatprep.mubr.msk.bf16.mxu1 %vm1527_vm0, %v4197_v0  ;;  %v4201_v52 = vld [vmem:[%s6193_s0 + $0x3ac] ss:$12 sps:$4 sm:$0xff]  }
 0x16b   :  { %v1884_v23 = vpop.f32.mrf.mxu0  ;;  %v2316_v24 = vpop.f32.mrf.mxu1  ;;  %v4202_v63 = vld [vmem:[%s6193_s0 + $0x3f8] ss:$12 sps:$4 sm:$0xff]  }
 0x16d   :  { %v4992_v39 = vpop.f32.mrf.mxu0  ;;  %v4994_v40 = vpop.f32.mrf.mxu1 }
 0x16e   :  { %6280 = vst [vmem:[#allocation38_spill] sm:$0xff] %v4992_v39  ;;  %6281 = vst [vmem:[#allocation39_spill] sm:$0xff] %v4994_v40 }
 0x16f   :  { %v1887_v0 = vpop.f32.mrf.mxu0  ;;  %v2319_v16 = vpop.f32.mrf.mxu1 }
 0x170   :  { %v4199_v0 = vld [vmem:[%s6193_s0 + $0x3a8] ss:$12 sps:$4 sm:$0xff]  }
 0x171   :  { %v5008_v23 = vpop.f32.mrf.mxu0  ;;  %2081 = vmatmul.mubr.bf16.gmra.mxu0 %v4194_v15  ;;  %v5010_v24 = vpop.f32.mrf.mxu1  ;;  %3872 = vmatmul.mubr.msk.bf16.gmra.mxu1 %vm1527_vm0, %v4198_v51  ;;  %v4203_v15 = vld [vmem:[%s6193_s0 + $0x410] ss:$12 sps:$4 sm:$0xff]  }
 0x172   :  { %6282 = vst [vmem:[#allocation40_spill] sm:$0xff] %v5008_v23  ;;  %6283 = vst [vmem:[#allocation41_spill] sm:$0xff] %v5010_v24  ;;  %2088 = vmatprep.mubr.bf16.mxu0 %v4201_v52  ;;  %3875 = vmatprep.mubr.msk.bf16.mxu1 %vm1527_vm0, %v4202_v63  ;;  %v4206_v51 = vld [vmem:[%s6193_s0 + $0x3c4] ss:$12 sps:$4 sm:$0xff]  }
 0x173   :  { %v1892_v48 = vpop.f32.mrf.mxu0  ;;  %v2324_v40 = vpop.f32.mrf.mxu1 }
 0x174   :  { %v4207_v48 = vld [vmem:[%s6193_s0 + $0x428] ss:$12 sps:$4 sm:$0xff]  }
 0x175   :  { %v5014_v36 = vpop.f32.mrf.mxu0  ;;  %v5016_v20 = vpop.f32.mrf.mxu1 }
 0x176   :  { %6284 = vst [vmem:[#allocation42_spill] sm:$0xff] %v5014_v36  ;;  %6285 = vst [vmem:[#allocation43_spill] sm:$0xff] %v5016_v20 }
 0x177   :  { %v1895_v40 = vpop.f32.mrf.mxu0  ;;  %v2327_v52 = vpop.f32.mrf.mxu1 }
 0x178   :  { %v4204_v40 = vld [vmem:[%s6193_s0 + $0x3c0] ss:$12 sps:$4 sm:$0xff]  }
 0x179   :  { %v5030_v63 = vpop.f32.mrf.mxu0  ;;  %2089 = vmatmul.mubr.bf16.gmra.mxu0 %v4199_v0  ;;  %v5032_v16 = vpop.f32.mrf.mxu1  ;;  %3876 = vmatmul.mubr.msk.bf16.gmra.mxu1 %vm1527_vm0, %v4203_v15  ;;  %v4208_v0 = vld [vmem:[%s6193_s0 + $0x440] ss:$12 sps:$4 sm:$0xff]   ;;  %v4211_v15 = vld [vmem:[%s6193_s0 + $0x3dc] ss:$12 sps:$4 sm:$0xff]  }
 0x17a   :  { %6286 = vst [vmem:[#allocation44_spill] sm:$0xff] %v5030_v63  ;;  %6287 = vst [vmem:[#allocation45_spill] sm:$0xff] %v5032_v16  ;;  %2096 = vmatprep.mubr.bf16.mxu0 %v4206_v51  ;;  %3879 = vmatprep.mubr.msk.bf16.mxu1 %vm1527_vm0, %v4207_v48 }
 0x17b   :  { %v1900_v20 = vpop.f32.mrf.mxu0  ;;  %v2332_v24 = vpop.f32.mrf.mxu1 }
 0x17c   :  { %v4212_v20 = vld [vmem:[%s6193_s0 + $0x458] ss:$12 sps:$4 sm:$0xff]  }
 0x17d   :  { %v5036_v38 = vpop.f32.mrf.mxu0  ;;  %v5038_v4 = vpop.f32.mrf.mxu1 }
 0x17e   :  { %6288 = vst [vmem:[#allocation46_spill] sm:$0xff] %v5036_v38  ;;  %6289 = vst [vmem:[#allocation47_spill] sm:$0xff] %v5038_v4 }
 0x17f   :  { %v1903_v24 = vpop.f32.mrf.mxu0  ;;  %v2335_v51 = vpop.f32.mrf.mxu1 }
 0x180   :  { %v4209_v24 = vld [vmem:[%s6193_s0 + $0x3d8] ss:$12 sps:$4 sm:$0xff]  }
 0x181   :  { %v5052_v48 = vpop.f32.mrf.mxu0  ;;  %2097 = vmatmul.mubr.bf16.gmra.mxu0 %v4204_v40  ;;  %v5054_v52 = vpop.f32.mrf.mxu1  ;;  %3880 = vmatmul.mubr.msk.bf16.gmra.mxu1 %vm1527_vm0, %v4208_v0  ;;  %v4213_v40 = vld [vmem:[%s6193_s0 + $0x470] ss:$12 sps:$4 sm:$0xff]   ;;  %v4216_v0 = vld [vmem:[%s6193_s0 + $0x3f4] ss:$12 sps:$4 sm:$0xff]  }
 0x182   :  { %6290 = vst [vmem:[#allocation48_spill] sm:$0xff] %v5052_v48  ;;  %6291 = vst [vmem:[#allocation49_spill] sm:$0xff] %v5054_v52  ;;  %2104 = vmatprep.mubr.bf16.mxu0 %v4211_v15  ;;  %3883 = vmatprep.mubr.msk.bf16.mxu1 %vm1527_vm0, %v4212_v20 }
 0x183   :  { %v1908_v4 = vpop.f32.mrf.mxu0  ;;  %v2340_v16 = vpop.f32.mrf.mxu1 }
 0x184   :  { %v4217_v4 = vld [vmem:[%s6193_s0 + $0x488] ss:$12 sps:$4 sm:$0xff]  }
 0x185   :  { %v5058_v28 = vpop.f32.mrf.mxu0  ;;  %v5060_v56 = vpop.f32.mrf.mxu1 }
 0x186   :  { %6292 = vst [vmem:[#allocation50_spill] sm:$0xff] %v5058_v28  ;;  %6293 = vst [vmem:[#allocation51_spill] sm:$0xff] %v5060_v56 }
 0x187   :  { %v1911_v16 = vpop.f32.mrf.mxu0  ;;  %v2343_v15 = vpop.f32.mrf.mxu1 }
 0x188   :  { %v4214_v16 = vld [vmem:[%s6193_s0 + $0x3f0] ss:$12 sps:$4 sm:$0xff]  }
 0x189   :  { %v5074_v20 = vpop.f32.mrf.mxu0  ;;  %2105 = vmatmul.mubr.bf16.gmra.mxu0 %v4209_v24  ;;  %v5076_v51 = vpop.f32.mrf.mxu1  ;;  %3884 = vmatmul.mubr.msk.bf16.gmra.mxu1 %vm1527_vm0, %v4213_v40  ;;  %v4218_v24 = vld [vmem:[%s6193_s0 + $0x4a0] ss:$12 sps:$4 sm:$0xff]  }
 0x18a   :  { %6294 = vst [vmem:[#allocation52_spill] sm:$0xff] %v5074_v20  ;;  %6295 = vst [vmem:[#allocation53_spill] sm:$0xff] %v5076_v51  ;;  %2112 = vmatprep.mubr.bf16.mxu0 %v4216_v0  ;;  %3887 = vmatprep.mubr.msk.bf16.mxu1 %vm1527_vm0, %v4217_v4  ;;  %v4221_v40 = vld [vmem:[%s6193_s0 + $0x40c] ss:$12 sps:$4 sm:$0xff]  }
 0x18b   :  { %v1916_v56 = vpop.f32.mrf.mxu0  ;;  %v2348_v52 = vpop.f32.mrf.mxu1 }
 0x18c   :  { %v4222_v56 = vld [vmem:[%s6193_s0 + $0x4b8] ss:$12 sps:$4 sm:$0xff]  }
 0x18d   :  { %v5080_v50 = vpop.f32.mrf.mxu0  ;;  %v5082_v12 = vpop.f32.mrf.mxu1 }
 0x18e   :  { %6296 = vst [vmem:[#allocation54_spill] sm:$0xff] %v5080_v50  ;;  %6297 = vst [vmem:[#allocation55_spill] sm:$0xff] %v5082_v12 }
 0x18f   :  { %v1919_v52 = vpop.f32.mrf.mxu0  ;;  %v2351_v0 = vpop.f32.mrf.mxu1 }
 0x190   :  { %v4219_v52 = vld [vmem:[%s6193_s0 + $0x408] ss:$12 sps:$4 sm:$0xff]  }
 0x191   :  { %v5096_v4 = vpop.f32.mrf.mxu0  ;;  %2113 = vmatmul.mubr.bf16.gmra.mxu0 %v4214_v16  ;;  %v5098_v15 = vpop.f32.mrf.mxu1  ;;  %3888 = vmatmul.mubr.msk.bf16.gmra.mxu1 %vm1527_vm0, %v4218_v24  ;;  %v4223_v16 = vld [vmem:[%s6193_s0 + $0x4d0] ss:$12 sps:$4 sm:$0xff]  }
 0x192   :  { %2120 = vmatprep.mubr.bf16.mxu0 %v4221_v40  ;;  %3891 = vmatprep.mubr.msk.bf16.mxu1 %vm1527_vm0, %v4222_v56  ;;  %v4226_v24 = vld [vmem:[%s6193_s0 + $0x424] ss:$12 sps:$4 sm:$0xff]  }
 0x193   :  { %v1924_v12 = vpop.f32.mrf.mxu0  ;;  %v5102_v51 = vpop.f32.mrf.mxu1 }
 0x194   :  { %v4227_v12 = vld [vmem:[%s6193_s0 + $0x4e8] ss:$12 sps:$4 sm:$0xff]  }
 0x195   :  { %v5104_v44 = vpop.f32.mrf.mxu0  ;;  %v5106_v2 = vpop.f32.mrf.mxu1 }
 0x197   :  { %v1927_v40 = vpop.f32.mrf.mxu0  ;;  %v5120_v56 = vpop.f32.mrf.mxu1 }
 0x198   :  { %v4224_v40 = vld [vmem:[%s6193_s0 + $0x420] ss:$12 sps:$4 sm:$0xff]  }
 0x199   :  { %v5122_v0 = vpop.f32.mrf.mxu0  ;;  %2121 = vmatmul.mubr.bf16.gmra.mxu0 %v4219_v52  ;;  %v5124_v14 = vpop.f32.mrf.mxu1  ;;  %3892 = vmatmul.mubr.msk.bf16.gmra.mxu1 %vm1527_vm0, %v4223_v16  ;;  %v4228_v52 = vld [vmem:[%s6193_s0 + $0x500] ss:$12 sps:$4 sm:$0xff]   ;;  %v4231_v16 = vld [vmem:[%s6193_s0 + $0x43c] ss:$12 sps:$4 sm:$0xff]  }
 0x19a   :  { %2128 = vmatprep.mubr.bf16.mxu0 %v4226_v24  ;;  %3895 = vmatprep.mubr.msk.bf16.mxu1 %vm1527_vm0, %v4227_v12 }
 0x19b   :  { %v1932_v32 = vpop.f32.mrf.mxu0  ;;  %v5128_v8 = vpop.f32.mrf.mxu1 }
 0x19c   :  { %v4232_v32 = vld [vmem:[%s6193_s0 + $0x518] ss:$12 sps:$4 sm:$0xff]  }
 0x19d   :  { %v5130_v26 = vpop.f32.mrf.mxu0  ;;  %v5132_v46 = vpop.f32.mrf.mxu1 }
 0x19f   :  { %v1935_v24 = vpop.f32.mrf.mxu0  ;;  %v5146_v12 = vpop.f32.mrf.mxu1 }
 0x1a0   :  { %v4229_v24 = vld [vmem:[%s6193_s0 + $0x438] ss:$12 sps:$4 sm:$0xff]  }
 0x1a1   :  { %v5148_v60 = vpop.f32.mrf.mxu0  ;;  %2129 = vmatmul.mubr.bf16.gmra.mxu0 %v4224_v40  ;;  %v5150_v42 = vpop.f32.mrf.mxu1  ;;  %3896 = vmatmul.mubr.msk.bf16.gmra.mxu1 %vm1527_vm0, %v4228_v52  ;;  %v4233_v40 = vld [vmem:[%s6193_s0 + $0x530] ss:$12 sps:$4 sm:$0xff]   ;;  %v4236_v52 = vld [vmem:[%s6193_s0 + $0x454] ss:$12 sps:$4 sm:$0xff]  }
 0x1a2   :  { %2136 = vmatprep.mubr.bf16.mxu0 %v4231_v16  ;;  %3899 = vmatprep.mubr.msk.bf16.mxu1 %vm1527_vm0, %v4232_v32 }
 0x1a3   :  { %v1940_v54 = vpop.f32.mrf.mxu0  ;;  %v5154_v22 = vpop.f32.mrf.mxu1 }
 0x1a4   :  { %v4237_v54 = vld [vmem:[%s6193_s0 + $0x548] ss:$12 sps:$4 sm:$0xff]  }
 0x1a5   :  { %v5156_v34 = vpop.f32.mrf.mxu0  ;;  %v5158_v18 = vpop.f32.mrf.mxu1 }
 0x1a7   :  { %v1943_v16 = vpop.f32.mrf.mxu0  ;;  %v5172_v32 = vpop.f32.mrf.mxu1 }
 0x1a8   :  { %v4234_v16 = vld [vmem:[%s6193_s0 + $0x450] ss:$12 sps:$4 sm:$0xff]  }
 0x1a9   :  { %v5174_v30 = vpop.f32.mrf.mxu0  ;;  %2137 = vmatmul.mubr.bf16.gmra.mxu0 %v4229_v24  ;;  %v5176_v62 = vpop.f32.mrf.mxu1  ;;  %3900 = vmatmul.mubr.msk.bf16.gmra.mxu1 %vm1527_vm0, %v4233_v40  ;;  %v4238_v24 = vld [vmem:[%s6193_s0 + $0x560] ss:$12 sps:$4 sm:$0xff]  }
 0x1aa   :  { %2144 = vmatprep.mubr.bf16.mxu0 %v4236_v52  ;;  %3903 = vmatprep.mubr.msk.bf16.mxu1 %vm1527_vm0, %v4237_v54  ;;  %v4241_v40 = vld [vmem:[%s6193_s0 + $0x46c] ss:$12 sps:$4 sm:$0xff]  }
 0x1ab   :  { %v1948_v10 = vpop.f32.mrf.mxu0  ;;  %v5180_v58 = vpop.f32.mrf.mxu1 }
 0x1ac   :  { %v4242_v10 = vld [vmem:[%s6193_s0 + $0x578] ss:$12 sps:$4 sm:$0xff]  }
 0x1ad   :  { %v5182_v6 = vpop.f32.mrf.mxu0  ;;  %v5184_v28 = vpop.f32.mrf.mxu1 }
 0x1af   :  { %v1951_v52 = vpop.f32.mrf.mxu0  ;;  %v5198_v54 = vpop.f32.mrf.mxu1 }
 0x1b0   :  { %v4239_v52 = vld [vmem:[%s6193_s0 + $0x468] ss:$12 sps:$4 sm:$0xff]  }
 0x1b1   :  { %v5200_v50 = vpop.f32.mrf.mxu0  ;;  %2145 = vmatmul.mubr.bf16.gmra.mxu0 %v4234_v16  ;;  %v5202_v48 = vpop.f32.mrf.mxu1  ;;  %3904 = vmatmul.mubr.msk.bf16.gmra.mxu1 %vm1527_vm0, %v4238_v24  ;;  %v4243_v16 = vld [vmem:[%s6193_s0 + $0x590] ss:$12 sps:$4 sm:$0xff]  }
 0x1b2   :  { %2152 = vmatprep.mubr.bf16.mxu0 %v4241_v40  ;;  %3907 = vmatprep.mubr.msk.bf16.mxu1 %vm1527_vm0, %v4242_v10  ;;  %v4246_v24 = vld [vmem:[%s6193_s0 + $0x484] ss:$12 sps:$4 sm:$0xff]  }
 0x1b3   :  { %v1956_v20 = vpop.f32.mrf.mxu0  ;;  %v5206_v36 = vpop.f32.mrf.mxu1 }
 0x1b4   :  { %v4247_v20 = vld [vmem:[%s6193_s0 + $0x5a8] ss:$12 sps:$4 sm:$0xff]  }
 0x1b5   :  { %v5208_v38 = vpop.f32.mrf.mxu0  ;;  %v5210_v23 = vpop.f32.mrf.mxu1 }
 0x1b6   :  { %6298 = vst [vmem:[#allocation56_spill] sm:$0xff] %v5210_v23 }
 0x1b7   :  { %v1959_v40 = vpop.f32.mrf.mxu0  ;;  %v5224_v10 = vpop.f32.mrf.mxu1 }
 0x1b8   :  { %6299 = vst [vmem:[#allocation57_spill] sm:$0xff] %v5224_v10  ;;  %v4244_v40 = vld [vmem:[%s6193_s0 + $0x480] ss:$12 sps:$4 sm:$0xff]  }
 0x1b9   :  { %v5226_v63 = vpop.f32.mrf.mxu0  ;;  %2153 = vmatmul.mubr.bf16.gmra.mxu0 %v4239_v52  ;;  %v5228_v47 = vpop.f32.mrf.mxu1  ;;  %3908 = vmatmul.mubr.msk.bf16.gmra.mxu1 %vm1527_vm0, %v4243_v16  ;;  %v4248_v52 = vld [vmem:[%s6193_s0 + $0x5c0] ss:$12 sps:$4 sm:$0xff]   ;;  %v4251_v16 = vld [vmem:[%s6193_s0 + $0x49c] ss:$12 sps:$4 sm:$0xff]  }
 0x1ba   :  { %6300 = vst [vmem:[#allocation58_spill] sm:$0xff] %v5228_v47  ;;  %2160 = vmatprep.mubr.bf16.mxu0 %v4246_v24  ;;  %3911 = vmatprep.mubr.msk.bf16.mxu1 %vm1527_vm0, %v4247_v20 }
 0x1bb   :  { %v1964_v39 = vpop.f32.mrf.mxu0  ;;  %v5232_v35 = vpop.f32.mrf.mxu1 }
 0x1bc   :  { %6301 = vst [vmem:[#allocation59_spill] sm:$0xff] %v5232_v35  ;;  %v4252_v39 = vld [vmem:[%s6193_s0 + $0x5d8] ss:$12 sps:$4 sm:$0xff]  }
 0x1bd   :  { %v5234_v19 = vpop.f32.mrf.mxu0  ;;  %v5236_v37 = vpop.f32.mrf.mxu1 }
 0x1be   :  { %6302 = vst [vmem:[#allocation60_spill] sm:$0xff] %v5236_v37 }
 0x1bf   :  { %v1967_v24 = vpop.f32.mrf.mxu0  ;;  %v5250_v20 = vpop.f32.mrf.mxu1 }
 0x1c0   :  { %6303 = vst [vmem:[#allocation61_spill] sm:$0xff] %v5250_v20  ;;  %v4249_v24 = vld [vmem:[%s6193_s0 + $0x498] ss:$12 sps:$4 sm:$0xff]  }
 0x1c1   :  { %v5252_v37 = vpop.f32.mrf.mxu0  ;;  %2161 = vmatmul.mubr.bf16.gmra.mxu0 %v4244_v40  ;;  %v5254_v3 = vpop.f32.mrf.mxu1  ;;  %3912 = vmatmul.mubr.msk.bf16.gmra.mxu1 %vm1527_vm0, %v4248_v52  ;;  %v4253_v40 = vld [vmem:[%s6193_s0 + $0x5f0] ss:$12 sps:$4 sm:$0xff]   ;;  %v4256_v52 = vld [vmem:[%s6193_s0 + $0x4b4] ss:$12 sps:$4 sm:$0xff]  }
 0x1c2   :  { %6304 = vst [vmem:[#allocation62_spill] sm:$0xff] %v5254_v3  ;;  %2168 = vmatprep.mubr.bf16.mxu0 %v4251_v16  ;;  %3915 = vmatprep.mubr.msk.bf16.mxu1 %vm1527_vm0, %v4252_v39 }
 0x1c3   :  { %v1972_v35 = vpop.f32.mrf.mxu0  ;;  %v5258_v27 = vpop.f32.mrf.mxu1 }
 0x1c4   :  { %6305 = vst [vmem:[#allocation63_spill] sm:$0xff] %v5258_v27  ;;  %v4257_v35 = vld [vmem:[%s6193_s0 + $0x608] ss:$12 sps:$4 sm:$0xff]  }
 0x1c5   :  { %v5260_v47 = vpop.f32.mrf.mxu0  ;;  %v5262_v55 = vpop.f32.mrf.mxu1 }
 0x1c6   :  { %6306 = vst [vmem:[#allocation64_spill] sm:$0xff] %v5262_v55 }
 0x1c7   :  { %v1975_v16 = vpop.f32.mrf.mxu0  ;;  %v5276_v39 = vpop.f32.mrf.mxu1 }
 0x1c8   :  { %6307 = vst [vmem:[#allocation65_spill] sm:$0xff] %v5276_v39  ;;  %v4254_v16 = vld [vmem:[%s6193_s0 + $0x4b0] ss:$12 sps:$4 sm:$0xff]  }
 0x1c9   :  { %v5278_v55 = vpop.f32.mrf.mxu0  ;;  %2169 = vmatmul.mubr.bf16.gmra.mxu0 %v4249_v24  ;;  %v5280_v27 = vpop.f32.mrf.mxu1  ;;  %3916 = vmatmul.mubr.msk.bf16.gmra.mxu1 %vm1527_vm0, %v4253_v40  ;;  %v4258_v24 = vld [vmem:[%s6193_s0 + $0x620] ss:$12 sps:$4 sm:$0xff]  }
 0x1ca   :  { %6308 = vst [vmem:[#allocation66_spill] sm:$0xff] %v5280_v27  ;;  %2176 = vmatprep.mubr.bf16.mxu0 %v4256_v52  ;;  %3919 = vmatprep.mubr.msk.bf16.mxu1 %vm1527_vm0, %v4257_v35  ;;  %v4261_v40 = vld [vmem:[%s6193_s0 + $0x4cc] ss:$12 sps:$4 sm:$0xff]  }
 0x1cb   :  { %v1980_v3 = vpop.f32.mrf.mxu0  ;;  %v5284_v20 = vpop.f32.mrf.mxu1 }
 0x1cc   :  { %6309 = vst [vmem:[#allocation67_spill] sm:$0xff] %v5284_v20  ;;  %v4262_v3 = vld [vmem:[%s6193_s0 + $0x638] ss:$12 sps:$4 sm:$0xff]  }
 0x1cd   :  { %v5286_v10 = vpop.f32.mrf.mxu0  ;;  %v5288_v49 = vpop.f32.mrf.mxu1 }
 0x1ce   :  { %6310 = vst [vmem:[#allocation68_spill] sm:$0xff] %v5288_v49 }
 0x1cf   :  { %v1983_v52 = vpop.f32.mrf.mxu0  ;;  %v5302_v35 = vpop.f32.mrf.mxu1 }
 0x1d0   :  { %6311 = vst [vmem:[#allocation69_spill] sm:$0xff] %v5302_v35  ;;  %v4259_v52 = vld [vmem:[%s6193_s0 + $0x4c8] ss:$12 sps:$4 sm:$0xff]  }
 0x1d1   :  { %v5304_v49 = vpop.f32.mrf.mxu0  ;;  %2177 = vmatmul.mubr.bf16.gmra.mxu0 %v4254_v16  ;;  %v5306_v20 = vpop.f32.mrf.mxu1  ;;  %3920 = vmatmul.mubr.msk.bf16.gmra.mxu1 %vm1527_vm0, %v4258_v24  ;;  %v4263_v16 = vld [vmem:[%s6193_s0 + $0x650] ss:$12 sps:$4 sm:$0xff]  }
 0x1d2   :  { %6312 = vst [vmem:[#allocation70_spill] sm:$0xff] %v5306_v20  ;;  %2184 = vmatprep.mubr.bf16.mxu0 %v4261_v40  ;;  %3923 = vmatprep.mubr.msk.bf16.mxu1 %vm1527_vm0, %v4262_v3  ;;  %v4266_v24 = vld [vmem:[%s6193_s0 + $0x4e4] ss:$12 sps:$4 sm:$0xff]   ;;  %v5335_v20 = vadd.f32 %v5098_v15, %v4722_v5 }
 0x1d3   :  { %v1988_v27 = vpop.f32.mrf.mxu0  ;;  %v5310_v39 = vpop.f32.mrf.mxu1 }
 0x1d4   :  { %6313 = vst [vmem:[#allocation71_spill] sm:$0xff] %v5310_v39  ;;  %v4267_v27 = vld [vmem:[%s6193_s0 + $0x668] ss:$12 sps:$4 sm:$0xff]  }
 0x1d5   :  { %v5312_v23 = vpop.f32.mrf.mxu0  ;;  %v5314_v11 = vpop.f32.mrf.mxu1 }
 0x1d6   :  { %6314 = vst [vmem:[#allocation72_spill] sm:$0xff] %v5312_v23  ;;  %6315 = vst [vmem:[#allocation73_spill] sm:$0xff] %v5314_v11 }
 0x1d7   :  { %v1991_v40 = vpop.f32.mrf.mxu0  ;;  %v5328_v3 = vpop.f32.mrf.mxu1 }
 0x1d8   :  { %6316 = vst [vmem:[#allocation74_spill] sm:$0xff] %v5328_v3  ;;  %v5343_v3 = vadd.f32 %v5102_v51, %v4700_v57  ;;  %v5360_v57 = vadd.f32 %v5106_v2, %v4728_v9  ;;  %v5375_v9 = vadd.f32 %v5120_v56, %v4706_v61  ;;  %v6346_v2 = vld [vmem:[#allocation30_spill] sm:$0xff] }
 0x1d9   :  { %v5330_v11 = vpop.f32.mrf.mxu0  ;;  %2185 = vmatmul.mubr.bf16.gmra.mxu0 %v4259_v52  ;;  %v3829_v39 = vpop.f32.mrf.mxu1  ;;  %3924 = vmatmul.mubr.msk.bf16.gmra.mxu1 %vm1527_vm0, %v4263_v16  ;;  %v6347_v52 = vld [vmem:[#allocation60_spill] sm:$0xff] }
 0x1da   :  { %v5338_v35 = vadd.f32 %v3829_v39, %v5122_v0  ;;  %2192 = vmatprep.mubr.bf16.mxu0 %v4266_v24  ;;  %3927 = vmatprep.mubr.msk.bf16.mxu1 %vm1527_vm0, %v4267_v27  ;;  %v4264_v0 = vld [vmem:[%s6193_s0 + $0x4e0] ss:$12 sps:$4 sm:$0xff]   ;;  %v4271_v39 = vld [vmem:[%s6193_s0 + $0x4fc] ss:$12 sps:$4 sm:$0xff]   ;;  %v4272_v24 = vld [vmem:[%s6193_s0 + $0x698] ss:$12 sps:$4 sm:$0xff]  }
 0x1db   :  { %v1996_v23 = vpop.f32.mrf.mxu0  ;;  %v2531_v40 = vpop.f32.mrf.mxu1 }
 0x1dc   :  { %v5348_v16 = vadd.f32 %v2531_v40, %v5096_v4  ;;  %v4268_v23 = vld [vmem:[%s6193_s0 + $0x680] ss:$12 sps:$4 sm:$0xff]  }
 0x1dd   :  { %v5350_v5 = vpop.f32.mrf.mxu0  ;;  %v3830_v15 = vpop.f32.mrf.mxu1 }
 0x1de   :  { %v5365_v4 = vadd.f32 %v3830_v15, %v5130_v26 }
 0x1df   :  { %v1999_v27 = vpop.f32.mrf.mxu0  ;;  %v2534_v40 = vpop.f32.mrf.mxu1 }
 0x1e0   :  { %v5380_v26 = vadd.f32 %v2534_v40, %v5104_v44  ;;  %v5387_v27 = vadd.f32 %v5124_v14, %v4766_v29 }
 0x1e1   :  { %v5382_v15 = vpop.f32.mrf.mxu0  ;;  %2193 = vmatmul.mubr.bf16.gmra.mxu0 %v4264_v0  ;;  %v3833_v51 = vpop.f32.mrf.mxu1  ;;  %3928 = vmatmul.mubr.msk.bf16.gmra.mxu1 %vm1527_vm0, %v4268_v23  ;;  %v5397_v0 = vadd.f32 %v5128_v8, %v4744_v17  ;;  %v5414_v17 = vadd.f32 %v5132_v46, %v4772_v33  ;;  %v6343_v8 = vld [vmem:[#allocation59_spill] sm:$0xff] }
 0x1e2   :  { %v5392_v56 = vadd.f32 %v3833_v51, %v5174_v30  ;;  %2200 = vmatprep.mubr.bf16.mxu0 %v4271_v39  ;;  %3931 = vmatprep.mubr.msk.bf16.mxu1 %vm1527_vm0, %v4272_v24  ;;  %v4269_v30 = vld [vmem:[%s6193_s0 + $0x4f8] ss:$12 sps:$4 sm:$0xff]   ;;  %v4273_v51 = vld [vmem:[%s6193_s0 + $0x6b0] ss:$12 sps:$4 sm:$0xff]  }
 0x1e3   :  { %v2004_v44 = vpop.f32.mrf.mxu0  ;;  %v2547_v40 = vpop.f32.mrf.mxu1 }
 0x1e4   :  { %v5402_v29 = vadd.f32 %v2547_v40, %v5148_v60  ;;  %v5423_v44 = vadd.f32 %v5146_v12, %v4750_v21  ;;  %v6338_v21 = vld [vmem:[#allocation28_spill] sm:$0xff]  ;;  %v6339_v40 = vld [vmem:[#allocation58_spill] sm:$0xff] }
 0x1e5   :  { %v5404_v14 = vpop.f32.mrf.mxu0  ;;  %v3834_v61 = vpop.f32.mrf.mxu1 }
 0x1e6   :  { %v5419_v60 = vadd.f32 %v3834_v61, %v5182_v6  ;;  %v5435_v6 = vadd.f32 %v5150_v42, %v4810_v53 }
 0x1e7   :  { %v2007_v39 = vpop.f32.mrf.mxu0  ;;  %v2550_v24 = vpop.f32.mrf.mxu1 }
 0x1e8   :  { %v5428_v23 = vadd.f32 %v2550_v24, %v5156_v34  ;;  %v5444_v34 = vadd.f32 %v5154_v22, %v4788_v41  ;;  %v5455_v24 = vadd.f32 %v5158_v18, %v4816_v59 }
 0x1e9   :  { %v5430_v33 = vpop.f32.mrf.mxu0  ;;  %2201 = vmatmul.mubr.bf16.gmra.mxu0 %v4269_v30  ;;  %v3837_v46 = vpop.f32.mrf.mxu1  ;;  %3932 = vmatmul.mubr.msk.bf16.gmra.mxu1 %vm1527_vm0, %v4273_v51 }
 0x1ea   :  { %v5440_v12 = vadd.f32 %v3837_v46, %v5226_v63  ;;  %v5475_v63 = vadd.f32 %v5176_v62, %v4854_v25 }
 0x1eb   :  { %v2012_v61 = vpop.f32.mrf.mxu0  ;;  %v2563_v39 = vpop.f32.mrf.mxu1 }
 0x1ec   :  { %v5449_v51 = vadd.f32 %v2563_v39, %v5200_v50  ;;  %v5464_v61 = vadd.f32 %v5172_v32, %v4794_v45  ;;  %6317 = vst [vmem:[#allocation75_spill] sm:$0xff] %v5475_v63  ;;  %v6334_v50 = vld [vmem:[#allocation57_spill] sm:$0xff] }
 0x1ed   :  { %v5451_v42 = vpop.f32.mrf.mxu0  ;;  %v3838_v53 = vpop.f32.mrf.mxu1 }
 0x1ee   :  { %v5460_v46 = vadd.f32 %v3838_v53, %v5234_v19  ;;  %v5495_v19 = vadd.f32 %v5184_v28, %v4860_v31 }
 0x1ef   :  { %v2015_v22 = vpop.f32.mrf.mxu0  ;;  %v2566_v41 = vpop.f32.mrf.mxu1 }
 0x1f0   :  { %v5469_v39 = vadd.f32 %v2566_v41, %v5208_v38  ;;  %v5484_v22 = vadd.f32 %v5180_v58, %v4832_v7  ;;  %6321 = vst [vmem:[#allocation79_spill] sm:$0xff] %v5495_v19  ;;  %v6330_v38 = vld [vmem:[#allocation56_spill] sm:$0xff] }
 0x1f1   :  { %v5471_v18 = vpop.f32.mrf.mxu0  ;;  %v3841_v59 = vpop.f32.mrf.mxu1 }
 0x1f2   :  { %v5480_v53 = vadd.f32 %v3841_v59, %v5278_v55  ;;  %6319 = vst [vmem:[#allocation77_spill] sm:$0xff] %v5484_v22  ;;  %v5513_v55 = vadd.f32 %v5202_v48, %v4898_v1 }
 0x1f3   :  { %v2020_v45 = vpop.f32.mrf.mxu0  ;;  %v2579_v32 = vpop.f32.mrf.mxu1 }
 0x1f4   :  { %6318 = vst [vmem:[#allocation76_spill] sm:$0xff] %v5480_v53  ;;  %v5489_v41 = vadd.f32 %v2579_v32, %v5252_v37  ;;  %v5504_v45 = vadd.f32 %v5198_v54, %v4838_v13  ;;  %6325 = vst [vmem:[#allocation83_spill] sm:$0xff] %v5513_v55  ;;  %v6329_v37 = vld [vmem:[#allocation22_spill] sm:$0xff] }
 0x1f5   :  { %v5491_v62 = vpop.f32.mrf.mxu0  ;;  %v3842_v25 = vpop.f32.mrf.mxu1 }
 0x1f6   :  { %6320 = vst [vmem:[#allocation78_spill] sm:$0xff] %v5489_v41  ;;  %v5500_v59 = vadd.f32 %v3842_v25, %v5286_v10  ;;  %6323 = vst [vmem:[#allocation81_spill] sm:$0xff] %v5504_v45  ;;  %v5531_v10 = vadd.f32 %v6330_v38, %v6329_v37 }
 0x1f7   :  { %v2023_v58 = vpop.f32.mrf.mxu0  ;;  %v2582_v7 = vpop.f32.mrf.mxu1 }
 0x1f8   :  { %6322 = vst [vmem:[#allocation80_spill] sm:$0xff] %v5500_v59  ;;  %v5509_v32 = vadd.f32 %v2582_v7, %v5260_v47  ;;  %v5522_v58 = vadd.f32 %v5206_v36, %v4876_v43  ;;  %6331 = vst [vmem:[#allocation22_spill] sm:$0xff] %v5531_v10 }
 0x1f9   :  { %v2026_v31 = vpop.f32.mrf.mxu0  ;;  %v3845_v28 = vpop.f32.mrf.mxu1 }
 0x1fa   :  { %6324 = vst [vmem:[#allocation82_spill] sm:$0xff] %v5509_v32  ;;  %v5518_v25 = vadd.f32 %v3845_v28, %v5330_v11  ;;  %6327 = vst [vmem:[#allocation85_spill] sm:$0xff] %v5522_v58  ;;  %v5549_v11 = vadd.f32 %v6339_v40, %v6338_v21 }
 0x1fb   :  { %v2028_v13 = vpop.f32.mrf.mxu0  ;;  %v2595_v54 = vpop.f32.mrf.mxu1 }
 0x1fc   :  { %6326 = vst [vmem:[#allocation84_spill] sm:$0xff] %v5518_v25  ;;  %v5527_v7 = vadd.f32 %v2595_v54, %v5304_v49  ;;  %v6333_v13 = vld [vmem:[#allocation19_spill] sm:$0xff]  ;;  %v6336_v54 = vld [vmem:[#allocation72_spill] sm:$0xff] }
 0x1fd   :  { %v2029_v1 = vpop.f32.mrf.mxu0  ;;  %v3846_v48 = vpop.f32.mrf.mxu1  ;;  %v5540_v47 = vadd.f32 %v6334_v50, %v6333_v13  ;;  %6340 = vst [vmem:[#allocation72_spill] sm:$0xff] %v5549_v11  ;;  %v6342_v13 = vld [vmem:[#allocation24_spill] sm:$0xff]  ;;  %v6355_v11 = vld [vmem:[#allocation62_spill] sm:$0xff] }
 0x1fe   :  { %6328 = vst [vmem:[#allocation86_spill] sm:$0xff] %v5527_v7  ;;  %v5536_v28 = vadd.f32 %v3846_v48, %v5350_v5  ;;  %v5558_v49 = vadd.f32 %v6343_v8, %v6342_v13  ;;  %v5567_v5 = vadd.f32 %v6347_v52, %v6346_v2  ;;  %v6350_v13 = vld [vmem:[#allocation26_spill] sm:$0xff] }
 0x1ff   :  { %v2031_v43 = vpop.f32.mrf.mxu0  ;;  %v2598_v36 = vpop.f32.mrf.mxu1  ;;  %6335 = vst [vmem:[#allocation19_spill] sm:$0xff] %v5540_v47 }
 0x200   :  { %6332 = vst [vmem:[#allocation56_spill] sm:$0xff] %v5536_v28  ;;  %v5545_v30 = vadd.f32 %v2598_v36, %v6336_v54  ;;  %6344 = vst [vmem:[#allocation58_spill] sm:$0xff] %v5558_v49 }
 0x201   :  { %v2034_v38 = vpop.f32.mrf.mxu0  ;;  %v3849_v37 = vpop.f32.mrf.mxu1  ;;  %6348 = vst [vmem:[#allocation59_spill] sm:$0xff] %v5567_v5 }
 0x202   :  { %6337 = vst [vmem:[#allocation57_spill] sm:$0xff] %v5545_v30  ;;  %v5554_v48 = vadd.f32 %v3849_v37, %v5430_v33  ;;  %v6351_v30 = vld [vmem:[#allocation61_spill] sm:$0xff] }
 0x203   :  { %v2036_v50 = vpop.f32.mrf.mxu0  ;;  %v2611_v43 = vpop.f32.mrf.mxu1  ;;  %v5576_v36 = vadd.f32 %v6351_v30, %v6350_v13  ;;  %v6358_v13 = vld [vmem:[#allocation32_spill] sm:$0xff] }
 0x204   :  { %6341 = vst [vmem:[#allocation28_spill] sm:$0xff] %v5554_v48  ;;  %v5563_v54 = vadd.f32 %v2611_v43, %v5382_v15  ;;  %v6354_v48 = vld [vmem:[#allocation36_spill] sm:$0xff] }
 0x205   :  { %v2037_v40 = vpop.f32.mrf.mxu0  ;;  %v3850_v21 = vpop.f32.mrf.mxu1  ;;  %6352 = vst [vmem:[#allocation60_spill] sm:$0xff] %v5576_v36  ;;  %v5585_v33 = vadd.f32 %v6355_v11, %v6354_v48  ;;  %v6362_v48 = vld [vmem:[#allocation38_spill] sm:$0xff] }
 0x206   :  { %6345 = vst [vmem:[#allocation24_spill] sm:$0xff] %v5563_v54  ;;  %v5572_v37 = vadd.f32 %v3850_v21, %v5451_v42  ;;  %v6359_v54 = vld [vmem:[#allocation63_spill] sm:$0xff]  ;;  %v6367_v42 = vld [vmem:[#allocation65_spill] sm:$0xff] }
 0x207   :  { %v2039_v8 = vpop.f32.mrf.mxu0  ;;  %v2614_v50 = vpop.f32.mrf.mxu1  ;;  %6356 = vst [vmem:[#allocation61_spill] sm:$0xff] %v5585_v33  ;;  %v5593_v49 = vadd.f32 %v6359_v54, %v6358_v13  ;;  %v6366_v13 = vld [vmem:[#allocation34_spill] sm:$0xff] }
 0x208   :  { %6349 = vst [vmem:[#allocation30_spill] sm:$0xff] %v5572_v37  ;;  %v5581_v43 = vadd.f32 %v2614_v50, %v5404_v14  ;;  %v6363_v37 = vld [vmem:[#allocation64_spill] sm:$0xff] }
 0x209   :  { %v2042_v52 = vpop.f32.mrf.mxu0  ;;  %v3853_v2 = vpop.f32.mrf.mxu1  ;;  %6360 = vst [vmem:[#allocation62_spill] sm:$0xff] %v5593_v49  ;;  %v5602_v5 = vadd.f32 %v6363_v37, %v6362_v48  ;;  %v6370_v48 = vld [vmem:[#allocation44_spill] sm:$0xff] }
 0x20a   :  { %6353 = vst [vmem:[#allocation26_spill] sm:$0xff] %v5581_v43  ;;  %v5589_v21 = vadd.f32 %v3853_v2, %v2026_v31  ;;  %v5610_v43 = vadd.f32 %v6367_v42, %v6366_v13  ;;  %v6374_v13 = vld [vmem:[#allocation40_spill] sm:$0xff]  ;;  %v6375_v31 = vld [vmem:[#allocation67_spill] sm:$0xff] }
 0x20b   :  { %v2044_v8 = vpop.f32.mrf.mxu0  ;;  %v2627_v30 = vpop.f32.mrf.mxu1  ;;  %6364 = vst [vmem:[#allocation63_spill] sm:$0xff] %v5602_v5 }
 0x20c   :  { %6357 = vst [vmem:[#allocation36_spill] sm:$0xff] %v5589_v21  ;;  %v5598_v50 = vadd.f32 %v2627_v30, %v5471_v18  ;;  %6368 = vst [vmem:[#allocation64_spill] sm:$0xff] %v5610_v43  ;;  %v6371_v21 = vld [vmem:[#allocation66_spill] sm:$0xff] }
 0x20d   :  { %v2045_v15 = vpop.f32.mrf.mxu0  ;;  %v3854_v11 = vpop.f32.mrf.mxu1  ;;  %v5619_v33 = vadd.f32 %v6371_v21, %v6370_v48  ;;  %v6378_v21 = vld [vmem:[#allocation46_spill] sm:$0xff]  ;;  %v6379_v48 = vld [vmem:[#allocation68_spill] sm:$0xff] }
 0x20e   :  { %6361 = vst [vmem:[#allocation32_spill] sm:$0xff] %v5598_v50  ;;  %v5606_v2 = vadd.f32 %v3854_v11, %v2029_v1  ;;  %v5627_v50 = vadd.f32 %v6375_v31, %v6374_v13  ;;  %v5635_v5 = vadd.f32 %v6379_v48, %v6378_v21  ;;  %v6382_v31 = vld [vmem:[#allocation42_spill] sm:$0xff]  ;;  %v6383_v13 = vld [vmem:[#allocation69_spill] sm:$0xff]  ;;  %v6386_v21 = vld [vmem:[#allocation52_spill] sm:$0xff] }
 0x20f   :  { %v2047_v8 = vpop.f32.mrf.mxu0  ;;  %v2630_v54 = vpop.f32.mrf.mxu1  ;;  %6372 = vst [vmem:[#allocation65_spill] sm:$0xff] %v5619_v33  ;;  %v6387_v48 = vld [vmem:[#allocation70_spill] sm:$0xff] }
 0x210   :  { %6365 = vst [vmem:[#allocation38_spill] sm:$0xff] %v5606_v2  ;;  %v5615_v30 = vadd.f32 %v2630_v54, %v5491_v62  ;;  %6376 = vst [vmem:[#allocation66_spill] sm:$0xff] %v5627_v50  ;;  %v5651_v33 = vadd.f32 %v6387_v48, %v6386_v21  ;;  %v6394_v21 = vld [vmem:[#allocation54_spill] sm:$0xff]  ;;  %v6395_v48 = vld [vmem:[#allocation73_spill] sm:$0xff] }
 0x211   :  { %v2050_v14 = vpop.f32.mrf.mxu0  ;;  %v3857_v37 = vpop.f32.mrf.mxu1  ;;  %6380 = vst [vmem:[#allocation67_spill] sm:$0xff] %v5635_v5  ;;  %v5667_v5 = vadd.f32 %v6395_v48, %v6394_v21 }
 0x212   :  { %6369 = vst [vmem:[#allocation34_spill] sm:$0xff] %v5615_v30  ;;  %v5623_v11 = vadd.f32 %v3857_v37, %v2042_v52  ;;  %v5643_v30 = vadd.f32 %v6383_v13, %v6382_v31  ;;  %6388 = vst [vmem:[#allocation69_spill] sm:$0xff] %v5651_v33  ;;  %v6390_v31 = vld [vmem:[#allocation48_spill] sm:$0xff]  ;;  %v6391_v13 = vld [vmem:[#allocation71_spill] sm:$0xff] }
 0x213   :  { %v2052_v8 = vpop.f32.mrf.mxu0  ;;  %v2643_v42 = vpop.f32.mrf.mxu1  ;;  %6396 = vst [vmem:[#allocation71_spill] sm:$0xff] %v5667_v5 }
 0x214   :  { %6373 = vst [vmem:[#allocation44_spill] sm:$0xff] %v5623_v11  ;;  %v5631_v54 = vadd.f32 %v2643_v42, %v2034_v38  ;;  %6384 = vst [vmem:[#allocation68_spill] sm:$0xff] %v5643_v30 }
 0x215   :  { %v2053_v18 = vpop.f32.mrf.mxu0  ;;  %v3858_v2 = vpop.f32.mrf.mxu1 }
 0x216   :  { %6377 = vst [vmem:[#allocation40_spill] sm:$0xff] %v5631_v54  ;;  %v5639_v37 = vadd.f32 %v3858_v2, %v2045_v15  ;;  %v5659_v54 = vadd.f32 %v6391_v13, %v6390_v31  ;;  %v6398_v31 = vld [vmem:[#allocation50_spill] sm:$0xff] }
 0x217   :  { %v2055_v8 = vpop.f32.mrf.mxu0  ;;  %v2646_v1 = vpop.f32.mrf.mxu1  ;;  %v6399_v13 = vld [vmem:[#allocation74_spill] sm:$0xff] }
 0x218   :  { %6381 = vst [vmem:[#allocation46_spill] sm:$0xff] %v5639_v37  ;;  %v5647_v42 = vadd.f32 %v2646_v1, %v2037_v40  ;;  %6392 = vst [vmem:[#allocation70_spill] sm:$0xff] %v5659_v54 }
 0x219   :  { %v2058_v62 = vpop.f32.mrf.mxu0  ;;  %v3861_v11 = vpop.f32.mrf.mxu1 }
 0x21a   :  { %6385 = vst [vmem:[#allocation42_spill] sm:$0xff] %v5647_v42  ;;  %v5655_v2 = vadd.f32 %v3861_v11, %v2058_v62  ;;  %v5675_v42 = vadd.f32 %v6399_v13, %v6398_v31 }
 0x21b   :  { %v2060_v8 = vpop.f32.mrf.mxu0  ;;  %v2659_v52 = vpop.f32.mrf.mxu1 }
 0x21c   :  { %6389 = vst [vmem:[#allocation52_spill] sm:$0xff] %v5655_v2  ;;  %v5663_v1 = vadd.f32 %v2659_v52, %v2050_v14  ;;  %6400 = vst [vmem:[#allocation73_spill] sm:$0xff] %v5675_v42 }
 0x21d   :  { %v2061_v38 = vpop.f32.mrf.mxu0  ;;  %v3862_v37 = vpop.f32.mrf.mxu1 }
 0x21e   :  { %6393 = vst [vmem:[#allocation48_spill] sm:$0xff] %v5663_v1  ;;  %v5671_v62 = vadd.f32 %v3862_v37, %v2061_v38 }
 0x21f   :  { %v2063_v8 = vpop.f32.mrf.mxu0  ;;  %v2662_v15 = vpop.f32.mrf.mxu1 }
 0x220   :  { %6397 = vst [vmem:[#allocation54_spill] sm:$0xff] %v5671_v62  ;;  %v5679_v52 = vadd.f32 %v2662_v15, %v2053_v18 }
 0x221   :  { %v2066_v40 = vpop.f32.mrf.mxu0  ;;  %v3865_v2 = vpop.f32.mrf.mxu1 }
 0x222   :  { %6401 = vst [vmem:[#allocation50_spill] sm:$0xff] %v5679_v52 }
 0x223   :  { %v2068_v48 = vpop.f32.mrf.mxu0  ;;  %v2675_v11 = vpop.f32.mrf.mxu1 }
 0x224   :  { %v5683_v37 = vadd.f32 %v2675_v11, %v2066_v40 }
 0x225   :  { %v2069_v38 = vpop.f32.mrf.mxu0  ;;  %v3866_v8 = vpop.f32.mrf.mxu1 }
 0x227   :  { %v2071_v1 = vpop.f32.mrf.mxu0  ;;  %v2678_v54 = vpop.f32.mrf.mxu1 }
 0x228   :  { %v5685_v31 = vadd.f32 %v2678_v54, %v2069_v38 }
 0x229   :  { %v2074_v13 = vpop.f32.mrf.mxu0  ;;  %v5687_v33 = vpop.f32.mrf.mxu1 }
 0x22a   :  { %v5689_v18 = vadd.f32 %v3865_v2, %v2074_v13 }
 0x22b   :  { %v2076_v15 = vpop.f32.mrf.mxu0  ;;  %v2691_v14 = vpop.f32.mrf.mxu1 }
 0x22d   :  { %v2077_v62 = vpop.f32.mrf.mxu0  ;;  %v5691_v5 = vpop.f32.mrf.mxu1 }
 0x22e   :  { %v5693_v48 = vadd.f32 %v3866_v8, %v2077_v62 }
 0x22f   :  { %v2079_v40 = vpop.f32.mrf.mxu0  ;;  %v2694_v11 = vpop.f32.mrf.mxu1 }
 0x231   :  { %v2082_v21 = vpop.f32.mrf.mxu0  ;;  %v5695_v52 = vpop.f32.mrf.mxu1 }
 0x232   :  { %v5697_v1 = vadd.f32 %v2691_v14, %v2082_v21 }
 0x233   :  { %v2084_v54 = vpop.f32.mrf.mxu0  ;;  %v5699_v38 = vpop.f32.mrf.mxu1 }
 0x235   :  { %v2085_v42 = vpop.f32.mrf.mxu0  ;;  %v5701_v2 = vpop.f32.mrf.mxu1 }
 0x236   :  { %v5703_v13 = vadd.f32 %v2694_v11, %v2085_v42 }
 0x237   :  { %v2087_v15 = vpop.f32.mrf.mxu0  ;;  %v5705_v30 = vpop.f32.mrf.mxu1 }
 0x239   :  { %v5707_v62 = vpop.f32.mrf.mxu0  ;;  %v5709_v8 = vpop.f32.mrf.mxu1 }
 0x23b   :  { %v2092_v40 = vpop.f32.mrf.mxu0  ;;  %v5711_v50 = vpop.f32.mrf.mxu1 }
 0x23d   :  { %v5713_v14 = vpop.f32.mrf.mxu0  ;;  %v5715_v21 = vpop.f32.mrf.mxu1 }
 0x23e   :  { %6402 = vst [vmem:[#allocation74_spill] sm:$0xff] %v5715_v21 }
 0x23f   :  { %v2095_v54 = vpop.f32.mrf.mxu0  ;;  %v5717_v43 = vpop.f32.mrf.mxu1 }
 0x240   :  { %6403 = vst [vmem:[#allocation87_spill] sm:$0xff] %v5717_v43 }
 0x241   :  { %v5719_v49 = vpop.f32.mrf.mxu0  ;;  %v5721_v42 = vpop.f32.mrf.mxu1 }
 0x242   :  { %6404 = vst [vmem:[#allocation88_spill] sm:$0xff] %v5721_v42 }
 0x243   :  { %v2100_v11 = vpop.f32.mrf.mxu0  ;;  %v5723_v15 = vpop.f32.mrf.mxu1 }
 0x244   :  { %6405 = vst [vmem:[#allocation89_spill] sm:$0xff] %v5723_v15 }
 0x245   :  { %v5725_v36 = vpop.f32.mrf.mxu0  ;;  %v5727_v47 = vpop.f32.mrf.mxu1 }
 0x246   :  { %6406 = vst [vmem:[#allocation90_spill] sm:$0xff] %v5727_v47 }
 0x247   :  { %v2103_v40 = vpop.f32.mrf.mxu0  ;;  %v5729_v28 = vpop.f32.mrf.mxu1 }
 0x248   :  { %6407 = vst [vmem:[#allocation91_spill] sm:$0xff] %v5729_v28 }
 0x249   :  { %v5731_v10 = vpop.f32.mrf.mxu0  ;;  %v5733_v7 = vpop.f32.mrf.mxu1 }
 0x24a   :  { %6408 = vst [vmem:[#allocation92_spill] sm:$0xff] %v5733_v7 }
 0x24b   :  { %v2108_v54 = vpop.f32.mrf.mxu0  ;;  %v5735_v58 = vpop.f32.mrf.mxu1 }
 0x24c   :  { %6409 = vst [vmem:[#allocation93_spill] sm:$0xff] %v5735_v58 }
 0x24d   :  { %v5737_v25 = vpop.f32.mrf.mxu0  ;;  %v5739_v55 = vpop.f32.mrf.mxu1 }
 0x24e   :  { %6410 = vst [vmem:[#allocation94_spill] sm:$0xff] %v5739_v55 }
 0x24f   :  { %v2111_v11 = vpop.f32.mrf.mxu0  ;;  %v5741_v32 = vpop.f32.mrf.mxu1 }
 0x250   :  { %6411 = vst [vmem:[#allocation95_spill] sm:$0xff] %v5741_v32 }
 0x251   :  { %v5743_v45 = vpop.f32.mrf.mxu0  ;;  %v5745_v47 = vpop.f32.mrf.mxu1 }
 0x252   :  { %6412 = vst [vmem:[#allocation96_spill] sm:$0xff] %v5745_v47 }
 0x253   :  { %v2116_v40 = vpop.f32.mrf.mxu0  ;;  %v5747_v28 = vpop.f32.mrf.mxu1 }
 0x254   :  { %6413 = vst [vmem:[#allocation97_spill] sm:$0xff] %v5747_v28 }
 0x255   :  { %v5749_v15 = vpop.f32.mrf.mxu0  ;;  %v5751_v7 = vpop.f32.mrf.mxu1 }
 0x256   :  { %6414 = vst [vmem:[#allocation98_spill] sm:$0xff] %v5749_v15  ;;  %6415 = vst [vmem:[#allocation99_spill] sm:$0xff] %v5751_v7 }
 0x257   :  { %v2119_v54 = vpop.f32.mrf.mxu0  ;;  %v5753_v58 = vpop.f32.mrf.mxu1 }
 0x258   :  { %6416 = vst [vmem:[#allocation100_spill] sm:$0xff] %v5753_v58 }
 0x259   :  { %v5755_v59 = vpop.f32.mrf.mxu0  ;;  %v5757_v55 = vpop.f32.mrf.mxu1 }
 0x25a   :  { %6417 = vst [vmem:[#allocation101_spill] sm:$0xff] %v5757_v55 }
 0x25b   :  { %v2124_v11 = vpop.f32.mrf.mxu0  ;;  %v5759_v32 = vpop.f32.mrf.mxu1 }
 0x25c   :  { %6418 = vst [vmem:[#allocation102_spill] sm:$0xff] %v5759_v32 }
 0x25d   :  { %v5761_v19 = vpop.f32.mrf.mxu0  ;;  %v5763_v47 = vpop.f32.mrf.mxu1 }
 0x25e   :  { %6419 = vst [vmem:[#allocation103_spill] sm:$0xff] %v5763_v47 }
 0x25f   :  { %v2127_v40 = vpop.f32.mrf.mxu0  ;;  %v5765_v28 = vpop.f32.mrf.mxu1 }
 0x260   :  { %6420 = vst [vmem:[#allocation104_spill] sm:$0xff] %v5765_v28  ;;  %v6428_v40 = vld [vmem:[#allocation4_spill] sm:$0xff] }
 0x261   :  { %v5767_v42 = vpop.f32.mrf.mxu0  ;;  %v5769_v7 = vpop.f32.mrf.mxu1 }
 0x262   :  { %6421 = vst [vmem:[#allocation105_spill] sm:$0xff] %v5767_v42  ;;  %6422 = vst [vmem:[#allocation106_spill] sm:$0xff] %v5769_v7  ;;  %v6429_v7 = vld [vmem:[#allocation2_spill] sm:$0xff] }
 0x263   :  { %v2132_v54 = vpop.f32.mrf.mxu0  ;;  %v5771_v58 = vpop.f32.mrf.mxu1 }
 0x264   :  { %6423 = vst [vmem:[#allocation107_spill] sm:$0xff] %v5771_v58  ;;  %v5787_v58 = vld [vmem:[%s6194_s2] ss:$0 sm:$0xff] }
 0x265   :  { %v5773_v41 = vpop.f32.mrf.mxu0  ;;  %v5775_v55 = vpop.f32.mrf.mxu1 }
 0x266   :  { %6424 = vst [vmem:[#allocation108_spill] sm:$0xff] %v5773_v41  ;;  %6425 = vst [vmem:[#allocation109_spill] sm:$0xff] %v5775_v55 }
 0x267   :  { %v2135_v11 = vpop.f32.mrf.mxu0  ;;  %v5777_v32 = vpop.f32.mrf.mxu1 }
 0x268   :  { %6426 = vst [vmem:[#allocation110_spill] sm:$0xff] %v5777_v32  ;;  %v6431_v32 = vmax.f32 %v5335_v20, %v5338_v35 }
 0x269   :  { %v5779_v22 = vpop.f32.mrf.mxu0  ;;  %v3901_v47 = vpop.f32.mrf.mxu1 }
 0x26a   :  { %6427 = vst [vmem:[#allocation111_spill] sm:$0xff] %v5779_v22  ;;  %v2828_v43 = vadd.f32 %v3901_v47, %v6428_v40 }
 0x26b   :  { %v2140_v28 = vpop.f32.mrf.mxu0  ;;  %v2819_v15 = vpop.f32.mrf.mxu1 }
 0x26c   :  { %v3000_v42 = vmax.f32 %v5689_v18, %v2828_v43  ;;  %v2820_v54 = vadd.f32 %v2819_v15, %v6429_v7  ;;  %v6432_v28 = vld [vmem:[#allocation5_spill] sm:$0xff]  ;;  %v6433_v18 = vmax.f32 %v5343_v3, %v5348_v16  ;;  %v2700_v3 = vadd.f32 %v5687_v33, %v5707_v62  ;;  %v6436_v16 = vld [vmem:[#allocation8_spill] sm:$0xff] }
 0x26d   :  { %v5789_v55 = vpop.f32.mrf.mxu0  ;;  %v3902_v11 = vpop.f32.mrf.mxu1 }
 0x26e   :  { %6430 = vst [vmem:[#allocation4_spill] sm:$0xff] %v5789_v55  ;;  %v3036_v41 = vmax.f32 %v6431_v32, %v3000_v42  ;;  %v2998_v47 = vmax.f32 %v5683_v37, %v2820_v54  ;;  %v2831_v40 = vadd.f32 %v3902_v11, %v6432_v28  ;;  %v6434_v55 = vld [vmem:[#allocation3_spill] sm:$0xff]  ;;  %v6437_v28 = vmax.f32 %v5375_v9, %v5380_v26 }
 0x26f   :  { %v2143_v22 = vpop.f32.mrf.mxu0  ;;  %v2822_v43 = vpop.f32.mrf.mxu1  ;;  %v6439_v9 = vmax.f32 %v5387_v27, %v5392_v56  ;;  %v6442_v27 = vmax.f32 %v5397_v0, %v5402_v29  ;;  %v6444_v29 = vmax.f32 %v5414_v17, %v5419_v60 }
 0x270   :  { %v3079_v7 = vadd.f32 %v5787_v58, %v3036_v41  ;;  %v3034_v15 = vmax.f32 %v6433_v18, %v2998_v47  ;;  %v3001_v53 = vmax.f32 %v5693_v48, %v2831_v40  ;;  %v2823_v63 = vadd.f32 %v2822_v43, %v6434_v55 }
 0x271   :  { %v5802_v21 = vpop.f32.mrf.mxu0  ;;  %v3905_v20 = vpop.f32.mrf.mxu1  ;;  %v6435_v22 = vmax.f32 %v5360_v57, %v5365_v4  ;;  %v6438_v4 = vld [vmem:[#allocation6_spill] sm:$0xff] }
 0x272   :  { %v3115_v35 = vmax.f32 %v3079_v7, 0.0  ;;  %v3077_v32 = vadd.f32 %v5787_v58, %v3034_v15  ;;  %v2999_v41 = vmax.f32 %v5685_v31, %v2823_v63  ;;  %v2844_v48 = vadd.f32 %v3905_v20, %v6436_v16  ;;  %v6440_v15 = vld [vmem:[#allocation9_spill] sm:$0xff] }
 0x273   :  { %v3037_v37 = vmax.f32 %v6435_v22, %v3001_v53  ;;  %v2148_v42 = vpop.f32.mrf.mxu0  ;;  %v2835_v55 = vpop.f32.mrf.mxu1  ;;  %v2703_v7 = vadd.f32 %v5691_v5, %v5713_v14 }
 0x274   :  { %v3679_v54 = vpack.c.bf16 %v3115_v35, %v3115_v35  ;;  %v3113_v11 = vmax.f32 %v3077_v32, 0.0  ;;  %v3035_v40 = vmax.f32 %v6437_v28, %v2999_v41  ;;  %v3004_v57 = vmax.f32 %v2700_v3, %v2844_v48  ;;  %v6441_v41 = vld [vmem:[#allocation7_spill] sm:$0xff] }
 0x275   :  { %v3080_v47 = vadd.f32 %v5787_v58, %v3037_v37  ;;  %v2836_v53 = vadd.f32 %v2835_v55, %v6438_v4  ;;  %v5817_v63 = vpop.f32.mrf.mxu0  ;;  %v3906_v31 = vpop.f32.mrf.mxu1  ;;  %v2716_v48 = vadd.f32 %v5695_v52, %v5731_v10  ;;  %v2708_v10 = vadd.f32 %v5699_v38, %v5719_v49 }
 0x276   :  { %3296 = vst.msk [vmem:[%s6195_s3 + $0x8] sm:$0xf] %vm3293_vm1, %v3679_v54  ;;  %v3677_v33 = vpack.c.bf16 %v3113_v11, %v3113_v11  ;;  %v3078_v43 = vadd.f32 %v5787_v58, %v3035_v40  ;;  %v3040_v26 = vmax.f32 %v6439_v9, %v3004_v57  ;;  %v2847_v20 = vadd.f32 %v3906_v31, %v6440_v15  ;;  %v6443_v54 = vld [vmem:[#allocation12_spill] sm:$0xff]  ;;  %v6448_v15 = vld [vmem:[#allocation13_spill] sm:$0xff] }
 0x277   :  { %v3116_v62 = vmax.f32 %v3080_v47, 0.0  ;;  %v3002_v18 = vmax.f32 %v5697_v1, %v2836_v53  ;;  %v2151_v35 = vpop.f32.mrf.mxu0  ;;  %v2838_v32 = vpop.f32.mrf.mxu1  ;;  %v6445_v52 = vmax.f32 %v5423_v44, %v5428_v23  ;;  %v6446_v53 = vld [vmem:[#allocation10_spill] sm:$0xff]  ;;  %v2711_v49 = vadd.f32 %v5705_v30, %v5725_v36 }
 0x278   :  { %3294 = vst.msk [vmem:[%s6195_s3] sm:$0xf] %vm3293_vm1, %v3677_v33  ;;  %v3114_v37 = vmax.f32 %v3078_v43, 0.0  ;;  %v2839_v3 = vadd.f32 %v2838_v32, %v6441_v41  ;;  %v3083_v5 = vadd.f32 %v5787_v58, %v3040_v26  ;;  %v3005_v1 = vmax.f32 %v2703_v7, %v2847_v20 }
 0x279   :  { %v3680_v22 = vpack.c.bf16 %v3116_v62, %v3116_v62  ;;  %v3038_v56 = vmax.f32 %v6442_v27, %v3002_v18  ;;  %v5840_v14 = vpop.f32.mrf.mxu0  ;;  %v3909_v16 = vpop.f32.mrf.mxu1  ;;  %v6447_v7 = vmax.f32 %v5435_v6, %v5440_v12  ;;  %v2719_v9 = vadd.f32 %v5701_v2, %v5737_v25 }
 0x27a   :  { %v3678_v42 = vpack.c.bf16 %v3114_v37, %v3114_v37  ;;  %v3003_v55 = vmax.f32 %v5703_v13, %v2839_v3  ;;  %v2860_v11 = vadd.f32 %v3909_v16, %v6443_v54  ;;  %v3119_v47 = vmax.f32 %v3083_v5, 0.0 }
 0x27b   :  { %3297 = vst.msk [vmem:[%s6195_s3 + $0xc] sm:$0xf] %vm3293_vm1, %v3680_v22  ;;  %v3081_v0 = vadd.f32 %v5787_v58, %v3038_v56  ;;  %v3041_v28 = vmax.f32 %v6444_v29, %v3005_v1  ;;  %v2156_v40 = vpop.f32.mrf.mxu0  ;;  %v2851_v57 = vpop.f32.mrf.mxu1  ;;  %v6449_v6 = vmax.f32 %v5444_v34, %v5449_v51  ;;  %v6450_v22 = vld [vmem:[#allocation11_spill] sm:$0xff]  ;;  %v2724_v34 = vadd.f32 %v5711_v50, %v5743_v45 }
 0x27c   :  { %3295 = vst.msk [vmem:[%s6195_s3 + $0x4] sm:$0xf] %vm3293_vm1, %v3678_v42  ;;  %v3039_v13 = vmax.f32 %v6445_v52, %v3003_v55  ;;  %v3008_v4 = vmax.f32 %v2716_v48, %v2860_v11  ;;  %v2852_v31 = vadd.f32 %v2851_v57, %v6446_v53  ;;  %v3683_v33 = vpack.c.bf16 %v3119_v47, %v3119_v47  ;;  %v6452_v42 = vld [vmem:[#allocation16_spill] sm:$0xff]  ;;  %v6454_v47 = vld [vmem:[#allocation14_spill] sm:$0xff] }
 0x27d   :  { %v3117_v17 = vmax.f32 %v3081_v0, 0.0  ;;  %v3084_v60 = vadd.f32 %v5787_v58, %v3041_v28  ;;  %v5865_v62 = vpop.f32.mrf.mxu0  ;;  %v3910_v43 = vpop.f32.mrf.mxu1  ;;  %v2732_v51 = vadd.f32 %v5709_v8, %v5755_v59  ;;  %v6451_v16 = vmax.f32 %v5455_v24, %v5460_v46 }
 0x27e   :  { %v3082_v38 = vadd.f32 %v5787_v58, %v3039_v13  ;;  %v3044_v23 = vmax.f32 %v6447_v7, %v3008_v4  ;;  %v3006_v44 = vmax.f32 %v2708_v10, %v2852_v31  ;;  %3300 = vst.msk [vmem:[%s6195_s3 + $0x18] sm:$0xf] %vm3293_vm1, %v3683_v33  ;;  %v2863_v20 = vadd.f32 %v3910_v43, %v6448_v15  ;;  %v6456_v13 = vld [vmem:[#allocation75_spill] sm:$0xff]  ;;  %v6457_v4 = vld [vmem:[#allocation76_spill] sm:$0xff]  ;;  %v6459_v33 = vld [vmem:[#allocation17_spill] sm:$0xff] }
 0x27f   :  { %v3681_v26 = vpack.c.bf16 %v3117_v17, %v3117_v17  ;;  %v3120_v18 = vmax.f32 %v3084_v60, 0.0  ;;  %v2159_v36 = vpop.f32.mrf.mxu0  ;;  %v2854_v30 = vpop.f32.mrf.mxu1  ;;  %v6453_v50 = vmax.f32 %v5464_v61, %v5469_v39  ;;  %v6455_v61 = vld [vmem:[#allocation74_spill] sm:$0xff]  ;;  %v6458_v53 = vmax.f32 %v6456_v13, %v6457_v4 }
 0x280   :  { %v3118_v35 = vmax.f32 %v3082_v38, 0.0  ;;  %v3087_v32 = vadd.f32 %v5787_v58, %v3044_v23  ;;  %v3042_v12 = vmax.f32 %v6449_v6, %v3006_v44  ;;  %v2855_v25 = vadd.f32 %v2854_v30, %v6450_v22  ;;  %v6461_v38 = vld [vmem:[#allocation87_spill] sm:$0xff]  ;;  %v6462_v44 = vld [vmem:[#allocation77_spill] sm:$0xff]  ;;  %v6479_v13 = vld [vmem:[#allocation90_spill] sm:$0xff] }
 0x281   :  { %3298 = vst.msk [vmem:[%s6195_s3 + $0x10] sm:$0xf] %vm3293_vm1, %v3681_v26  ;;  %v3684_v2 = vpack.c.bf16 %v3120_v18, %v3120_v18  ;;  %v3009_v37 = vmax.f32 %v2719_v9, %v2863_v20  ;;  %v5889_v41 = vpop.f32.mrf.mxu0  ;;  %v3913_v3 = vpop.f32.mrf.mxu1  ;;  %v2735_v39 = vadd.f32 %v6455_v61, %v5761_v19  ;;  %v6463_v19 = vld [vmem:[#allocation78_spill] sm:$0xff]  ;;  %v6465_v18 = vld [vmem:[#allocation15_spill] sm:$0xff] }
 0x282   :  { %v3682_v5 = vpack.c.bf16 %v3118_v35, %v3118_v35  ;;  %v3123_v27 = vmax.f32 %v3087_v32, 0.0  ;;  %v3085_v56 = vadd.f32 %v5787_v58, %v3042_v12  ;;  %v3007_v1 = vmax.f32 %v2711_v49, %v2855_v25  ;;  %v6460_v49 = vld [vmem:[#allocation98_spill] sm:$0xff]  ;;  %v6466_v25 = vld [vmem:[#allocation111_spill] sm:$0xff] }
 0x283   :  { %3301 = vst.msk [vmem:[%s6195_s3 + $0x1c] sm:$0xf] %vm3293_vm1, %v3684_v2  ;;  %v3045_v48 = vmax.f32 %v6451_v16, %v3009_v37  ;;  %v2876_v55 = vadd.f32 %v3913_v3, %v6452_v42  ;;  %v2164_v54 = vpop.f32.mrf.mxu0  ;;  %v2867_v11 = vpop.f32.mrf.mxu1  ;;  %v2727_v7 = vadd.f32 %v6461_v38, %v6460_v49  ;;  %v6464_v9 = vmax.f32 %v6462_v44, %v6463_v19  ;;  %v6467_v2 = vld [vmem:[#allocation88_spill] sm:$0xff]  ;;  %v6472_v42 = vld [vmem:[#allocation105_spill] sm:$0xff]  ;;  %v6485_v44 = vld [vmem:[#allocation91_spill] sm:$0xff] }
 0x284   :  { %3299 = vst.msk [vmem:[%s6195_s3 + $0x14] sm:$0xf] %vm3293_vm1, %v3682_v5  ;;  %v3687_v45 = vpack.c.bf16 %v3123_v27, %v3123_v27  ;;  %v3121_v59 = vmax.f32 %v3085_v56, 0.0  ;;  %v3043_v8 = vmax.f32 %v6453_v50, %v3007_v1  ;;  %v2868_v0 = vadd.f32 %v2867_v11, %v6454_v47  ;;  %v6468_v5 = vld [vmem:[#allocation79_spill] sm:$0xff]  ;;  %v6469_v27 = vld [vmem:[#allocation80_spill] sm:$0xff]  ;;  %v6477_v47 = vld [vmem:[#allocation18_spill] sm:$0xff] }
 0x285   :  { %v3088_v24 = vadd.f32 %v5787_v58, %v3045_v48  ;;  %v3012_v46 = vmax.f32 %v2732_v51, %v2876_v55  ;;  %v5913_v29 = vpop.f32.mrf.mxu0  ;;  %v3914_v28 = vpop.f32.mrf.mxu1  ;;  %v2748_v37 = vadd.f32 %v6467_v2, %v6466_v25  ;;  %v6470_v56 = vmax.f32 %v6468_v5, %v6469_v27  ;;  %v6473_v55 = vld [vmem:[#allocation89_spill] sm:$0xff]  ;;  %v6490_v5 = vld [vmem:[#allocation92_spill] sm:$0xff] }
 0x286   :  { %3304 = vst.msk [vmem:[%s6195_s3 + $0x28] sm:$0xf] %vm3293_vm1, %v3687_v45  ;;  %v3685_v40 = vpack.c.bf16 %v3121_v59, %v3121_v59  ;;  %v3086_v57 = vadd.f32 %v5787_v58, %v3043_v8  ;;  %v3010_v10 = vmax.f32 %v2724_v34, %v2868_v0  ;;  %v2879_v17 = vadd.f32 %v3914_v28, %v6459_v33  ;;  %v6471_v34 = vld [vmem:[#allocation21_spill] sm:$0xff]  ;;  %v6475_v59 = vld [vmem:[#allocation82_spill] sm:$0xff]  ;;  %v6481_v33 = vld [vmem:[#allocation84_spill] sm:$0xff] }
 0x287   :  { %v3124_v52 = vmax.f32 %v3088_v24, 0.0  ;;  %v3048_v31 = vmax.f32 %v6458_v53, %v3012_v46  ;;  %v2167_v60 = vpop.f32.mrf.mxu0  ;;  %v2870_v43 = vpop.f32.mrf.mxu1  ;;  %v2740_v54 = vadd.f32 %v6473_v55, %v6472_v42  ;;  %v6474_v45 = vld [vmem:[#allocation81_spill] sm:$0xff]  ;;  %v2764_v27 = vadd.f32 %v6490_v5, %v5840_v14 }
 0x288   :  { %3302 = vst.msk [vmem:[%s6195_s3 + $0x20] sm:$0xf] %vm3293_vm1, %v3685_v40  ;;  %v3122_v23 = vmax.f32 %v3086_v57, 0.0  ;;  %v3046_v26 = vmax.f32 %v6464_v9, %v3010_v10  ;;  %v2871_v15 = vadd.f32 %v2870_v43, %v6465_v18  ;;  %v3013_v30 = vmax.f32 %v2735_v39, %v2879_v17  ;;  %v6483_v43 = vld [vmem:[#allocation23_spill] sm:$0xff]  ;;  %v6487_v18 = vld [vmem:[#allocation86_spill] sm:$0xff] }
 0x289   :  { %v3688_v20 = vpack.c.bf16 %v3124_v52, %v3124_v52  ;;  %v3091_v36 = vadd.f32 %v5787_v58, %v3048_v31  ;;  %v5937_v35 = vpop.f32.mrf.mxu0  ;;  %v3917_v32 = vpop.f32.mrf.mxu1  ;;  %v6476_v50 = vmax.f32 %v6474_v45, %v6475_v59  ;;  %v6478_v52 = vld [vmem:[#allocation4_spill] sm:$0xff]  ;;  %v6480_v31 = vld [vmem:[#allocation83_spill] sm:$0xff] }
 0x28a   :  { %v3686_v6 = vpack.c.bf16 %v3122_v23, %v3122_v23  ;;  %v3089_v12 = vadd.f32 %v5787_v58, %v3046_v26  ;;  %v3011_v22 = vmax.f32 %v2727_v7, %v2871_v15  ;;  %v3049_v1 = vmax.f32 %v6470_v56, %v3013_v30  ;;  %v6484_v23 = vld [vmem:[#allocation108_spill] sm:$0xff]  ;;  %v6486_v26 = vld [vmem:[#allocation85_spill] sm:$0xff]  ;;  %v6496_v59 = vld [vmem:[#allocation19_spill] sm:$0xff] }
 0x28b   :  { %3305 = vst.msk [vmem:[%s6195_s3 + $0x2c] sm:$0xf] %vm3293_vm1, %v3688_v20  ;;  %v3127_v3 = vmax.f32 %v3091_v36, 0.0  ;;  %v2892_v51 = vadd.f32 %v3917_v32, %v6471_v34  ;;  %v2172_v16 = vpop.f32.mrf.mxu0  ;;  %v2883_v48 = vpop.f32.mrf.mxu1  ;;  %v2751_v4 = vadd.f32 %v6479_v13, %v6478_v52  ;;  %v6482_v17 = vmax.f32 %v6480_v31, %v6481_v33  ;;  %v6489_v36 = vld [vmem:[#allocation20_spill] sm:$0xff]  ;;  %v6500_v13 = vld [vmem:[#allocation94_spill] sm:$0xff] }
 0x28c   :  { %3303 = vst.msk [vmem:[%s6195_s3 + $0x24] sm:$0xf] %vm3293_vm1, %v3686_v6  ;;  %v3125_v11 = vmax.f32 %v3089_v12, 0.0  ;;  %v3047_v8 = vmax.f32 %v6476_v50, %v3011_v22  ;;  %v2884_v0 = vadd.f32 %v2883_v48, %v6477_v47  ;;  %v3092_v46 = vadd.f32 %v5787_v58, %v3049_v1  ;;  %v6491_v1 = vld [vmem:[#allocation22_spill] sm:$0xff]  ;;  %v6492_v34 = vld [vmem:[#allocation56_spill] sm:$0xff]  ;;  %v6494_v48 = vld [vmem:[#allocation29_spill] sm:$0xff] }
 0x28d   :  { %v3691_v24 = vpack.c.bf16 %v3127_v3, %v3127_v3  ;;  %v3016_v28 = vmax.f32 %v2748_v37, %v2892_v51  ;;  %v5961_v40 = vpop.f32.mrf.mxu0  ;;  %v3918_v57 = vpop.f32.mrf.mxu1  ;;  %v2743_v19 = vadd.f32 %v6485_v44, %v6484_v23  ;;  %v6488_v15 = vmax.f32 %v6486_v26, %v6487_v18  ;;  %v6497_v50 = vld [vmem:[#allocation57_spill] sm:$0xff]  ;;  %v6501_v31 = vld [vmem:[#allocation72_spill] sm:$0xff]  ;;  %v6505_v23 = vld [vmem:[#allocation95_spill] sm:$0xff] }
 0x28e   :  { %v3689_v10 = vpack.c.bf16 %v3125_v11, %v3125_v11  ;;  %v3090_v61 = vadd.f32 %v5787_v58, %v3047_v8  ;;  %v3014_v39 = vmax.f32 %v2740_v54, %v2884_v0  ;;  %v3128_v53 = vmax.f32 %v3092_v46, 0.0  ;;  %v6495_v11 = vld [vmem:[#allocation93_spill] sm:$0xff]  ;;  %v6502_v33 = vld [vmem:[#allocation28_spill] sm:$0xff] }
 0x28f   :  { %3308 = vst.msk [vmem:[%s6195_s3 + $0x38] sm:$0xf] %vm3293_vm1, %v3691_v24  ;;  %v3052_v60 = vmax.f32 %v6482_v17, %v3016_v28  ;;  %v2895_v49 = vadd.f32 %v3918_v57, %v6483_v43  ;;  %v2175_v38 = vpop.f32.mrf.mxu0  ;;  %v2886_v7 = vpop.f32.mrf.mxu1  ;;  %v6493_v51 = vmax.f32 %v6491_v1, %v6492_v34  ;;  %v2756_v45 = vadd.f32 %v6495_v11, %v5802_v21  ;;  %v6499_v0 = vld [vmem:[#allocation25_spill] sm:$0xff]  ;;  %v6504_v43 = vld [vmem:[#allocation31_spill] sm:$0xff]  ;;  %v6516_v11 = vld [vmem:[#allocation60_spill] sm:$0xff] }
 0x290   :  { %3306 = vst.msk [vmem:[%s6195_s3 + $0x30] sm:$0xf] %vm3293_vm1, %v3689_v10  ;;  %v3126_v9 = vmax.f32 %v3090_v61, 0.0  ;;  %v3050_v20 = vmax.f32 %v6488_v15, %v3014_v39  ;;  %v2887_v30 = vadd.f32 %v2886_v7, %v6489_v36  ;;  %v3692_v32 = vpack.c.bf16 %v3128_v53, %v3128_v53  ;;  %v6509_v15 = vld [vmem:[#allocation27_spill] sm:$0xff] }
 0x291   :  { %v3095_v6 = vadd.f32 %v5787_v58, %v3052_v60  ;;  %v3017_v12 = vmax.f32 %v2751_v4, %v2895_v49  ;;  %v5985_v22 = vpop.f32.mrf.mxu0  ;;  %v3921_v25 = vpop.f32.mrf.mxu1  ;;  %v6498_v8 = vmax.f32 %v6496_v59, %v6497_v50  ;;  %v2767_v4 = vadd.f32 %v6500_v13, %v5865_v62  ;;  %v6519_v50 = vld [vmem:[#allocation33_spill] sm:$0xff] }
 0x292   :  { %v3690_v2 = vpack.c.bf16 %v3126_v9, %v3126_v9  ;;  %v3093_v37 = vadd.f32 %v5787_v58, %v3050_v20  ;;  %v3015_v3 = vmax.f32 %v2743_v19, %v2887_v30  ;;  %3309 = vst.msk [vmem:[%s6195_s3 + $0x3c] sm:$0xf] %vm3293_vm1, %v3692_v32  ;;  %v2908_v42 = vadd.f32 %v3921_v25, %v6494_v48  ;;  %v6506_v19 = vld [vmem:[#allocation58_spill] sm:$0xff]  ;;  %v6507_v9 = vld [vmem:[#allocation24_spill] sm:$0xff]  ;;  %v6521_v13 = vld [vmem:[#allocation61_spill] sm:$0xff] }
 0x293   :  { %v3131_v56 = vmax.f32 %v3095_v6, 0.0  ;;  %v3053_v16 = vmax.f32 %v6493_v51, %v3017_v12  ;;  %v2180_v55 = vpop.f32.mrf.mxu0  ;;  %v2899_v54 = vpop.f32.mrf.mxu1  ;;  %v6503_v17 = vmax.f32 %v6501_v31, %v6502_v33  ;;  %v2759_v44 = vadd.f32 %v6505_v23, %v5817_v63  ;;  %v6514_v51 = vld [vmem:[#allocation37_spill] sm:$0xff]  ;;  %v6524_v33 = vld [vmem:[#allocation39_spill] sm:$0xff]  ;;  %v6527_v23 = vld [vmem:[#allocation32_spill] sm:$0xff] }
 0x294   :  { %3307 = vst.msk [vmem:[%s6195_s3 + $0x34] sm:$0xf] %vm3293_vm1, %v3690_v2  ;;  %v3129_v14 = vmax.f32 %v3093_v37, 0.0  ;;  %v3051_v47 = vmax.f32 %v6498_v8, %v3015_v3  ;;  %v2900_v24 = vadd.f32 %v2899_v54, %v6499_v0  ;;  %v3020_v57 = vmax.f32 %v2764_v27, %v2908_v42  ;;  %v6510_v37 = vld [vmem:[#allocation96_spill] sm:$0xff]  ;;  %v6511_v27 = vld [vmem:[#allocation59_spill] sm:$0xff]  ;;  %v6515_v55 = vld [vmem:[#allocation97_spill] sm:$0xff] }
 0x295   :  { %v3695_v46 = vpack.c.bf16 %v3131_v56, %v3131_v56  ;;  %v3096_v28 = vadd.f32 %v5787_v58, %v3053_v16  ;;  %v6009_v10 = vpop.f32.mrf.mxu0  ;;  %v3922_v61 = vpop.f32.mrf.mxu1  ;;  %v6508_v26 = vmax.f32 %v6506_v19, %v6507_v9  ;;  %v2780_v3 = vadd.f32 %v6510_v37, %v5937_v35  ;;  %v6512_v56 = vld [vmem:[#allocation30_spill] sm:$0xff]  ;;  %v6529_v19 = vld [vmem:[#allocation35_spill] sm:$0xff] }
 0x296   :  { %v3693_v21 = vpack.c.bf16 %v3129_v14, %v3129_v14  ;;  %v3094_v39 = vadd.f32 %v5787_v58, %v3051_v47  ;;  %v3018_v52 = vmax.f32 %v2756_v45, %v2900_v24  ;;  %v3056_v60 = vmax.f32 %v6503_v17, %v3020_v57  ;;  %v6517_v45 = vld [vmem:[#allocation26_spill] sm:$0xff] }
 0x297   :  { %3312 = vst.msk [vmem:[%s6195_s3 + $0x48] sm:$0xf] %vm3293_vm1, %v3695_v46  ;;  %v3132_v53 = vmax.f32 %v3096_v28, 0.0  ;;  %v2911_v49 = vadd.f32 %v3922_v61, %v6504_v43  ;;  %v2183_v38 = vpop.f32.mrf.mxu0  ;;  %v2902_v7 = vpop.f32.mrf.mxu1  ;;  %v6513_v1 = vmax.f32 %v6511_v27, %v6512_v56  ;;  %v2772_v54 = vadd.f32 %v6515_v55, %v5889_v41  ;;  %v6532_v37 = vld [vmem:[#allocation38_spill] sm:$0xff]  ;;  %v6534_v27 = vld [vmem:[#allocation45_spill] sm:$0xff] }
 0x298   :  { %3310 = vst.msk [vmem:[%s6195_s3 + $0x40] sm:$0xf] %vm3293_vm1, %v3693_v21  ;;  %v3130_v62 = vmax.f32 %v3094_v39, 0.0  ;;  %v3054_v18 = vmax.f32 %v6508_v26, %v3018_v52  ;;  %v2903_v20 = vadd.f32 %v2902_v7, %v6509_v15  ;;  %v3099_v30 = vadd.f32 %v5787_v58, %v3056_v60  ;;  %v6520_v21 = vld [vmem:[#allocation99_spill] sm:$0xff]  ;;  %v6526_v7 = vld [vmem:[#allocation62_spill] sm:$0xff] }
 0x299   :  { %v3696_v36 = vpack.c.bf16 %v3132_v53, %v3132_v53  ;;  %v3021_v32 = vmax.f32 %v2767_v4, %v2911_v49  ;;  %v2186_v6 = vpop.f32.mrf.mxu0  ;;  %v3925_v12 = vpop.f32.mrf.mxu1  ;;  %v6518_v14 = vmax.f32 %v6516_v11, %v6517_v45  ;;  %v2783_v39 = vadd.f32 %v6520_v21, %v5961_v40  ;;  %v6522_v4 = vld [vmem:[#allocation36_spill] sm:$0xff] }
 0x29a   :  { %v3694_v25 = vpack.c.bf16 %v3130_v62, %v3130_v62  ;;  %v3097_v63 = vadd.f32 %v5787_v58, %v3054_v18  ;;  %v3019_v2 = vmax.f32 %v2759_v44, %v2903_v20  ;;  %v3135_v5 = vmax.f32 %v3099_v30, 0.0  ;;  %v6525_v49 = vld [vmem:[#allocation100_spill] sm:$0xff] }
 0x29b   :  { %3313 = vst.msk [vmem:[%s6195_s3 + $0x4c] sm:$0xf] %vm3293_vm1, %v3696_v36  ;;  %v3057_v34 = vmax.f32 %v6513_v1, %v3021_v32  ;;  %v2924_v16 = vadd.f32 %v3925_v12, %v6514_v51  ;;  %v2188_v48 = vpop.f32.mrf.mxu0  ;;  %v2915_v42 = vpop.f32.mrf.mxu1  ;;  %v6523_v53 = vmax.f32 %v6521_v13, %v6522_v4  ;;  %v2775_v38 = vadd.f32 %v6525_v49, %v5913_v29  ;;  %v6530_v12 = vld [vmem:[#allocation101_spill] sm:$0xff]  ;;  %v6535_v51 = vld [vmem:[#allocation102_spill] sm:$0xff] }
 0x29c   :  { %3311 = vst.msk [vmem:[%s6195_s3 + $0x44] sm:$0xf] %vm3293_vm1, %v3694_v25  ;;  %v3133_v35 = vmax.f32 %v3097_v63, 0.0  ;;  %v3055_v59 = vmax.f32 %v6518_v14, %v3019_v2  ;;  %v2916_v8 = vadd.f32 %v2915_v42, %v6519_v50  ;;  %v3699_v47 = vpack.c.bf16 %v3135_v5, %v3135_v5  ;;  %v6531_v2 = vld [vmem:[#allocation63_spill] sm:$0xff]  ;;  %v6536_v42 = vld [vmem:[#allocation64_spill] sm:$0xff] }
 0x29d   :  { %v3100_v0 = vadd.f32 %v5787_v58, %v3057_v34  ;;  %v3024_v24 = vmax.f32 %v2780_v3, %v2924_v16  ;;  %v2189_v46 = vpop.f32.mrf.mxu0  ;;  %v3926_v28 = vpop.f32.mrf.mxu1  ;;  %v6528_v44 = vmax.f32 %v6526_v7, %v6527_v23  ;;  %v2796_v25 = vadd.f32 %v6530_v12, %v2186_v6  ;;  %v6537_v6 = vld [vmem:[#allocation34_spill] sm:$0xff] }
 0x29e   :  { %v3697_v57 = vpack.c.bf16 %v3133_v35, %v3133_v35  ;;  %v3098_v41 = vadd.f32 %v5787_v58, %v3055_v59  ;;  %v3022_v61 = vmax.f32 %v2772_v54, %v2916_v8  ;;  %3316 = vst.msk [vmem:[%s6195_s3 + $0x58] sm:$0xf] %vm3293_vm1, %v3699_v47  ;;  %v2927_v17 = vadd.f32 %v3926_v28, %v6524_v33  ;;  %v6539_v35 = vld [vmem:[#allocation41_spill] sm:$0xff] }
 0x29f   :  { %v3136_v52 = vmax.f32 %v3100_v0, 0.0  ;;  %v3060_v31 = vmax.f32 %v6523_v53, %v3024_v24  ;;  %v2191_v60 = vpop.f32.mrf.mxu0  ;;  %v2918_v43 = vpop.f32.mrf.mxu1  ;;  %v6533_v3 = vmax.f32 %v6531_v2, %v6532_v37  ;;  %v2788_v16 = vadd.f32 %v6535_v51, %v5985_v22  ;;  %v6540_v24 = vld [vmem:[#allocation103_spill] sm:$0xff] }
 0x2a0   :  { %3314 = vst.msk [vmem:[%s6195_s3 + $0x50] sm:$0xf] %vm3293_vm1, %v3697_v57  ;;  %v3134_v40 = vmax.f32 %v3098_v41, 0.0  ;;  %v3058_v62 = vmax.f32 %v6528_v44, %v3022_v61  ;;  %v2919_v9 = vadd.f32 %v2918_v43, %v6529_v19  ;;  %v3025_v15 = vmax.f32 %v2783_v39, %v2927_v17  ;;  %v6541_v41 = vld [vmem:[#allocation65_spill] sm:$0xff]  ;;  %v6542_v61 = vld [vmem:[#allocation44_spill] sm:$0xff]  ;;  %v6546_v60 = vld [vmem:[#allocation66_spill] sm:$0xff] }
 0x2a1   :  { %v3700_v26 = vpack.c.bf16 %v3136_v52, %v3136_v52  ;;  %v3103_v18 = vadd.f32 %v5787_v58, %v3060_v31  ;;  %v2194_v20 = vpop.f32.mrf.mxu0  ;;  %v3929_v36 = vpop.f32.mrf.mxu1  ;;  %v6538_v55 = vmax.f32 %v6536_v42, %v6537_v6  ;;  %v2799_v28 = vadd.f32 %v6540_v24, %v2189_v46  ;;  %v6544_v52 = vld [vmem:[#allocation47_spill] sm:$0xff]  ;;  %v6545_v31 = vld [vmem:[#allocation104_spill] sm:$0xff] }
 0x2a2   :  { %v3698_v30 = vpack.c.bf16 %v3134_v40, %v3134_v40  ;;  %v3101_v29 = vadd.f32 %v5787_v58, %v3058_v62  ;;  %v3023_v32 = vmax.f32 %v2775_v38, %v2919_v9  ;;  %v3061_v5 = vmax.f32 %v6533_v3, %v3025_v15  ;;  %v6547_v46 = vld [vmem:[#allocation40_spill] sm:$0xff]  ;;  %v6549_v38 = vld [vmem:[#allocation43_spill] sm:$0xff] }
 0x2a3   :  { %3317 = vst.msk [vmem:[%s6195_s3 + $0x5c] sm:$0xf] %vm3293_vm1, %v3700_v26  ;;  %v3139_v63 = vmax.f32 %v3103_v18, 0.0  ;;  %v2940_v56 = vadd.f32 %v3929_v36, %v6534_v27  ;;  %v2196_v1 = vpop.f32.mrf.mxu0  ;;  %v2931_v34 = vpop.f32.mrf.mxu1  ;;  %v6543_v21 = vmax.f32 %v6541_v41, %v6542_v61  ;;  %v2791_v33 = vadd.f32 %v6545_v31, %v6009_v10  ;;  %v6550_v18 = vld [vmem:[#allocation106_spill] sm:$0xff]  ;;  %v6555_v3 = vld [vmem:[#allocation107_spill] sm:$0xff] }
 0x2a4   :  { %3315 = vst.msk [vmem:[%s6195_s3 + $0x54] sm:$0xf] %vm3293_vm1, %v3698_v30  ;;  %v3137_v48 = vmax.f32 %v3101_v29, 0.0  ;;  %v3059_v54 = vmax.f32 %v6538_v55, %v3023_v32  ;;  %v2932_v11 = vadd.f32 %v2931_v34, %v6539_v35  ;;  %v3104_v14 = vadd.f32 %v5787_v58, %v3061_v5  ;;  %v6551_v30 = vld [vmem:[#allocation67_spill] sm:$0xff]  ;;  %v6552_v29 = vld [vmem:[#allocation46_spill] sm:$0xff] }
 0x2a5   :  { %v3703_v45 = vpack.c.bf16 %v3139_v63, %v3139_v63  ;;  %v3028_v59 = vmax.f32 %v2796_v25, %v2940_v56  ;;  %v2197_v50 = vpop.f32.mrf.mxu0  ;;  %v3930_v8 = vpop.f32.mrf.mxu1  ;;  %v6548_v43 = vmax.f32 %v6546_v60, %v6547_v46  ;;  %v6553_v32 = vmax.f32 %v6551_v30, %v6552_v29  ;;  %v6554_v25 = vld [vmem:[#allocation53_spill] sm:$0xff]  ;;  %v6556_v56 = vld [vmem:[#allocation68_spill] sm:$0xff]  ;;  %v6557_v1 = vld [vmem:[#allocation42_spill] sm:$0xff] }
 0x2a6   :  { %v3701_v47 = vpack.c.bf16 %v3137_v48, %v3137_v48  ;;  %v3102_v22 = vadd.f32 %v5787_v58, %v3059_v54  ;;  %v3026_v0 = vmax.f32 %v2788_v16, %v2932_v11  ;;  %v3140_v57 = vmax.f32 %v3104_v14, 0.0  ;;  %v6559_v16 = vld [vmem:[#allocation49_spill] sm:$0xff] }
 0x2a7   :  { %3320 = vst.msk [vmem:[%s6195_s3 + $0x68] sm:$0xf] %vm3293_vm1, %v3703_v45  ;;  %v3064_v39 = vmax.f32 %v6543_v21, %v3028_v59  ;;  %v2943_v13 = vadd.f32 %v3930_v8, %v6544_v52  ;;  %v2199_v4 = vpop.f32.mrf.mxu0  ;;  %v2934_v53 = vpop.f32.mrf.mxu1  ;;  %v2804_v5 = vadd.f32 %v6555_v3, %v2194_v20  ;;  %v6558_v34 = vmax.f32 %v6556_v56, %v6557_v1  ;;  %v6560_v59 = vld [vmem:[#allocation109_spill] sm:$0xff]  ;;  %v6565_v21 = vld [vmem:[#allocation110_spill] sm:$0xff] }
 0x2a8   :  { %3318 = vst.msk [vmem:[%s6195_s3 + $0x60] sm:$0xf] %vm3293_vm1, %v3701_v47  ;;  %v3138_v17 = vmax.f32 %v3102_v22, 0.0  ;;  %v3062_v49 = vmax.f32 %v6548_v43, %v3026_v0  ;;  %v2935_v40 = vadd.f32 %v2934_v53, %v6549_v38  ;;  %v3704_v7 = vpack.c.bf16 %v3140_v57, %v3140_v57  ;;  %v6561_v47 = vld [vmem:[#allocation69_spill] sm:$0xff]  ;;  %v6562_v22 = vld [vmem:[#allocation52_spill] sm:$0xff] }
 0x2a9   :  { %v3107_v23 = vadd.f32 %v5787_v58, %v3064_v39  ;;  %v3029_v44 = vmax.f32 %v2799_v28, %v2943_v13  ;;  %v2202_v62 = vpop.f32.mrf.mxu0  ;;  %v3933_v19 = vpop.f32.mrf.mxu1  ;;  %v6563_v0 = vmax.f32 %v6561_v47, %v6562_v22  ;;  %v6564_v28 = vld [vmem:[#allocation55_spill] sm:$0xff]  ;;  %v2807_v39 = vadd.f32 %v6565_v21, %v2197_v50  ;;  %v6566_v13 = vld [vmem:[#allocation70_spill] sm:$0xff]  ;;  %v6567_v4 = vld [vmem:[#allocation48_spill] sm:$0xff] }
 0x2aa   :  { %v3702_v9 = vpack.c.bf16 %v3138_v17, %v3138_v17  ;;  %v3105_v10 = vadd.f32 %v5787_v58, %v3062_v49  ;;  %v3027_v26 = vmax.f32 %v2791_v33, %v2935_v40  ;;  %v2812_v15 = vadd.f32 %v6550_v18, %v2202_v62  ;;  %3321 = vst.msk [vmem:[%s6195_s3 + $0x6c] sm:$0xf] %vm3293_vm1, %v3704_v7  ;;  %v6569_v33 = vld [vmem:[#allocation51_spill] sm:$0xff] }
 0x2ab   :  { %v3143_v36 = vmax.f32 %v3107_v23, 0.0  ;;  %v3065_v12 = vmax.f32 %v6553_v32, %v3029_v44  ;;  %v2956_v63 = vadd.f32 %v3933_v19, %v6554_v25  ;;  %v2204_v2 = vpop.f32.mrf.mxu0  ;;  %v2947_v37 = vpop.f32.mrf.mxu1  ;;  %v6568_v53 = vmax.f32 %v6566_v13, %v6567_v4  ;;  %v6570_v7 = vld [vmem:[#allocation71_spill] sm:$0xff]  ;;  %v6571_v23 = vld [vmem:[#allocation54_spill] sm:$0xff] }
 0x2ac   :  { %3319 = vst.msk [vmem:[%s6195_s3 + $0x64] sm:$0xf] %vm3293_vm1, %v3702_v9  ;;  %v3141_v27 = vmax.f32 %v3105_v10, 0.0  ;;  %v3063_v51 = vmax.f32 %v6558_v34, %v3027_v26  ;;  %v2948_v48 = vadd.f32 %v2947_v37, %v6559_v16  ;;  %v6572_v44 = vmax.f32 %v6570_v7, %v6571_v23  ;;  %v6573_v9 = vld [vmem:[#allocation73_spill] sm:$0xff]  ;;  %v6574_v10 = vld [vmem:[#allocation50_spill] sm:$0xff] }
 0x2ad   :  { %v3707_v42 = vpack.c.bf16 %v3143_v36, %v3143_v36  ;;  %v3108_v6 = vadd.f32 %v5787_v58, %v3065_v12  ;;  %v3032_v55 = vmax.f32 %v2812_v15, %v2956_v63  ;;  %v2205_v54 = vpop.f32.mrf.mxu0  ;;  %v3934_v35 = vpop.f32.mrf.mxu1  ;;  %v6575_v26 = vmax.f32 %v6573_v9, %v6574_v10 }
 0x2ae   :  { %v3705_v11 = vpack.c.bf16 %v3141_v27, %v3141_v27  ;;  %v3106_v45 = vadd.f32 %v5787_v58, %v3063_v51  ;;  %v3030_v14 = vmax.f32 %v2804_v5, %v2948_v48  ;;  %v2815_v8 = vadd.f32 %v6560_v59, %v2205_v54 }
 0x2af   :  { %3324 = vst.msk [vmem:[%s6195_s3 + $0x78] sm:$0xf] %vm3293_vm1, %v3707_v42  ;;  %v3144_v20 = vmax.f32 %v3108_v6, 0.0  ;;  %v3068_v24 = vmax.f32 %v6563_v0, %v3032_v55  ;;  %v2959_v57 = vadd.f32 %v3934_v35, %v6564_v28  ;;  %v2207_v41 = vpop.f32.mrf.mxu0  ;;  %v2950_v61 = vpop.f32.mrf.mxu1 }
 0x2b0   :  { %3322 = vst.msk [vmem:[%s6195_s3 + $0x70] sm:$0xf] %vm3293_vm1, %v3705_v11  ;;  %v3142_v52 = vmax.f32 %v3106_v45, 0.0  ;;  %v3066_v31 = vmax.f32 %v6568_v53, %v3030_v14  ;;  %v2951_v17 = vadd.f32 %v2950_v61, %v6569_v33 }
 0x2b1   :  { %v3708_v60 = vpack.c.bf16 %v3144_v20, %v3144_v20  ;;  %v3111_v46 = vadd.f32 %v5787_v58, %v3068_v24  ;;  %v3033_v43 = vmax.f32 %v2815_v8, %v2959_v57 }
 0x2b2   :  { %v3706_v49 = vpack.c.bf16 %v3142_v52, %v3142_v52  ;;  %v3109_v38 = vadd.f32 %v5787_v58, %v3066_v31  ;;  %v3031_v40 = vmax.f32 %v2807_v39, %v2951_v17 }
 0x2b3   :  { %3325 = vst.msk [vmem:[%s6195_s3 + $0x7c] sm:$0xf] %vm3293_vm1, %v3708_v60  ;;  %v3147_v50 = vmax.f32 %v3111_v46, 0.0  ;;  %v3069_v62 = vmax.f32 %v6572_v44, %v3033_v43 }
 0x2b4   :  { %3323 = vst.msk [vmem:[%s6195_s3 + $0x74] sm:$0xf] %vm3293_vm1, %v3706_v49  ;;  %v3145_v19 = vmax.f32 %v3109_v38, 0.0  ;;  %v3067_v18 = vmax.f32 %v6575_v26, %v3031_v40 }
 0x2b5   :  { %v3711_v15 = vpack.c.bf16 %v3147_v50, %v3147_v50  ;;  %v3112_v36 = vadd.f32 %v5787_v58, %v3069_v62 }
 0x2b6   :  { %v3709_v30 = vpack.c.bf16 %v3145_v19, %v3145_v19  ;;  %v3110_v29 = vadd.f32 %v5787_v58, %v3067_v18 }
 0x2b7   :  { %3328 = vst.msk [vmem:[%s6195_s3 + $0x88] sm:$0xf] %vm3293_vm1, %v3711_v15  ;;  %v3148_v32 = vmax.f32 %v3112_v36, 0.0 }
 0x2b8   :  { %3326 = vst.msk [vmem:[%s6195_s3 + $0x80] sm:$0xf] %vm3293_vm1, %v3709_v30  ;;  %v3146_v12 = vmax.f32 %v3110_v29, 0.0 }
 0x2b9   :  { %v3712_v25 = vpack.c.bf16 %v3148_v32, %v3148_v32 }
 0x2ba   :  { %v3710_v63 = vpack.c.bf16 %v3146_v12, %v3146_v12 }
 0x2bb   :  { %3329 = vst.msk [vmem:[%s6195_s3 + $0x8c] sm:$0xf] %vm3293_vm1, %v3712_v25 }
 0x2bc   :  { %3327 = vst.msk [vmem:[%s6195_s3 + $0x84] sm:$0xf] %vm3293_vm1, %v3710_v63 }

// kernel: simple_cnn_forward.5
= control target key start
LH: loop header
LB: loop body
LE: loop exit
PB: predicated region body
PF: predicated region fallthrough
CT: control target
= control target key end

     0   :  { %v1203_v28 = vlaneseq  ;;  %v8767_v36 = vmov 1966171168   ;;  %s10747_s0 = inlined_call_operand.vmem [shape: bf16[2,9216], index: 0, kind: input, shape index: {}]   ;;  %s10748_s1 = inlined_call_operand.vmem [shape: bf16[9216,128], index: 1, kind: input, shape index: {}]   ;;  %s10749_s2 = inlined_call_operand.vmem [shape: f32[1,128], index: 2, kind: input, shape index: {}]   ;;  %s10750_s3 = inlined_call_operand.vmem [shape: f32[128,10], index: 3, kind: input, shape index: {}]   ;;  %s10751_s4 = inlined_call_operand.vmem [shape: f32[1,10], index: 4, kind: input, shape index: {}]   ;;  %s10752_s5 = inlined_call_operand.hbm [shape: f32[2,10], index: 5, kind: output, shape index: {}]  }
   0x1   :  { %v8156_v0 = vld [vmem:[%s10748_s1 + $0x78] sm:$0xff]   ;;  %v8160_v4 = vld [vmem:[%s10748_s1 + $0x70] sm:$0xff]   ;;  %v8164_v8 = vld [vmem:[%s10748_s1 + $0x68] sm:$0xff]   ;;  %v1201_v37 = vunpack.c.l.s4 %v8767_v36 }
   0x2   :  { %v8157_v1 = vld [vmem:[%s10748_s1 + $0xf8] sm:$0xff]   ;;  %7308 = vmatprep.subr.bf16.mxu0 %v8156_v0  ;;  %v8161_v5 = vld [vmem:[%s10748_s1 + $0xf0] sm:$0xff]   ;;  %v8165_v9 = vld [vmem:[%s10748_s1 + $0xe8] sm:$0xff]   ;;  %v1204_v33 = vshrl.u32 %v1203_v28, 7 }
   0x3   :  { %v8158_v2 = vld [vmem:[%s10748_s1 + $0x38] sm:$0xff]   ;;  %7330 = vmatprep.subr.bf16.mxu1 %v8157_v1  ;;  %v8162_v6 = vld [vmem:[%s10748_s1 + $0x30] sm:$0xff]   ;;  %v8166_v10 = vld [vmem:[%s10748_s1 + $0x28] sm:$0xff]   ;;  %v1202_v40 = vunpack.c.0.s8 %v1201_v37 }
   0x4   :  { %v8159_v3 = vld [vmem:[%s10748_s1 + $0xb8] sm:$0xff]   ;;  %7309 = vmatpush3.bf16.msra.mxu0 %v8158_v2  ;;  %v8163_v7 = vld [vmem:[%s10748_s1 + $0xb0] sm:$0xff]   ;;  %v8167_v11 = vld [vmem:[%s10748_s1 + $0xa8] sm:$0xff]  }
   0x5   :  { %7331 = vmatpush3.bf16.msra.mxu1 %v8159_v3  ;;  %7310 = vmatprep.subr.bf16.mxu0 %v8160_v4  ;;  %v8168_v12 = vld [vmem:[%s10748_s1 + $0x60] sm:$0xff]   ;;  %v8172_v16 = vld [vmem:[%s10748_s1 + $0x58] sm:$0xff]   ;;  %v8176_v20 = vld [vmem:[%s10748_s1 + $0x50] sm:$0xff]   ;;  %v8906_v41 = vsub.s32 %v1202_v40, %v1204_v33 }
   0x6   :  { %7332 = vmatprep.subr.bf16.mxu1 %v8161_v5  ;;  %v8169_v13 = vld [vmem:[%s10748_s1 + $0xe0] sm:$0xff]   ;;  %v8173_v17 = vld [vmem:[%s10748_s1 + $0xd8] sm:$0xff]   ;;  %v8177_v21 = vld [vmem:[%s10748_s1 + $0xd0] sm:$0xff]  }
   0x7   :  { %v8170_v14 = vld [vmem:[%s10748_s1 + $0x20] sm:$0xff]   ;;  %v8174_v18 = vld [vmem:[%s10748_s1 + $0x18] sm:$0xff]   ;;  %v8178_v22 = vld [vmem:[%s10748_s1 + $0x10] sm:$0xff]  }
   0x8   :  { %7311 = vmatpush3.bf16.msra.mxu0 %v8162_v6  ;;  %v8171_v15 = vld [vmem:[%s10748_s1 + $0xa0] sm:$0xff]   ;;  %v8175_v19 = vld [vmem:[%s10748_s1 + $0x98] sm:$0xff]   ;;  %v8179_v23 = vld [vmem:[%s10748_s1 + $0x90] sm:$0xff]  }
   0x9   :  { %7333 = vmatpush3.bf16.msra.mxu1 %v8163_v7  ;;  %7312 = vmatprep.subr.bf16.mxu0 %v8164_v8  ;;  %v8180_v24 = vld [vmem:[%s10748_s1 + $0x48] sm:$0xff]   ;;  %v8184_v29 = vld [vmem:[%s10748_s1 + $0x40] sm:$0xff]   ;;  %v8189_v35 = vld [vmem:[%s10748_s1 + $0x178] sm:$0xff]  }
   0xa   :  { %7334 = vmatprep.subr.bf16.mxu1 %v8165_v9  ;;  %v8181_v25 = vld [vmem:[%s10748_s1 + $0xc8] sm:$0xff]   ;;  %v8185_v30 = vld [vmem:[%s10748_s1 + $0xc0] sm:$0xff]   ;;  %v8190_v38 = vld [vmem:[%s10748_s1 + $0x1f8] sm:$0xff]  }
   0xb   :  { %v8182_v26 = vld [vmem:[%s10748_s1 + $0x8] sm:$0xff]   ;;  %v8186_v31 = vld [vmem:[%s10748_s1] sm:$0xff]   ;;  %v8191_v47 = vld [vmem:[%s10748_s1 + $0x138] sm:$0xff]  }
   0xc   :  { %7313 = vmatpush3.bf16.msra.mxu0 %v8166_v10  ;;  %v8183_v27 = vld [vmem:[%s10748_s1 + $0x88] sm:$0xff]   ;;  %v8187_v32 = vld [vmem:[%s10748_s1 + $0x80] sm:$0xff]   ;;  %v8192_v49 = vld [vmem:[%s10748_s1 + $0x1b8] sm:$0xff]  }
   0xd   :  { %7335 = vmatpush3.bf16.msra.mxu1 %v8167_v11  ;;  %7314 = vmatprep.subr.bf16.mxu0 %v8168_v12  ;;  %v22_v34 = vld [vmem:[%s10747_s0] sm:$0xff]  ;;  %v8193_v52 = vld [vmem:[%s10748_s1 + $0x170] sm:$0xff]   ;;  %v8197_v58 = vld [vmem:[%s10748_s1 + $0x168] sm:$0xff]  }
   0xe   :  { %7336 = vmatprep.subr.bf16.mxu1 %v8169_v13  ;;  %v1199_v39 = vcombine.high %v22_v34, %v22_v34  ;;  %v1206_v42 = vrot.slane %v22_v34, %v8906_v41  ;;  %v8194_v54 = vld [vmem:[%s10748_s1 + $0x1f0] sm:$0xff]   ;;  %v8198_v59 = vld [vmem:[%s10748_s1 + $0x1e8] sm:$0xff]   ;;  %v8201_v62 = vld [vmem:[%s10748_s1 + $0x160] sm:$0xff]  }
   0xf   :  { %v8195_v55 = vld [vmem:[%s10748_s1 + $0x130] sm:$0xff]   ;;  %v8199_v60 = vld [vmem:[%s10748_s1 + $0x128] sm:$0xff]   ;;  %v8202_v63 = vld [vmem:[%s10748_s1 + $0x1e0] sm:$0xff]  }
  0x10   :  { %7315 = vmatpush3.bf16.msra.mxu0 %v8170_v14  ;;  %v8910_v43 = vrot.slane %v1199_v39, %v8906_v41  ;;  %v1214_v44 = vcombine.high %v1206_v42, %v1206_v42  ;;  %v1222_v45 = vrot.slane %v1206_v42, %v8906_v41  ;;  %v8196_v57 = vld [vmem:[%s10748_s1 + $0x1b0] sm:$0xff]   ;;  %v8200_v61 = vld [vmem:[%s10748_s1 + $0x1a8] sm:$0xff]   ;;  %v8203_v0 = vld [vmem:[%s10748_s1 + $0x120] sm:$0xff]  }
  0x11   :  { %7337 = vmatpush3.bf16.msra.mxu1 %v8171_v15  ;;  %7316 = vmatprep.subr.bf16.mxu0 %v8172_v16  ;;  %v8204_v1 = vld [vmem:[%s10748_s1 + $0x1a0] sm:$0xff]   ;;  %v8205_v2 = vld [vmem:[%s10748_s1 + $0x158] sm:$0xff]   ;;  %v8209_v6 = vld [vmem:[%s10748_s1 + $0x150] sm:$0xff]  }
  0x12   :  { %7338 = vmatprep.subr.bf16.mxu1 %v8173_v17  ;;  %v1215_v46 = vcombine.high %v8910_v43, %v8910_v43  ;;  %v1236_v48 = vrot.slane %v1214_v44, %v8906_v41  ;;  %v1244_v51 = vcombine.high %v1222_v45, %v1222_v45  ;;  %v8206_v3 = vld [vmem:[%s10748_s1 + $0x1d8] sm:$0xff]   ;;  %v8210_v7 = vld [vmem:[%s10748_s1 + $0x1d0] sm:$0xff]   ;;  %v8213_v10 = vld [vmem:[%s10748_s1 + $0x148] sm:$0xff]  }
  0x13   :  { %v8207_v4 = vld [vmem:[%s10748_s1 + $0x118] sm:$0xff]   ;;  %v8211_v8 = vld [vmem:[%s10748_s1 + $0x110] sm:$0xff]   ;;  %v8214_v11 = vld [vmem:[%s10748_s1 + $0x1c8] sm:$0xff]  }
  0x14   :  { %7317 = vmatpush3.bf16.msra.mxu0 %v8174_v18  ;;  %v1243_v50 = vrot.slane %v1215_v46, %v8906_v41  ;;  %5200 = vmatprep.mubr.bf16.mxu0 %v1236_v48  ;;  %v1246_v53 = vcombine.high %v1236_v48, %v1236_v48  ;;  %v8208_v5 = vld [vmem:[%s10748_s1 + $0x198] sm:$0xff]   ;;  %v8212_v9 = vld [vmem:[%s10748_s1 + $0x190] sm:$0xff]   ;;  %v8215_v12 = vld [vmem:[%s10748_s1 + $0x108] sm:$0xff]   ;;  %v1229_v18 = vrot.slane %v8910_v43, %v8906_v41 }
  0x15   :  { %7339 = vmatpush3.bf16.msra.mxu1 %v8175_v19  ;;  %7318 = vmatprep.subr.bf16.mxu0 %v8176_v20  ;;  %v8216_v13 = vld [vmem:[%s10748_s1 + $0x188] sm:$0xff]   ;;  %v8217_v14 = vld [vmem:[%s10748_s1 + $0x140] sm:$0xff]   ;;  %v8221_v19 = vld [vmem:[%s10748_s1 + $0x278] sm:$0xff]  }
  0x16   :  { %7340 = vmatprep.subr.bf16.mxu1 %v8177_v21  ;;  %v1247_v56 = vcombine.high %v1243_v50, %v1243_v50  ;;  %5240 = vmatprep.mubr.bf16.mxu1 %v1246_v53  ;;  %v8218_v15 = vld [vmem:[%s10748_s1 + $0x1c0] sm:$0xff]   ;;  %v8222_v20 = vld [vmem:[%s10748_s1 + $0x2f8] sm:$0xff]   ;;  %v8229_v28 = vld [vmem:[%s10748_s1 + $0x268] sm:$0xff]  }
  0x17   :  { %v8219_v16 = vld [vmem:[%s10748_s1 + $0x100] sm:$0xff]   ;;  %v8223_v21 = vld [vmem:[%s10748_s1 + $0x238] sm:$0xff]   ;;  %v8241_v40 = vld [vmem:[%s10748_s1 + $0x250] sm:$0xff]  }
  0x18   :  { %7319 = vmatpush3.bf16.msra.mxu0 %v8178_v22  ;;  %v8220_v17 = vld [vmem:[%s10748_s1 + $0x180] sm:$0xff]   ;;  %v8224_v22 = vld [vmem:[%s10748_s1 + $0x2b8] sm:$0xff]   ;;  %v8242_v42 = vld [vmem:[%s10748_s1 + $0x2d0] sm:$0xff]  }
  0x19   :  { %7341 = vmatpush3.bf16.msra.mxu1 %v8179_v23  ;;  %7320 = vmatprep.subr.bf16.mxu0 %v8180_v24  ;;  %v1245_v23 = vcombine.high %v1229_v18, %v1229_v18  ;;  %v8225_v24 = vld [vmem:[%s10748_s1 + $0x270] sm:$0xff]   ;;  %v8234_v33 = vld [vmem:[%s10748_s1 + $0x2e0] sm:$0xff]   ;;  %v8237_v36 = vld [vmem:[%s10748_s1 + $0x258] sm:$0xff]  }
  0x1a   :  { %7342 = vmatprep.subr.bf16.mxu1 %v8181_v25  ;;  %v8226_v25 = vld [vmem:[%s10748_s1 + $0x2f0] sm:$0xff]   ;;  %v8235_v34 = vld [vmem:[%s10748_s1 + $0x220] sm:$0xff]   ;;  %v8238_v37 = vld [vmem:[%s10748_s1 + $0x2d8] sm:$0xff]  }
  0x1b   :  { %v8240_v39 = vld [vmem:[%s10748_s1 + $0x298] sm:$0xff]   ;;  %v8243_v43 = vld [vmem:[%s10748_s1 + $0x210] sm:$0xff]   ;;  %v23_v46 = vld [vmem:[%s10747_s0 + $0x8] sm:$0xff] }
  0x1c   :  { %7321 = vmatpush3.bf16.msra.mxu0 %v8182_v26  ;;  %v8227_v26 = vld [vmem:[%s10748_s1 + $0x230] sm:$0xff]   ;;  %v1255_v48 = vrot.slane %v23_v46, %v8906_v41 }
  0x1d   :  { %7343 = vmatpush3.bf16.msra.mxu1 %v8183_v27  ;;  %7322 = vmatprep.subr.bf16.mxu0 %v8184_v29  ;;  %v8228_v27 = vld [vmem:[%s10748_s1 + $0x2b0] sm:$0xff]   ;;  %v8230_v29 = vld [vmem:[%s10748_s1 + $0x2e8] sm:$0xff]  }
  0x1e   :  { %7344 = vmatprep.subr.bf16.mxu1 %v8185_v30  ;;  %v8231_v30 = vld [vmem:[%s10748_s1 + $0x228] sm:$0xff]   ;;  %v8244_v44 = vld [vmem:[%s10748_s1 + $0x290] sm:$0xff]  }
  0x20   :  { %7323 = vmatpush3.bf16.msra.mxu0 %v8186_v31  ;;  %v8232_v31 = vld [vmem:[%s10748_s1 + $0x2a8] sm:$0xff]  }
  0x21   :  { %7345 = vmatpush3.bf16.msra.mxu1 %v8187_v32  ;;  %7352 = vmatprep.subr.bf16.mxu0 %v8189_v35  ;;  %v8233_v32 = vld [vmem:[%s10748_s1 + $0x260] sm:$0xff]  }
  0x22   :  { %7374 = vmatprep.subr.bf16.mxu1 %v8190_v38  ;;  %v8236_v35 = vld [vmem:[%s10748_s1 + $0x2a0] sm:$0xff]   ;;  %v8239_v38 = vld [vmem:[%s10748_s1 + $0x218] sm:$0xff]  }
  0x23   :  { %5201 = vmatmul.mubr.bf16.vlgmr.msra.gmra.mxu0 %v1222_v45  ;;  %v8245_v45 = vld [vmem:[%s10748_s1 + $0x248] sm:$0xff]  }
  0x24   :  { %7353 = vmatpush3.bf16.msra.mxu0 %v8191_v47  ;;  %5241 = vmatmul.mubr.bf16.vlgmr.msra.gmra.mxu1 %v1244_v51  ;;  %v8246_v47 = vld [vmem:[%s10748_s1 + $0x2c8] sm:$0xff]  }
  0x25   :  { %7354 = vmatprep.subr.bf16.mxu0 %v8193_v52  ;;  %7375 = vmatpush3.bf16.msra.mxu1 %v8192_v49  ;;  %v1248_v49 = vcombine.high %v23_v46, %v23_v46  ;;  %v8248_v51 = vld [vmem:[%s10748_s1 + $0x288] sm:$0xff]   ;;  %v1263_v52 = vcombine.high %v1255_v48, %v1255_v48 }
  0x26   :  { %5280 = vmatprep.mubr.bf16.mxu0 %v1243_v50  ;;  %7376 = vmatprep.subr.bf16.mxu1 %v8194_v54  ;;  %v8247_v50 = vld [vmem:[%s10748_s1 + $0x208] sm:$0xff]   ;;  %v8249_v54 = vld [vmem:[%s10748_s1 + $0x240] sm:$0xff]  }
  0x27   :  { %5320 = vmatprep.mubr.bf16.mxu1 %v1247_v56  ;;  %v9098_v53 = vrot.slane %v1248_v49, %v8906_v41  ;;  %v1285_v56 = vrot.slane %v1263_v52, %v8906_v41  ;;  %v8296_v46 = vld [vmem:[%s10748_s1 + $0x428] sm:$0xff]   ;;  %v8299_v49 = vld [vmem:[%s10748_s1 + $0x4e0] sm:$0xff]   ;;  %v8302_v52 = vld [vmem:[%s10748_s1 + $0x458] sm:$0xff]  }
  0x28   :  { %7355 = vmatpush3.bf16.msra.mxu0 %v8195_v55  ;;  %v8250_v55 = vld [vmem:[%s10748_s1 + $0x2c0] sm:$0xff]  }
  0x29   :  { %7356 = vmatprep.subr.bf16.mxu0 %v8197_v58  ;;  %7377 = vmatpush3.bf16.msra.mxu1 %v8196_v57  ;;  %v1264_v57 = vcombine.high %v9098_v53, %v9098_v53  ;;  %v8251_v58 = vld [vmem:[%s10748_s1 + $0x200] sm:$0xff]  }
  0x2a   :  { %7378 = vmatprep.subr.bf16.mxu1 %v8198_v59  ;;  %v8252_v59 = vld [vmem:[%s10748_s1 + $0x280] sm:$0xff]  }
  0x2c   :  { %7357 = vmatpush3.bf16.msra.mxu0 %v8199_v60  ;;  %v1295_v60 = vcombine.high %v1285_v56, %v1285_v56 }
  0x2d   :  { %7358 = vmatprep.subr.bf16.mxu0 %v8201_v62  ;;  %7379 = vmatpush3.bf16.msra.mxu1 %v8200_v61  ;;  %v1271_v61 = vrot.slane %v1255_v48, %v8906_v41  ;;  %v8253_v62 = vld [vmem:[%s10748_s1 + $0x378] sm:$0xff]   ;;  %v8298_v48 = vld [vmem:[%s10748_s1 + $0x460] sm:$0xff]  }
  0x2e   :  { %7380 = vmatprep.subr.bf16.mxu1 %v8202_v63  ;;  %v8254_v63 = vld [vmem:[%s10748_s1 + $0x3f8] sm:$0xff]  }
  0x30   :  { %7359 = vmatpush3.bf16.msra.mxu0 %v8203_v0  ;;  %v1292_v0 = vrot.slane %v1264_v57, %v8906_v41  ;;  %v8307_v57 = vld [vmem:[%s10748_s1 + $0x4d0] sm:$0xff]  }
  0x31   :  { %7360 = vmatprep.subr.bf16.mxu0 %v8205_v2  ;;  %7381 = vmatpush3.bf16.msra.mxu1 %v8204_v1  ;;  %v8255_v1 = vld [vmem:[%s10748_s1 + $0x338] sm:$0xff]  }
  0x32   :  { %7382 = vmatprep.subr.bf16.mxu1 %v8206_v3  ;;  %v8256_v2 = vld [vmem:[%s10748_s1 + $0x3b8] sm:$0xff]   ;;  %v1293_v3 = vcombine.high %v1271_v61, %v1271_v61 }
  0x34   :  { %7361 = vmatpush3.bf16.msra.mxu0 %v8207_v4  ;;  %v8257_v4 = vld [vmem:[%s10748_s1 + $0x370] sm:$0xff]  }
  0x35   :  { %7362 = vmatprep.subr.bf16.mxu0 %v8209_v6  ;;  %7383 = vmatpush3.bf16.msra.mxu1 %v8208_v5  ;;  %v8258_v5 = vld [vmem:[%s10748_s1 + $0x3f0] sm:$0xff]   ;;  %v1296_v6 = vcombine.high %v1292_v0, %v1292_v0 }
  0x36   :  { %7384 = vmatprep.subr.bf16.mxu1 %v8210_v7  ;;  %v8259_v7 = vld [vmem:[%s10748_s1 + $0x330] sm:$0xff]  }
  0x38   :  { %7363 = vmatpush3.bf16.msra.mxu0 %v8211_v8  ;;  %v8260_v8 = vld [vmem:[%s10748_s1 + $0x3b0] sm:$0xff]  }
  0x39   :  { %7364 = vmatprep.subr.bf16.mxu0 %v8213_v10  ;;  %7385 = vmatpush3.bf16.msra.mxu1 %v8212_v9  ;;  %v8261_v9 = vld [vmem:[%s10748_s1 + $0x368] sm:$0xff]  }
  0x3a   :  { %7386 = vmatprep.subr.bf16.mxu1 %v8214_v11  ;;  %v8262_v10 = vld [vmem:[%s10748_s1 + $0x3e8] sm:$0xff]  }
  0x3b   :  { %v8263_v11 = vld [vmem:[%s10748_s1 + $0x328] sm:$0xff]  }
  0x3c   :  { %7365 = vmatpush3.bf16.msra.mxu0 %v8215_v12  ;;  %v8264_v12 = vld [vmem:[%s10748_s1 + $0x3a8] sm:$0xff]  }
  0x3d   :  { %7366 = vmatprep.subr.bf16.mxu0 %v8217_v14  ;;  %7387 = vmatpush3.bf16.msra.mxu1 %v8216_v13  ;;  %v8265_v13 = vld [vmem:[%s10748_s1 + $0x360] sm:$0xff]  }
  0x3e   :  { %7388 = vmatprep.subr.bf16.mxu1 %v8218_v15  ;;  %v8266_v14 = vld [vmem:[%s10748_s1 + $0x3e0] sm:$0xff]  }
  0x3f   :  { %v8267_v15 = vld [vmem:[%s10748_s1 + $0x320] sm:$0xff]  }
  0x40   :  { %7367 = vmatpush3.bf16.msra.mxu0 %v8219_v16  ;;  %v8268_v16 = vld [vmem:[%s10748_s1 + $0x3a0] sm:$0xff]  }
  0x41   :  { %7396 = vmatprep.subr.bf16.mxu0 %v8221_v19  ;;  %7389 = vmatpush3.bf16.msra.mxu1 %v8220_v17  ;;  %v8269_v17 = vld [vmem:[%s10748_s1 + $0x358] sm:$0xff]  }
  0x42   :  { %7418 = vmatprep.subr.bf16.mxu1 %v8222_v20  ;;  %v8271_v19 = vld [vmem:[%s10748_s1 + $0x318] sm:$0xff]  }
  0x43   :  { %5281 = vmatmul.mubr.bf16.vlgmr.msra.gmra.mxu0 %v1229_v18  ;;  %v8270_v18 = vld [vmem:[%s10748_s1 + $0x3d8] sm:$0xff]  }
  0x44   :  { %7397 = vmatpush3.bf16.msra.mxu0 %v8223_v21  ;;  %5321 = vmatmul.mubr.bf16.vlgmr.msra.gmra.mxu1 %v1245_v23  ;;  %v8272_v20 = vld [vmem:[%s10748_s1 + $0x398] sm:$0xff]   ;;  %v8273_v21 = vld [vmem:[%s10748_s1 + $0x350] sm:$0xff]  }
  0x45   :  { %7398 = vmatprep.subr.bf16.mxu0 %v8225_v24  ;;  %7419 = vmatpush3.bf16.msra.mxu1 %v8224_v22  ;;  %v8274_v22 = vld [vmem:[%s10748_s1 + $0x3d0] sm:$0xff]  }
  0x46   :  { %7420 = vmatprep.subr.bf16.mxu1 %v8226_v25  ;;  %5360 = vmatprep.mubr.bf16.mxu0 %v1285_v56  ;;  %v8275_v23 = vld [vmem:[%s10748_s1 + $0x310] sm:$0xff]   ;;  %v8277_v25 = vld [vmem:[%s10748_s1 + $0x348] sm:$0xff]  }
  0x47   :  { %5400 = vmatprep.mubr.bf16.mxu1 %v1295_v60  ;;  %v8276_v24 = vld [vmem:[%s10748_s1 + $0x390] sm:$0xff]   ;;  %v8310_v60 = vld [vmem:[%s10748_s1 + $0x448] sm:$0xff]  }
  0x48   :  { %7399 = vmatpush3.bf16.msra.mxu0 %v8227_v26  ;;  %v8278_v26 = vld [vmem:[%s10748_s1 + $0x3c8] sm:$0xff]   ;;  %v8306_v56 = vld [vmem:[%s10748_s1 + $0x450] sm:$0xff]  }
  0x49   :  { %7400 = vmatprep.subr.bf16.mxu0 %v8229_v28  ;;  %7421 = vmatpush3.bf16.msra.mxu1 %v8228_v27  ;;  %v8279_v27 = vld [vmem:[%s10748_s1 + $0x308] sm:$0xff]  }
  0x4a   :  { %7422 = vmatprep.subr.bf16.mxu1 %v8230_v29  ;;  %v8280_v28 = vld [vmem:[%s10748_s1 + $0x388] sm:$0xff]   ;;  %v8281_v29 = vld [vmem:[%s10748_s1 + $0x340] sm:$0xff]  }
  0x4c   :  { %7401 = vmatpush3.bf16.msra.mxu0 %v8231_v30  ;;  %v8282_v30 = vld [vmem:[%s10748_s1 + $0x3c0] sm:$0xff]  }
  0x4d   :  { %7402 = vmatprep.subr.bf16.mxu0 %v8233_v32  ;;  %7423 = vmatpush3.bf16.msra.mxu1 %v8232_v31  ;;  %v8283_v31 = vld [vmem:[%s10748_s1 + $0x300] sm:$0xff]  }
  0x4e   :  { %7424 = vmatprep.subr.bf16.mxu1 %v8234_v33  ;;  %v8284_v32 = vld [vmem:[%s10748_s1 + $0x380] sm:$0xff]   ;;  %v1278_v33 = vrot.slane %v9098_v53, %v8906_v41  ;;  %v8303_v53 = vld [vmem:[%s10748_s1 + $0x4d8] sm:$0xff]  }
  0x50   :  { %7403 = vmatpush3.bf16.msra.mxu0 %v8235_v34  ;;  %v8286_v34 = vld [vmem:[%s10748_s1 + $0x478] sm:$0xff]  }
  0x51   :  { %7404 = vmatprep.subr.bf16.mxu0 %v8237_v36  ;;  %7425 = vmatpush3.bf16.msra.mxu1 %v8236_v35  ;;  %v8287_v35 = vld [vmem:[%s10748_s1 + $0x4f8] sm:$0xff]  }
  0x52   :  { %7426 = vmatprep.subr.bf16.mxu1 %v8238_v37  ;;  %v8288_v36 = vld [vmem:[%s10748_s1 + $0x438] sm:$0xff]  }
  0x53   :  { %v8289_v37 = vld [vmem:[%s10748_s1 + $0x4b8] sm:$0xff]  }
  0x54   :  { %7405 = vmatpush3.bf16.msra.mxu0 %v8239_v38  ;;  %v1294_v38 = vcombine.high %v1278_v33, %v1278_v33 }
  0x55   :  { %7406 = vmatprep.subr.bf16.mxu0 %v8241_v40  ;;  %7427 = vmatpush3.bf16.msra.mxu1 %v8240_v39  ;;  %v8290_v39 = vld [vmem:[%s10748_s1 + $0x470] sm:$0xff]  }
  0x56   :  { %7428 = vmatprep.subr.bf16.mxu1 %v8242_v42  ;;  %v8291_v40 = vld [vmem:[%s10748_s1 + $0x4f0] sm:$0xff]  }
  0x57   :  { %v8292_v42 = vld [vmem:[%s10748_s1 + $0x430] sm:$0xff]  }
  0x58   :  { %7407 = vmatpush3.bf16.msra.mxu0 %v8243_v43  ;;  %v8293_v43 = vld [vmem:[%s10748_s1 + $0x4b0] sm:$0xff]  }
  0x59   :  { %7408 = vmatprep.subr.bf16.mxu0 %v8245_v45  ;;  %7429 = vmatpush3.bf16.msra.mxu1 %v8244_v44  ;;  %v8294_v44 = vld [vmem:[%s10748_s1 + $0x468] sm:$0xff]  }
  0x5a   :  { %7430 = vmatprep.subr.bf16.mxu1 %v8246_v47  ;;  %v8295_v45 = vld [vmem:[%s10748_s1 + $0x4e8] sm:$0xff]  }
  0x5b   :  { %v8297_v47 = vld [vmem:[%s10748_s1 + $0x4a8] sm:$0xff]  }
  0x5c   :  { %7409 = vmatpush3.bf16.msra.mxu0 %v8247_v50  ;;  %v8300_v50 = vld [vmem:[%s10748_s1 + $0x420] sm:$0xff]  }
  0x5d   :  { %7410 = vmatprep.subr.bf16.mxu0 %v8249_v54  ;;  %7431 = vmatpush3.bf16.msra.mxu1 %v8248_v51  ;;  %v8301_v51 = vld [vmem:[%s10748_s1 + $0x4a0] sm:$0xff]   ;;  %v8304_v54 = vld [vmem:[%s10748_s1 + $0x418] sm:$0xff]  }
  0x5e   :  { %7432 = vmatprep.subr.bf16.mxu1 %v8250_v55  ;;  %v8305_v55 = vld [vmem:[%s10748_s1 + $0x498] sm:$0xff]  }
  0x60   :  { %7411 = vmatpush3.bf16.msra.mxu0 %v8251_v58  ;;  %v8308_v58 = vld [vmem:[%s10748_s1 + $0x410] sm:$0xff]  }
  0x61   :  { %7440 = vmatprep.subr.bf16.mxu0 %v8253_v62  ;;  %7433 = vmatpush3.bf16.msra.mxu1 %v8252_v59  ;;  %v8309_v59 = vld [vmem:[%s10748_s1 + $0x490] sm:$0xff]   ;;  %v8311_v62 = vld [vmem:[%s10748_s1 + $0x4c8] sm:$0xff]  }
  0x62   :  { %7462 = vmatprep.subr.bf16.mxu1 %v8254_v63 }
  0x63   :  { %5361 = vmatmul.mubr.bf16.vlgmr.msra.gmra.mxu0 %v1271_v61  ;;  %v24_v61 = vld [vmem:[%s10747_s0 + $0x10] sm:$0xff] }
  0x64   :  { %7441 = vmatpush3.bf16.msra.mxu0 %v8255_v1  ;;  %5440 = vmatprep.mubr.bf16.mxu0 %v1292_v0  ;;  %v1304_v63 = vrot.slane %v24_v61, %v8906_v41  ;;  %v1297_v0 = vcombine.high %v24_v61, %v24_v61  ;;  %v8312_v1 = vld [vmem:[%s10748_s1 + $0x408] sm:$0xff]  }
  0x65   :  { %5401 = vmatmul.mubr.bf16.vlgmr.msra.gmra.mxu1 %v1293_v3  ;;  %7442 = vmatprep.subr.bf16.mxu0 %v8257_v4  ;;  %v8361_v61 = vld [vmem:[%s10748_s1 + $0x628] sm:$0xff]  }
  0x66   :  { %7463 = vmatpush3.bf16.msra.mxu1 %v8256_v2  ;;  %5480 = vmatprep.mubr.bf16.mxu1 %v1296_v6  ;;  %v8313_v2 = vld [vmem:[%s10748_s1 + $0x488] sm:$0xff]   ;;  %v1312_v3 = vcombine.high %v1304_v63, %v1304_v63  ;;  %v9304_v4 = vrot.slane %v1297_v0, %v8906_v41  ;;  %v8315_v6 = vld [vmem:[%s10748_s1 + $0x4c0] sm:$0xff]  }
  0x67   :  { %7464 = vmatprep.subr.bf16.mxu1 %v8258_v5  ;;  %v8314_v5 = vld [vmem:[%s10748_s1 + $0x440] sm:$0xff]  }
  0x68   :  { %7443 = vmatpush3.bf16.msra.mxu0 %v8259_v7  ;;  %v1334_v7 = vrot.slane %v1312_v3, %v8906_v41  ;;  %v8364_v0 = vld [vmem:[%s10748_s1 + $0x6e0] sm:$0xff]   ;;  %v8367_v3 = vld [vmem:[%s10748_s1 + $0x658] sm:$0xff]  }
  0x69   :  { %7444 = vmatprep.subr.bf16.mxu0 %v8261_v9  ;;  %v8316_v9 = vld [vmem:[%s10748_s1 + $0x400] sm:$0xff]  }
  0x6a   :  { %7465 = vmatpush3.bf16.msra.mxu1 %v8260_v8  ;;  %v1313_v8 = vcombine.high %v9304_v4, %v9304_v4 }
  0x6b   :  { %7466 = vmatprep.subr.bf16.mxu1 %v8262_v10  ;;  %v8317_v10 = vld [vmem:[%s10748_s1 + $0x480] sm:$0xff]  }
  0x6c   :  { %7445 = vmatpush3.bf16.msra.mxu0 %v8263_v11  ;;  %v1344_v11 = vcombine.high %v1334_v7, %v1334_v7 }
  0x6d   :  { %7446 = vmatprep.subr.bf16.mxu0 %v8265_v13  ;;  %v8318_v13 = vld [vmem:[%s10748_s1 + $0x578] sm:$0xff]  }
  0x6e   :  { %7467 = vmatpush3.bf16.msra.mxu1 %v8264_v12  ;;  %v1320_v12 = vrot.slane %v1304_v63, %v8906_v41  ;;  %v8363_v63 = vld [vmem:[%s10748_s1 + $0x660] sm:$0xff]  }
  0x6f   :  { %7468 = vmatprep.subr.bf16.mxu1 %v8266_v14  ;;  %v8319_v14 = vld [vmem:[%s10748_s1 + $0x5f8] sm:$0xff]  }
  0x70   :  { %7447 = vmatpush3.bf16.msra.mxu0 %v8267_v15  ;;  %v1341_v15 = vrot.slane %v1313_v8, %v8906_v41  ;;  %v8372_v8 = vld [vmem:[%s10748_s1 + $0x6d0] sm:$0xff]  }
  0x71   :  { %7448 = vmatprep.subr.bf16.mxu0 %v8269_v17  ;;  %v8321_v17 = vld [vmem:[%s10748_s1 + $0x5b8] sm:$0xff]  }
  0x72   :  { %7469 = vmatpush3.bf16.msra.mxu1 %v8268_v16  ;;  %v8320_v16 = vld [vmem:[%s10748_s1 + $0x538] sm:$0xff]  }
  0x73   :  { %7470 = vmatprep.subr.bf16.mxu1 %v8270_v18  ;;  %v1342_v18 = vcombine.high %v1320_v12, %v1320_v12 }
  0x74   :  { %7449 = vmatpush3.bf16.msra.mxu0 %v8271_v19  ;;  %v8322_v19 = vld [vmem:[%s10748_s1 + $0x570] sm:$0xff]  }
  0x75   :  { %7450 = vmatprep.subr.bf16.mxu0 %v8273_v21  ;;  %v1345_v21 = vcombine.high %v1341_v15, %v1341_v15 }
  0x76   :  { %7471 = vmatpush3.bf16.msra.mxu1 %v8272_v20  ;;  %v8323_v20 = vld [vmem:[%s10748_s1 + $0x5f0] sm:$0xff]  }
  0x77   :  { %7472 = vmatprep.subr.bf16.mxu1 %v8274_v22  ;;  %v8324_v22 = vld [vmem:[%s10748_s1 + $0x530] sm:$0xff]  }
  0x78   :  { %7451 = vmatpush3.bf16.msra.mxu0 %v8275_v23  ;;  %v8325_v23 = vld [vmem:[%s10748_s1 + $0x5b0] sm:$0xff]  }
  0x79   :  { %7452 = vmatprep.subr.bf16.mxu0 %v8277_v25  ;;  %v8327_v25 = vld [vmem:[%s10748_s1 + $0x5e8] sm:$0xff]  }
  0x7a   :  { %7473 = vmatpush3.bf16.msra.mxu1 %v8276_v24  ;;  %v8326_v24 = vld [vmem:[%s10748_s1 + $0x568] sm:$0xff]  }
  0x7b   :  { %7474 = vmatprep.subr.bf16.mxu1 %v8278_v26  ;;  %v8328_v26 = vld [vmem:[%s10748_s1 + $0x528] sm:$0xff]  }
  0x7c   :  { %7453 = vmatpush3.bf16.msra.mxu0 %v8279_v27  ;;  %v8329_v27 = vld [vmem:[%s10748_s1 + $0x5a8] sm:$0xff]  }
  0x7d   :  { %7454 = vmatprep.subr.bf16.mxu0 %v8281_v29  ;;  %v8331_v29 = vld [vmem:[%s10748_s1 + $0x5e0] sm:$0xff]  }
  0x7e   :  { %7475 = vmatpush3.bf16.msra.mxu1 %v8280_v28  ;;  %v8330_v28 = vld [vmem:[%s10748_s1 + $0x560] sm:$0xff]  }
  0x7f   :  { %7476 = vmatprep.subr.bf16.mxu1 %v8282_v30  ;;  %v8332_v30 = vld [vmem:[%s10748_s1 + $0x520] sm:$0xff]  }
  0x80   :  { %7455 = vmatpush3.bf16.msra.mxu0 %v8283_v31  ;;  %v8333_v31 = vld [vmem:[%s10748_s1 + $0x5a0] sm:$0xff]  }
  0x81   :  { %7484 = vmatprep.subr.bf16.mxu0 %v8286_v34  ;;  %v8336_v34 = vld [vmem:[%s10748_s1 + $0x518] sm:$0xff]  }
  0x82   :  { %7477 = vmatpush3.bf16.msra.mxu1 %v8284_v32  ;;  %v8334_v32 = vld [vmem:[%s10748_s1 + $0x558] sm:$0xff]  }
  0x83   :  { %5441 = vmatmul.mubr.bf16.vlgmr.msra.gmra.mxu0 %v1278_v33  ;;  %7506 = vmatprep.subr.bf16.mxu1 %v8287_v35  ;;  %v8335_v33 = vld [vmem:[%s10748_s1 + $0x5d8] sm:$0xff]  }
  0x84   :  { %7485 = vmatpush3.bf16.msra.mxu0 %v8288_v36  ;;  %5520 = vmatprep.mubr.bf16.mxu0 %v1334_v7  ;;  %v8337_v35 = vld [vmem:[%s10748_s1 + $0x598] sm:$0xff]   ;;  %v8338_v36 = vld [vmem:[%s10748_s1 + $0x550] sm:$0xff]  }
  0x85   :  { %5481 = vmatmul.mubr.bf16.vlgmr.msra.gmra.mxu1 %v1294_v38  ;;  %7486 = vmatprep.subr.bf16.mxu0 %v8290_v39  ;;  %v8340_v38 = vld [vmem:[%s10748_s1 + $0x510] sm:$0xff]  }
  0x86   :  { %7507 = vmatpush3.bf16.msra.mxu1 %v8289_v37  ;;  %5560 = vmatprep.mubr.bf16.mxu1 %v1344_v11  ;;  %v8339_v37 = vld [vmem:[%s10748_s1 + $0x5d0] sm:$0xff]   ;;  %v8375_v11 = vld [vmem:[%s10748_s1 + $0x648] sm:$0xff]  }
  0x87   :  { %7508 = vmatprep.subr.bf16.mxu1 %v8291_v40  ;;  %v8341_v39 = vld [vmem:[%s10748_s1 + $0x590] sm:$0xff]   ;;  %v8342_v40 = vld [vmem:[%s10748_s1 + $0x548] sm:$0xff]  }
  0x88   :  { %7487 = vmatpush3.bf16.msra.mxu0 %v8292_v42  ;;  %v8343_v42 = vld [vmem:[%s10748_s1 + $0x5c8] sm:$0xff]   ;;  %v8371_v7 = vld [vmem:[%s10748_s1 + $0x650] sm:$0xff]  }
  0x89   :  { %7488 = vmatprep.subr.bf16.mxu0 %v8294_v44  ;;  %v8345_v44 = vld [vmem:[%s10748_s1 + $0x588] sm:$0xff]  }
  0x8a   :  { %7509 = vmatpush3.bf16.msra.mxu1 %v8293_v43  ;;  %v8344_v43 = vld [vmem:[%s10748_s1 + $0x508] sm:$0xff]  }
  0x8b   :  { %7510 = vmatprep.subr.bf16.mxu1 %v8295_v45  ;;  %v8346_v45 = vld [vmem:[%s10748_s1 + $0x540] sm:$0xff]  }
  0x8c   :  { %7489 = vmatpush3.bf16.msra.mxu0 %v8296_v46  ;;  %v8347_v46 = vld [vmem:[%s10748_s1 + $0x5c0] sm:$0xff]  }
  0x8d   :  { %7490 = vmatprep.subr.bf16.mxu0 %v8298_v48  ;;  %v8349_v48 = vld [vmem:[%s10748_s1 + $0x580] sm:$0xff]  }
  0x8e   :  { %7511 = vmatpush3.bf16.msra.mxu1 %v8297_v47  ;;  %v8348_v47 = vld [vmem:[%s10748_s1 + $0x500] sm:$0xff]  }
  0x8f   :  { %7512 = vmatprep.subr.bf16.mxu1 %v8299_v49  ;;  %v1327_v49 = vrot.slane %v9304_v4, %v8906_v41  ;;  %v8368_v4 = vld [vmem:[%s10748_s1 + $0x6d8] sm:$0xff]  }
  0x90   :  { %7491 = vmatpush3.bf16.msra.mxu0 %v8300_v50  ;;  %v8351_v50 = vld [vmem:[%s10748_s1 + $0x678] sm:$0xff]  }
  0x91   :  { %7492 = vmatprep.subr.bf16.mxu0 %v8302_v52  ;;  %v8353_v52 = vld [vmem:[%s10748_s1 + $0x638] sm:$0xff]  }
  0x92   :  { %7513 = vmatpush3.bf16.msra.mxu1 %v8301_v51  ;;  %v8352_v51 = vld [vmem:[%s10748_s1 + $0x6f8] sm:$0xff]  }
  0x93   :  { %7514 = vmatprep.subr.bf16.mxu1 %v8303_v53  ;;  %v8354_v53 = vld [vmem:[%s10748_s1 + $0x6b8] sm:$0xff]  }
  0x94   :  { %7493 = vmatpush3.bf16.msra.mxu0 %v8304_v54  ;;  %v1343_v54 = vcombine.high %v1327_v49, %v1327_v49 }
  0x95   :  { %7494 = vmatprep.subr.bf16.mxu0 %v8306_v56  ;;  %v8356_v56 = vld [vmem:[%s10748_s1 + $0x6f0] sm:$0xff]  }
  0x96   :  { %7515 = vmatpush3.bf16.msra.mxu1 %v8305_v55  ;;  %v8355_v55 = vld [vmem:[%s10748_s1 + $0x670] sm:$0xff]  }
  0x97   :  { %7516 = vmatprep.subr.bf16.mxu1 %v8307_v57  ;;  %v8357_v57 = vld [vmem:[%s10748_s1 + $0x630] sm:$0xff]  }
  0x98   :  { %7495 = vmatpush3.bf16.msra.mxu0 %v8308_v58  ;;  %v8358_v58 = vld [vmem:[%s10748_s1 + $0x6b0] sm:$0xff]  }
  0x99   :  { %7496 = vmatprep.subr.bf16.mxu0 %v8310_v60  ;;  %v8360_v60 = vld [vmem:[%s10748_s1 + $0x6e8] sm:$0xff]  }
  0x9a   :  { %7517 = vmatpush3.bf16.msra.mxu1 %v8309_v59  ;;  %v8359_v59 = vld [vmem:[%s10748_s1 + $0x668] sm:$0xff]  }
  0x9b   :  { %7518 = vmatprep.subr.bf16.mxu1 %v8311_v62  ;;  %v8362_v62 = vld [vmem:[%s10748_s1 + $0x6a8] sm:$0xff]  }
  0x9c   :  { %7497 = vmatpush3.bf16.msra.mxu0 %v8312_v1  ;;  %v8365_v1 = vld [vmem:[%s10748_s1 + $0x620] sm:$0xff]  }
  0x9d   :  { %7498 = vmatprep.subr.bf16.mxu0 %v8314_v5  ;;  %v8369_v5 = vld [vmem:[%s10748_s1 + $0x618] sm:$0xff]  }
  0x9e   :  { %7519 = vmatpush3.bf16.msra.mxu1 %v8313_v2  ;;  %v8366_v2 = vld [vmem:[%s10748_s1 + $0x6a0] sm:$0xff]  }
  0x9f   :  { %7520 = vmatprep.subr.bf16.mxu1 %v8315_v6  ;;  %v8370_v6 = vld [vmem:[%s10748_s1 + $0x698] sm:$0xff]  }
  0xa0   :  { %7499 = vmatpush3.bf16.msra.mxu0 %v8316_v9  ;;  %v8373_v9 = vld [vmem:[%s10748_s1 + $0x610] sm:$0xff]  }
  0xa1   :  { %7528 = vmatprep.subr.bf16.mxu0 %v8318_v13  ;;  %v8376_v13 = vld [vmem:[%s10748_s1 + $0x6c8] sm:$0xff]  }
  0xa2   :  { %7521 = vmatpush3.bf16.msra.mxu1 %v8317_v10  ;;  %v8374_v10 = vld [vmem:[%s10748_s1 + $0x690] sm:$0xff]  }
  0xa3   :  { %5521 = vmatmul.mubr.bf16.vlgmr.msra.gmra.mxu0 %v1320_v12  ;;  %7550 = vmatprep.subr.bf16.mxu1 %v8319_v14  ;;  %v25_v12 = vld [vmem:[%s10747_s0 + $0x18] sm:$0xff] }
  0xa4   :  { %7529 = vmatpush3.bf16.msra.mxu0 %v8320_v16  ;;  %5600 = vmatprep.mubr.bf16.mxu0 %v1341_v15  ;;  %v1353_v14 = vrot.slane %v25_v12, %v8906_v41  ;;  %v1346_v15 = vcombine.high %v25_v12, %v25_v12  ;;  %v8377_v16 = vld [vmem:[%s10748_s1 + $0x608] sm:$0xff]   ;;  %v8414_v12 = vld [vmem:[%s10748_s1 + $0x780] sm:$0xff]  }
  0xa5   :  { %5561 = vmatmul.mubr.bf16.vlgmr.msra.gmra.mxu1 %v1342_v18  ;;  %7530 = vmatprep.subr.bf16.mxu0 %v8322_v19 }
  0xa6   :  { %7551 = vmatpush3.bf16.msra.mxu1 %v8321_v17  ;;  %5640 = vmatprep.mubr.bf16.mxu1 %v1345_v21  ;;  %v8379_v17 = vld [vmem:[%s10748_s1 + $0x640] sm:$0xff]   ;;  %v1361_v18 = vcombine.high %v1353_v14, %v1353_v14  ;;  %v9510_v19 = vrot.slane %v1346_v15, %v8906_v41  ;;  %v8417_v15 = vld [vmem:[%s10748_s1 + $0x8f8] sm:$0xff]  }
  0xa7   :  { %7552 = vmatprep.subr.bf16.mxu1 %v8323_v20  ;;  %v8378_v20 = vld [vmem:[%s10748_s1 + $0x688] sm:$0xff]   ;;  %v8380_v21 = vld [vmem:[%s10748_s1 + $0x6c0] sm:$0xff]  }
  0xa8   :  { %7531 = vmatpush3.bf16.msra.mxu0 %v8324_v22  ;;  %v8381_v22 = vld [vmem:[%s10748_s1 + $0x600] sm:$0xff]  }
  0xa9   :  { %7532 = vmatprep.subr.bf16.mxu0 %v8326_v24  ;;  %v1362_v24 = vcombine.high %v9510_v19, %v9510_v19 }
  0xaa   :  { %7553 = vmatpush3.bf16.msra.mxu1 %v8325_v23  ;;  %v1383_v23 = vrot.slane %v1361_v18, %v8906_v41 }
  0xab   :  { %7554 = vmatprep.subr.bf16.mxu1 %v8327_v25  ;;  %v8382_v25 = vld [vmem:[%s10748_s1 + $0x680] sm:$0xff]  }
  0xac   :  { %7533 = vmatpush3.bf16.msra.mxu0 %v8328_v26  ;;  %v1393_v26 = vcombine.high %v1383_v23, %v1383_v23 }
  0xad   :  { %7534 = vmatprep.subr.bf16.mxu0 %v8330_v28  ;;  %v8383_v28 = vld [vmem:[%s10748_s1 + $0x778] sm:$0xff]  }
  0xae   :  { %7555 = vmatpush3.bf16.msra.mxu1 %v8329_v27  ;;  %v1369_v27 = vrot.slane %v1353_v14, %v8906_v41  ;;  %v8416_v14 = vld [vmem:[%s10748_s1 + $0x878] sm:$0xff]  }
  0xaf   :  { %7556 = vmatprep.subr.bf16.mxu1 %v8331_v29  ;;  %v8384_v29 = vld [vmem:[%s10748_s1 + $0x7f8] sm:$0xff]  }
  0xb0   :  { %7535 = vmatpush3.bf16.msra.mxu0 %v8332_v30  ;;  %v1390_v30 = vrot.slane %v1362_v24, %v8906_v41 }
  0xb1   :  { %7536 = vmatprep.subr.bf16.mxu0 %v8334_v32  ;;  %v8386_v32 = vld [vmem:[%s10748_s1 + $0x7b8] sm:$0xff]  }
  0xb2   :  { %7557 = vmatpush3.bf16.msra.mxu1 %v8333_v31  ;;  %v8385_v31 = vld [vmem:[%s10748_s1 + $0x738] sm:$0xff]  }
  0xb3   :  { %7558 = vmatprep.subr.bf16.mxu1 %v8335_v33  ;;  %v1391_v33 = vcombine.high %v1369_v27, %v1369_v27 }
  0xb4   :  { %7537 = vmatpush3.bf16.msra.mxu0 %v8336_v34  ;;  %v8387_v34 = vld [vmem:[%s10748_s1 + $0x770] sm:$0xff]  }
  0xb5   :  { %7538 = vmatprep.subr.bf16.mxu0 %v8338_v36  ;;  %v1394_v36 = vcombine.high %v1390_v30, %v1390_v30 }
  0xb6   :  { %7559 = vmatpush3.bf16.msra.mxu1 %v8337_v35  ;;  %v8388_v35 = vld [vmem:[%s10748_s1 + $0x7f0] sm:$0xff]  }
  0xb7   :  { %7560 = vmatprep.subr.bf16.mxu1 %v8339_v37 }
  0xb8   :  { %7539 = vmatpush3.bf16.msra.mxu0 %v8340_v38  ;;  %v6730_v38 = vld [vmem:[%s10749_s2] ss:$0 sm:$0xff] }
  0xb9   :  { %7540 = vmatprep.subr.bf16.mxu0 %v8342_v40  ;;  %v8390_v40 = vld [vmem:[%s10748_s1 + $0x7b0] sm:$0xff]  }
  0xba   :  { %7561 = vmatpush3.bf16.msra.mxu1 %v8341_v39  ;;  %v8389_v39 = vld [vmem:[%s10748_s1 + $0x730] sm:$0xff]  }
  0xbb   :  { %7562 = vmatprep.subr.bf16.mxu1 %v8343_v42 }
  0xbc   :  { %7541 = vmatpush3.bf16.msra.mxu0 %v8344_v43 }
  0xbd   :  { %7542 = vmatprep.subr.bf16.mxu0 %v8346_v45 }
  0xbe   :  { %7563 = vmatpush3.bf16.msra.mxu1 %v8345_v44  ;;  %v8391_v44 = vld [vmem:[%s10748_s1 + $0x768] sm:$0xff]  }
  0xbf   :  { %7564 = vmatprep.subr.bf16.mxu1 %v8347_v46  ;;  %v8392_v46 = vld [vmem:[%s10748_s1 + $0x7e8] sm:$0xff]  }
  0xc0   :  { %7543 = vmatpush3.bf16.msra.mxu0 %v8348_v47 }
  0xc1   :  { %7572 = vmatprep.subr.bf16.mxu0 %v8351_v50 }
  0xc2   :  { %7565 = vmatpush3.bf16.msra.mxu1 %v8349_v48 }
  0xc3   :  { %5601 = vmatmul.mubr.bf16.vlgmr.msra.gmra.mxu0 %v1327_v49  ;;  %7594 = vmatprep.subr.bf16.mxu1 %v8352_v51  ;;  %v8393_v49 = vld [vmem:[%s10748_s1 + $0x728] sm:$0xff]  }
  0xc4   :  { %7573 = vmatpush3.bf16.msra.mxu0 %v8353_v52  ;;  %5680 = vmatprep.mubr.bf16.mxu0 %v1383_v23  ;;  %v8394_v52 = vld [vmem:[%s10748_s1 + $0x7a8] sm:$0xff]   ;;  %v8423_v23 = vld [vmem:[%s10748_s1 + $0x8b0] sm:$0xff]  }
  0xc5   :  { %5641 = vmatmul.mubr.bf16.vlgmr.msra.gmra.mxu1 %v1343_v54  ;;  %7574 = vmatprep.subr.bf16.mxu0 %v8355_v55  ;;  %v8395_v55 = vld [vmem:[%s10748_s1 + $0x760] sm:$0xff]  }
  0xc6   :  { %7595 = vmatpush3.bf16.msra.mxu1 %v8354_v53  ;;  %5720 = vmatprep.mubr.bf16.mxu1 %v1393_v26  ;;  %v8424_v26 = vld [vmem:[%s10748_s1 + $0x868] sm:$0xff]  }
  0xc7   :  { %7596 = vmatprep.subr.bf16.mxu1 %v8356_v56 }
  0xc8   :  { %7575 = vmatpush3.bf16.msra.mxu0 %v8357_v57  ;;  %v8396_v57 = vld [vmem:[%s10748_s1 + $0x7e0] sm:$0xff]  }
  0xc9   :  { %7576 = vmatprep.subr.bf16.mxu0 %v8359_v59  ;;  %v8397_v59 = vld [vmem:[%s10748_s1 + $0x720] sm:$0xff]  }
  0xca   :  { %7597 = vmatpush3.bf16.msra.mxu1 %v8358_v58 }
  0xcb   :  { %7598 = vmatprep.subr.bf16.mxu1 %v8360_v60  ;;  %v8398_v60 = vld [vmem:[%s10748_s1 + $0x7a0] sm:$0xff]  }
  0xcc   :  { %7577 = vmatpush3.bf16.msra.mxu0 %v8361_v61  ;;  %v8399_v61 = vld [vmem:[%s10748_s1 + $0x758] sm:$0xff]  }
  0xcd   :  { %7578 = vmatprep.subr.bf16.mxu0 %v8363_v63  ;;  %v8401_v63 = vld [vmem:[%s10748_s1 + $0x718] sm:$0xff]  }
  0xce   :  { %7599 = vmatpush3.bf16.msra.mxu1 %v8362_v62  ;;  %v8400_v62 = vld [vmem:[%s10748_s1 + $0x7d8] sm:$0xff]  }
  0xcf   :  { %7600 = vmatprep.subr.bf16.mxu1 %v8364_v0  ;;  %v8402_v0 = vld [vmem:[%s10748_s1 + $0x798] sm:$0xff]  }
  0xd0   :  { %7579 = vmatpush3.bf16.msra.mxu0 %v8365_v1  ;;  %v8403_v1 = vld [vmem:[%s10748_s1 + $0x750] sm:$0xff]  }
  0xd1   :  { %7580 = vmatprep.subr.bf16.mxu0 %v8367_v3  ;;  %v8405_v3 = vld [vmem:[%s10748_s1 + $0x710] sm:$0xff]  }
  0xd2   :  { %7601 = vmatpush3.bf16.msra.mxu1 %v8366_v2  ;;  %v8404_v2 = vld [vmem:[%s10748_s1 + $0x7d0] sm:$0xff]  }
  0xd3   :  { %7602 = vmatprep.subr.bf16.mxu1 %v8368_v4  ;;  %v8406_v4 = vld [vmem:[%s10748_s1 + $0x790] sm:$0xff]  }
  0xd4   :  { %7581 = vmatpush3.bf16.msra.mxu0 %v8369_v5  ;;  %v8407_v5 = vld [vmem:[%s10748_s1 + $0x748] sm:$0xff]  }
  0xd5   :  { %7582 = vmatprep.subr.bf16.mxu0 %v8371_v7  ;;  %v8409_v7 = vld [vmem:[%s10748_s1 + $0x708] sm:$0xff]  }
  0xd6   :  { %7603 = vmatpush3.bf16.msra.mxu1 %v8370_v6  ;;  %v8408_v6 = vld [vmem:[%s10748_s1 + $0x7c8] sm:$0xff]  }
  0xd7   :  { %7604 = vmatprep.subr.bf16.mxu1 %v8372_v8  ;;  %v8410_v8 = vld [vmem:[%s10748_s1 + $0x788] sm:$0xff]  }
  0xd8   :  { %7583 = vmatpush3.bf16.msra.mxu0 %v8373_v9  ;;  %v8411_v9 = vld [vmem:[%s10748_s1 + $0x740] sm:$0xff]  }
  0xd9   :  { %7584 = vmatprep.subr.bf16.mxu0 %v8375_v11  ;;  %v8413_v11 = vld [vmem:[%s10748_s1 + $0x700] sm:$0xff]  }
  0xda   :  { %7605 = vmatpush3.bf16.msra.mxu1 %v8374_v10  ;;  %v8412_v10 = vld [vmem:[%s10748_s1 + $0x7c0] sm:$0xff]  }
  0xdb   :  { %7606 = vmatprep.subr.bf16.mxu1 %v8376_v13  ;;  %v1376_v13 = vrot.slane %v9510_v19, %v8906_v41  ;;  %v8420_v19 = vld [vmem:[%s10748_s1 + $0x870] sm:$0xff]  }
  0xdc   :  { %7585 = vmatpush3.bf16.msra.mxu0 %v8377_v16  ;;  %v8418_v16 = vld [vmem:[%s10748_s1 + $0x838] sm:$0xff]  }
  0xdd   :  { %7586 = vmatprep.subr.bf16.mxu0 %v8379_v17  ;;  %v8419_v17 = vld [vmem:[%s10748_s1 + $0x8b8] sm:$0xff]   ;;  %v1392_v18 = vcombine.high %v1376_v13, %v1376_v13 }
  0xde   :  { %7607 = vmatpush3.bf16.msra.mxu1 %v8378_v20  ;;  %v8421_v20 = vld [vmem:[%s10748_s1 + $0x8f0] sm:$0xff]  }
  0xdf   :  { %7608 = vmatprep.subr.bf16.mxu1 %v8380_v21 }
  0xe0   :  { %7587 = vmatpush3.bf16.msra.mxu0 %v8381_v22  ;;  %v8422_v22 = vld [vmem:[%s10748_s1 + $0x830] sm:$0xff]  }
  0xe1   :  { %7616 = vmatprep.subr.bf16.mxu0 %v8383_v28  ;;  %v8425_v28 = vld [vmem:[%s10748_s1 + $0x8e8] sm:$0xff]  }
  0xe2   :  { %7609 = vmatpush3.bf16.msra.mxu1 %v8382_v25 }
  0xe3   :  { %v7324_v37 = vpop.f32.mrf.mxu0  ;;  %5681 = vmatmul.mubr.bf16.vlgmr.msra.gmra.mxu0 %v1369_v27  ;;  %7638 = vmatprep.subr.bf16.mxu1 %v8384_v29 }
  0xe4   :  { %7617 = vmatpush3.bf16.msra.mxu0 %v8385_v31  ;;  %5760 = vmatprep.mubr.bf16.mxu0 %v1390_v30  ;;  %v7346_v42 = vpop.f32.mrf.mxu1  ;;  %v8426_v31 = vld [vmem:[%s10748_s1 + $0x828] sm:$0xff]  }
  0xe5   :  { %5721 = vmatmul.mubr.bf16.vlgmr.msra.gmra.mxu1 %v1391_v33  ;;  %v7325_v43 = vpop.f32.mrf.mxu0  ;;  %7618 = vmatprep.subr.bf16.mxu0 %v8387_v34  ;;  %v8427_v34 = vld [vmem:[%s10748_s1 + $0x8a8] sm:$0xff]  }
  0xe6   :  { %7639 = vmatpush3.bf16.msra.mxu1 %v8386_v32  ;;  %v7326_v45 = vadd.f32 %v7325_v43, %v7324_v37  ;;  %5800 = vmatprep.mubr.bf16.mxu1 %v1394_v36  ;;  %v7347_v47 = vpop.f32.mrf.mxu1  ;;  %v8428_v37 = vld [vmem:[%s10748_s1 + $0x860] sm:$0xff]  }
  0xe7   :  { %v7327_v48 = vpop.f32.mrf.mxu0  ;;  %7640 = vmatprep.subr.bf16.mxu1 %v8388_v35  ;;  %v7348_v51 = vadd.f32 %v7347_v47, %v7346_v42  ;;  %v8430_v42 = vld [vmem:[%s10748_s1 + $0x820] sm:$0xff]   ;;  %v8435_v47 = vld [vmem:[%s10748_s1 + $0x898] sm:$0xff]  }
  0xe8   :  { %v5203_v50 = vadd.f32 %v7326_v45, %v6730_v38  ;;  %7619 = vmatpush3.bf16.msra.mxu0 %v8389_v39  ;;  %v7349_v53 = vpop.f32.mrf.mxu1  ;;  %v8429_v39 = vld [vmem:[%s10748_s1 + $0x8e0] sm:$0xff]   ;;  %v8433_v45 = vld [vmem:[%s10748_s1 + $0x8d8] sm:$0xff]   ;;  %v8436_v48 = vld [vmem:[%s10748_s1 + $0x850] sm:$0xff]  }
  0xe9   :  { %v7328_v54 = vpop.f32.mrf.mxu0  ;;  %7620 = vmatprep.subr.bf16.mxu0 %v8391_v44  ;;  %v8431_v43 = vld [vmem:[%s10748_s1 + $0x8a0] sm:$0xff]   ;;  %v8432_v44 = vld [vmem:[%s10748_s1 + $0x858] sm:$0xff]   ;;  %v8441_v53 = vld [vmem:[%s10748_s1 + $0x8c8] sm:$0xff]  }
  0xea   :  { %v9571_v56 = vadd.f32 %v7348_v51, %v5203_v50  ;;  %7641 = vmatpush3.bf16.msra.mxu1 %v8390_v40  ;;  %v7350_v58 = vpop.f32.mrf.mxu1  ;;  %v8438_v50 = vld [vmem:[%s10748_s1 + $0x810] sm:$0xff]   ;;  %v26_v54 = vld [vmem:[%s10747_s0 + $0x20] sm:$0xff] }
  0xeb   :  { %7642 = vmatprep.subr.bf16.mxu1 %v8392_v46  ;;  %v8434_v46 = vld [vmem:[%s10748_s1 + $0x818] sm:$0xff]   ;;  %v8439_v51 = vld [vmem:[%s10748_s1 + $0x890] sm:$0xff]   ;;  %v8443_v58 = vld [vmem:[%s10748_s1 + $0x888] sm:$0xff]  }
  0xec   :  { %7621 = vmatpush3.bf16.msra.mxu0 %v8393_v49  ;;  %v8437_v49 = vld [vmem:[%s10748_s1 + $0x8d0] sm:$0xff]  }
  0xed   :  { %7622 = vmatprep.subr.bf16.mxu0 %v8395_v55  ;;  %v8442_v55 = vld [vmem:[%s10748_s1 + $0x808] sm:$0xff]  }
  0xee   :  { %7643 = vmatpush3.bf16.msra.mxu1 %v8394_v52  ;;  %v8440_v52 = vld [vmem:[%s10748_s1 + $0x848] sm:$0xff]  }
  0xef   :  { %7644 = vmatprep.subr.bf16.mxu1 %v8396_v57  ;;  %v1395_v57 = vcombine.high %v26_v54, %v26_v54 }
  0xf0   :  { %7623 = vmatpush3.bf16.msra.mxu0 %v8397_v59  ;;  %v8444_v59 = vld [vmem:[%s10748_s1 + $0x840] sm:$0xff]  }
  0xf1   :  { %7624 = vmatprep.subr.bf16.mxu0 %v8399_v61  ;;  %v9727_v61 = vrot.slane %v1395_v57, %v8906_v41  ;;  %v8484_v57 = vld [vmem:[%s10748_s1 + $0xab8] sm:$0xff]  }
  0xf2   :  { %7645 = vmatpush3.bf16.msra.mxu1 %v8398_v60 }
  0xf3   :  { %7646 = vmatprep.subr.bf16.mxu1 %v8400_v62  ;;  %v8445_v62 = vld [vmem:[%s10748_s1 + $0x8c0] sm:$0xff]  }
  0xf4   :  { %7625 = vmatpush3.bf16.msra.mxu0 %v8401_v63  ;;  %v8446_v63 = vld [vmem:[%s10748_s1 + $0x800] sm:$0xff]  }
  0xf5   :  { %7626 = vmatprep.subr.bf16.mxu0 %v8403_v1  ;;  %v1411_v1 = vcombine.high %v9727_v61, %v9727_v61 }
  0xf6   :  { %7647 = vmatpush3.bf16.msra.mxu1 %v8402_v0 }
  0xf7   :  { %7648 = vmatprep.subr.bf16.mxu1 %v8404_v2  ;;  %v8447_v2 = vld [vmem:[%s10748_s1 + $0x880] sm:$0xff]  }
  0xf8   :  { %7627 = vmatpush3.bf16.msra.mxu0 %v8405_v3 }
  0xf9   :  { %7628 = vmatprep.subr.bf16.mxu0 %v8407_v5  ;;  %v8448_v5 = vld [vmem:[%s10748_s1 + $0x978] sm:$0xff]  }
  0xfa   :  { %7649 = vmatpush3.bf16.msra.mxu1 %v8406_v4 }
  0xfb   :  { %7650 = vmatprep.subr.bf16.mxu1 %v8408_v6  ;;  %v8449_v6 = vld [vmem:[%s10748_s1 + $0x9f8] sm:$0xff]  }
  0xfc   :  { %7629 = vmatpush3.bf16.msra.mxu0 %v8409_v7  ;;  %v1439_v7 = vrot.slane %v1411_v1, %v8906_v41 }
  0xfd   :  { %7630 = vmatprep.subr.bf16.mxu0 %v8411_v9  ;;  %v8451_v9 = vld [vmem:[%s10748_s1 + $0x9b8] sm:$0xff]  }
  0xfe   :  { %7651 = vmatpush3.bf16.msra.mxu1 %v8410_v8  ;;  %v8450_v8 = vld [vmem:[%s10748_s1 + $0x938] sm:$0xff]  }
  0xff   :  { %7652 = vmatprep.subr.bf16.mxu1 %v8412_v10 }
 0x100   :  { %7631 = vmatpush3.bf16.msra.mxu0 %v8413_v11  ;;  %v8452_v11 = vld [vmem:[%s10748_s1 + $0x970] sm:$0xff]  }
 0x101   :  { %7660 = vmatprep.subr.bf16.mxu0 %v8416_v14 }
 0x102   :  { %7653 = vmatpush3.bf16.msra.mxu1 %v8414_v12  ;;  %v8453_v12 = vld [vmem:[%s10748_s1 + $0x9f0] sm:$0xff]  }
 0x103   :  { %v7368_v21 = vpop.f32.mrf.mxu0  ;;  %5761 = vmatmul.mubr.bf16.vlgmr.msra.gmra.mxu0 %v1376_v13  ;;  %7682 = vmatprep.subr.bf16.mxu1 %v8417_v15  ;;  %v1443_v13 = vcombine.high %v1439_v7, %v1439_v7  ;;  %v8454_v15 = vld [vmem:[%s10748_s1 + $0x930] sm:$0xff]  }
 0x104   :  { %7661 = vmatpush3.bf16.msra.mxu0 %v8418_v16  ;;  %v7390_v24 = vpop.f32.mrf.mxu1  ;;  %v8455_v16 = vld [vmem:[%s10748_s1 + $0x9b0] sm:$0xff]  }
 0x105   :  { %5801 = vmatmul.mubr.bf16.vlgmr.msra.gmra.mxu1 %v1392_v18  ;;  %v7369_v25 = vpop.f32.mrf.mxu0  ;;  %7662 = vmatprep.subr.bf16.mxu0 %v8420_v19  ;;  %v8456_v19 = vld [vmem:[%s10748_s1 + $0x968] sm:$0xff]  }
 0x106   :  { %7683 = vmatpush3.bf16.msra.mxu1 %v8419_v17  ;;  %v7370_v27 = vadd.f32 %v7369_v25, %v7368_v21  ;;  %v7391_v29 = vpop.f32.mrf.mxu1  ;;  %v8457_v21 = vld [vmem:[%s10748_s1 + $0x9e8] sm:$0xff]  }
 0x107   :  { %v7371_v30 = vpop.f32.mrf.mxu0  ;;  %7684 = vmatprep.subr.bf16.mxu1 %v8421_v20  ;;  %v7392_v33 = vadd.f32 %v7391_v29, %v7390_v24  ;;  %v8458_v24 = vld [vmem:[%s10748_s1 + $0x928] sm:$0xff]  }
 0x108   :  { %v5283_v32 = vadd.f32 %v7370_v27, %v9571_v56  ;;  %7663 = vmatpush3.bf16.msra.mxu0 %v8422_v22  ;;  %v7393_v35 = vpop.f32.mrf.mxu1  ;;  %v1402_v56 = vrot.slane %v26_v54, %v8906_v41  ;;  %v8459_v27 = vld [vmem:[%s10748_s1 + $0x9a8] sm:$0xff]   ;;  %v8460_v30 = vld [vmem:[%s10748_s1 + $0x960] sm:$0xff]   ;;  %v8481_v54 = vld [vmem:[%s10748_s1 + $0xa78] sm:$0xff]  }
 0x109   :  { %v7372_v36 = vpop.f32.mrf.mxu0  ;;  %7664 = vmatprep.subr.bf16.mxu0 %v8424_v26  ;;  %v8463_v35 = vld [vmem:[%s10748_s1 + $0x9a0] sm:$0xff]  }
 0x10a   :  { %v9672_v38 = vadd.f32 %v7392_v33, %v5283_v32  ;;  %7685 = vmatpush3.bf16.msra.mxu1 %v8423_v23  ;;  %v7394_v40 = vpop.f32.mrf.mxu1  ;;  %v1410_v60 = vcombine.high %v1402_v56, %v1402_v56  ;;  %v1418_v4 = vrot.slane %v1402_v56, %v8906_v41  ;;  %v8461_v32 = vld [vmem:[%s10748_s1 + $0x9e0] sm:$0xff]   ;;  %v8464_v36 = vld [vmem:[%s10748_s1 + $0x958] sm:$0xff]  }
 0x10b   :  { %7686 = vmatprep.subr.bf16.mxu1 %v8425_v28  ;;  %v8468_v40 = vld [vmem:[%s10748_s1 + $0x950] sm:$0xff]   ;;  %v8483_v56 = vld [vmem:[%s10748_s1 + $0xa38] sm:$0xff]  }
 0x10c   :  { %7665 = vmatpush3.bf16.msra.mxu0 %v8426_v31  ;;  %v1432_v0 = vrot.slane %v1410_v60, %v8906_v41  ;;  %v1440_v10 = vcombine.high %v1418_v4, %v1418_v4  ;;  %v8486_v60 = vld [vmem:[%s10748_s1 + $0xaf0] sm:$0xff]  }
 0x10d   :  { %7666 = vmatprep.subr.bf16.mxu0 %v8428_v37  ;;  %v8465_v37 = vld [vmem:[%s10748_s1 + $0x9d8] sm:$0xff]  }
 0x10e   :  { %7687 = vmatpush3.bf16.msra.mxu1 %v8427_v34  ;;  %5840 = vmatprep.mubr.bf16.mxu0 %v1432_v0  ;;  %v1442_v3 = vcombine.high %v1432_v0, %v1432_v0  ;;  %v8462_v34 = vld [vmem:[%s10748_s1 + $0x920] sm:$0xff]  }
 0x10f   :  { %7688 = vmatprep.subr.bf16.mxu1 %v8429_v39  ;;  %v8467_v39 = vld [vmem:[%s10748_s1 + $0x998] sm:$0xff]  }
 0x110   :  { %7667 = vmatpush3.bf16.msra.mxu0 %v8430_v42  ;;  %5880 = vmatprep.mubr.bf16.mxu1 %v1442_v3  ;;  %v8469_v42 = vld [vmem:[%s10748_s1 + $0x9d0] sm:$0xff]  }
 0x111   :  { %7668 = vmatprep.subr.bf16.mxu0 %v8432_v44  ;;  %v8471_v44 = vld [vmem:[%s10748_s1 + $0x990] sm:$0xff]  }
 0x112   :  { %7689 = vmatpush3.bf16.msra.mxu1 %v8431_v43  ;;  %v8470_v43 = vld [vmem:[%s10748_s1 + $0x910] sm:$0xff]  }
 0x113   :  { %7690 = vmatprep.subr.bf16.mxu1 %v8433_v45  ;;  %v8472_v45 = vld [vmem:[%s10748_s1 + $0x948] sm:$0xff]  }
 0x114   :  { %7669 = vmatpush3.bf16.msra.mxu0 %v8434_v46  ;;  %v8473_v46 = vld [vmem:[%s10748_s1 + $0x9c8] sm:$0xff]  }
 0x115   :  { %7670 = vmatprep.subr.bf16.mxu0 %v8436_v48  ;;  %v8475_v48 = vld [vmem:[%s10748_s1 + $0x988] sm:$0xff]  }
 0x116   :  { %7691 = vmatpush3.bf16.msra.mxu1 %v8435_v47  ;;  %v8474_v47 = vld [vmem:[%s10748_s1 + $0x908] sm:$0xff]  }
 0x117   :  { %7692 = vmatprep.subr.bf16.mxu1 %v8437_v49  ;;  %v8476_v49 = vld [vmem:[%s10748_s1 + $0x940] sm:$0xff]  }
 0x118   :  { %7671 = vmatpush3.bf16.msra.mxu0 %v8438_v50  ;;  %v8477_v50 = vld [vmem:[%s10748_s1 + $0x9c0] sm:$0xff]  }
 0x119   :  { %7672 = vmatprep.subr.bf16.mxu0 %v8440_v52  ;;  %v8479_v52 = vld [vmem:[%s10748_s1 + $0x980] sm:$0xff]  }
 0x11a   :  { %7693 = vmatpush3.bf16.msra.mxu1 %v8439_v51  ;;  %v8478_v51 = vld [vmem:[%s10748_s1 + $0x900] sm:$0xff]  }
 0x11b   :  { %7694 = vmatprep.subr.bf16.mxu1 %v8441_v53  ;;  %v1425_v53 = vrot.slane %v9727_v61, %v8906_v41 }
 0x11c   :  { %7673 = vmatpush3.bf16.msra.mxu0 %v8442_v55  ;;  %v8482_v55 = vld [vmem:[%s10748_s1 + $0xaf8] sm:$0xff]  }
 0x11d   :  { %7674 = vmatprep.subr.bf16.mxu0 %v8444_v59  ;;  %v8485_v59 = vld [vmem:[%s10748_s1 + $0xa70] sm:$0xff]  }
 0x11e   :  { %7695 = vmatpush3.bf16.msra.mxu1 %v8443_v58  ;;  %v1441_v58 = vcombine.high %v1425_v53, %v1425_v53 }
 0x11f   :  { %7696 = vmatprep.subr.bf16.mxu1 %v8445_v62  ;;  %v8487_v62 = vld [vmem:[%s10748_s1 + $0xa30] sm:$0xff]  }
 0x120   :  { %7675 = vmatpush3.bf16.msra.mxu0 %v8446_v63  ;;  %v8488_v63 = vld [vmem:[%s10748_s1 + $0xab0] sm:$0xff]  }
 0x121   :  { %7704 = vmatprep.subr.bf16.mxu0 %v8448_v5 }
 0x122   :  { %7697 = vmatpush3.bf16.msra.mxu1 %v8447_v2  ;;  %v8489_v2 = vld [vmem:[%s10748_s1 + $0xa68] sm:$0xff]  }
 0x123   :  { %v7412_v14 = vpop.f32.mrf.mxu0  ;;  %5841 = vmatmul.mubr.bf16.vlgmr.msra.gmra.mxu0 %v1418_v4  ;;  %7726 = vmatprep.subr.bf16.mxu1 %v8449_v6  ;;  %v8490_v4 = vld [vmem:[%s10748_s1 + $0xae8] sm:$0xff]  }
 0x124   :  { %7705 = vmatpush3.bf16.msra.mxu0 %v8450_v8  ;;  %5920 = vmatprep.mubr.bf16.mxu0 %v1439_v7  ;;  %v8491_v7 = vld [vmem:[%s10748_s1 + $0xa28] sm:$0xff]  }
 0x125   :  { %v7434_v17 = vpop.f32.mrf.mxu1  ;;  %5881 = vmatmul.mubr.bf16.vlgmr.msra.gmra.mxu1 %v1440_v10  ;;  %v7413_v18 = vpop.f32.mrf.mxu0  ;;  %7706 = vmatprep.subr.bf16.mxu0 %v8452_v11  ;;  %v8492_v10 = vld [vmem:[%s10748_s1 + $0xaa8] sm:$0xff]  }
 0x126   :  { %7727 = vmatpush3.bf16.msra.mxu1 %v8451_v9  ;;  %v7414_v20 = vadd.f32 %v7413_v18, %v7412_v14  ;;  %5960 = vmatprep.mubr.bf16.mxu1 %v1443_v13  ;;  %v8493_v13 = vld [vmem:[%s10748_s1 + $0xa60] sm:$0xff]  }
 0x127   :  { %v7435_v22 = vpop.f32.mrf.mxu1  ;;  %v7415_v23 = vpop.f32.mrf.mxu0  ;;  %7728 = vmatprep.subr.bf16.mxu1 %v8453_v12  ;;  %v8496_v18 = vld [vmem:[%s10748_s1 + $0xaa0] sm:$0xff]  }
 0x128   :  { %v5363_v25 = vadd.f32 %v7414_v20, %v9672_v38  ;;  %v7436_v26 = vadd.f32 %v7435_v22, %v7434_v17  ;;  %7707 = vmatpush3.bf16.msra.mxu0 %v8454_v15  ;;  %v8466_v38 = vld [vmem:[%s10748_s1 + $0x918] sm:$0xff]   ;;  %v8494_v15 = vld [vmem:[%s10748_s1 + $0xae0] sm:$0xff]   ;;  %v8501_v23 = vld [vmem:[%s10748_s1 + $0xa50] sm:$0xff]  }
 0x129   :  { %v7437_v28 = vpop.f32.mrf.mxu1  ;;  %v7416_v29 = vpop.f32.mrf.mxu0  ;;  %7708 = vmatprep.subr.bf16.mxu0 %v8456_v19  ;;  %v8495_v17 = vld [vmem:[%s10748_s1 + $0xa20] sm:$0xff]   ;;  %v8497_v19 = vld [vmem:[%s10748_s1 + $0xa58] sm:$0xff]  }
 0x12a   :  { %v9783_v31 = vadd.f32 %v7436_v26, %v5363_v25  ;;  %7729 = vmatpush3.bf16.msra.mxu1 %v8455_v16  ;;  %v8498_v20 = vld [vmem:[%s10748_s1 + $0xad8] sm:$0xff]   ;;  %v8503_v25 = vld [vmem:[%s10748_s1 + $0xa10] sm:$0xff]   ;;  %v8506_v28 = vld [vmem:[%s10748_s1 + $0xac8] sm:$0xff]  }
 0x12b   :  { %v7438_v33 = vpop.f32.mrf.mxu1  ;;  %7730 = vmatprep.subr.bf16.mxu1 %v8457_v21  ;;  %v8499_v21 = vld [vmem:[%s10748_s1 + $0xa18] sm:$0xff]   ;;  %v8504_v26 = vld [vmem:[%s10748_s1 + $0xa90] sm:$0xff]   ;;  %v8507_v29 = vld [vmem:[%s10748_s1 + $0xa08] sm:$0xff]  }
 0x12c   :  { %7709 = vmatpush3.bf16.msra.mxu0 %v8458_v24  ;;  %v8500_v22 = vld [vmem:[%s10748_s1 + $0xa98] sm:$0xff]   ;;  %v8502_v24 = vld [vmem:[%s10748_s1 + $0xad0] sm:$0xff]  }
 0x12d   :  { %7710 = vmatprep.subr.bf16.mxu0 %v8460_v30  ;;  %v27_v30 = vld [vmem:[%s10747_s0 + $0x28] sm:$0xff] }
 0x12e   :  { %7731 = vmatpush3.bf16.msra.mxu1 %v8459_v27  ;;  %v8505_v27 = vld [vmem:[%s10748_s1 + $0xa48] sm:$0xff]   ;;  %v1444_v33 = vcombine.high %v27_v30, %v27_v30 }
 0x12f   :  { %7732 = vmatprep.subr.bf16.mxu1 %v8461_v32  ;;  %v1451_v32 = vrot.slane %v27_v30, %v8906_v41  ;;  %v8547_v30 = vld [vmem:[%s10748_s1 + $0xcf8] sm:$0xff]  }
 0x130   :  { %7711 = vmatpush3.bf16.msra.mxu0 %v8462_v34  ;;  %v8509_v34 = vld [vmem:[%s10748_s1 + $0xa40] sm:$0xff]  }
 0x131   :  { %7712 = vmatprep.subr.bf16.mxu0 %v8464_v36  ;;  %v1459_v36 = vcombine.high %v1451_v32, %v1451_v32 }
 0x132   :  { %7733 = vmatpush3.bf16.msra.mxu1 %v8463_v35  ;;  %v8510_v35 = vld [vmem:[%s10748_s1 + $0xac0] sm:$0xff]  }
 0x133   :  { %7734 = vmatprep.subr.bf16.mxu1 %v8465_v37  ;;  %v9942_v37 = vrot.slane %v1444_v33, %v8906_v41 }
 0x134   :  { %7713 = vmatpush3.bf16.msra.mxu0 %v8466_v38  ;;  %v8511_v38 = vld [vmem:[%s10748_s1 + $0xa00] sm:$0xff]  }
 0x135   :  { %7714 = vmatprep.subr.bf16.mxu0 %v8468_v40  ;;  %v1481_v40 = vrot.slane %v1459_v36, %v8906_v41 }
 0x136   :  { %7735 = vmatpush3.bf16.msra.mxu1 %v8467_v39  ;;  %v8512_v39 = vld [vmem:[%s10748_s1 + $0xa80] sm:$0xff]  }
 0x137   :  { %7736 = vmatprep.subr.bf16.mxu1 %v8469_v42  ;;  %v1460_v42 = vcombine.high %v9942_v37, %v9942_v37 }
 0x138   :  { %7715 = vmatpush3.bf16.msra.mxu0 %v8470_v43  ;;  %v1467_v43 = vrot.slane %v1451_v32, %v8906_v41  ;;  %v8549_v32 = vld [vmem:[%s10748_s1 + $0xcb8] sm:$0xff]  }
 0x139   :  { %7716 = vmatprep.subr.bf16.mxu0 %v8472_v45  ;;  %v1491_v45 = vcombine.high %v1481_v40, %v1481_v40 }
 0x13a   :  { %7737 = vmatpush3.bf16.msra.mxu1 %v8471_v44  ;;  %v8513_v44 = vld [vmem:[%s10748_s1 + $0xb78] sm:$0xff]  }
 0x13b   :  { %7738 = vmatprep.subr.bf16.mxu1 %v8473_v46  ;;  %v8514_v46 = vld [vmem:[%s10748_s1 + $0xbf8] sm:$0xff]  }
 0x13c   :  { %7717 = vmatpush3.bf16.msra.mxu0 %v8474_v47  ;;  %v1488_v47 = vrot.slane %v1460_v42, %v8906_v41  ;;  %v8554_v42 = vld [vmem:[%s10748_s1 + $0xc68] sm:$0xff]  }
 0x13d   :  { %7718 = vmatprep.subr.bf16.mxu0 %v8476_v49  ;;  %v8516_v49 = vld [vmem:[%s10748_s1 + $0xbb8] sm:$0xff]  }
 0x13e   :  { %7739 = vmatpush3.bf16.msra.mxu1 %v8475_v48  ;;  %v8515_v48 = vld [vmem:[%s10748_s1 + $0xb38] sm:$0xff]  }
 0x13f   :  { %7740 = vmatprep.subr.bf16.mxu1 %v8477_v50  ;;  %v1489_v50 = vcombine.high %v1467_v43, %v1467_v43 }
 0x140   :  { %7719 = vmatpush3.bf16.msra.mxu0 %v8478_v51  ;;  %v8517_v51 = vld [vmem:[%s10748_s1 + $0xb70] sm:$0xff]  }
 0x141   :  { %7748 = vmatprep.subr.bf16.mxu0 %v8481_v54 }
 0x142   :  { %7741 = vmatpush3.bf16.msra.mxu1 %v8479_v52  ;;  %v8518_v52 = vld [vmem:[%s10748_s1 + $0xbf0] sm:$0xff]  }
 0x143   :  { %v7456_v61 = vpop.f32.mrf.mxu0  ;;  %5921 = vmatmul.mubr.bf16.vlgmr.msra.gmra.mxu0 %v1425_v53  ;;  %7770 = vmatprep.subr.bf16.mxu1 %v8482_v55  ;;  %v1492_v53 = vcombine.high %v1488_v47, %v1488_v47  ;;  %v8519_v55 = vld [vmem:[%s10748_s1 + $0xb30] sm:$0xff]  }
 0x144   :  { %7749 = vmatpush3.bf16.msra.mxu0 %v8483_v56  ;;  %6000 = vmatprep.mubr.bf16.mxu0 %v1481_v40  ;;  %v8520_v56 = vld [vmem:[%s10748_s1 + $0xbb0] sm:$0xff]  }
 0x145   :  { %v7478_v0 = vpop.f32.mrf.mxu1  ;;  %5961 = vmatmul.mubr.bf16.vlgmr.msra.gmra.mxu1 %v1441_v58  ;;  %v7457_v1 = vpop.f32.mrf.mxu0  ;;  %7750 = vmatprep.subr.bf16.mxu0 %v8485_v59  ;;  %v8521_v59 = vld [vmem:[%s10748_s1 + $0xb68] sm:$0xff]  }
 0x146   :  { %7771 = vmatpush3.bf16.msra.mxu1 %v8484_v57  ;;  %v7458_v3 = vadd.f32 %v7457_v1, %v7456_v61  ;;  %6040 = vmatprep.mubr.bf16.mxu1 %v1491_v45  ;;  %v8522_v61 = vld [vmem:[%s10748_s1 + $0xbe8] sm:$0xff]  }
 0x147   :  { %v7479_v5 = vpop.f32.mrf.mxu1  ;;  %v7459_v6 = vpop.f32.mrf.mxu0  ;;  %7772 = vmatprep.subr.bf16.mxu1 %v8486_v60 }
 0x148   :  { %v5443_v8 = vadd.f32 %v7458_v3, %v9783_v31  ;;  %v7480_v9 = vadd.f32 %v7479_v5, %v7478_v0  ;;  %7751 = vmatpush3.bf16.msra.mxu0 %v8487_v62  ;;  %v8508_v31 = vld [vmem:[%s10748_s1 + $0xa88] sm:$0xff]   ;;  %v8525_v6 = vld [vmem:[%s10748_s1 + $0xb60] sm:$0xff]  }
 0x149   :  { %v7481_v11 = vpop.f32.mrf.mxu1  ;;  %v7460_v12 = vpop.f32.mrf.mxu0  ;;  %7752 = vmatprep.subr.bf16.mxu0 %v8489_v2  ;;  %v8523_v0 = vld [vmem:[%s10748_s1 + $0xb28] sm:$0xff]  }
 0x14a   :  { %v9884_v14 = vadd.f32 %v7480_v9, %v5443_v8  ;;  %7773 = vmatpush3.bf16.msra.mxu1 %v8488_v63  ;;  %v8524_v3 = vld [vmem:[%s10748_s1 + $0xba8] sm:$0xff]   ;;  %v8526_v8 = vld [vmem:[%s10748_s1 + $0xbe0] sm:$0xff]   ;;  %v8529_v12 = vld [vmem:[%s10748_s1 + $0xb58] sm:$0xff]  }
 0x14b   :  { %v7482_v16 = vpop.f32.mrf.mxu1  ;;  %7774 = vmatprep.subr.bf16.mxu1 %v8490_v4  ;;  %v8528_v11 = vld [vmem:[%s10748_s1 + $0xba0] sm:$0xff]  }
 0x14c   :  { %7753 = vmatpush3.bf16.msra.mxu0 %v8491_v7  ;;  %v8533_v16 = vld [vmem:[%s10748_s1 + $0xb50] sm:$0xff]  }
 0x14d   :  { %7754 = vmatprep.subr.bf16.mxu0 %v8493_v13  ;;  %v8530_v13 = vld [vmem:[%s10748_s1 + $0xbd8] sm:$0xff]  }
 0x14e   :  { %7775 = vmatpush3.bf16.msra.mxu1 %v8492_v10  ;;  %v8527_v10 = vld [vmem:[%s10748_s1 + $0xb20] sm:$0xff]  }
 0x14f   :  { %7776 = vmatprep.subr.bf16.mxu1 %v8494_v15  ;;  %v8532_v15 = vld [vmem:[%s10748_s1 + $0xb98] sm:$0xff]  }
 0x150   :  { %7755 = vmatpush3.bf16.msra.mxu0 %v8495_v17  ;;  %v8534_v17 = vld [vmem:[%s10748_s1 + $0xbd0] sm:$0xff]  }
 0x151   :  { %7756 = vmatprep.subr.bf16.mxu0 %v8497_v19  ;;  %v8536_v19 = vld [vmem:[%s10748_s1 + $0xb90] sm:$0xff]  }
 0x152   :  { %7777 = vmatpush3.bf16.msra.mxu1 %v8496_v18  ;;  %v8535_v18 = vld [vmem:[%s10748_s1 + $0xb10] sm:$0xff]  }
 0x153   :  { %7778 = vmatprep.subr.bf16.mxu1 %v8498_v20  ;;  %v8537_v20 = vld [vmem:[%s10748_s1 + $0xb48] sm:$0xff]  }
 0x154   :  { %7757 = vmatpush3.bf16.msra.mxu0 %v8499_v21  ;;  %v8538_v21 = vld [vmem:[%s10748_s1 + $0xbc8] sm:$0xff]  }
 0x155   :  { %7758 = vmatprep.subr.bf16.mxu0 %v8501_v23  ;;  %v8540_v23 = vld [vmem:[%s10748_s1 + $0xb88] sm:$0xff]  }
 0x156   :  { %7779 = vmatpush3.bf16.msra.mxu1 %v8500_v22  ;;  %v8539_v22 = vld [vmem:[%s10748_s1 + $0xb08] sm:$0xff]  }
 0x157   :  { %7780 = vmatprep.subr.bf16.mxu1 %v8502_v24  ;;  %v8541_v24 = vld [vmem:[%s10748_s1 + $0xb40] sm:$0xff]  }
 0x158   :  { %7759 = vmatpush3.bf16.msra.mxu0 %v8503_v25  ;;  %v8542_v25 = vld [vmem:[%s10748_s1 + $0xbc0] sm:$0xff]  }
 0x159   :  { %7760 = vmatprep.subr.bf16.mxu0 %v8505_v27  ;;  %v8544_v27 = vld [vmem:[%s10748_s1 + $0xb80] sm:$0xff]  }
 0x15a   :  { %7781 = vmatpush3.bf16.msra.mxu1 %v8504_v26  ;;  %v8543_v26 = vld [vmem:[%s10748_s1 + $0xb00] sm:$0xff]  }
 0x15b   :  { %7782 = vmatprep.subr.bf16.mxu1 %v8506_v28  ;;  %v1474_v28 = vrot.slane %v9942_v37, %v8906_v41  ;;  %v8552_v37 = vld [vmem:[%s10748_s1 + $0xc30] sm:$0xff]  }
 0x15c   :  { %7761 = vmatpush3.bf16.msra.mxu0 %v8507_v29  ;;  %v8546_v29 = vld [vmem:[%s10748_s1 + $0xc78] sm:$0xff]  }
 0x15d   :  { %7762 = vmatprep.subr.bf16.mxu0 %v8509_v34  ;;  %v1490_v33 = vcombine.high %v1474_v28, %v1474_v28  ;;  %v8550_v34 = vld [vmem:[%s10748_s1 + $0xc70] sm:$0xff]  }
 0x15e   :  { %7783 = vmatpush3.bf16.msra.mxu1 %v8508_v31  ;;  %v8548_v31 = vld [vmem:[%s10748_s1 + $0xc38] sm:$0xff]  }
 0x15f   :  { %7784 = vmatprep.subr.bf16.mxu1 %v8510_v35  ;;  %v8551_v35 = vld [vmem:[%s10748_s1 + $0xcf0] sm:$0xff]  }
 0x160   :  { %7763 = vmatpush3.bf16.msra.mxu0 %v8511_v38  ;;  %v8553_v38 = vld [vmem:[%s10748_s1 + $0xcb0] sm:$0xff]  }
 0x161   :  { %7792 = vmatprep.subr.bf16.mxu0 %v8513_v44  ;;  %v8555_v44 = vld [vmem:[%s10748_s1 + $0xce8] sm:$0xff]  }
 0x162   :  { %7785 = vmatpush3.bf16.msra.mxu1 %v8512_v39 }
 0x163   :  { %v7500_v54 = vpop.f32.mrf.mxu0  ;;  %6001 = vmatmul.mubr.bf16.vlgmr.msra.gmra.mxu0 %v1467_v43  ;;  %7814 = vmatprep.subr.bf16.mxu1 %v8514_v46 }
 0x164   :  { %7793 = vmatpush3.bf16.msra.mxu0 %v8515_v48  ;;  %6080 = vmatprep.mubr.bf16.mxu0 %v1488_v47  ;;  %v8556_v47 = vld [vmem:[%s10748_s1 + $0xc28] sm:$0xff]  }
 0x165   :  { %v7522_v57 = vpop.f32.mrf.mxu1  ;;  %6041 = vmatmul.mubr.bf16.vlgmr.msra.gmra.mxu1 %v1489_v50  ;;  %v7501_v58 = vpop.f32.mrf.mxu0  ;;  %7794 = vmatprep.subr.bf16.mxu0 %v8517_v51  ;;  %v8557_v50 = vld [vmem:[%s10748_s1 + $0xca8] sm:$0xff]  }
 0x166   :  { %7815 = vmatpush3.bf16.msra.mxu1 %v8516_v49  ;;  %v7502_v60 = vadd.f32 %v7501_v58, %v7500_v54  ;;  %6120 = vmatprep.mubr.bf16.mxu1 %v1492_v53  ;;  %v8558_v53 = vld [vmem:[%s10748_s1 + $0xc60] sm:$0xff]  }
 0x167   :  { %v7523_v62 = vpop.f32.mrf.mxu1  ;;  %v7503_v63 = vpop.f32.mrf.mxu0  ;;  %7816 = vmatprep.subr.bf16.mxu1 %v8518_v52  ;;  %v8561_v58 = vld [vmem:[%s10748_s1 + $0xca0] sm:$0xff]  }
 0x168   :  { %v5523_v1 = vadd.f32 %v7502_v60, %v9884_v14  ;;  %v7524_v2 = vadd.f32 %v7523_v62, %v7522_v57  ;;  %7795 = vmatpush3.bf16.msra.mxu0 %v8519_v55  ;;  %v8531_v14 = vld [vmem:[%s10748_s1 + $0xb18] sm:$0xff]   ;;  %v8559_v55 = vld [vmem:[%s10748_s1 + $0xce0] sm:$0xff]   ;;  %v8566_v63 = vld [vmem:[%s10748_s1 + $0xc50] sm:$0xff]  }
 0x169   :  { %v7525_v4 = vpop.f32.mrf.mxu1  ;;  %v7504_v5 = vpop.f32.mrf.mxu0  ;;  %7796 = vmatprep.subr.bf16.mxu0 %v8521_v59  ;;  %v8560_v57 = vld [vmem:[%s10748_s1 + $0xc20] sm:$0xff]   ;;  %v8562_v59 = vld [vmem:[%s10748_s1 + $0xc58] sm:$0xff]  }
 0x16a   :  { %v9995_v7 = vadd.f32 %v7524_v2, %v5523_v1  ;;  %7817 = vmatpush3.bf16.msra.mxu1 %v8520_v56  ;;  %v8563_v60 = vld [vmem:[%s10748_s1 + $0xcd8] sm:$0xff]   ;;  %v8568_v1 = vld [vmem:[%s10748_s1 + $0xc10] sm:$0xff]   ;;  %v8571_v4 = vld [vmem:[%s10748_s1 + $0xcc8] sm:$0xff]  }
 0x16b   :  { %v7526_v9 = vpop.f32.mrf.mxu1  ;;  %7818 = vmatprep.subr.bf16.mxu1 %v8522_v61  ;;  %v8564_v61 = vld [vmem:[%s10748_s1 + $0xc18] sm:$0xff]   ;;  %v8569_v2 = vld [vmem:[%s10748_s1 + $0xc90] sm:$0xff]   ;;  %v8572_v5 = vld [vmem:[%s10748_s1 + $0xc08] sm:$0xff]  }
 0x16c   :  { %7797 = vmatpush3.bf16.msra.mxu0 %v8523_v0  ;;  %v8565_v62 = vld [vmem:[%s10748_s1 + $0xc98] sm:$0xff]   ;;  %v8567_v0 = vld [vmem:[%s10748_s1 + $0xcd0] sm:$0xff]  }
 0x16d   :  { %7798 = vmatprep.subr.bf16.mxu0 %v8525_v6  ;;  %v28_v6 = vld [vmem:[%s10747_s0 + $0x30] sm:$0xff] }
 0x16e   :  { %7819 = vmatpush3.bf16.msra.mxu1 %v8524_v3  ;;  %v8570_v3 = vld [vmem:[%s10748_s1 + $0xc48] sm:$0xff]   ;;  %v1493_v9 = vcombine.high %v28_v6, %v28_v6 }
 0x16f   :  { %7820 = vmatprep.subr.bf16.mxu1 %v8526_v8  ;;  %v1500_v8 = vrot.slane %v28_v6, %v8906_v41  ;;  %v8612_v6 = vld [vmem:[%s10748_s1 + $0xef8] sm:$0xff]  }
 0x170   :  { %7799 = vmatpush3.bf16.msra.mxu0 %v8527_v10  ;;  %v8574_v10 = vld [vmem:[%s10748_s1 + $0xc40] sm:$0xff]  }
 0x171   :  { %7800 = vmatprep.subr.bf16.mxu0 %v8529_v12  ;;  %v1508_v12 = vcombine.high %v1500_v8, %v1500_v8 }
 0x172   :  { %7821 = vmatpush3.bf16.msra.mxu1 %v8528_v11  ;;  %v8575_v11 = vld [vmem:[%s10748_s1 + $0xcc0] sm:$0xff]  }
 0x173   :  { %7822 = vmatprep.subr.bf16.mxu1 %v8530_v13  ;;  %v10154_v13 = vrot.slane %v1493_v9, %v8906_v41 }
 0x174   :  { %7801 = vmatpush3.bf16.msra.mxu0 %v8531_v14  ;;  %v8576_v14 = vld [vmem:[%s10748_s1 + $0xc00] sm:$0xff]  }
 0x175   :  { %7802 = vmatprep.subr.bf16.mxu0 %v8533_v16  ;;  %v1530_v16 = vrot.slane %v1508_v12, %v8906_v41 }
 0x176   :  { %7823 = vmatpush3.bf16.msra.mxu1 %v8532_v15  ;;  %v8577_v15 = vld [vmem:[%s10748_s1 + $0xc80] sm:$0xff]  }
 0x177   :  { %7824 = vmatprep.subr.bf16.mxu1 %v8534_v17  ;;  %v1509_v17 = vcombine.high %v10154_v13, %v10154_v13 }
 0x178   :  { %7803 = vmatpush3.bf16.msra.mxu0 %v8535_v18  ;;  %v1516_v18 = vrot.slane %v1500_v8, %v8906_v41  ;;  %v8614_v8 = vld [vmem:[%s10748_s1 + $0xeb8] sm:$0xff]  }
 0x179   :  { %7804 = vmatprep.subr.bf16.mxu0 %v8537_v20  ;;  %v1540_v20 = vcombine.high %v1530_v16, %v1530_v16 }
 0x17a   :  { %7825 = vmatpush3.bf16.msra.mxu1 %v8536_v19  ;;  %v8578_v19 = vld [vmem:[%s10748_s1 + $0xd78] sm:$0xff]  }
 0x17b   :  { %7826 = vmatprep.subr.bf16.mxu1 %v8538_v21  ;;  %v8579_v21 = vld [vmem:[%s10748_s1 + $0xdf8] sm:$0xff]  }
 0x17c   :  { %7805 = vmatpush3.bf16.msra.mxu0 %v8539_v22  ;;  %v1537_v22 = vrot.slane %v1509_v17, %v8906_v41  ;;  %v8619_v17 = vld [vmem:[%s10748_s1 + $0xe68] sm:$0xff]  }
 0x17d   :  { %7806 = vmatprep.subr.bf16.mxu0 %v8541_v24  ;;  %v8581_v24 = vld [vmem:[%s10748_s1 + $0xdb8] sm:$0xff]  }
 0x17e   :  { %7827 = vmatpush3.bf16.msra.mxu1 %v8540_v23  ;;  %v8580_v23 = vld [vmem:[%s10748_s1 + $0xd38] sm:$0xff]  }
 0x17f   :  { %7828 = vmatprep.subr.bf16.mxu1 %v8542_v25  ;;  %v1538_v25 = vcombine.high %v1516_v18, %v1516_v18 }
 0x180   :  { %7807 = vmatpush3.bf16.msra.mxu0 %v8543_v26  ;;  %v8582_v26 = vld [vmem:[%s10748_s1 + $0xd70] sm:$0xff]  }
 0x181   :  { %7836 = vmatprep.subr.bf16.mxu0 %v8546_v29 }
 0x182   :  { %7829 = vmatpush3.bf16.msra.mxu1 %v8544_v27  ;;  %v8583_v27 = vld [vmem:[%s10748_s1 + $0xdf0] sm:$0xff]  }
 0x183   :  { %v7544_v36 = vpop.f32.mrf.mxu0  ;;  %6081 = vmatmul.mubr.bf16.vlgmr.msra.gmra.mxu0 %v1474_v28  ;;  %7858 = vmatprep.subr.bf16.mxu1 %v8547_v30  ;;  %v1541_v28 = vcombine.high %v1537_v22, %v1537_v22  ;;  %v8584_v30 = vld [vmem:[%s10748_s1 + $0xd30] sm:$0xff]  }
 0x184   :  { %7837 = vmatpush3.bf16.msra.mxu0 %v8548_v31  ;;  %6160 = vmatprep.mubr.bf16.mxu0 %v1530_v16  ;;  %v8585_v31 = vld [vmem:[%s10748_s1 + $0xdb0] sm:$0xff]  }
 0x185   :  { %v7566_v39 = vpop.f32.mrf.mxu1  ;;  %6121 = vmatmul.mubr.bf16.vlgmr.msra.gmra.mxu1 %v1490_v33  ;;  %v7545_v40 = vpop.f32.mrf.mxu0  ;;  %7838 = vmatprep.subr.bf16.mxu0 %v8550_v34  ;;  %v8586_v34 = vld [vmem:[%s10748_s1 + $0xd68] sm:$0xff]  }
 0x186   :  { %7859 = vmatpush3.bf16.msra.mxu1 %v8549_v32  ;;  %v7546_v43 = vadd.f32 %v7545_v40, %v7544_v36  ;;  %6200 = vmatprep.mubr.bf16.mxu1 %v1540_v20  ;;  %v8587_v36 = vld [vmem:[%s10748_s1 + $0xde8] sm:$0xff]  }
 0x187   :  { %v7567_v45 = vpop.f32.mrf.mxu1  ;;  %v7547_v46 = vpop.f32.mrf.mxu0  ;;  %7860 = vmatprep.subr.bf16.mxu1 %v8551_v35 }
 0x188   :  { %v5603_v48 = vadd.f32 %v7546_v43, %v9995_v7  ;;  %v7568_v49 = vadd.f32 %v7567_v45, %v7566_v39  ;;  %7839 = vmatpush3.bf16.msra.mxu0 %v8552_v37  ;;  %v8573_v7 = vld [vmem:[%s10748_s1 + $0xc88] sm:$0xff]   ;;  %v8590_v46 = vld [vmem:[%s10748_s1 + $0xd60] sm:$0xff]  }
 0x189   :  { %v7569_v51 = vpop.f32.mrf.mxu1  ;;  %v7548_v52 = vpop.f32.mrf.mxu0  ;;  %7840 = vmatprep.subr.bf16.mxu0 %v8554_v42  ;;  %v8588_v39 = vld [vmem:[%s10748_s1 + $0xd28] sm:$0xff]  }
 0x18a   :  { %v10096_v54 = vadd.f32 %v7568_v49, %v5603_v48  ;;  %7861 = vmatpush3.bf16.msra.mxu1 %v8553_v38  ;;  %v8589_v43 = vld [vmem:[%s10748_s1 + $0xda8] sm:$0xff]   ;;  %v8591_v48 = vld [vmem:[%s10748_s1 + $0xde0] sm:$0xff]   ;;  %v8594_v52 = vld [vmem:[%s10748_s1 + $0xd58] sm:$0xff]  }
 0x18b   :  { %v7570_v56 = vpop.f32.mrf.mxu1  ;;  %7862 = vmatprep.subr.bf16.mxu1 %v8555_v44  ;;  %v8593_v51 = vld [vmem:[%s10748_s1 + $0xda0] sm:$0xff]  }
 0x18c   :  { %7841 = vmatpush3.bf16.msra.mxu0 %v8556_v47  ;;  %v8598_v56 = vld [vmem:[%s10748_s1 + $0xd50] sm:$0xff]  }
 0x18d   :  { %7842 = vmatprep.subr.bf16.mxu0 %v8558_v53  ;;  %v8595_v53 = vld [vmem:[%s10748_s1 + $0xdd8] sm:$0xff]  }
 0x18e   :  { %7863 = vmatpush3.bf16.msra.mxu1 %v8557_v50  ;;  %v8592_v50 = vld [vmem:[%s10748_s1 + $0xd20] sm:$0xff]  }
 0x18f   :  { %7864 = vmatprep.subr.bf16.mxu1 %v8559_v55  ;;  %v8597_v55 = vld [vmem:[%s10748_s1 + $0xd98] sm:$0xff]  }
 0x190   :  { %7843 = vmatpush3.bf16.msra.mxu0 %v8560_v57  ;;  %v8599_v57 = vld [vmem:[%s10748_s1 + $0xdd0] sm:$0xff]  }
 0x191   :  { %7844 = vmatprep.subr.bf16.mxu0 %v8562_v59  ;;  %v8601_v59 = vld [vmem:[%s10748_s1 + $0xd90] sm:$0xff]  }
 0x192   :  { %7865 = vmatpush3.bf16.msra.mxu1 %v8561_v58  ;;  %v8600_v58 = vld [vmem:[%s10748_s1 + $0xd10] sm:$0xff]  }
 0x193   :  { %7866 = vmatprep.subr.bf16.mxu1 %v8563_v60  ;;  %v8602_v60 = vld [vmem:[%s10748_s1 + $0xd48] sm:$0xff]  }
 0x194   :  { %7845 = vmatpush3.bf16.msra.mxu0 %v8564_v61  ;;  %v8603_v61 = vld [vmem:[%s10748_s1 + $0xdc8] sm:$0xff]  }
 0x195   :  { %7846 = vmatprep.subr.bf16.mxu0 %v8566_v63  ;;  %v8605_v63 = vld [vmem:[%s10748_s1 + $0xd88] sm:$0xff]  }
 0x196   :  { %7867 = vmatpush3.bf16.msra.mxu1 %v8565_v62  ;;  %v8604_v62 = vld [vmem:[%s10748_s1 + $0xd08] sm:$0xff]  }
 0x197   :  { %7868 = vmatprep.subr.bf16.mxu1 %v8567_v0  ;;  %v8606_v0 = vld [vmem:[%s10748_s1 + $0xd40] sm:$0xff]  }
 0x198   :  { %7847 = vmatpush3.bf16.msra.mxu0 %v8568_v1  ;;  %v8607_v1 = vld [vmem:[%s10748_s1 + $0xdc0] sm:$0xff]  }
 0x199   :  { %7848 = vmatprep.subr.bf16.mxu0 %v8570_v3  ;;  %v8609_v3 = vld [vmem:[%s10748_s1 + $0xd80] sm:$0xff]  }
 0x19a   :  { %7869 = vmatpush3.bf16.msra.mxu1 %v8569_v2  ;;  %v8608_v2 = vld [vmem:[%s10748_s1 + $0xd00] sm:$0xff]  }
 0x19b   :  { %7870 = vmatprep.subr.bf16.mxu1 %v8571_v4  ;;  %v1523_v4 = vrot.slane %v10154_v13, %v8906_v41  ;;  %v8617_v13 = vld [vmem:[%s10748_s1 + $0xe30] sm:$0xff]  }
 0x19c   :  { %7849 = vmatpush3.bf16.msra.mxu0 %v8572_v5  ;;  %v8611_v5 = vld [vmem:[%s10748_s1 + $0xe78] sm:$0xff]  }
 0x19d   :  { %7850 = vmatprep.subr.bf16.mxu0 %v8574_v10  ;;  %v1539_v9 = vcombine.high %v1523_v4, %v1523_v4  ;;  %v8615_v10 = vld [vmem:[%s10748_s1 + $0xe70] sm:$0xff]  }
 0x19e   :  { %7871 = vmatpush3.bf16.msra.mxu1 %v8573_v7  ;;  %v8613_v7 = vld [vmem:[%s10748_s1 + $0xe38] sm:$0xff]  }
 0x19f   :  { %7872 = vmatprep.subr.bf16.mxu1 %v8575_v11  ;;  %v8616_v11 = vld [vmem:[%s10748_s1 + $0xef0] sm:$0xff]  }
 0x1a0   :  { %7851 = vmatpush3.bf16.msra.mxu0 %v8576_v14  ;;  %v8618_v14 = vld [vmem:[%s10748_s1 + $0xeb0] sm:$0xff]  }
 0x1a1   :  { %7880 = vmatprep.subr.bf16.mxu0 %v8578_v19  ;;  %v8620_v19 = vld [vmem:[%s10748_s1 + $0xee8] sm:$0xff]  }
 0x1a2   :  { %7873 = vmatpush3.bf16.msra.mxu1 %v8577_v15 }
 0x1a3   :  { %v7588_v29 = vpop.f32.mrf.mxu0  ;;  %6161 = vmatmul.mubr.bf16.vlgmr.msra.gmra.mxu0 %v1516_v18  ;;  %7902 = vmatprep.subr.bf16.mxu1 %v8579_v21 }
 0x1a4   :  { %7881 = vmatpush3.bf16.msra.mxu0 %v8580_v23  ;;  %6240 = vmatprep.mubr.bf16.mxu0 %v1537_v22  ;;  %v8621_v22 = vld [vmem:[%s10748_s1 + $0xe28] sm:$0xff]  }
 0x1a5   :  { %v7610_v32 = vpop.f32.mrf.mxu1  ;;  %6201 = vmatmul.mubr.bf16.vlgmr.msra.gmra.mxu1 %v1538_v25  ;;  %v7589_v33 = vpop.f32.mrf.mxu0  ;;  %7882 = vmatprep.subr.bf16.mxu0 %v8582_v26  ;;  %v8622_v25 = vld [vmem:[%s10748_s1 + $0xea8] sm:$0xff]  }
 0x1a6   :  { %7903 = vmatpush3.bf16.msra.mxu1 %v8581_v24  ;;  %v7590_v35 = vadd.f32 %v7589_v33, %v7588_v29  ;;  %6280 = vmatprep.mubr.bf16.mxu1 %v1541_v28  ;;  %v8623_v28 = vld [vmem:[%s10748_s1 + $0xe60] sm:$0xff]  }
 0x1a7   :  { %v7611_v37 = vpop.f32.mrf.mxu1  ;;  %v7591_v38 = vpop.f32.mrf.mxu0  ;;  %7904 = vmatprep.subr.bf16.mxu1 %v8583_v27  ;;  %v8626_v33 = vld [vmem:[%s10748_s1 + $0xea0] sm:$0xff]  }
 0x1a8   :  { %v5683_v40 = vadd.f32 %v7590_v35, %v10096_v54  ;;  %v7612_v42 = vadd.f32 %v7611_v37, %v7610_v32  ;;  %7883 = vmatpush3.bf16.msra.mxu0 %v8584_v30  ;;  %v8596_v54 = vld [vmem:[%s10748_s1 + $0xd18] sm:$0xff]   ;;  %v8624_v30 = vld [vmem:[%s10748_s1 + $0xee0] sm:$0xff]   ;;  %v8631_v38 = vld [vmem:[%s10748_s1 + $0xe50] sm:$0xff]  }
 0x1a9   :  { %v7613_v44 = vpop.f32.mrf.mxu1  ;;  %v7592_v45 = vpop.f32.mrf.mxu0  ;;  %7884 = vmatprep.subr.bf16.mxu0 %v8586_v34  ;;  %v8625_v32 = vld [vmem:[%s10748_s1 + $0xe20] sm:$0xff]   ;;  %v8627_v34 = vld [vmem:[%s10748_s1 + $0xe58] sm:$0xff]  }
 0x1aa   :  { %v10207_v47 = vadd.f32 %v7612_v42, %v5683_v40  ;;  %7905 = vmatpush3.bf16.msra.mxu1 %v8585_v31  ;;  %v8628_v35 = vld [vmem:[%s10748_s1 + $0xed8] sm:$0xff]   ;;  %v8633_v40 = vld [vmem:[%s10748_s1 + $0xe10] sm:$0xff]   ;;  %v8636_v44 = vld [vmem:[%s10748_s1 + $0xec8] sm:$0xff]  }
 0x1ab   :  { %v7614_v49 = vpop.f32.mrf.mxu1  ;;  %7906 = vmatprep.subr.bf16.mxu1 %v8587_v36  ;;  %v8629_v36 = vld [vmem:[%s10748_s1 + $0xe18] sm:$0xff]   ;;  %v8634_v42 = vld [vmem:[%s10748_s1 + $0xe90] sm:$0xff]   ;;  %v8637_v45 = vld [vmem:[%s10748_s1 + $0xe08] sm:$0xff]  }
 0x1ac   :  { %7885 = vmatpush3.bf16.msra.mxu0 %v8588_v39  ;;  %v8630_v37 = vld [vmem:[%s10748_s1 + $0xe98] sm:$0xff]   ;;  %v8632_v39 = vld [vmem:[%s10748_s1 + $0xed0] sm:$0xff]  }
 0x1ad   :  { %7886 = vmatprep.subr.bf16.mxu0 %v8590_v46  ;;  %v29_v46 = vld [vmem:[%s10747_s0 + $0x38] sm:$0xff] }
 0x1ae   :  { %7907 = vmatpush3.bf16.msra.mxu1 %v8589_v43  ;;  %v8635_v43 = vld [vmem:[%s10748_s1 + $0xe48] sm:$0xff]   ;;  %v1542_v49 = vcombine.high %v29_v46, %v29_v46 }
 0x1af   :  { %7908 = vmatprep.subr.bf16.mxu1 %v8591_v48  ;;  %v1549_v48 = vrot.slane %v29_v46, %v8906_v41  ;;  %v8677_v46 = vld [vmem:[%s10748_s1 + $0x10f8] sm:$0xff]  }
 0x1b0   :  { %7887 = vmatpush3.bf16.msra.mxu0 %v8592_v50  ;;  %v8639_v50 = vld [vmem:[%s10748_s1 + $0xe40] sm:$0xff]  }
 0x1b1   :  { %7888 = vmatprep.subr.bf16.mxu0 %v8594_v52  ;;  %v1557_v52 = vcombine.high %v1549_v48, %v1549_v48 }
 0x1b2   :  { %7909 = vmatpush3.bf16.msra.mxu1 %v8593_v51  ;;  %v8640_v51 = vld [vmem:[%s10748_s1 + $0xec0] sm:$0xff]  }
 0x1b3   :  { %7910 = vmatprep.subr.bf16.mxu1 %v8595_v53  ;;  %v10366_v53 = vrot.slane %v1542_v49, %v8906_v41 }
 0x1b4   :  { %7889 = vmatpush3.bf16.msra.mxu0 %v8596_v54  ;;  %v8641_v54 = vld [vmem:[%s10748_s1 + $0xe00] sm:$0xff]  }
 0x1b5   :  { %7890 = vmatprep.subr.bf16.mxu0 %v8598_v56  ;;  %v1579_v56 = vrot.slane %v1557_v52, %v8906_v41 }
 0x1b6   :  { %7911 = vmatpush3.bf16.msra.mxu1 %v8597_v55  ;;  %v8642_v55 = vld [vmem:[%s10748_s1 + $0xe80] sm:$0xff]  }
 0x1b7   :  { %7912 = vmatprep.subr.bf16.mxu1 %v8599_v57  ;;  %v1558_v57 = vcombine.high %v10366_v53, %v10366_v53 }
 0x1b8   :  { %7891 = vmatpush3.bf16.msra.mxu0 %v8600_v58  ;;  %v1565_v58 = vrot.slane %v1549_v48, %v8906_v41  ;;  %v8679_v48 = vld [vmem:[%s10748_s1 + $0x10b8] sm:$0xff]  }
 0x1b9   :  { %7892 = vmatprep.subr.bf16.mxu0 %v8602_v60  ;;  %v1589_v60 = vcombine.high %v1579_v56, %v1579_v56 }
 0x1ba   :  { %7913 = vmatpush3.bf16.msra.mxu1 %v8601_v59  ;;  %v8643_v59 = vld [vmem:[%s10748_s1 + $0xf78] sm:$0xff]  }
 0x1bb   :  { %7914 = vmatprep.subr.bf16.mxu1 %v8603_v61  ;;  %v8644_v61 = vld [vmem:[%s10748_s1 + $0xff8] sm:$0xff]  }
 0x1bc   :  { %7893 = vmatpush3.bf16.msra.mxu0 %v8604_v62  ;;  %v1586_v62 = vrot.slane %v1558_v57, %v8906_v41  ;;  %v8684_v57 = vld [vmem:[%s10748_s1 + $0x1068] sm:$0xff]  }
 0x1bd   :  { %7894 = vmatprep.subr.bf16.mxu0 %v8606_v0  ;;  %v8646_v0 = vld [vmem:[%s10748_s1 + $0xfb8] sm:$0xff]  }
 0x1be   :  { %7915 = vmatpush3.bf16.msra.mxu1 %v8605_v63  ;;  %v8645_v63 = vld [vmem:[%s10748_s1 + $0xf38] sm:$0xff]  }
 0x1bf   :  { %7916 = vmatprep.subr.bf16.mxu1 %v8607_v1  ;;  %v1587_v1 = vcombine.high %v1565_v58, %v1565_v58 }
 0x1c0   :  { %7895 = vmatpush3.bf16.msra.mxu0 %v8608_v2  ;;  %v8647_v2 = vld [vmem:[%s10748_s1 + $0xf70] sm:$0xff]  }
 0x1c1   :  { %7924 = vmatprep.subr.bf16.mxu0 %v8611_v5 }
 0x1c2   :  { %7917 = vmatpush3.bf16.msra.mxu1 %v8609_v3  ;;  %v8648_v3 = vld [vmem:[%s10748_s1 + $0xff0] sm:$0xff]  }
 0x1c3   :  { %v7632_v12 = vpop.f32.mrf.mxu0  ;;  %6241 = vmatmul.mubr.bf16.vlgmr.msra.gmra.mxu0 %v1523_v4  ;;  %7946 = vmatprep.subr.bf16.mxu1 %v8612_v6  ;;  %v1590_v4 = vcombine.high %v1586_v62, %v1586_v62  ;;  %v8649_v6 = vld [vmem:[%s10748_s1 + $0xf30] sm:$0xff]  }
 0x1c4   :  { %7925 = vmatpush3.bf16.msra.mxu0 %v8613_v7  ;;  %6320 = vmatprep.mubr.bf16.mxu0 %v1579_v56  ;;  %v8650_v7 = vld [vmem:[%s10748_s1 + $0xfb0] sm:$0xff]  }
 0x1c5   :  { %v7654_v15 = vpop.f32.mrf.mxu1  ;;  %6281 = vmatmul.mubr.bf16.vlgmr.msra.gmra.mxu1 %v1539_v9  ;;  %v7633_v16 = vpop.f32.mrf.mxu0  ;;  %7926 = vmatprep.subr.bf16.mxu0 %v8615_v10  ;;  %v8651_v10 = vld [vmem:[%s10748_s1 + $0xf68] sm:$0xff]  }
 0x1c6   :  { %7947 = vmatpush3.bf16.msra.mxu1 %v8614_v8  ;;  %v7634_v18 = vadd.f32 %v7633_v16, %v7632_v12  ;;  %6360 = vmatprep.mubr.bf16.mxu1 %v1589_v60  ;;  %v8652_v12 = vld [vmem:[%s10748_s1 + $0xfe8] sm:$0xff]  }
 0x1c7   :  { %v7655_v20 = vpop.f32.mrf.mxu1  ;;  %v7635_v21 = vpop.f32.mrf.mxu0  ;;  %7948 = vmatprep.subr.bf16.mxu1 %v8616_v11 }
 0x1c8   :  { %v5763_v23 = vadd.f32 %v7634_v18, %v10207_v47  ;;  %v7656_v24 = vadd.f32 %v7655_v20, %v7654_v15  ;;  %7927 = vmatpush3.bf16.msra.mxu0 %v8617_v13  ;;  %v8638_v47 = vld [vmem:[%s10748_s1 + $0xe88] sm:$0xff]   ;;  %v8655_v21 = vld [vmem:[%s10748_s1 + $0xf60] sm:$0xff]  }
 0x1c9   :  { %v7657_v26 = vpop.f32.mrf.mxu1  ;;  %v7636_v27 = vpop.f32.mrf.mxu0  ;;  %7928 = vmatprep.subr.bf16.mxu0 %v8619_v17  ;;  %v8653_v15 = vld [vmem:[%s10748_s1 + $0xf28] sm:$0xff]  }
 0x1ca   :  { %v10308_v29 = vadd.f32 %v7656_v24, %v5763_v23  ;;  %7949 = vmatpush3.bf16.msra.mxu1 %v8618_v14  ;;  %v8654_v18 = vld [vmem:[%s10748_s1 + $0xfa8] sm:$0xff]   ;;  %v8656_v23 = vld [vmem:[%s10748_s1 + $0xfe0] sm:$0xff]   ;;  %v8659_v27 = vld [vmem:[%s10748_s1 + $0xf58] sm:$0xff]  }
 0x1cb   :  { %v7658_v31 = vpop.f32.mrf.mxu1  ;;  %7950 = vmatprep.subr.bf16.mxu1 %v8620_v19  ;;  %v8658_v26 = vld [vmem:[%s10748_s1 + $0xfa0] sm:$0xff]  }
 0x1cc   :  { %7929 = vmatpush3.bf16.msra.mxu0 %v8621_v22  ;;  %v8663_v31 = vld [vmem:[%s10748_s1 + $0xf50] sm:$0xff]  }
 0x1cd   :  { %7930 = vmatprep.subr.bf16.mxu0 %v8623_v28  ;;  %v8660_v28 = vld [vmem:[%s10748_s1 + $0xfd8] sm:$0xff]  }
 0x1ce   :  { %7951 = vmatpush3.bf16.msra.mxu1 %v8622_v25  ;;  %v8657_v25 = vld [vmem:[%s10748_s1 + $0xf20] sm:$0xff]  }
 0x1cf   :  { %7952 = vmatprep.subr.bf16.mxu1 %v8624_v30  ;;  %v8662_v30 = vld [vmem:[%s10748_s1 + $0xf98] sm:$0xff]  }
 0x1d0   :  { %7931 = vmatpush3.bf16.msra.mxu0 %v8625_v32  ;;  %v8664_v32 = vld [vmem:[%s10748_s1 + $0xfd0] sm:$0xff]  }
 0x1d1   :  { %7932 = vmatprep.subr.bf16.mxu0 %v8627_v34  ;;  %v8666_v34 = vld [vmem:[%s10748_s1 + $0xf90] sm:$0xff]  }
 0x1d2   :  { %7953 = vmatpush3.bf16.msra.mxu1 %v8626_v33  ;;  %v8665_v33 = vld [vmem:[%s10748_s1 + $0xf10] sm:$0xff]  }
 0x1d3   :  { %7954 = vmatprep.subr.bf16.mxu1 %v8628_v35  ;;  %v8667_v35 = vld [vmem:[%s10748_s1 + $0xf48] sm:$0xff]  }
 0x1d4   :  { %7933 = vmatpush3.bf16.msra.mxu0 %v8629_v36  ;;  %v8668_v36 = vld [vmem:[%s10748_s1 + $0xfc8] sm:$0xff]  }
 0x1d5   :  { %7934 = vmatprep.subr.bf16.mxu0 %v8631_v38  ;;  %v8670_v38 = vld [vmem:[%s10748_s1 + $0xf88] sm:$0xff]  }
 0x1d6   :  { %7955 = vmatpush3.bf16.msra.mxu1 %v8630_v37  ;;  %v8669_v37 = vld [vmem:[%s10748_s1 + $0xf08] sm:$0xff]  }
 0x1d7   :  { %7956 = vmatprep.subr.bf16.mxu1 %v8632_v39  ;;  %v8671_v39 = vld [vmem:[%s10748_s1 + $0xf40] sm:$0xff]  }
 0x1d8   :  { %7935 = vmatpush3.bf16.msra.mxu0 %v8633_v40  ;;  %v8672_v40 = vld [vmem:[%s10748_s1 + $0xfc0] sm:$0xff]  }
 0x1d9   :  { %7936 = vmatprep.subr.bf16.mxu0 %v8635_v43  ;;  %v8674_v43 = vld [vmem:[%s10748_s1 + $0xf80] sm:$0xff]  }
 0x1da   :  { %7957 = vmatpush3.bf16.msra.mxu1 %v8634_v42  ;;  %v8673_v42 = vld [vmem:[%s10748_s1 + $0xf00] sm:$0xff]  }
 0x1db   :  { %7958 = vmatprep.subr.bf16.mxu1 %v8636_v44  ;;  %v1572_v44 = vrot.slane %v10366_v53, %v8906_v41  ;;  %v8682_v53 = vld [vmem:[%s10748_s1 + $0x1030] sm:$0xff]  }
 0x1dc   :  { %7937 = vmatpush3.bf16.msra.mxu0 %v8637_v45  ;;  %v8676_v45 = vld [vmem:[%s10748_s1 + $0x1078] sm:$0xff]  }
 0x1dd   :  { %7938 = vmatprep.subr.bf16.mxu0 %v8639_v50  ;;  %v1588_v49 = vcombine.high %v1572_v44, %v1572_v44  ;;  %v8680_v50 = vld [vmem:[%s10748_s1 + $0x1070] sm:$0xff]  }
 0x1de   :  { %7959 = vmatpush3.bf16.msra.mxu1 %v8638_v47  ;;  %v8678_v47 = vld [vmem:[%s10748_s1 + $0x1038] sm:$0xff]  }
 0x1df   :  { %7960 = vmatprep.subr.bf16.mxu1 %v8640_v51  ;;  %v8681_v51 = vld [vmem:[%s10748_s1 + $0x10f0] sm:$0xff]  }
 0x1e0   :  { %7939 = vmatpush3.bf16.msra.mxu0 %v8641_v54  ;;  %v8683_v54 = vld [vmem:[%s10748_s1 + $0x10b0] sm:$0xff]  }
 0x1e1   :  { %7968 = vmatprep.subr.bf16.mxu0 %v8643_v59  ;;  %v8685_v59 = vld [vmem:[%s10748_s1 + $0x10e8] sm:$0xff]  }
 0x1e2   :  { %7961 = vmatpush3.bf16.msra.mxu1 %v8642_v55 }
 0x1e3   :  { %v7676_v5 = vpop.f32.mrf.mxu0  ;;  %6321 = vmatmul.mubr.bf16.vlgmr.msra.gmra.mxu0 %v1565_v58  ;;  %7990 = vmatprep.subr.bf16.mxu1 %v8644_v61 }
 0x1e4   :  { %7969 = vmatpush3.bf16.msra.mxu0 %v8645_v63  ;;  %6400 = vmatprep.mubr.bf16.mxu0 %v1586_v62  ;;  %v8686_v62 = vld [vmem:[%s10748_s1 + $0x1028] sm:$0xff]  }
 0x1e5   :  { %v7698_v8 = vpop.f32.mrf.mxu1  ;;  %6361 = vmatmul.mubr.bf16.vlgmr.msra.gmra.mxu1 %v1587_v1  ;;  %v7677_v9 = vpop.f32.mrf.mxu0  ;;  %7970 = vmatprep.subr.bf16.mxu0 %v8647_v2  ;;  %v8687_v1 = vld [vmem:[%s10748_s1 + $0x10a8] sm:$0xff]  }
 0x1e6   :  { %7991 = vmatpush3.bf16.msra.mxu1 %v8646_v0  ;;  %v7678_v11 = vadd.f32 %v7677_v9, %v7676_v5  ;;  %6440 = vmatprep.mubr.bf16.mxu1 %v1590_v4  ;;  %v8688_v4 = vld [vmem:[%s10748_s1 + $0x1060] sm:$0xff]  }
 0x1e7   :  { %v7699_v13 = vpop.f32.mrf.mxu1  ;;  %v7679_v14 = vpop.f32.mrf.mxu0  ;;  %7992 = vmatprep.subr.bf16.mxu1 %v8648_v3  ;;  %v8691_v9 = vld [vmem:[%s10748_s1 + $0x10a0] sm:$0xff]  }
 0x1e8   :  { %v5843_v16 = vadd.f32 %v7678_v11, %v10308_v29  ;;  %v7700_v17 = vadd.f32 %v7699_v13, %v7698_v8  ;;  %7971 = vmatpush3.bf16.msra.mxu0 %v8649_v6  ;;  %v8661_v29 = vld [vmem:[%s10748_s1 + $0xf18] sm:$0xff]   ;;  %v8689_v6 = vld [vmem:[%s10748_s1 + $0x10e0] sm:$0xff]   ;;  %v8696_v14 = vld [vmem:[%s10748_s1 + $0x1050] sm:$0xff]  }
 0x1e9   :  { %v7701_v19 = vpop.f32.mrf.mxu1  ;;  %v7680_v20 = vpop.f32.mrf.mxu0  ;;  %7972 = vmatprep.subr.bf16.mxu0 %v8651_v10  ;;  %v8690_v8 = vld [vmem:[%s10748_s1 + $0x1020] sm:$0xff]   ;;  %v8692_v10 = vld [vmem:[%s10748_s1 + $0x1058] sm:$0xff]  }
 0x1ea   :  { %v10419_v22 = vadd.f32 %v7700_v17, %v5843_v16  ;;  %7993 = vmatpush3.bf16.msra.mxu1 %v8650_v7  ;;  %v8693_v11 = vld [vmem:[%s10748_s1 + $0x10d8] sm:$0xff]   ;;  %v8698_v16 = vld [vmem:[%s10748_s1 + $0x1010] sm:$0xff]   ;;  %v8701_v19 = vld [vmem:[%s10748_s1 + $0x10c8] sm:$0xff]  }
 0x1eb   :  { %v7702_v24 = vpop.f32.mrf.mxu1  ;;  %7994 = vmatprep.subr.bf16.mxu1 %v8652_v12  ;;  %v8694_v12 = vld [vmem:[%s10748_s1 + $0x1018] sm:$0xff]   ;;  %v8699_v17 = vld [vmem:[%s10748_s1 + $0x1090] sm:$0xff]   ;;  %v8702_v20 = vld [vmem:[%s10748_s1 + $0x1008] sm:$0xff]  }
 0x1ec   :  { %7973 = vmatpush3.bf16.msra.mxu0 %v8653_v15  ;;  %v8695_v13 = vld [vmem:[%s10748_s1 + $0x1098] sm:$0xff]   ;;  %v8697_v15 = vld [vmem:[%s10748_s1 + $0x10d0] sm:$0xff]  }
 0x1ed   :  { %7974 = vmatprep.subr.bf16.mxu0 %v8655_v21  ;;  %v30_v21 = vld [vmem:[%s10747_s0 + $0x40] sm:$0xff] }
 0x1ee   :  { %7995 = vmatpush3.bf16.msra.mxu1 %v8654_v18  ;;  %v8700_v18 = vld [vmem:[%s10748_s1 + $0x1048] sm:$0xff]   ;;  %v1591_v24 = vcombine.high %v30_v21, %v30_v21 }
 0x1ef   :  { %7996 = vmatprep.subr.bf16.mxu1 %v8656_v23  ;;  %v1598_v23 = vrot.slane %v30_v21, %v8906_v41 }
 0x1f0   :  { %7975 = vmatpush3.bf16.msra.mxu0 %v8657_v25  ;;  %v8703_v25 = vld [vmem:[%s10748_s1 + $0x1088] sm:$0xff]  }
 0x1f1   :  { %7976 = vmatprep.subr.bf16.mxu0 %v8659_v27  ;;  %v1606_v27 = vcombine.high %v1598_v23, %v1598_v23 }
 0x1f2   :  { %7997 = vmatpush3.bf16.msra.mxu1 %v8658_v26  ;;  %v8705_v26 = vld [vmem:[%s10748_s1 + $0x10c0] sm:$0xff]  }
 0x1f3   :  { %7998 = vmatprep.subr.bf16.mxu1 %v8660_v28  ;;  %v10578_v28 = vrot.slane %v1591_v24, %v8906_v41 }
 0x1f4   :  { %7977 = vmatpush3.bf16.msra.mxu0 %v8661_v29  ;;  %v8706_v29 = vld [vmem:[%s10748_s1 + $0x1000] sm:$0xff]  }
 0x1f5   :  { %7978 = vmatprep.subr.bf16.mxu0 %v8663_v31  ;;  %v1614_v31 = vrot.slane %v1598_v23, %v8906_v41 }
 0x1f6   :  { %7999 = vmatpush3.bf16.msra.mxu1 %v8662_v30  ;;  %v1628_v30 = vrot.slane %v1606_v27, %v8906_v41 }
 0x1f7   :  { %8000 = vmatprep.subr.bf16.mxu1 %v8664_v32  ;;  %v8708_v32 = vld [vmem:[%s10748_s1 + $0x1178] sm:$0xff]  }
 0x1f8   :  { %7979 = vmatpush3.bf16.msra.mxu0 %v8665_v33  ;;  %v1607_v33 = vcombine.high %v10578_v28, %v10578_v28 }
 0x1f9   :  { %7980 = vmatprep.subr.bf16.mxu0 %v8667_v35  ;;  %v1638_v35 = vcombine.high %v1628_v30, %v1628_v30 }
 0x1fa   :  { %8001 = vmatpush3.bf16.msra.mxu1 %v8666_v34  ;;  %v8707_v34 = vld [vmem:[%s10748_s1 + $0x1080] sm:$0xff]  }
 0x1fb   :  { %8002 = vmatprep.subr.bf16.mxu1 %v8668_v36  ;;  %v8709_v36 = vld [vmem:[%s10748_s1 + $0x11f8] sm:$0xff]  }
 0x1fc   :  { %7981 = vmatpush3.bf16.msra.mxu0 %v8669_v37  ;;  %v1635_v37 = vrot.slane %v1607_v33, %v8906_v41 }
 0x1fd   :  { %7982 = vmatprep.subr.bf16.mxu0 %v8671_v39  ;;  %v1636_v39 = vcombine.high %v1614_v31, %v1614_v31 }
 0x1fe   :  { %8003 = vmatpush3.bf16.msra.mxu1 %v8670_v38  ;;  %v8710_v38 = vld [vmem:[%s10748_s1 + $0x1138] sm:$0xff]  }
 0x1ff   :  { %8004 = vmatprep.subr.bf16.mxu1 %v8672_v40  ;;  %v8712_v40 = vld [vmem:[%s10748_s1 + $0x1170] sm:$0xff]  }
 0x200   :  { %7983 = vmatpush3.bf16.msra.mxu0 %v8673_v42  ;;  %v8711_v42 = vld [vmem:[%s10748_s1 + $0x11b8] sm:$0xff]  }
 0x201   :  { %8012 = vmatprep.subr.bf16.mxu0 %v8676_v45  ;;  %v8713_v45 = vld [vmem:[%s10748_s1 + $0x11f0] sm:$0xff]  }
 0x202   :  { %8005 = vmatpush3.bf16.msra.mxu1 %v8674_v43  ;;  %v1639_v43 = vcombine.high %v1635_v37, %v1635_v37 }
 0x203   :  { %v7720_v52 = vpop.f32.mrf.mxu0  ;;  %6401 = vmatmul.mubr.bf16.vlgmr.msra.gmra.mxu0 %v1572_v44  ;;  %8034 = vmatprep.subr.bf16.mxu1 %v8677_v46  ;;  %v8714_v46 = vld [vmem:[%s10748_s1 + $0x1130] sm:$0xff]  }
 0x204   :  { %8013 = vmatpush3.bf16.msra.mxu0 %v8678_v47  ;;  %6480 = vmatprep.mubr.bf16.mxu0 %v1628_v30 }
 0x205   :  { %v7742_v55 = vpop.f32.mrf.mxu1  ;;  %6441 = vmatmul.mubr.bf16.vlgmr.msra.gmra.mxu1 %v1588_v49  ;;  %v7721_v56 = vpop.f32.mrf.mxu0  ;;  %8014 = vmatprep.subr.bf16.mxu0 %v8680_v50  ;;  %v8716_v49 = vld [vmem:[%s10748_s1 + $0x1168] sm:$0xff]  }
 0x206   :  { %8035 = vmatpush3.bf16.msra.mxu1 %v8679_v48  ;;  %v7722_v58 = vadd.f32 %v7721_v56, %v7720_v52  ;;  %6520 = vmatprep.mubr.bf16.mxu1 %v1638_v35 }
 0x207   :  { %v7743_v60 = vpop.f32.mrf.mxu1  ;;  %v7723_v61 = vpop.f32.mrf.mxu0  ;;  %8036 = vmatprep.subr.bf16.mxu1 %v8681_v51  ;;  %v8715_v51 = vld [vmem:[%s10748_s1 + $0x11b0] sm:$0xff]  }
 0x208   :  { %v5923_v63 = vadd.f32 %v7722_v58, %v10419_v22  ;;  %v7744_v0 = vadd.f32 %v7743_v60, %v7742_v55  ;;  %8015 = vmatpush3.bf16.msra.mxu0 %v8682_v53  ;;  %v8704_v22 = vld [vmem:[%s10748_s1 + $0x1040] sm:$0xff]  }
 0x209   :  { %v7745_v2 = vpop.f32.mrf.mxu1  ;;  %v7724_v3 = vpop.f32.mrf.mxu0  ;;  %8016 = vmatprep.subr.bf16.mxu0 %v8684_v57  ;;  %v8718_v57 = vld [vmem:[%s10748_s1 + $0x1128] sm:$0xff]   ;;  %v8720_v60 = vld [vmem:[%s10748_s1 + $0x1160] sm:$0xff]  }
 0x20a   :  { %v10520_v5 = vadd.f32 %v7744_v0, %v5923_v63  ;;  %8037 = vmatpush3.bf16.msra.mxu1 %v8683_v54  ;;  %v8717_v54 = vld [vmem:[%s10748_s1 + $0x11e8] sm:$0xff]   ;;  %v8721_v0 = vld [vmem:[%s10748_s1 + $0x11e0] sm:$0xff]   ;;  %v8724_v2 = vld [vmem:[%s10748_s1 + $0x1158] sm:$0xff]  }
 0x20b   :  { %v7746_v7 = vpop.f32.mrf.mxu1  ;;  %8038 = vmatprep.subr.bf16.mxu1 %v8685_v59  ;;  %v8723_v3 = vld [vmem:[%s10748_s1 + $0x11a0] sm:$0xff]  }
 0x20c   :  { %8017 = vmatpush3.bf16.msra.mxu0 %v8686_v62  ;;  %v8719_v62 = vld [vmem:[%s10748_s1 + $0x11a8] sm:$0xff]   ;;  %v8727_v7 = vld [vmem:[%s10748_s1 + $0x1198] sm:$0xff]  }
 0x20d   :  { %8018 = vmatprep.subr.bf16.mxu0 %v8688_v4  ;;  %v8725_v4 = vld [vmem:[%s10748_s1 + $0x11d8] sm:$0xff]  }
 0x20e   :  { %8039 = vmatpush3.bf16.msra.mxu1 %v8687_v1  ;;  %v8722_v1 = vld [vmem:[%s10748_s1 + $0x1120] sm:$0xff]  }
 0x20f   :  { %8040 = vmatprep.subr.bf16.mxu1 %v8689_v6  ;;  %v8728_v6 = vld [vmem:[%s10748_s1 + $0x1150] sm:$0xff]  }
 0x210   :  { %8019 = vmatpush3.bf16.msra.mxu0 %v8690_v8  ;;  %v8729_v8 = vld [vmem:[%s10748_s1 + $0x11d0] sm:$0xff]  }
 0x211   :  { %8020 = vmatprep.subr.bf16.mxu0 %v8692_v10  ;;  %v8732_v10 = vld [vmem:[%s10748_s1 + $0x1148] sm:$0xff]  }
 0x212   :  { %8041 = vmatpush3.bf16.msra.mxu1 %v8691_v9  ;;  %v8730_v9 = vld [vmem:[%s10748_s1 + $0x1110] sm:$0xff]  }
 0x213   :  { %8042 = vmatprep.subr.bf16.mxu1 %v8693_v11  ;;  %v8731_v11 = vld [vmem:[%s10748_s1 + $0x1190] sm:$0xff]  }
 0x214   :  { %8021 = vmatpush3.bf16.msra.mxu0 %v8694_v12  ;;  %v8733_v12 = vld [vmem:[%s10748_s1 + $0x11c8] sm:$0xff]  }
 0x215   :  { %8022 = vmatprep.subr.bf16.mxu0 %v8696_v14 }
 0x216   :  { %8043 = vmatpush3.bf16.msra.mxu1 %v8695_v13  ;;  %v8734_v13 = vld [vmem:[%s10748_s1 + $0x1108] sm:$0xff]  }
 0x217   :  { %8044 = vmatprep.subr.bf16.mxu1 %v8697_v15 }
 0x218   :  { %8023 = vmatpush3.bf16.msra.mxu0 %v8698_v16 }
 0x219   :  { %8024 = vmatprep.subr.bf16.mxu0 %v8700_v18 }
 0x21a   :  { %8045 = vmatpush3.bf16.msra.mxu1 %v8699_v17 }
 0x21b   :  { %8046 = vmatprep.subr.bf16.mxu1 %v8701_v19 }
 0x21c   :  { %8025 = vmatpush3.bf16.msra.mxu0 %v8702_v20 }
 0x21d   :  { %8026 = vmatprep.subr.bf16.mxu0 %v8704_v22 }
 0x21e   :  { %8047 = vmatpush3.bf16.msra.mxu1 %v8703_v25 }
 0x21f   :  { %8048 = vmatprep.subr.bf16.mxu1 %v8705_v26 }
 0x220   :  { %8027 = vmatpush3.bf16.msra.mxu0 %v8706_v29 }
 0x221   :  { %8056 = vmatprep.subr.bf16.mxu0 %v8708_v32 }
 0x222   :  { %8049 = vmatpush3.bf16.msra.mxu1 %v8707_v34 }
 0x223   :  { %v7764_v44 = vpop.f32.mrf.mxu0  ;;  %6481 = vmatmul.mubr.bf16.vlgmr.msra.gmra.mxu0 %v1614_v31  ;;  %8078 = vmatprep.subr.bf16.mxu1 %v8709_v36 }
 0x224   :  { %8057 = vmatpush3.bf16.msra.mxu0 %v8710_v38  ;;  %6560 = vmatprep.mubr.bf16.mxu0 %v1635_v37 }
 0x225   :  { %v7786_v47 = vpop.f32.mrf.mxu1  ;;  %6521 = vmatmul.mubr.bf16.vlgmr.msra.gmra.mxu1 %v1636_v39  ;;  %v7765_v48 = vpop.f32.mrf.mxu0  ;;  %8058 = vmatprep.subr.bf16.mxu0 %v8712_v40 }
 0x226   :  { %8079 = vmatpush3.bf16.msra.mxu1 %v8711_v42  ;;  %v7766_v50 = vadd.f32 %v7765_v48, %v7764_v44  ;;  %6600 = vmatprep.mubr.bf16.mxu1 %v1639_v43 }
 0x227   :  { %v7787_v52 = vpop.f32.mrf.mxu1  ;;  %v7767_v53 = vpop.f32.mrf.mxu0  ;;  %8080 = vmatprep.subr.bf16.mxu1 %v8713_v45 }
 0x228   :  { %v6003_v55 = vadd.f32 %v7766_v50, %v10520_v5  ;;  %v7788_v56 = vadd.f32 %v7787_v52, %v7786_v47  ;;  %8059 = vmatpush3.bf16.msra.mxu0 %v8714_v46  ;;  %v8726_v5 = vld [vmem:[%s10748_s1 + $0x1118] sm:$0xff]  }
 0x229   :  { %v7789_v58 = vpop.f32.mrf.mxu1  ;;  %v7768_v59 = vpop.f32.mrf.mxu0  ;;  %8060 = vmatprep.subr.bf16.mxu0 %v8716_v49 }
 0x22a   :  { %v6043_v61 = vadd.f32 %v7788_v56, %v6003_v55  ;;  %8081 = vmatpush3.bf16.msra.mxu1 %v8715_v51 }
 0x22b   :  { %v7790_v63 = vpop.f32.mrf.mxu1  ;;  %8082 = vmatprep.subr.bf16.mxu1 %v8717_v54 }
 0x22c   :  { %8061 = vmatpush3.bf16.msra.mxu0 %v8718_v57 }
 0x22d   :  { %8062 = vmatprep.subr.bf16.mxu0 %v8720_v60 }
 0x22e   :  { %8083 = vmatpush3.bf16.msra.mxu1 %v8719_v62 }
 0x22f   :  { %8084 = vmatprep.subr.bf16.mxu1 %v8721_v0 }
 0x230   :  { %8063 = vmatpush3.bf16.msra.mxu0 %v8722_v1 }
 0x231   :  { %8064 = vmatprep.subr.bf16.mxu0 %v8724_v2 }
 0x232   :  { %8085 = vmatpush3.bf16.msra.mxu1 %v8723_v3 }
 0x233   :  { %8086 = vmatprep.subr.bf16.mxu1 %v8725_v4 }
 0x234   :  { %8065 = vmatpush3.bf16.msra.mxu0 %v8726_v5 }
 0x235   :  { %8066 = vmatprep.subr.bf16.mxu0 %v8728_v6 }
 0x236   :  { %8087 = vmatpush3.bf16.msra.mxu1 %v8727_v7 }
 0x237   :  { %8088 = vmatprep.subr.bf16.mxu1 %v8729_v8 }
 0x238   :  { %8067 = vmatpush3.bf16.msra.mxu0 %v8730_v9 }
 0x239   :  { %10 = vsyncpa [#allocation3], 0  ;;  %8068 = vmatprep.subr.bf16.mxu0 %v8732_v10  ;;  %v8736_v14 = vld [vmem:[%s10748_s1 + $0x1140] sm:$0xff]   ;;  %v8735_v15 = vld [vmem:[%s10748_s1 + $0x1188] sm:$0xff]   ;;  %v1621_v18 = vrot.slane %v10578_v28, %v8906_v41  ;;  %v8768_v46 = vmov 0.0   ;;  %vm8769_vm0 = vmmov 0  }
 0x23a   :  { %8089 = vmatpush3.bf16.msra.mxu1 %v8731_v11  ;;  %v8737_v16 = vld [vmem:[%s10748_s1 + $0x11c0] sm:$0xff]   ;;  %v6624_v45 = vld [vmem:[%s10750_s3 + $0x78] sm:$0xff]  ;;  %v6623_v47 = vld [vmem:[%s10750_s3 + $0x70] sm:$0xff]  ;;  %vm6702_vm1 = vcmask 74752   ;;  %s8770_s14 = smov [#allocation2]  }
 0x23b   :  { %8090 = vmatprep.subr.bf16.mxu1 %v8733_v12  ;;  %v8738_v17 = vld [vmem:[%s10748_s1 + $0x1100] sm:$0xff]   ;;  %v1637_v20 = vcombine.high %v1621_v18, %v1621_v18  ;;  %v6622_v48 = vld [vmem:[%s10750_s3 + $0x68] sm:$0xff]  ;;  %v6620_v50 = vld [vmem:[%s10750_s3 + $0x58] sm:$0xff] }
 0x23c   :  { %8069 = vmatpush3.bf16.msra.mxu0 %v8734_v13  ;;  %v8739_v19 = vld [vmem:[%s10748_s1 + $0x1180] sm:$0xff]   ;;  %v6619_v51 = vld [vmem:[%s10750_s3 + $0x50] sm:$0xff]  ;;  %v6618_v52 = vld [vmem:[%s10750_s3 + $0x48] sm:$0xff] }
 0x23d   :  { %8070 = vmatprep.subr.bf16.mxu0 %v8736_v14  ;;  %v6621_v49 = vld [vmem:[%s10750_s3 + $0x60] sm:$0xff]  ;;  %v6616_v54 = vld [vmem:[%s10750_s3 + $0x38] sm:$0xff]  ;;  %v6615_v55 = vld [vmem:[%s10750_s3 + $0x30] sm:$0xff] }
 0x23e   :  { %8091 = vmatpush3.bf16.msra.mxu1 %v8735_v15  ;;  %v6617_v53 = vld [vmem:[%s10750_s3 + $0x40] sm:$0xff]  ;;  %v6614_v57 = vld [vmem:[%s10750_s3 + $0x28] sm:$0xff]  ;;  %v6612_v2 = vld [vmem:[%s10750_s3 + $0x18] sm:$0xff] }
 0x23f   :  { %8092 = vmatprep.subr.bf16.mxu1 %v8737_v16  ;;  %v6611_v6 = vld [vmem:[%s10750_s3 + $0x10] sm:$0xff]  ;;  %v6610_v8 = vld [vmem:[%s10750_s3 + $0x8] sm:$0xff]  ;;  %v6609_v9 = vld [vmem:[%s10750_s3] sm:$0xff] }
 0x240   :  { %8071 = vmatpush3.bf16.msra.mxu0 %v8738_v17 }
 0x241   :  { %8117 = vmatprep.subr.mxu0 %v8768_v46 }
 0x242   :  { %8093 = vmatpush3.bf16.msra.mxu1 %v8739_v19 }
 0x243   :  { %v7808_v21 = vpop.f32.mrf.mxu0  ;;  %6561 = vmatmul.mubr.bf16.vlgmr.msra.gmra.mxu0 %v1621_v18 }
 0x244   :  { %8118 = vmatpush3.msra.mxu0 %v6624_v45  ;;  %8149 = vmatprep.mubr.msk.f32.mxu0 %vm8769_vm0, %v8768_v46 }
 0x245   :  { %v7830_v22 = vpop.f32.mrf.mxu1  ;;  %6601 = vmatmul.mubr.bf16.vlgmr.msra.gmra.mxu1 %v1637_v20  ;;  %v7809_v23 = vpop.f32.mrf.mxu0  ;;  %8119 = vmatprep.subr.mxu0 %v8768_v46 }
 0x246   :  { %v7810_v24 = vadd.f32 %v7809_v23, %v7808_v21  ;;  %8120 = vmatpush3.msra.mxu0 %v6623_v47 }
 0x247   :  { %v7831_v25 = vpop.f32.mrf.mxu1  ;;  %v7811_v26 = vpop.f32.mrf.mxu0  ;;  %8121 = vmatprep.subr.mxu0 %v8768_v46 }
 0x248   :  { %v6083_v27 = vadd.f32 %v7810_v24, %v6043_v61  ;;  %v7832_v29 = vadd.f32 %v7831_v25, %v7830_v22  ;;  %8122 = vmatpush3.msra.mxu0 %v6622_v48  ;;  %v6613_v61 = vld [vmem:[%s10750_s3 + $0x20] sm:$0xff] }
 0x249   :  { %v7833_v41 = vpop.f32.mrf.mxu1  ;;  %v7812_v28 = vpop.f32.mrf.mxu0  ;;  %8123 = vmatprep.subr.mxu0 %v8768_v46 }
 0x24a   :  { %v6123_v30 = vadd.f32 %v7832_v29, %v6083_v27  ;;  %8124 = vmatpush3.msra.mxu0 %v6621_v49 }
 0x24b   :  { %v7834_v31 = vpop.f32.mrf.mxu1  ;;  %8125 = vmatprep.subr.mxu0 %v8768_v46 }
 0x24c   :  { %8126 = vmatpush3.msra.mxu0 %v6620_v50 }
 0x24d   :  { %8127 = vmatprep.subr.mxu0 %v8768_v46 }
 0x24e   :  { %8128 = vmatpush3.msra.mxu0 %v6619_v51 }
 0x24f   :  { %8129 = vmatprep.subr.mxu0 %v8768_v46 }
 0x250   :  { %8130 = vmatpush3.msra.mxu0 %v6618_v52 }
 0x251   :  { %8131 = vmatprep.subr.mxu0 %v8768_v46 }
 0x252   :  { %8132 = vmatpush3.msra.mxu0 %v6617_v53 }
 0x253   :  { %8133 = vmatprep.subr.mxu0 %v8768_v46 }
 0x254   :  { %8134 = vmatpush3.msra.mxu0 %v6616_v54 }
 0x255   :  { %8135 = vmatprep.subr.mxu0 %v8768_v46 }
 0x256   :  { %8136 = vmatpush3.msra.mxu0 %v6615_v55 }
 0x257   :  { %8137 = vmatprep.subr.mxu0 %v8768_v46 }
 0x258   :  { %8138 = vmatpush3.msra.mxu0 %v6614_v57 }
 0x259   :  { %8139 = vmatprep.subr.mxu0 %v8768_v46 }
 0x25a   :  { %8140 = vmatpush3.msra.mxu0 %v6613_v61 }
 0x25b   :  { %8141 = vmatprep.subr.mxu0 %v8768_v46 }
 0x25c   :  { %8142 = vmatpush3.msra.mxu0 %v6612_v2 }
 0x25d   :  { %8143 = vmatprep.subr.mxu0 %v8768_v46 }
 0x25e   :  { %8144 = vmatpush3.msra.mxu0 %v6611_v6 }
 0x25f   :  { %8145 = vmatprep.subr.mxu0 %v8768_v46 }
 0x260   :  { %8146 = vmatpush3.msra.mxu0 %v6610_v8 }
 0x261   :  { %8147 = vmatprep.subr.mxu0 %v8768_v46 }
 0x262   :  { %8148 = vmatpush3.msra.mxu0 %v6609_v9 }
 0x263   :  { %v7852_v32 = vpop.f32.mrf.mxu0 }
 0x265   :  { %v7874_v33 = vpop.f32.mrf.mxu1  ;;  %v7853_v34 = vpop.f32.mrf.mxu0 }
 0x266   :  { %v7854_v35 = vadd.f32 %v7853_v34, %v7852_v32 }
 0x267   :  { %v7875_v36 = vpop.f32.mrf.mxu1  ;;  %v7855_v37 = vpop.f32.mrf.mxu0 }
 0x268   :  { %v6163_v38 = vadd.f32 %v7854_v35, %v6123_v30  ;;  %v7876_v39 = vadd.f32 %v7875_v36, %v7874_v33 }
 0x269   :  { %v7877_v40 = vpop.f32.mrf.mxu1  ;;  %v7856_v42 = vpop.f32.mrf.mxu0 }
 0x26a   :  { %v6203_v43 = vadd.f32 %v7876_v39, %v6163_v38 }
 0x26b   :  { %v7878_v44 = vpop.f32.mrf.mxu1 }
 0x283   :  { %v7896_v56 = vpop.f32.mrf.mxu0 }
 0x285   :  { %v7918_v58 = vpop.f32.mrf.mxu1  ;;  %v7897_v59 = vpop.f32.mrf.mxu0 }
 0x286   :  { %v7898_v60 = vadd.f32 %v7897_v59, %v7896_v56  ;;  %v7307_v59 = vld [vmem:[%s10751_s4] ss:$0 sm:$0xff]  ;;  %s6722_s4 = sshll.u32 %s8770_s14, 4  ;;  %s6723_s4 = int_to_ptr.vmem [resolvable:$true] %s6722_s4 }
 0x287   :  { %v7919_v62 = vpop.f32.mrf.mxu1  ;;  %v7899_v63 = vpop.f32.mrf.mxu0  ;;  %s8745_s15 = scalar_lea.vmem %s6723_s4, 32  ;;  %p8750_p1 = scmp.lt.s32.totalorder %s6723_s4, %s6723_s4 }
 0x288   :  { %v6243_v0 = vadd.f32 %v7898_v60, %v6203_v43  ;;  %v7920_v1 = vadd.f32 %v7919_v62, %v7918_v58  ;;  %p8746_p0 = scmp.ne.s32.totalorder %s6723_s4, %s8745_s15  ;;  %p8751_p2 = scmp.lt.s32.totalorder %s8745_s15, %s8745_s15 }
 0x289   :  { %v7921_v3 = vpop.f32.mrf.mxu1  ;;  %v7900_v4 = vpop.f32.mrf.mxu0 }
 0x28a   :  { %v6283_v5 = vadd.f32 %v7920_v1, %v6243_v0  ;;  %p8752_p3 = por %p8751_p2, %p8750_p1 }
 0x28b   :  { %v7922_v7 = vpop.f32.mrf.mxu1 }
 0x28c   :  { %p8753_p4 = pnand %p8752_p3, %p8746_p0 }
 0x2a3   :  { %v7940_v10 = vpop.f32.mrf.mxu0 }
 0x2a5   :  { %v7962_v11 = vpop.f32.mrf.mxu1  ;;  %v7941_v12 = vpop.f32.mrf.mxu0 }
 0x2a6   :  { %v7942_v13 = vadd.f32 %v7941_v12, %v7940_v10 }
 0x2a7   :  { %v7963_v14 = vpop.f32.mrf.mxu1  ;;  %v7943_v15 = vpop.f32.mrf.mxu0 }
 0x2a8   :  { %v6323_v16 = vadd.f32 %v7942_v13, %v6283_v5  ;;  %v7964_v17 = vadd.f32 %v7963_v14, %v7962_v11 }
 0x2a9   :  { %v7965_v18 = vpop.f32.mrf.mxu1  ;;  %v7944_v19 = vpop.f32.mrf.mxu0 }
 0x2aa   :  { %v6363_v20 = vadd.f32 %v7964_v17, %v6323_v16 }
 0x2ab   :  { %v7966_v21 = vpop.f32.mrf.mxu1 }
 0x2c3   :  { %v7984_v22 = vpop.f32.mrf.mxu0 }
 0x2c5   :  { %v8006_v23 = vpop.f32.mrf.mxu1  ;;  %v7985_v24 = vpop.f32.mrf.mxu0 }
 0x2c6   :  { %v7986_v37 = vadd.f32 %v7985_v24, %v7984_v22 }
 0x2c7   :  { %v8007_v25 = vpop.f32.mrf.mxu1  ;;  %v7987_v26 = vpop.f32.mrf.mxu0 }
 0x2c8   :  { %v6403_v38 = vadd.f32 %v7986_v37, %v6363_v20  ;;  %v8008_v39 = vadd.f32 %v8007_v25, %v8006_v23 }
 0x2c9   :  { %v8009_v27 = vpop.f32.mrf.mxu1  ;;  %v7988_v29 = vpop.f32.mrf.mxu0 }
 0x2ca   :  { %v6443_v42 = vadd.f32 %v8008_v39, %v6403_v38 }
 0x2cb   :  { %v8010_v41 = vpop.f32.mrf.mxu1 }
 0x2e3   :  { %v8028_v28 = vpop.f32.mrf.mxu0 }
 0x2e5   :  { %v8050_v30 = vpop.f32.mrf.mxu1  ;;  %v8029_v31 = vpop.f32.mrf.mxu0 }
 0x2e6   :  { %v8030_v40 = vadd.f32 %v8029_v31, %v8028_v28 }
 0x2e7   :  { %v8051_v32 = vpop.f32.mrf.mxu1  ;;  %v8031_v33 = vpop.f32.mrf.mxu0 }
 0x2e8   :  { %v6483_v43 = vadd.f32 %v8030_v40, %v6443_v42  ;;  %v8052_v44 = vadd.f32 %v8051_v32, %v8050_v30 }
 0x2e9   :  { %v8053_v34 = vpop.f32.mrf.mxu1  ;;  %v8032_v35 = vpop.f32.mrf.mxu0 }
 0x2ea   :  { %v6523_v48 = vadd.f32 %v8052_v44, %v6483_v43 }
 0x2eb   :  { %v8054_v36 = vpop.f32.mrf.mxu1 }
 0x303   :  { %v8072_v45 = vpop.f32.mrf.mxu0 }
 0x305   :  { %v8094_v46 = vpop.f32.mrf.mxu1  ;;  %v8073_v47 = vpop.f32.mrf.mxu0 }
 0x306   :  { %v8074_v49 = vadd.f32 %v8073_v47, %v8072_v45 }
 0x307   :  { %v8095_v50 = vpop.f32.mrf.mxu1  ;;  %v8075_v51 = vpop.f32.mrf.mxu0 }
 0x308   :  { %v6563_v52 = vadd.f32 %v8074_v49, %v6523_v48  ;;  %v8096_v53 = vadd.f32 %v8095_v50, %v8094_v46 }
 0x309   :  { %v8097_v54 = vpop.f32.mrf.mxu1  ;;  %v8076_v55 = vpop.f32.mrf.mxu0 }
 0x30a   :  { %v6603_v56 = vadd.f32 %v8096_v53, %v6563_v52 }
 0x30b   :  { %v8098_v57 = vpop.f32.mrf.mxu1 }
 0x30c   :  { %v6608_v58 = vmax.f32 %v6603_v56, 0.0 }
 0x30e   :  { %8150 = vmatmul.mubr.f32.vlgmr.msra.gmra.mxu0 %v6608_v58 }
 0x3ce   :  { %v6698_v60 = vpop.f32.mrf.mxu0 }
 0x3cf   :  { %v6699_v61 = vadd.f32 %v7307_v59, %v6698_v60 }
 0x3d0   :  { %v8151_v62 = vpop.f32.mrf.mxu0 }
 0x3d1   :  { %v6703_v63 = vsel %vm6702_vm1, %v6699_v61, -inf }
 0x3d2   :  { %6704 = vmax.xlane.f32.xlu0 %v6703_v63 }
 0x45b   :  { %v6705_v0 = vpop.xlane.xlu0 %6704 }
 0x45c   :  { %v6706_v1 = vsub.f32 %v6699_v61, %v6705_v0 }
 0x45e   :  { %v6707_v2 = vmul.f32 1.442695, %v6706_v1 }
 0x460   :  { %8741 = vpow2.f32 %v6707_v2 }
 0x46d   :  { %v8742_v3 = vpop.eup %8741 }
 0x46e   :  { %v6709_v4 = vsel %vm6702_vm1, %v8742_v3, 0.0 }
 0x46f   :  { %6710 = vadd.xlane.f32.xlu0 %v6709_v4 }
 0x4f8   :  { %v6711_v5 = vpop.xlane.xlu0 %6710 }
 0x4f9   :  { %8743 = vlog2.f32 %v6711_v5 }
 0x506   :  { %v8744_v6 = vpop.eup %8743 }
 0x507   :  { %v6713_v7 = vmul.f32 0.6931472, %v8744_v6 }
 0x509   :  { %v6714_v8 = vsub.f32 %v6706_v1, %v6713_v7 }
 0x50b   :  { %6715 = vst.msk [vmem:[#allocation2] sm:$0x3] %vm6702_vm1, %v6714_v8 }
 0x50c   :  { %8756 = shalt.err (!%p8753_p4)
}
 0x50d   :  { %6725 = dma.vmem_to_hbm [thread:$0]  %s6723_s4, 32, %s10752_s5, [#allocation3]  }
 0x50e   :  { %8765 = dma.done.wait [#allocation3], 32  }
 0x50f   :  { %8766 = vsyncadd [#allocation3], 4294967264 }
 0x510   :  { %6729 = vsyncpa [#allocation3], 1 }

</bundles_post_ra>
